<compile_context>
chip_gen: v7x
topology: tpu7x:2x2x1
jax: 0.10.0
libtpu: 0.0.40
codegen_flags: <defaults>
</compile_context>

<pallas_src>
import numpy as np
import jax
import jax.numpy as jnp
from jax.experimental import pallas as pl
from jax.experimental.pallas import tpu as pltpu


# ---------------------------------------------------------------------------
# Haar 2x2 filters (identical values to get_wav() in the PyTorch reference).
# ---------------------------------------------------------------------------
def _haar_filters():
    L = (1.0 / np.sqrt(2.0)) * np.ones((1, 2))
    Hh = (1.0 / np.sqrt(2.0)) * np.ones((1, 2))
    Hh[0, 0] = -Hh[0, 0]
    LL = L.T @ L
    LH = L.T @ Hh
    HL = Hh.T @ L
    HH = Hh.T @ Hh
    return tuple(np.asarray(f, np.float32) for f in (LL, LH, HL, HH))


# ---------------------------------------------------------------------------
# Constant "dilation" matrices: place a (*, Tw) row into the (*, 2Tw) lane-
# interleaved output columns 2w+q (UP branch), optionally with the Haar tap
# per phase baked in (depthwise branches, columns [p=0 | p=1] halves).
# ---------------------------------------------------------------------------
def _dilation_mats(tw):
    idx = np.arange(tw)
    d0 = np.zeros((tw, 2 * tw), np.float32)
    d1 = np.zeros((tw, 2 * tw), np.float32)
    d0[idx, 2 * idx] = 1.0
    d1[idx, 2 * idx + 1] = 1.0
    return d0, d1


def _haar_dilation_mats(filters, tw):
    idx = np.arange(tw)
    mats = []
    for f in filters:
        f = np.asarray(f, np.float32)
        m = np.zeros((tw, 4 * tw), np.float32)
        for p in range(2):
            for q in range(2):
                m[idx, p * 2 * tw + 2 * idx + q] = f[p, q]
        mats.append(m)
    return np.stack(mats, axis=0)           # (num_wav, Tw, 4Tw)


# ---------------------------------------------------------------------------
# Kernel: one (batch, H-tile, W-tile) block per grid step.
#   UP   : per input row, (4C,C)@(C,Tw) MXU matmul (rows = q*2C + p*C + d),
#          then two dilation matmuls place q into lanes; rows 2h+p stored.
#   Haar : per input row, one (C,Tw)@(Tw,4Tw) matmul with taps baked in.
#   orig : dense pass-through copy into the last channels of the output block.
# ---------------------------------------------------------------------------
def _make_kernel(C, C_orig, num_wav, Th, Tw, out_dtype, compute_dtype):
    C2, TW2 = 2 * C, 2 * Tw

    def kernel(*refs):
        x_ref = refs[0]
        wav_refs = refs[1:1 + num_wav]
        orig_ref = refs[1 + num_wav]
        wm_ref = refs[2 + num_wav]
        bias_ref = refs[3 + num_wav]
        d0_ref = refs[4 + num_wav]
        d1_ref = refs[5 + num_wav]
        dh_ref = refs[6 + num_wav]
        out_ref = refs[7 + num_wav]

        wm = wm_ref[...]                                   # (4C, C), resident
        bias = bias_ref[...]                               # (2C, 1) f32
        d0 = d0_ref[...]                                   # (Tw, 2Tw) f32
        d1 = d1_ref[...]                                   # (Tw, 2Tw) f32
        dhs = [dh_ref[k] for k in range(num_wav)]          # (Tw, 4Tw) each

        for h in range(Th):
            # ---- dense transposed conv (all 4 phases fused) -------------
            xh = x_ref[0, :, h, :].astype(compute_dtype)   # (C, Tw)
            up = jnp.dot(wm, xh, preferred_element_type=jnp.float32)   # (4C, Tw)
            r = (jnp.dot(up[:C2], d0, preferred_element_type=jnp.float32)
                 + jnp.dot(up[C2:], d1, preferred_element_type=jnp.float32)
                 + bias).astype(out_dtype)                 # (2C, 2Tw): rows p*C+d
            out_ref[0, 0:C, 2 * h, :] = r[:C]
            out_ref[0, 0:C, 2 * h + 1, :] = r[C:]

            # ---- depthwise Haar branches (taps baked into dilation) ------
            for k in range(num_wav):
                wk = wav_refs[k][0, :, h, :].astype(compute_dtype)      # (C, Tw)
                rk = jnp.dot(wk, dhs[k],
                             preferred_element_type=jnp.float32).astype(out_dtype)
                lo = (1 + k) * C
                out_ref[0, lo:lo + C, 2 * h, :] = rk[:, :TW2]
                out_ref[0, lo:lo + C, 2 * h + 1, :] = rk[:, TW2:]

        # ---- pass-through of `original` (in-kernel concat, dense store) ---
        lo = (1 + num_wav) * C
        out_ref[0, lo:lo + C_orig, :, :] = orig_ref[0].astype(out_dtype)

    return kernel


# ---------------------------------------------------------------------------
# Tile selection / VMEM accounting (includes double-buffered resident weights).
# ---------------------------------------------------------------------------
def _vmem_estimate(C, C_orig, num_wav, th, tw, in_bytes, out_bytes):
    d_tot = (1 + num_wav) * C + C_orig
    blocks = (1 + num_wav) * C * th * tw * in_bytes            # x + wavelet tiles
    blocks += C_orig * (2 * th) * (2 * tw) * in_bytes          # original tile
    blocks += d_tot * (2 * th) * (2 * tw) * out_bytes          # output tile
    resident = 4 * C * C * out_bytes + 2 * C * 4               # fused weight + bias
    resident += 2 * tw * (2 * tw) * 4                          # D0, D1 (f32)
    resident += num_wav * tw * (4 * tw) * out_bytes            # Haar dilation mats
    return 2 * (blocks + resident)                             # double-buffered


def _pick_tiles(C, C_orig, num_wav, H, W, in_bytes, out_bytes, budget):
    tw_cands = [W] if (W <= 256 or W % 128 != 0) else [128]
    if H <= 32:
        th_cands = [H]
    else:
        th_cands = [t for t in (32, 16, 8) if H % t == 0] or [H]
    chosen = None
    for th in th_cands:
        for tw in tw_cands:
            est = _vmem_estimate(C, C_orig, num_wav, th, tw, in_bytes, out_bytes)
            if chosen is None or est < chosen[2]:
                chosen = (th, tw, est)
            if est <= budget:
                return th, tw, est
    return chosen


# ---------------------------------------------------------------------------
# Wrapper: builds operands/specs and issues a single pallas_call.
# ---------------------------------------------------------------------------
def wave_unpool_pallas(x, wav_inputs, wav_filters, w_up, b_up, original,
                       *, th=None, tw=None):
    if original is None:
        raise ValueError("WaveUnpool forward requires `original` "
                         "(as in the PyTorch reference).")
    B, C, H, W = x.shape
    num_wav = len(wav_inputs)
    C_orig = original.shape[1]
    assert original.shape == (B, C_orig, 2 * H, 2 * W)
    for t in wav_inputs:
        assert t.shape == (B, C, H, W)

    out_dtype = jnp.result_type(*(t.dtype for t in (x, *wav_inputs, original)))
    out_dtype = jnp.bfloat16 if out_dtype == jnp.bfloat16 else jnp.float32
    compute_dtype = out_dtype
    in_bytes = np.dtype(x.dtype).itemsize
    out_bytes = np.dtype(out_dtype).itemsize

    try:
        vmem_cap = int(pltpu.get_tpu_info().vmem_capacity_bytes)
    except Exception:
        vmem_cap = 64 * 1024 * 1024          # conservative default (v7x per-core)
    budget = int(0.55 * vmem_cap)

    th_auto, tw_auto, _ = _pick_tiles(C, C_orig, num_wav, H, W,
                                      in_bytes, out_bytes, budget)
    th = th_auto if th is None else th
    tw = tw_auto if tw is None else tw
    assert H % th == 0 and (th % 8 == 0 or th == H), (th, H)
    assert W % tw == 0 and (tw % 128 == 0 or tw == W), (tw, W)
    est = _vmem_estimate(C, C_orig, num_wav, th, tw, in_bytes, out_bytes)
    vmem_limit = int(min(max(2 * est + (8 << 20), 32 << 20), int(0.7 * vmem_cap)))

    d_tot = (1 + num_wav) * C + C_orig

    # ConvTranspose2d weight (Cin, Cout, 2, 2) -> fused (4C, C), rows q*2C + p*C + d.
    wm4 = jnp.transpose(w_up, (3, 2, 1, 0)).reshape(4 * C, C).astype(compute_dtype)
    bias2 = jnp.tile(b_up.astype(jnp.float32), 2).reshape(2 * C, 1)
    d0_np, d1_np = _dilation_mats(tw)
    d0 = jnp.asarray(d0_np)
    d1 = jnp.asarray(d1_np)
    dh = jnp.asarray(_haar_dilation_mats(wav_filters, tw), dtype=compute_dtype)

    grid = (B, H // th, W // tw)

    def tile_map(b, i, j):
        return (b, 0, i, j)

    def const_map2(b, i, j):
        return (0, 0)

    def const_map3(b, i, j):
        return (0, 0, 0)

    # NOTE: resident operands (wm4/bias2/d0/d1/dh) could be single-buffered with
    # pipeline_mode=pl.Buffered(1) on v7x to save VMEM; kept default for robustness.
    in_specs = (
        [pl.BlockSpec((1, C, th, tw), tile_map)]
        + [pl.BlockSpec((1, C, th, tw), tile_map) for _ in range(num_wav)]
        + [pl.BlockSpec((1, C_orig, 2 * th, 2 * tw), tile_map),
           pl.BlockSpec((4 * C, C), const_map2),
           pl.BlockSpec((2 * C, 1), const_map2),
           pl.BlockSpec((tw, 2 * tw), const_map2),
           pl.BlockSpec((tw, 2 * tw), const_map2),
           pl.BlockSpec((num_wav, tw, 4 * tw), const_map3)]
    )
    out_spec = pl.BlockSpec((1, d_tot, 2 * th, 2 * tw), tile_map)

    macs_per_elem = 4 * C * C + 8 * C * tw + num_wav * 4 * C * tw
    flops = 2 * B * H * W * macs_per_elem
    bytes_accessed = (B * H * W * (1 + num_wav) * C * in_bytes
                      + B * (2 * H) * (2 * W) * (C_orig * in_bytes
                                                 + d_tot * out_bytes))
    try:
        cost = pl.CostEstimate(flops=int(flops), transcendentals=0,
                               bytes_accessed=int(bytes_accessed))
    except Exception:
        cost = None

    kernel = _make_kernel(C, C_orig, num_wav, th, tw, out_dtype, compute_dtype)
    call = pl.pallas_call(
        kernel,
        out_shape=jax.ShapeDtypeStruct((B, d_tot, 2 * H, 2 * W), out_dtype),
        grid=grid,
        in_specs=in_specs,
        out_specs=out_spec,
        compiler_params=pltpu.CompilerParams(
            dimension_semantics=("parallel", "parallel", "parallel"),
            vmem_limit_bytes=vmem_limit),
        cost_estimate=cost,
    )
    return call(x, *wav_inputs, original, wm4, bias2, d0, d1, dh)


class WaveUnpool:
    """Pallas port of models.layers.WaveUnpool (forward only, NCHW I/O).

    As in the PyTorch spec, `option_unpool` is stored but the forward only
    distinguishes the (LL, original) path from the cat5 path.
    """

    def __init__(self, in_channels, option_unpool='cat5', key=None):
        self.in_channels = in_channels
        self.option_unpool = option_unpool
        key = jax.random.PRNGKey(0) if key is None else key
        kw, kb = jax.random.split(key)
        fan_in = in_channels * 2 * 2
        bound = 1.0 / np.sqrt(fan_in)
        # nn.ConvTranspose2d default-init replacement (deterministic, same shapes):
        self.w_up = jax.random.uniform(kw, (in_channels, in_channels, 2, 2),
                                       jnp.float32, -bound, bound)
        self.b_up = jax.random.uniform(kb, (in_channels,), jnp.float32, -bound, bound)
        self.fLL, self.fLH, self.fHL, self.fHH = _haar_filters()

    def __call__(self, out, LH, HL, HH, LL=None, original=None, *, th=None, tw=None):
        if LL is not None and original is not None:
            return wave_unpool_pallas(out, [LL], [self.fLL], self.w_up, self.b_up,
                                      original, th=th, tw=tw)
        return wave_unpool_pallas(out, [LH, HL, HH],
                                  [self.fLH, self.fHL, self.fHH],
                                  self.w_up, self.b_up, original, th=th, tw=tw)


# ---------------------------------------------------------------------------
# Pure-JAX reference (correctness check only).
# ---------------------------------------------------------------------------
def _ref_up(x, w, b):
    B, C, H, W = x.shape
    y = jnp.einsum('bchw,cdpq->bdhpwq', x, w) + b[None, :, None, None, None, None]
    return y.reshape(B, C, 2 * H, 2 * W)


def _ref_dw(x, f):
    B, C, H, W = x.shape
    return jnp.einsum('bchw,pq->bchpwq', x, jnp.asarray(f)).reshape(B, C, 2 * H, 2 * W)


if __name__ == "__main__":
    B, C, H, W = 2, 4, 16, 16
    key = jax.random.PRNGKey(0)
    k_out, k_lh, k_hl, k_hh, k_ll, k_orig, k_mod = jax.random.split(key, 7)

    out = jax.random.normal(k_out, (B, C, H, W), jnp.float32)
    LH = jax.random.normal(k_lh, (B, C, H, W), jnp.float32)
    HL = jax.random.normal(k_hl, (B, C, H, W), jnp.float32)
    HH = jax.random.normal(k_hh, (B, C, H, W), jnp.float32)
    LL = jax.random.normal(k_ll, (B, C, H, W), jnp.float32)
    original = jax.random.normal(k_orig, (B, C, 2 * H, 2 * W), jnp.float32)

    mod = WaveUnpool(C, option_unpool='cat5', key=k_mod)

    ref_cat5 = jnp.concatenate(
        [_ref_up(out, mod.w_up, mod.b_up), _ref_dw(LH, mod.fLH),
         _ref_dw(HL, mod.fHL), _ref_dw(HH, mod.fHH), original], axis=1)
    ref_ll = jnp.concatenate(
        [_ref_up(out, mod.w_up, mod.b_up), _ref_dw(LL, mod.fLL), original], axis=1)

    # --- cat5 path, auto tiles (Th=H, Tw=W -> grid (B,1,1)) ---
    y = jax.block_until_ready(mod(out, LH, HL, HH, original=original))
    assert y.shape == (B, 5 * C, 2 * H, 2 * W)
    assert jnp.allclose(y, ref_cat5, atol=1e-5, rtol=1e-5)

    # --- cat5 path, forced row tiling (Th=8 -> grid (B,2,1), pipelined path) ---
    y2 = jax.block_until_ready(mod(out, LH, HL, HH, original=original, th=8))
    assert jnp.allclose(y2, ref_cat5, atol=1e-5, rtol=1e-5)

    # --- LL path: cat([UP(out), LL(LL), original], dim=1) ---
    y3 = jax.block_until_ready(mod(out, LH, HL, HH, LL=LL, original=original))
    assert y3.shape == (B, 3 * C, 2 * H, 2 * W)
    assert jnp.allclose(y3, ref_ll, atol=1e-5, rtol=1e-5)

    # --- bf16 I/O path (output dtype follows inputs, f32 MXU accumulation) ---
    bf = lambda t: t.astype(jnp.bfloat16)
    y4 = jax.block_until_ready(mod(bf(out), bf(LH), bf(HL), bf(HH),
                                   original=bf(original)))
    assert y4.dtype == jnp.bfloat16
    assert jnp.allclose(y4.astype(jnp.float32), ref_cat5, atol=1e-1, rtol=1e-1)

    print("KERNEL_OK")
</pallas_src>

<mosaic_0001>
module attributes {stable_mosaic.version = 11 : i64} {
  func.func @kernel(%arg0: i32, %arg1: i32, %arg2: i32, %arg3: memref<1x4x16x16xf32, #tpu.memory_space<vmem>>, %arg4: memref<1x4x16x16xf32, #tpu.memory_space<vmem>>, %arg5: memref<1x4x16x16xf32, #tpu.memory_space<vmem>>, %arg6: memref<1x4x16x16xf32, #tpu.memory_space<vmem>>, %arg7: memref<1x4x32x32xf32, #tpu.memory_space<vmem>>, %arg8: memref<16x4xf32, #tpu.memory_space<vmem>>, %arg9: memref<8x1xf32, #tpu.memory_space<vmem>>, %arg10: memref<16x32xf32, #tpu.memory_space<vmem>>, %arg11: memref<16x32xf32, #tpu.memory_space<vmem>>, %arg12: memref<3x16x64xf32, #tpu.memory_space<vmem>>, %arg13: memref<1x20x32x32xf32, #tpu.memory_space<vmem>>) attributes {dimension_semantics = [#tpu.dimension_semantics<parallel>, #tpu.dimension_semantics<parallel>, #tpu.dimension_semantics<parallel>], iteration_bounds = array<i64: 2, 1, 1>, scalar_prefetch = 0 : i64, scratch_operands = 0 : i64, tpu.core_type = #tpu.core_type<tc>, window_params = [{transform_indices = @transform_0, window_bounds = array<i64: 1, 4, 16, 16>}, {transform_indices = @transform_1, window_bounds = array<i64: 1, 4, 16, 16>}, {transform_indices = @transform_2, window_bounds = array<i64: 1, 4, 16, 16>}, {transform_indices = @transform_3, window_bounds = array<i64: 1, 4, 16, 16>}, {transform_indices = @transform_4, window_bounds = array<i64: 1, 4, 32, 32>}, {pipeline_mode = #tpu.pipeline_mode<synchronous>, transform_indices = @transform_5, window_bounds = array<i64: 16, 4>}, {pipeline_mode = #tpu.pipeline_mode<synchronous>, transform_indices = @transform_6, window_bounds = array<i64: 8, 1>}, {pipeline_mode = #tpu.pipeline_mode<synchronous>, transform_indices = @transform_7, window_bounds = array<i64: 16, 32>}, {pipeline_mode = #tpu.pipeline_mode<synchronous>, transform_indices = @transform_8, window_bounds = array<i64: 16, 32>}, {pipeline_mode = #tpu.pipeline_mode<synchronous>, transform_indices = @transform_9, window_bounds = array<i64: 3, 16, 64>}, {transform_indices = @transform_10, window_bounds = array<i64: 1, 20, 32, 32>}]} {
    %c0 = arith.constant 0 : index
    %c0_0 = arith.constant 0 : index
    %0 = vector.load %arg8[%c0, %c0_0] : memref<16x4xf32, #tpu.memory_space<vmem>>, vector<16x4xf32>
    %c0_1 = arith.constant 0 : index
    %c0_2 = arith.constant 0 : index
    %1 = vector.load %arg9[%c0_1, %c0_2] : memref<8x1xf32, #tpu.memory_space<vmem>>, vector<8x1xf32>
    %c0_3 = arith.constant 0 : index
    %c0_4 = arith.constant 0 : index
    %2 = vector.load %arg10[%c0_3, %c0_4] : memref<16x32xf32, #tpu.memory_space<vmem>>, vector<16x32xf32>
    %c0_5 = arith.constant 0 : index
    %c0_6 = arith.constant 0 : index
    %3 = vector.load %arg11[%c0_5, %c0_6] : memref<16x32xf32, #tpu.memory_space<vmem>>, vector<16x32xf32>
    %c0_7 = arith.constant 0 : index
    %c0_8 = arith.constant 0 : index
    %c0_9 = arith.constant 0 : index
    %4 = vector.load %arg12[%c0_7, %c0_8, %c0_9] : memref<3x16x64xf32, #tpu.memory_space<vmem>>, vector<1x16x64xf32>
    %5 = vector.shape_cast %4 : vector<1x16x64xf32> to vector<16x64xf32>
    %c1 = arith.constant 1 : index
    %c0_10 = arith.constant 0 : index
    %c0_11 = arith.constant 0 : index
    %6 = vector.load %arg12[%c1, %c0_10, %c0_11] : memref<3x16x64xf32, #tpu.memory_space<vmem>>, vector<1x16x64xf32>
    %7 = vector.shape_cast %6 : vector<1x16x64xf32> to vector<16x64xf32>
    %c2 = arith.constant 2 : index
    %c0_12 = arith.constant 0 : index
    %c0_13 = arith.constant 0 : index
    %8 = vector.load %arg12[%c2, %c0_12, %c0_13] : memref<3x16x64xf32, #tpu.memory_space<vmem>>, vector<1x16x64xf32>
    %9 = vector.shape_cast %8 : vector<1x16x64xf32> to vector<16x64xf32>
    %c0_14 = arith.constant 0 : index
    %c0_15 = arith.constant 0 : index
    %c0_16 = arith.constant 0 : index
    %c0_17 = arith.constant 0 : index
    %10 = vector.load %arg3[%c0_14, %c0_15, %c0_16, %c0_17] : memref<1x4x16x16xf32, #tpu.memory_space<vmem>>, vector<1x4x1x16xf32>
    %11 = vector.shape_cast %10 : vector<1x4x1x16xf32> to vector<4x16xf32>
    %cst = arith.constant dense<0.000000e+00> : vector<16x16xf32>
    %12 = tpu.matmul %0, %11, %cst {dimension_numbers = #tpu.dot_dimension_numbers<[1], [0], [0], [1], [0, 0, 1, 1], [], []>} : vector<16x4xf32>, vector<4x16xf32>, vector<16x16xf32> -> vector<16x16xf32>
    %13 = vector.extract_strided_slice %12 {offsets = [0, 0], sizes = [8, 16], strides = [1, 1]} : vector<16x16xf32> to vector<8x16xf32>
    %cst_18 = arith.constant dense<0.000000e+00> : vector<8x32xf32>
    %14 = tpu.matmul %13, %2, %cst_18 {dimension_numbers = #tpu.dot_dimension_numbers<[1], [0], [0], [1], [0, 0, 1, 1], [], []>} : vector<8x16xf32>, vector<16x32xf32>, vector<8x32xf32> -> vector<8x32xf32>
    %15 = vector.extract_strided_slice %12 {offsets = [8, 0], sizes = [8, 16], strides = [1, 1]} : vector<16x16xf32> to vector<8x16xf32>
    %cst_19 = arith.constant dense<0.000000e+00> : vector<8x32xf32>
    %16 = tpu.matmul %15, %3, %cst_19 {dimension_numbers = #tpu.dot_dimension_numbers<[1], [0], [0], [1], [0, 0, 1, 1], [], []>} : vector<8x16xf32>, vector<16x32xf32>, vector<8x32xf32> -> vector<8x32xf32>
    %17 = arith.addf %14, %16 : vector<8x32xf32>
    %18 = vector.broadcast %1 : vector<8x1xf32> to vector<8x32xf32>
    %19 = arith.addf %17, %18 : vector<8x32xf32>
    %20 = vector.extract_strided_slice %19 {offsets = [0, 0], sizes = [4, 32], strides = [1, 1]} : vector<8x32xf32> to vector<4x32xf32>
    %c0_20 = arith.constant 0 : index
    %c0_21 = arith.constant 0 : index
    %c0_22 = arith.constant 0 : index
    %c0_23 = arith.constant 0 : index
    %21 = vector.load %arg13[%c0_20, %c0_21, %c0_22, %c0_23] : memref<1x20x32x32xf32, #tpu.memory_space<vmem>>, vector<1x4x1x32xf32>
    %22 = vector.shape_cast %21 : vector<1x4x1x32xf32> to vector<4x32xf32>
    %23 = vector.shape_cast %20 : vector<4x32xf32> to vector<1x4x1x32xf32>
    tpu.vector_store %arg13[%c0_20, %c0_21, %c0_22, %c0_23], %23 {strides = array<i32>} : memref<1x20x32x32xf32, #tpu.memory_space<vmem>>, vector<1x4x1x32xf32>,
    %24 = vector.extract_strided_slice %19 {offsets = [4, 0], sizes = [4, 32], strides = [1, 1]} : vector<8x32xf32> to vector<4x32xf32>
    %c0_24 = arith.constant 0 : index
    %c0_25 = arith.constant 0 : index
    %c1_26 = arith.constant 1 : index
    %c0_27 = arith.constant 0 : index
    %25 = vector.load %arg13[%c0_24, %c0_25, %c1_26, %c0_27] : memref<1x20x32x32xf32, #tpu.memory_space<vmem>>, vector<1x4x1x32xf32>
    %26 = vector.shape_cast %25 : vector<1x4x1x32xf32> to vector<4x32xf32>
    %27 = vector.shape_cast %24 : vector<4x32xf32> to vector<1x4x1x32xf32>
    tpu.vector_store %arg13[%c0_24, %c0_25, %c1_26, %c0_27], %27 {strides = array<i32>} : memref<1x20x32x32xf32, #tpu.memory_space<vmem>>, vector<1x4x1x32xf32>,
    %c0_28 = arith.constant 0 : index
    %c0_29 = arith.constant 0 : index
    %c0_30 = arith.constant 0 : index
    %c0_31 = arith.constant 0 : index
    %28 = vector.load %arg4[%c0_28, %c0_29, %c0_30, %c0_31] : memref<1x4x16x16xf32, #tpu.memory_space<vmem>>, vector<1x4x1x16xf32>
    %29 = vector.shape_cast %28 : vector<1x4x1x16xf32> to vector<4x16xf32>
    %cst_32 = arith.constant dense<0.000000e+00> : vector<4x64xf32>
    %30 = tpu.matmul %29, %5, %cst_32 {dimension_numbers = #tpu.dot_dimension_numbers<[1], [0], [0], [1], [0, 0, 1, 1], [], []>} : vector<4x16xf32>, vector<16x64xf32>, vector<4x64xf32> -> vector<4x64xf32>
    %31 = vector.extract_strided_slice %30 {offsets = [0, 0], sizes = [4, 32], strides = [1, 1]} : vector<4x64xf32> to vector<4x32xf32>
    %c0_33 = arith.constant 0 : index
    %c4 = arith.constant 4 : index
    %c0_34 = arith.constant 0 : index
    %c0_35 = arith.constant 0 : index
    %32 = vector.load %arg13[%c0_33, %c4, %c0_34, %c0_35] : memref<1x20x32x32xf32, #tpu.memory_space<vmem>>, vector<1x4x1x32xf32>
    %33 = vector.shape_cast %32 : vector<1x4x1x32xf32> to vector<4x32xf32>
    %34 = vector.shape_cast %31 : vector<4x32xf32> to vector<1x4x1x32xf32>
    tpu.vector_store %arg13[%c0_33, %c4, %c0_34, %c0_35], %34 {strides = array<i32>} : memref<1x20x32x32xf32, #tpu.memory_space<vmem>>, vector<1x4x1x32xf32>,
    %35 = vector.extract_strided_slice %30 {offsets = [0, 32], sizes = [4, 32], strides = [1, 1]} : vector<4x64xf32> to vector<4x32xf32>
    %c0_36 = arith.constant 0 : index
    %c4_37 = arith.constant 4 : index
    %c1_38 = arith.constant 1 : index
    %c0_39 = arith.constant 0 : index
    %36 = vector.load %arg13[%c0_36, %c4_37, %c1_38, %c0_39] : memref<1x20x32x32xf32, #tpu.memory_space<vmem>>, vector<1x4x1x32xf32>
    %37 = vector.shape_cast %36 : vector<1x4x1x32xf32> to vector<4x32xf32>
    %38 = vector.shape_cast %35 : vector<4x32xf32> to vector<1x4x1x32xf32>
    tpu.vector_store %arg13[%c0_36, %c4_37, %c1_38, %c0_39], %38 {strides = array<i32>} : memref<1x20x32x32xf32, #tpu.memory_space<vmem>>, vector<1x4x1x32xf32>,
    %c0_40 = arith.constant 0 : index
    %c0_41 = arith.constant 0 : index
    %c0_42 = arith.constant 0 : index
    %c0_43 = arith.constant 0 : index
    %39 = vector.load %arg5[%c0_40, %c0_41, %c0_42, %c0_43] : memref<1x4x16x16xf32, #tpu.memory_space<vmem>>, vector<1x4x1x16xf32>
    %40 = vector.shape_cast %39 : vector<1x4x1x16xf32> to vector<4x16xf32>
    %cst_44 = arith.constant dense<0.000000e+00> : vector<4x64xf32>
    %41 = tpu.matmul %40, %7, %cst_44 {dimension_numbers = #tpu.dot_dimension_numbers<[1], [0], [0], [1], [0, 0, 1, 1], [], []>} : vector<4x16xf32>, vector<16x64xf32>, vector<4x64xf32> -> vector<4x64xf32>
    %42 = vector.extract_strided_slice %41 {offsets = [0, 0], sizes = [4, 32], strides = [1, 1]} : vector<4x64xf32> to vector<4x32xf32>
    %c0_45 = arith.constant 0 : index
    %c8 = arith.constant 8 : index
    %c0_46 = arith.constant 0 : index
    %c0_47 = arith.constant 0 : index
    %43 = vector.load %arg13[%c0_45, %c8, %c0_46, %c0_47] : memref<1x20x32x32xf32, #tpu.memory_space<vmem>>, vector<1x4x1x32xf32>
    %44 = vector.shape_cast %43 : vector<1x4x1x32xf32> to vector<4x32xf32>
    %45 = vector.shape_cast %42 : vector<4x32xf32> to vector<1x4x1x32xf32>
    tpu.vector_store %arg13[%c0_45, %c8, %c0_46, %c0_47], %45 {strides = array<i32>} : memref<1x20x32x32xf32, #tpu.memory_space<vmem>>, vector<1x4x1x32xf32>,
    %46 = vector.extract_strided_slice %41 {offsets = [0, 32], sizes = [4, 32], strides = [1, 1]} : vector<4x64xf32> to vector<4x32xf32>
    %c0_48 = arith.constant 0 : index
    %c8_49 = arith.constant 8 : index
    %c1_50 = arith.constant 1 : index
    %c0_51 = arith.constant 0 : index
    %47 = vector.load %arg13[%c0_48, %c8_49, %c1_50, %c0_51] : memref<1x20x32x32xf32, #tpu.memory_space<vmem>>, vector<1x4x1x32xf32>
    %48 = vector.shape_cast %47 : vector<1x4x1x32xf32> to vector<4x32xf32>
    %49 = vector.shape_cast %46 : vector<4x32xf32> to vector<1x4x1x32xf32>
    tpu.vector_store %arg13[%c0_48, %c8_49, %c1_50, %c0_51], %49 {strides = array<i32>} : memref<1x20x32x32xf32, #tpu.memory_space<vmem>>, vector<1x4x1x32xf32>,
    %c0_52 = arith.constant 0 : index
    %c0_53 = arith.constant 0 : index
    %c0_54 = arith.constant 0 : index
    %c0_55 = arith.constant 0 : index
    %50 = vector.load %arg6[%c0_52, %c0_53, %c0_54, %c0_55] : memref<1x4x16x16xf32, #tpu.memory_space<vmem>>, vector<1x4x1x16xf32>
    %51 = vector.shape_cast %50 : vector<1x4x1x16xf32> to vector<4x16xf32>
    %cst_56 = arith.constant dense<0.000000e+00> : vector<4x64xf32>
    %52 = tpu.matmul %51, %9, %cst_56 {dimension_numbers = #tpu.dot_dimension_numbers<[1], [0], [0], [1], [0, 0, 1, 1], [], []>} : vector<4x16xf32>, vector<16x64xf32>, vector<4x64xf32> -> vector<4x64xf32>
    %53 = vector.extract_strided_slice %52 {offsets = [0, 0], sizes = [4, 32], strides = [1, 1]} : vector<4x64xf32> to vector<4x32xf32>
    %c0_57 = arith.constant 0 : index
    %c12 = arith.constant 12 : index
    %c0_58 = arith.constant 0 : index
    %c0_59 = arith.constant 0 : index
    %54 = vector.load %arg13[%c0_57, %c12, %c0_58, %c0_59] : memref<1x20x32x32xf32, #tpu.memory_space<vmem>>, vector<1x4x1x32xf32>
    %55 = vector.shape_cast %54 : vector<1x4x1x32xf32> to vector<4x32xf32>
    %56 = vector.shape_cast %53 : vector<4x32xf32> to vector<1x4x1x32xf32>
    tpu.vector_store %arg13[%c0_57, %c12, %c0_58, %c0_59], %56 {strides = array<i32>} : memref<1x20x32x32xf32, #tpu.memory_space<vmem>>, vector<1x4x1x32xf32>,
    %57 = vector.extract_strided_slice %52 {offsets = [0, 32], sizes = [4, 32], strides = [1, 1]} : vector<4x64xf32> to vector<4x32xf32>
    %c0_60 = arith.constant 0 : index
    %c12_61 = arith.constant 12 : index
    %c1_62 = arith.constant 1 : index
    %c0_63 = arith.constant 0 : index
    %58 = vector.load %arg13[%c0_60, %c12_61, %c1_62, %c0_63] : memref<1x20x32x32xf32, #tpu.memory_space<vmem>>, vector<1x4x1x32xf32>
    %59 = vector.shape_cast %58 : vector<1x4x1x32xf32> to vector<4x32xf32>
    %60 = vector.shape_cast %57 : vector<4x32xf32> to vector<1x4x1x32xf32>
    tpu.vector_store %arg13[%c0_60, %c12_61, %c1_62, %c0_63], %60 {strides = array<i32>} : memref<1x20x32x32xf32, #tpu.memory_space<vmem>>, vector<1x4x1x32xf32>,
    %c0_64 = arith.constant 0 : index
    %c0_65 = arith.constant 0 : index
    %c1_66 = arith.constant 1 : index
    %c0_67 = arith.constant 0 : index
    %61 = vector.load %arg3[%c0_64, %c0_65, %c1_66, %c0_67] : memref<1x4x16x16xf32, #tpu.memory_space<vmem>>, vector<1x4x1x16xf32>
    %62 = vector.shape_cast %61 : vector<1x4x1x16xf32> to vector<4x16xf32>
    %cst_68 = arith.constant dense<0.000000e+00> : vector<16x16xf32>
    %63 = tpu.matmul %0, %62, %cst_68 {dimension_numbers = #tpu.dot_dimension_numbers<[1], [0], [0], [1], [0, 0, 1, 1], [], []>} : vector<16x4xf32>, vector<4x16xf32>, vector<16x16xf32> -> vector<16x16xf32>
    %64 = vector.extract_strided_slice %63 {offsets = [0, 0], sizes = [8, 16], strides = [1, 1]} : vector<16x16xf32> to vector<8x16xf32>
    %cst_69 = arith.constant dense<0.000000e+00> : vector<8x32xf32>
    %65 = tpu.matmul %64, %2, %cst_69 {dimension_numbers = #tpu.dot_dimension_numbers<[1], [0], [0], [1], [0, 0, 1, 1], [], []>} : vector<8x16xf32>, vector<16x32xf32>, vector<8x32xf32> -> vector<8x32xf32>
    %66 = vector.extract_strided_slice %63 {offsets = [8, 0], sizes = [8, 16], strides = [1, 1]} : vector<16x16xf32> to vector<8x16xf32>
    %cst_70 = arith.constant dense<0.000000e+00> : vector<8x32xf32>
    %67 = tpu.matmul %66, %3, %cst_70 {dimension_numbers = #tpu.dot_dimension_numbers<[1], [0], [0], [1], [0, 0, 1, 1], [], []>} : vector<8x16xf32>, vector<16x32xf32>, vector<8x32xf32> -> vector<8x32xf32>
    %68 = arith.addf %65, %67 : vector<8x32xf32>
    %69 = vector.broadcast %1 : vector<8x1xf32> to vector<8x32xf32>
    %70 = arith.addf %68, %69 : vector<8x32xf32>
    %71 = vector.extract_strided_slice %70 {offsets = [0, 0], sizes = [4, 32], strides = [1, 1]} : vector<8x32xf32> to vector<4x32xf32>
    %c0_71 = arith.constant 0 : index
    %c0_72 = arith.constant 0 : index
    %c2_73 = arith.constant 2 : index
    %c0_74 = arith.constant 0 : index
    %72 = vector.load %arg13[%c0_71, %c0_72, %c2_73, %c0_74] : memref<1x20x32x32xf32, #tpu.memory_space<vmem>>, vector<1x4x1x32xf32>
    %73 = vector.shape_cast %72 : vector<1x4x1x32xf32> to vector<4x32xf32>
    %74 = vector.shape_cast %71 : vector<4x32xf32> to vector<1x4x1x32xf32>
    tpu.vector_store %arg13[%c0_71, %c0_72, %c2_73, %c0_74], %74 {strides = array<i32>} : memref<1x20x32x32xf32, #tpu.memory_space<vmem>>, vector<1x4x1x32xf32>,
    %75 = vector.extract_strided_slice %70 {offsets = [4, 0], sizes = [4, 32], strides = [1, 1]} : vector<8x32xf32> to vector<4x32xf32>
    %c0_75 = arith.constant 0 : index
    %c0_76 = arith.constant 0 : index
    %c3 = arith.constant 3 : index
    %c0_77 = arith.constant 0 : index
    %76 = vector.load %arg13[%c0_75, %c0_76, %c3, %c0_77] : memref<1x20x32x32xf32, #tpu.memory_space<vmem>>, vector<1x4x1x32xf32>
    %77 = vector.shape_cast %76 : vector<1x4x1x32xf32> to vector<4x32xf32>
    %78 = vector.shape_cast %75 : vector<4x32xf32> to vector<1x4x1x32xf32>
    tpu.vector_store %arg13[%c0_75, %c0_76, %c3, %c0_77], %78 {strides = array<i32>} : memref<1x20x32x32xf32, #tpu.memory_space<vmem>>, vector<1x4x1x32xf32>,
    %c0_78 = arith.constant 0 : index
    %c0_79 = arith.constant 0 : index
    %c1_80 = arith.constant 1 : index
    %c0_81 = arith.constant 0 : index
    %79 = vector.load %arg4[%c0_78, %c0_79, %c1_80, %c0_81] : memref<1x4x16x16xf32, #tpu.memory_space<vmem>>, vector<1x4x1x16xf32>
    %80 = vector.shape_cast %79 : vector<1x4x1x16xf32> to vector<4x16xf32>
    %cst_82 = arith.constant dense<0.000000e+00> : vector<4x64xf32>
    %81 = tpu.matmul %80, %5, %cst_82 {dimension_numbers = #tpu.dot_dimension_numbers<[1], [0], [0], [1], [0, 0, 1, 1], [], []>} : vector<4x16xf32>, vector<16x64xf32>, vector<4x64xf32> -> vector<4x64xf32>
    %82 = vector.extract_strided_slice %81 {offsets = [0, 0], sizes = [4, 32], strides = [1, 1]} : vector<4x64xf32> to vector<4x32xf32>
    %c0_83 = arith.constant 0 : index
    %c4_84 = arith.constant 4 : index
    %c2_85 = arith.constant 2 : index
    %c0_86 = arith.constant 0 : index
    %83 = vector.load %arg13[%c0_83, %c4_84, %c2_85, %c0_86] : memref<1x20x32x32xf32, #tpu.memory_space<vmem>>, vector<1x4x1x32xf32>
    %84 = vector.shape_cast %83 : vector<1x4x1x32xf32> to vector<4x32xf32>
    %85 = vector.shape_cast %82 : vector<4x32xf32> to vector<1x4x1x32xf32>
    tpu.vector_store %arg13[%c0_83, %c4_84, %c2_85, %c0_86], %85 {strides = array<i32>} : memref<1x20x32x32xf32, #tpu.memory_space<vmem>>, vector<1x4x1x32xf32>,
    %86 = vector.extract_strided_slice %81 {offsets = [0, 32], sizes = [4, 32], strides = [1, 1]} : vector<4x64xf32> to vector<4x32xf32>
    %c0_87 = arith.constant 0 : index
    %c4_88 = arith.constant 4 : index
    %c3_89 = arith.constant 3 : index
    %c0_90 = arith.constant 0 : index
    %87 = vector.load %arg13[%c0_87, %c4_88, %c3_89, %c0_90] : memref<1x20x32x32xf32, #tpu.memory_space<vmem>>, vector<1x4x1x32xf32>
    %88 = vector.shape_cast %87 : vector<1x4x1x32xf32> to vector<4x32xf32>
    %89 = vector.shape_cast %86 : vector<4x32xf32> to vector<1x4x1x32xf32>
    tpu.vector_store %arg13[%c0_87, %c4_88, %c3_89, %c0_90], %89 {strides = array<i32>} : memref<1x20x32x32xf32, #tpu.memory_space<vmem>>, vector<1x4x1x32xf32>,
    %c0_91 = arith.constant 0 : index
    %c0_92 = arith.constant 0 : index
    %c1_93 = arith.constant 1 : index
    %c0_94 = arith.constant 0 : index
    %90 = vector.load %arg5[%c0_91, %c0_92, %c1_93, %c0_94] : memref<1x4x16x16xf32, #tpu.memory_space<vmem>>, vector<1x4x1x16xf32>
    %91 = vector.shape_cast %90 : vector<1x4x1x16xf32> to vector<4x16xf32>
    %cst_95 = arith.constant dense<0.000000e+00> : vector<4x64xf32>
    %92 = tpu.matmul %91, %7, %cst_95 {dimension_numbers = #tpu.dot_dimension_numbers<[1], [0], [0], [1], [0, 0, 1, 1], [], []>} : vector<4x16xf32>, vector<16x64xf32>, vector<4x64xf32> -> vector<4x64xf32>
    %93 = vector.extract_strided_slice %92 {offsets = [0, 0], sizes = [4, 32], strides = [1, 1]} : vector<4x64xf32> to vector<4x32xf32>
    %c0_96 = arith.constant 0 : index
    %c8_97 = arith.constant 8 : index
    %c2_98 = arith.constant 2 : index
    %c0_99 = arith.constant 0 : index
    %94 = vector.load %arg13[%c0_96, %c8_97, %c2_98, %c0_99] : memref<1x20x32x32xf32, #tpu.memory_space<vmem>>, vector<1x4x1x32xf32>
    %95 = vector.shape_cast %94 : vector<1x4x1x32xf32> to vector<4x32xf32>
    %96 = vector.shape_cast %93 : vector<4x32xf32> to vector<1x4x1x32xf32>
    tpu.vector_store %arg13[%c0_96, %c8_97, %c2_98, %c0_99], %96 {strides = array<i32>} : memref<1x20x32x32xf32, #tpu.memory_space<vmem>>, vector<1x4x1x32xf32>,
    %97 = vector.extract_strided_slice %92 {offsets = [0, 32], sizes = [4, 32], strides = [1, 1]} : vector<4x64xf32> to vector<4x32xf32>
    %c0_100 = arith.constant 0 : index
    %c8_101 = arith.constant 8 : index
    %c3_102 = arith.constant 3 : index
    %c0_103 = arith.constant 0 : index
    %98 = vector.load %arg13[%c0_100, %c8_101, %c3_102, %c0_103] : memref<1x20x32x32xf32, #tpu.memory_space<vmem>>, vector<1x4x1x32xf32>
    %99 = vector.shape_cast %98 : vector<1x4x1x32xf32> to vector<4x32xf32>
    %100 = vector.shape_cast %97 : vector<4x32xf32> to vector<1x4x1x32xf32>
    tpu.vector_store %arg13[%c0_100, %c8_101, %c3_102, %c0_103], %100 {strides = array<i32>} : memref<1x20x32x32xf32, #tpu.memory_space<vmem>>, vector<1x4x1x32xf32>,
    %c0_104 = arith.constant 0 : index
    %c0_105 = arith.constant 0 : index
    %c1_106 = arith.constant 1 : index
    %c0_107 = arith.constant 0 : index
    %101 = vector.load %arg6[%c0_104, %c0_105, %c1_106, %c0_107] : memref<1x4x16x16xf32, #tpu.memory_space<vmem>>, vector<1x4x1x16xf32>
    %102 = vector.shape_cast %101 : vector<1x4x1x16xf32> to vector<4x16xf32>
    %cst_108 = arith.constant dense<0.000000e+00> : vector<4x64xf32>
    %103 = tpu.matmul %102, %9, %cst_108 {dimension_numbers = #tpu.dot_dimension_numbers<[1], [0], [0], [1], [0, 0, 1, 1], [], []>} : vector<4x16xf32>, vector<16x64xf32>, vector<4x64xf32> -> vector<4x64xf32>
    %104 = vector.extract_strided_slice %103 {offsets = [0, 0], sizes = [4, 32], strides = [1, 1]} : vector<4x64xf32> to vector<4x32xf32>
    %c0_109 = arith.constant 0 : index
    %c12_110 = arith.constant 12 : index
    %c2_111 = arith.constant 2 : index
    %c0_112 = arith.constant 0 : index
    %105 = vector.load %arg13[%c0_109, %c12_110, %c2_111, %c0_112] : memref<1x20x32x32xf32, #tpu.memory_space<vmem>>, vector<1x4x1x32xf32>
    %106 = vector.shape_cast %105 : vector<1x4x1x32xf32> to vector<4x32xf32>
    %107 = vector.shape_cast %104 : vector<4x32xf32> to vector<1x4x1x32xf32>
    tpu.vector_store %arg13[%c0_109, %c12_110, %c2_111, %c0_112], %107 {strides = array<i32>} : memref<1x20x32x32xf32, #tpu.memory_space<vmem>>, vector<1x4x1x32xf32>,
    %108 = vector.extract_strided_slice %103 {offsets = [0, 32], sizes = [4, 32], strides = [1, 1]} : vector<4x64xf32> to vector<4x32xf32>
    %c0_113 = arith.constant 0 : index
    %c12_114 = arith.constant 12 : index
    %c3_115 = arith.constant 3 : index
    %c0_116 = arith.constant 0 : index
    %109 = vector.load %arg13[%c0_113, %c12_114, %c3_115, %c0_116] : memref<1x20x32x32xf32, #tpu.memory_space<vmem>>, vector<1x4x1x32xf32>
    %110 = vector.shape_cast %109 : vector<1x4x1x32xf32> to vector<4x32xf32>
    %111 = vector.shape_cast %108 : vector<4x32xf32> to vector<1x4x1x32xf32>
    tpu.vector_store %arg13[%c0_113, %c12_114, %c3_115, %c0_116], %111 {strides = array<i32>} : memref<1x20x32x32xf32, #tpu.memory_space<vmem>>, vector<1x4x1x32xf32>,
    %c0_117 = arith.constant 0 : index
    %c0_118 = arith.constant 0 : index
    %c2_119 = arith.constant 2 : index
    %c0_120 = arith.constant 0 : index
    %112 = vector.load %arg3[%c0_117, %c0_118, %c2_119, %c0_120] : memref<1x4x16x16xf32, #tpu.memory_space<vmem>>, vector<1x4x1x16xf32>
    %113 = vector.shape_cast %112 : vector<1x4x1x16xf32> to vector<4x16xf32>
    %cst_121 = arith.constant dense<0.000000e+00> : vector<16x16xf32>
    %114 = tpu.matmul %0, %113, %cst_121 {dimension_numbers = #tpu.dot_dimension_numbers<[1], [0], [0], [1], [0, 0, 1, 1], [], []>} : vector<16x4xf32>, vector<4x16xf32>, vector<16x16xf32> -> vector<16x16xf32>
    %115 = vector.extract_strided_slice %114 {offsets = [0, 0], sizes = [8, 16], strides = [1, 1]} : vector<16x16xf32> to vector<8x16xf32>
    %cst_122 = arith.constant dense<0.000000e+00> : vector<8x32xf32>
    %116 = tpu.matmul %115, %2, %cst_122 {dimension_numbers = #tpu.dot_dimension_numbers<[1], [0], [0], [1], [0, 0, 1, 1], [], []>} : vector<8x16xf32>, vector<16x32xf32>, vector<8x32xf32> -> vector<8x32xf32>
    %117 = vector.extract_strided_slice %114 {offsets = [8, 0], sizes = [8, 16], strides = [1, 1]} : vector<16x16xf32> to vector<8x16xf32>
    %cst_123 = arith.constant dense<0.000000e+00> : vector<8x32xf32>
    %118 = tpu.matmul %117, %3, %cst_123 {dimension_numbers = #tpu.dot_dimension_numbers<[1], [0], [0], [1], [0, 0, 1, 1], [], []>} : vector<8x16xf32>, vector<16x32xf32>, vector<8x32xf32> -> vector<8x32xf32>
    %119 = arith.addf %116, %118 : vector<8x32xf32>
    %120 = vector.broadcast %1 : vector<8x1xf32> to vector<8x32xf32>
    %121 = arith.addf %119, %120 : vector<8x32xf32>
    %122 = vector.extract_strided_slice %121 {offsets = [0, 0], sizes = [4, 32], strides = [1, 1]} : vector<8x32xf32> to vector<4x32xf32>
    %c0_124 = arith.constant 0 : index
    %c0_125 = arith.constant 0 : index
    %c4_126 = arith.constant 4 : index
    %c0_127 = arith.constant 0 : index
    %123 = vector.load %arg13[%c0_124, %c0_125, %c4_126, %c0_127] : memref<1x20x32x32xf32, #tpu.memory_space<vmem>>, vector<1x4x1x32xf32>
    %124 = vector.shape_cast %123 : vector<1x4x1x32xf32> to vector<4x32xf32>
    %125 = vector.shape_cast %122 : vector<4x32xf32> to vector<1x4x1x32xf32>
    tpu.vector_store %arg13[%c0_124, %c0_125, %c4_126, %c0_127], %125 {strides = array<i32>} : memref<1x20x32x32xf32, #tpu.memory_space<vmem>>, vector<1x4x1x32xf32>,
    %126 = vector.extract_strided_slice %121 {offsets = [4, 0], sizes = [4, 32], strides = [1, 1]} : vector<8x32xf32> to vector<4x32xf32>
    %c0_128 = arith.constant 0 : index
    %c0_129 = arith.constant 0 : index
    %c5 = arith.constant 5 : index
    %c0_130 = arith.constant 0 : index
    %127 = vector.load %arg13[%c0_128, %c0_129, %c5, %c0_130] : memref<1x20x32x32xf32, #tpu.memory_space<vmem>>, vector<1x4x1x32xf32>
    %128 = vector.shape_cast %127 : vector<1x4x1x32xf32> to vector<4x32xf32>
    %129 = vector.shape_cast %126 : vector<4x32xf32> to vector<1x4x1x32xf32>
    tpu.vector_store %arg13[%c0_128, %c0_129, %c5, %c0_130], %129 {strides = array<i32>} : memref<1x20x32x32xf32, #tpu.memory_space<vmem>>, vector<1x4x1x32xf32>,
    %c0_131 = arith.constant 0 : index
    %c0_132 = arith.constant 0 : index
    %c2_133 = arith.constant 2 : index
    %c0_134 = arith.constant 0 : index
    %130 = vector.load %arg4[%c0_131, %c0_132, %c2_133, %c0_134] : memref<1x4x16x16xf32, #tpu.memory_space<vmem>>, vector<1x4x1x16xf32>
    %131 = vector.shape_cast %130 : vector<1x4x1x16xf32> to vector<4x16xf32>
    %cst_135 = arith.constant dense<0.000000e+00> : vector<4x64xf32>
    %132 = tpu.matmul %131, %5, %cst_135 {dimension_numbers = #tpu.dot_dimension_numbers<[1], [0], [0], [1], [0, 0, 1, 1], [], []>} : vector<4x16xf32>, vector<16x64xf32>, vector<4x64xf32> -> vector<4x64xf32>
    %133 = vector.extract_strided_slice %132 {offsets = [0, 0], sizes = [4, 32], strides = [1, 1]} : vector<4x64xf32> to vector<4x32xf32>
    %c0_136 = arith.constant 0 : index
    %c4_137 = arith.constant 4 : index
    %c4_138 = arith.constant 4 : index
    %c0_139 = arith.constant 0 : index
    %134 = vector.load %arg13[%c0_136, %c4_137, %c4_138, %c0_139] : memref<1x20x32x32xf32, #tpu.memory_space<vmem>>, vector<1x4x1x32xf32>
    %135 = vector.shape_cast %134 : vector<1x4x1x32xf32> to vector<4x32xf32>
    %136 = vector.shape_cast %133 : vector<4x32xf32> to vector<1x4x1x32xf32>
    tpu.vector_store %arg13[%c0_136, %c4_137, %c4_138, %c0_139], %136 {strides = array<i32>} : memref<1x20x32x32xf32, #tpu.memory_space<vmem>>, vector<1x4x1x32xf32>,
    %137 = vector.extract_strided_slice %132 {offsets = [0, 32], sizes = [4, 32], strides = [1, 1]} : vector<4x64xf32> to vector<4x32xf32>
    %c0_140 = arith.constant 0 : index
    %c4_141 = arith.constant 4 : index
    %c5_142 = arith.constant 5 : index
    %c0_143 = arith.constant 0 : index
    %138 = vector.load %arg13[%c0_140, %c4_141, %c5_142, %c0_143] : memref<1x20x32x32xf32, #tpu.memory_space<vmem>>, vector<1x4x1x32xf32>
    %139 = vector.shape_cast %138 : vector<1x4x1x32xf32> to vector<4x32xf32>
    %140 = vector.shape_cast %137 : vector<4x32xf32> to vector<1x4x1x32xf32>
    tpu.vector_store %arg13[%c0_140, %c4_141, %c5_142, %c0_143], %140 {strides = array<i32>} : memref<1x20x32x32xf32, #tpu.memory_space<vmem>>, vector<1x4x1x32xf32>,
    %c0_144 = arith.constant 0 : index
    %c0_145 = arith.constant 0 : index
    %c2_146 = arith.constant 2 : index
    %c0_147 = arith.constant 0 : index
    %141 = vector.load %arg5[%c0_144, %c0_145, %c2_146, %c0_147] : memref<1x4x16x16xf32, #tpu.memory_space<vmem>>, vector<1x4x1x16xf32>
    %142 = vector.shape_cast %141 : vector<1x4x1x16xf32> to vector<4x16xf32>
    %cst_148 = arith.constant dense<0.000000e+00> : vector<4x64xf32>
    %143 = tpu.matmul %142, %7, %cst_148 {dimension_numbers = #tpu.dot_dimension_numbers<[1], [0], [0], [1], [0, 0, 1, 1], [], []>} : vector<4x16xf32>, vector<16x64xf32>, vector<4x64xf32> -> vector<4x64xf32>
    %144 = vector.extract_strided_slice %143 {offsets = [0, 0], sizes = [4, 32], strides = [1, 1]} : vector<4x64xf32> to vector<4x32xf32>
    %c0_149 = arith.constant 0 : index
    %c8_150 = arith.constant 8 : index
    %c4_151 = arith.constant 4 : index
    %c0_152 = arith.constant 0 : index
    %145 = vector.load %arg13[%c0_149, %c8_150, %c4_151, %c0_152] : memref<1x20x32x32xf32, #tpu.memory_space<vmem>>, vector<1x4x1x32xf32>
    %146 = vector.shape_cast %145 : vector<1x4x1x32xf32> to vector<4x32xf32>
    %147 = vector.shape_cast %144 : vector<4x32xf32> to vector<1x4x1x32xf32>
    tpu.vector_store %arg13[%c0_149, %c8_150, %c4_151, %c0_152], %147 {strides = array<i32>} : memref<1x20x32x32xf32, #tpu.memory_space<vmem>>, vector<1x4x1x32xf32>,
    %148 = vector.extract_strided_slice %143 {offsets = [0, 32], sizes = [4, 32], strides = [1, 1]} : vector<4x64xf32> to vector<4x32xf32>
    %c0_153 = arith.constant 0 : index
    %c8_154 = arith.constant 8 : index
    %c5_155 = arith.constant 5 : index
    %c0_156 = arith.constant 0 : index
    %149 = vector.load %arg13[%c0_153, %c8_154, %c5_155, %c0_156] : memref<1x20x32x32xf32, #tpu.memory_space<vmem>>, vector<1x4x1x32xf32>
    %150 = vector.shape_cast %149 : vector<1x4x1x32xf32> to vector<4x32xf32>
    %151 = vector.shape_cast %148 : vector<4x32xf32> to vector<1x4x1x32xf32>
    tpu.vector_store %arg13[%c0_153, %c8_154, %c5_155, %c0_156], %151 {strides = array<i32>} : memref<1x20x32x32xf32, #tpu.memory_space<vmem>>, vector<1x4x1x32xf32>,
    %c0_157 = arith.constant 0 : index
    %c0_158 = arith.constant 0 : index
    %c2_159 = arith.constant 2 : index
    %c0_160 = arith.constant 0 : index
    %152 = vector.load %arg6[%c0_157, %c0_158, %c2_159, %c0_160] : memref<1x4x16x16xf32, #tpu.memory_space<vmem>>, vector<1x4x1x16xf32>
    %153 = vector.shape_cast %152 : vector<1x4x1x16xf32> to vector<4x16xf32>
    %cst_161 = arith.constant dense<0.000000e+00> : vector<4x64xf32>
    %154 = tpu.matmul %153, %9, %cst_161 {dimension_numbers = #tpu.dot_dimension_numbers<[1], [0], [0], [1], [0, 0, 1, 1], [], []>} : vector<4x16xf32>, vector<16x64xf32>, vector<4x64xf32> -> vector<4x64xf32>
    %155 = vector.extract_strided_slice %154 {offsets = [0, 0], sizes = [4, 32], strides = [1, 1]} : vector<4x64xf32> to vector<4x32xf32>
    %c0_162 = arith.constant 0 : index
    %c12_163 = arith.constant 12 : index
    %c4_164 = arith.constant 4 : index
    %c0_165 = arith.constant 0 : index
    %156 = vector.load %arg13[%c0_162, %c12_163, %c4_164, %c0_165] : memref<1x20x32x32xf32, #tpu.memory_space<vmem>>, vector<1x4x1x32xf32>
    %157 = vector.shape_cast %156 : vector<1x4x1x32xf32> to vector<4x32xf32>
    %158 = vector.shape_cast %155 : vector<4x32xf32> to vector<1x4x1x32xf32>
    tpu.vector_store %arg13[%c0_162, %c12_163, %c4_164, %c0_165], %158 {strides = array<i32>} : memref<1x20x32x32xf32, #tpu.memory_space<vmem>>, vector<1x4x1x32xf32>,
    %159 = vector.extract_strided_slice %154 {offsets = [0, 32], sizes = [4, 32], strides = [1, 1]} : vector<4x64xf32> to vector<4x32xf32>
    %c0_166 = arith.constant 0 : index
    %c12_167 = arith.constant 12 : index
    %c5_168 = arith.constant 5 : index
    %c0_169 = arith.constant 0 : index
    %160 = vector.load %arg13[%c0_166, %c12_167, %c5_168, %c0_169] : memref<1x20x32x32xf32, #tpu.memory_space<vmem>>, vector<1x4x1x32xf32>
    %161 = vector.shape_cast %160 : vector<1x4x1x32xf32> to vector<4x32xf32>
    %162 = vector.shape_cast %159 : vector<4x32xf32> to vector<1x4x1x32xf32>
    tpu.vector_store %arg13[%c0_166, %c12_167, %c5_168, %c0_169], %162 {strides = array<i32>} : memref<1x20x32x32xf32, #tpu.memory_space<vmem>>, vector<1x4x1x32xf32>,
    %c0_170 = arith.constant 0 : index
    %c0_171 = arith.constant 0 : index
    %c3_172 = arith.constant 3 : index
    %c0_173 = arith.constant 0 : index
    %163 = vector.load %arg3[%c0_170, %c0_171, %c3_172, %c0_173] : memref<1x4x16x16xf32, #tpu.memory_space<vmem>>, vector<1x4x1x16xf32>
    %164 = vector.shape_cast %163 : vector<1x4x1x16xf32> to vector<4x16xf32>
    %cst_174 = arith.constant dense<0.000000e+00> : vector<16x16xf32>
    %165 = tpu.matmul %0, %164, %cst_174 {dimension_numbers = #tpu.dot_dimension_numbers<[1], [0], [0], [1], [0, 0, 1, 1], [], []>} : vector<16x4xf32>, vector<4x16xf32>, vector<16x16xf32> -> vector<16x16xf32>
    %166 = vector.extract_strided_slice %165 {offsets = [0, 0], sizes = [8, 16], strides = [1, 1]} : vector<16x16xf32> to vector<8x16xf32>
    %cst_175 = arith.constant dense<0.000000e+00> : vector<8x32xf32>
    %167 = tpu.matmul %166, %2, %cst_175 {dimension_numbers = #tpu.dot_dimension_numbers<[1], [0], [0], [1], [0, 0, 1, 1], [], []>} : vector<8x16xf32>, vector<16x32xf32>, vector<8x32xf32> -> vector<8x32xf32>
    %168 = vector.extract_strided_slice %165 {offsets = [8, 0], sizes = [8, 16], strides = [1, 1]} : vector<16x16xf32> to vector<8x16xf32>
    %cst_176 = arith.constant dense<0.000000e+00> : vector<8x32xf32>
    %169 = tpu.matmul %168, %3, %cst_176 {dimension_numbers = #tpu.dot_dimension_numbers<[1], [0], [0], [1], [0, 0, 1, 1], [], []>} : vector<8x16xf32>, vector<16x32xf32>, vector<8x32xf32> -> vector<8x32xf32>
    %170 = arith.addf %167, %169 : vector<8x32xf32>
    %171 = vector.broadcast %1 : vector<8x1xf32> to vector<8x32xf32>
    %172 = arith.addf %170, %171 : vector<8x32xf32>
    %173 = vector.extract_strided_slice %172 {offsets = [0, 0], sizes = [4, 32], strides = [1, 1]} : vector<8x32xf32> to vector<4x32xf32>
    %c0_177 = arith.constant 0 : index
    %c0_178 = arith.constant 0 : index
    %c6 = arith.constant 6 : index
    %c0_179 = arith.constant 0 : index
    %174 = vector.load %arg13[%c0_177, %c0_178, %c6, %c0_179] : memref<1x20x32x32xf32, #tpu.memory_space<vmem>>, vector<1x4x1x32xf32>
    %175 = vector.shape_cast %174 : vector<1x4x1x32xf32> to vector<4x32xf32>
    %176 = vector.shape_cast %173 : vector<4x32xf32> to vector<1x4x1x32xf32>
    tpu.vector_store %arg13[%c0_177, %c0_178, %c6, %c0_179], %176 {strides = array<i32>} : memref<1x20x32x32xf32, #tpu.memory_space<vmem>>, vector<1x4x1x32xf32>,
    %177 = vector.extract_strided_slice %172 {offsets = [4, 0], sizes = [4, 32], strides = [1, 1]} : vector<8x32xf32> to vector<4x32xf32>
    %c0_180 = arith.constant 0 : index
    %c0_181 = arith.constant 0 : index
    %c7 = arith.constant 7 : index
    %c0_182 = arith.constant 0 : index
    %178 = vector.load %arg13[%c0_180, %c0_181, %c7, %c0_182] : memref<1x20x32x32xf32, #tpu.memory_space<vmem>>, vector<1x4x1x32xf32>
    %179 = vector.shape_cast %178 : vector<1x4x1x32xf32> to vector<4x32xf32>
    %180 = vector.shape_cast %177 : vector<4x32xf32> to vector<1x4x1x32xf32>
    tpu.vector_store %arg13[%c0_180, %c0_181, %c7, %c0_182], %180 {strides = array<i32>} : memref<1x20x32x32xf32, #tpu.memory_space<vmem>>, vector<1x4x1x32xf32>,
    %c0_183 = arith.constant 0 : index
    %c0_184 = arith.constant 0 : index
    %c3_185 = arith.constant 3 : index
    %c0_186 = arith.constant 0 : index
    %181 = vector.load %arg4[%c0_183, %c0_184, %c3_185, %c0_186] : memref<1x4x16x16xf32, #tpu.memory_space<vmem>>, vector<1x4x1x16xf32>
    %182 = vector.shape_cast %181 : vector<1x4x1x16xf32> to vector<4x16xf32>
    %cst_187 = arith.constant dense<0.000000e+00> : vector<4x64xf32>
    %183 = tpu.matmul %182, %5, %cst_187 {dimension_numbers = #tpu.dot_dimension_numbers<[1], [0], [0], [1], [0, 0, 1, 1], [], []>} : vector<4x16xf32>, vector<16x64xf32>, vector<4x64xf32> -> vector<4x64xf32>
    %184 = vector.extract_strided_slice %183 {offsets = [0, 0], sizes = [4, 32], strides = [1, 1]} : vector<4x64xf32> to vector<4x32xf32>
    %c0_188 = arith.constant 0 : index
    %c4_189 = arith.constant 4 : index
    %c6_190 = arith.constant 6 : index
    %c0_191 = arith.constant 0 : index
    %185 = vector.load %arg13[%c0_188, %c4_189, %c6_190, %c0_191] : memref<1x20x32x32xf32, #tpu.memory_space<vmem>>, vector<1x4x1x32xf32>
    %186 = vector.shape_cast %185 : vector<1x4x1x32xf32> to vector<4x32xf32>
    %187 = vector.shape_cast %184 : vector<4x32xf32> to vector<1x4x1x32xf32>
    tpu.vector_store %arg13[%c0_188, %c4_189, %c6_190, %c0_191], %187 {strides = array<i32>} : memref<1x20x32x32xf32, #tpu.memory_space<vmem>>, vector<1x4x1x32xf32>,
    %188 = vector.extract_strided_slice %183 {offsets = [0, 32], sizes = [4, 32], strides = [1, 1]} : vector<4x64xf32> to vector<4x32xf32>
    %c0_192 = arith.constant 0 : index
    %c4_193 = arith.constant 4 : index
    %c7_194 = arith.constant 7 : index
    %c0_195 = arith.constant 0 : index
    %189 = vector.load %arg13[%c0_192, %c4_193, %c7_194, %c0_195] : memref<1x20x32x32xf32, #tpu.memory_space<vmem>>, vector<1x4x1x32xf32>
    %190 = vector.shape_cast %189 : vector<1x4x1x32xf32> to vector<4x32xf32>
    %191 = vector.shape_cast %188 : vector<4x32xf32> to vector<1x4x1x32xf32>
    tpu.vector_store %arg13[%c0_192, %c4_193, %c7_194, %c0_195], %191 {strides = array<i32>} : memref<1x20x32x32xf32, #tpu.memory_space<vmem>>, vector<1x4x1x32xf32>,
    %c0_196 = arith.constant 0 : index
    %c0_197 = arith.constant 0 : index
    %c3_198 = arith.constant 3 : index
    %c0_199 = arith.constant 0 : index
    %192 = vector.load %arg5[%c0_196, %c0_197, %c3_198, %c0_199] : memref<1x4x16x16xf32, #tpu.memory_space<vmem>>, vector<1x4x1x16xf32>
    %193 = vector.shape_cast %192 : vector<1x4x1x16xf32> to vector<4x16xf32>
    %cst_200 = arith.constant dense<0.000000e+00> : vector<4x64xf32>
    %194 = tpu.matmul %193, %7, %cst_200 {dimension_numbers = #tpu.dot_dimension_numbers<[1], [0], [0], [1], [0, 0, 1, 1], [], []>} : vector<4x16xf32>, vector<16x64xf32>, vector<4x64xf32> -> vector<4x64xf32>
    %195 = vector.extract_strided_slice %194 {offsets = [0, 0], sizes = [4, 32], strides = [1, 1]} : vector<4x64xf32> to vector<4x32xf32>
    %c0_201 = arith.constant 0 : index
    %c8_202 = arith.constant 8 : index
    %c6_203 = arith.constant 6 : index
    %c0_204 = arith.constant 0 : index
    %196 = vector.load %arg13[%c0_201, %c8_202, %c6_203, %c0_204] : memref<1x20x32x32xf32, #tpu.memory_space<vmem>>, vector<1x4x1x32xf32>
    %197 = vector.shape_cast %196 : vector<1x4x1x32xf32> to vector<4x32xf32>
    %198 = vector.shape_cast %195 : vector<4x32xf32> to vector<1x4x1x32xf32>
    tpu.vector_store %arg13[%c0_201, %c8_202, %c6_203, %c0_204], %198 {strides = array<i32>} : memref<1x20x32x32xf32, #tpu.memory_space<vmem>>, vector<1x4x1x32xf32>,
    %199 = vector.extract_strided_slice %194 {offsets = [0, 32], sizes = [4, 32], strides = [1, 1]} : vector<4x64xf32> to vector<4x32xf32>
    %c0_205 = arith.constant 0 : index
    %c8_206 = arith.constant 8 : index
    %c7_207 = arith.constant 7 : index
    %c0_208 = arith.constant 0 : index
    %200 = vector.load %arg13[%c0_205, %c8_206, %c7_207, %c0_208] : memref<1x20x32x32xf32, #tpu.memory_space<vmem>>, vector<1x4x1x32xf32>
    %201 = vector.shape_cast %200 : vector<1x4x1x32xf32> to vector<4x32xf32>
    %202 = vector.shape_cast %199 : vector<4x32xf32> to vector<1x4x1x32xf32>
    tpu.vector_store %arg13[%c0_205, %c8_206, %c7_207, %c0_208], %202 {strides = array<i32>} : memref<1x20x32x32xf32, #tpu.memory_space<vmem>>, vector<1x4x1x32xf32>,
    %c0_209 = arith.constant 0 : index
    %c0_210 = arith.constant 0 : index
    %c3_211 = arith.constant 3 : index
    %c0_212 = arith.constant 0 : index
    %203 = vector.load %arg6[%c0_209, %c0_210, %c3_211, %c0_212] : memref<1x4x16x16xf32, #tpu.memory_space<vmem>>, vector<1x4x1x16xf32>
    %204 = vector.shape_cast %203 : vector<1x4x1x16xf32> to vector<4x16xf32>
    %cst_213 = arith.constant dense<0.000000e+00> : vector<4x64xf32>
    %205 = tpu.matmul %204, %9, %cst_213 {dimension_numbers = #tpu.dot_dimension_numbers<[1], [0], [0], [1], [0, 0, 1, 1], [], []>} : vector<4x16xf32>, vector<16x64xf32>, vector<4x64xf32> -> vector<4x64xf32>
    %206 = vector.extract_strided_slice %205 {offsets = [0, 0], sizes = [4, 32], strides = [1, 1]} : vector<4x64xf32> to vector<4x32xf32>
    %c0_214 = arith.constant 0 : index
    %c12_215 = arith.constant 12 : index
    %c6_216 = arith.constant 6 : index
    %c0_217 = arith.constant 0 : index
    %207 = vector.load %arg13[%c0_214, %c12_215, %c6_216, %c0_217] : memref<1x20x32x32xf32, #tpu.memory_space<vmem>>, vector<1x4x1x32xf32>
    %208 = vector.shape_cast %207 : vector<1x4x1x32xf32> to vector<4x32xf32>
    %209 = vector.shape_cast %206 : vector<4x32xf32> to vector<1x4x1x32xf32>
    tpu.vector_store %arg13[%c0_214, %c12_215, %c6_216, %c0_217], %209 {strides = array<i32>} : memref<1x20x32x32xf32, #tpu.memory_space<vmem>>, vector<1x4x1x32xf32>,
    %210 = vector.extract_strided_slice %205 {offsets = [0, 32], sizes = [4, 32], strides = [1, 1]} : vector<4x64xf32> to vector<4x32xf32>
    %c0_218 = arith.constant 0 : index
    %c12_219 = arith.constant 12 : index
    %c7_220 = arith.constant 7 : index
    %c0_221 = arith.constant 0 : index
    %211 = vector.load %arg13[%c0_218, %c12_219, %c7_220, %c0_221] : memref<1x20x32x32xf32, #tpu.memory_space<vmem>>, vector<1x4x1x32xf32>
    %212 = vector.shape_cast %211 : vector<1x4x1x32xf32> to vector<4x32xf32>
    %213 = vector.shape_cast %210 : vector<4x32xf32> to vector<1x4x1x32xf32>
    tpu.vector_store %arg13[%c0_218, %c12_219, %c7_220, %c0_221], %213 {strides = array<i32>} : memref<1x20x32x32xf32, #tpu.memory_space<vmem>>, vector<1x4x1x32xf32>,
    %c0_222 = arith.constant 0 : index
    %c0_223 = arith.constant 0 : index
    %c4_224 = arith.constant 4 : index
    %c0_225 = arith.constant 0 : index
    %214 = vector.load %arg3[%c0_222, %c0_223, %c4_224, %c0_225] : memref<1x4x16x16xf32, #tpu.memory_space<vmem>>, vector<1x4x1x16xf32>
    %215 = vector.shape_cast %214 : vector<1x4x1x16xf32> to vector<4x16xf32>
    %cst_226 = arith.constant dense<0.000000e+00> : vector<16x16xf32>
    %216 = tpu.matmul %0, %215, %cst_226 {dimension_numbers = #tpu.dot_dimension_numbers<[1], [0], [0], [1], [0, 0, 1, 1], [], []>} : vector<16x4xf32>, vector<4x16xf32>, vector<16x16xf32> -> vector<16x16xf32>
    %217 = vector.extract_strided_slice %216 {offsets = [0, 0], sizes = [8, 16], strides = [1, 1]} : vector<16x16xf32> to vector<8x16xf32>
    %cst_227 = arith.constant dense<0.000000e+00> : vector<8x32xf32>
    %218 = tpu.matmul %217, %2, %cst_227 {dimension_numbers = #tpu.dot_dimension_numbers<[1], [0], [0], [1], [0, 0, 1, 1], [], []>} : vector<8x16xf32>, vector<16x32xf32>, vector<8x32xf32> -> vector<8x32xf32>
    %219 = vector.extract_strided_slice %216 {offsets = [8, 0], sizes = [8, 16], strides = [1, 1]} : vector<16x16xf32> to vector<8x16xf32>
    %cst_228 = arith.constant dense<0.000000e+00> : vector<8x32xf32>
    %220 = tpu.matmul %219, %3, %cst_228 {dimension_numbers = #tpu.dot_dimension_numbers<[1], [0], [0], [1], [0, 0, 1, 1], [], []>} : vector<8x16xf32>, vector<16x32xf32>, vector<8x32xf32> -> vector<8x32xf32>
    %221 = arith.addf %218, %220 : vector<8x32xf32>
    %222 = vector.broadcast %1 : vector<8x1xf32> to vector<8x32xf32>
    %223 = arith.addf %221, %222 : vector<8x32xf32>
    %224 = vector.extract_strided_slice %223 {offsets = [0, 0], sizes = [4, 32], strides = [1, 1]} : vector<8x32xf32> to vector<4x32xf32>
    %c0_229 = arith.constant 0 : index
    %c0_230 = arith.constant 0 : index
    %c8_231 = arith.constant 8 : index
    %c0_232 = arith.constant 0 : index
    %225 = vector.load %arg13[%c0_229, %c0_230, %c8_231, %c0_232] : memref<1x20x32x32xf32, #tpu.memory_space<vmem>>, vector<1x4x1x32xf32>
    %226 = vector.shape_cast %225 : vector<1x4x1x32xf32> to vector<4x32xf32>
    %227 = vector.shape_cast %224 : vector<4x32xf32> to vector<1x4x1x32xf32>
    tpu.vector_store %arg13[%c0_229, %c0_230, %c8_231, %c0_232], %227 {strides = array<i32>} : memref<1x20x32x32xf32, #tpu.memory_space<vmem>>, vector<1x4x1x32xf32>,
    %228 = vector.extract_strided_slice %223 {offsets = [4, 0], sizes = [4, 32], strides = [1, 1]} : vector<8x32xf32> to vector<4x32xf32>
    %c0_233 = arith.constant 0 : index
    %c0_234 = arith.constant 0 : index
    %c9 = arith.constant 9 : index
    %c0_235 = arith.constant 0 : index
    %229 = vector.load %arg13[%c0_233, %c0_234, %c9, %c0_235] : memref<1x20x32x32xf32, #tpu.memory_space<vmem>>, vector<1x4x1x32xf32>
    %230 = vector.shape_cast %229 : vector<1x4x1x32xf32> to vector<4x32xf32>
    %231 = vector.shape_cast %228 : vector<4x32xf32> to vector<1x4x1x32xf32>
    tpu.vector_store %arg13[%c0_233, %c0_234, %c9, %c0_235], %231 {strides = array<i32>} : memref<1x20x32x32xf32, #tpu.memory_space<vmem>>, vector<1x4x1x32xf32>,
    %c0_236 = arith.constant 0 : index
    %c0_237 = arith.constant 0 : index
    %c4_238 = arith.constant 4 : index
    %c0_239 = arith.constant 0 : index
    %232 = vector.load %arg4[%c0_236, %c0_237, %c4_238, %c0_239] : memref<1x4x16x16xf32, #tpu.memory_space<vmem>>, vector<1x4x1x16xf32>
    %233 = vector.shape_cast %232 : vector<1x4x1x16xf32> to vector<4x16xf32>
    %cst_240 = arith.constant dense<0.000000e+00> : vector<4x64xf32>
    %234 = tpu.matmul %233, %5, %cst_240 {dimension_numbers = #tpu.dot_dimension_numbers<[1], [0], [0], [1], [0, 0, 1, 1], [], []>} : vector<4x16xf32>, vector<16x64xf32>, vector<4x64xf32> -> vector<4x64xf32>
    %235 = vector.extract_strided_slice %234 {offsets = [0, 0], sizes = [4, 32], strides = [1, 1]} : vector<4x64xf32> to vector<4x32xf32>
    %c0_241 = arith.constant 0 : index
    %c4_242 = arith.constant 4 : index
    %c8_243 = arith.constant 8 : index
    %c0_244 = arith.constant 0 : index
    %236 = vector.load %arg13[%c0_241, %c4_242, %c8_243, %c0_244] : memref<1x20x32x32xf32, #tpu.memory_space<vmem>>, vector<1x4x1x32xf32>
    %237 = vector.shape_cast %236 : vector<1x4x1x32xf32> to vector<4x32xf32>
    %238 = vector.shape_cast %235 : vector<4x32xf32> to vector<1x4x1x32xf32>
    tpu.vector_store %arg13[%c0_241, %c4_242, %c8_243, %c0_244], %238 {strides = array<i32>} : memref<1x20x32x32xf32, #tpu.memory_space<vmem>>, vector<1x4x1x32xf32>,
    %239 = vector.extract_strided_slice %234 {offsets = [0, 32], sizes = [4, 32], strides = [1, 1]} : vector<4x64xf32> to vector<4x32xf32>
    %c0_245 = arith.constant 0 : index
    %c4_246 = arith.constant 4 : index
    %c9_247 = arith.constant 9 : index
    %c0_248 = arith.constant 0 : index
    %240 = vector.load %arg13[%c0_245, %c4_246, %c9_247, %c0_248] : memref<1x20x32x32xf32, #tpu.memory_space<vmem>>, vector<1x4x1x32xf32>
    %241 = vector.shape_cast %240 : vector<1x4x1x32xf32> to vector<4x32xf32>
    %242 = vector.shape_cast %239 : vector<4x32xf32> to vector<1x4x1x32xf32>
    tpu.vector_store %arg13[%c0_245, %c4_246, %c9_247, %c0_248], %242 {strides = array<i32>} : memref<1x20x32x32xf32, #tpu.memory_space<vmem>>, vector<1x4x1x32xf32>,
    %c0_249 = arith.constant 0 : index
    %c0_250 = arith.constant 0 : index
    %c4_251 = arith.constant 4 : index
    %c0_252 = arith.constant 0 : index
    %243 = vector.load %arg5[%c0_249, %c0_250, %c4_251, %c0_252] : memref<1x4x16x16xf32, #tpu.memory_space<vmem>>, vector<1x4x1x16xf32>
    %244 = vector.shape_cast %243 : vector<1x4x1x16xf32> to vector<4x16xf32>
    %cst_253 = arith.constant dense<0.000000e+00> : vector<4x64xf32>
    %245 = tpu.matmul %244, %7, %cst_253 {dimension_numbers = #tpu.dot_dimension_numbers<[1], [0], [0], [1], [0, 0, 1, 1], [], []>} : vector<4x16xf32>, vector<16x64xf32>, vector<4x64xf32> -> vector<4x64xf32>
    %246 = vector.extract_strided_slice %245 {offsets = [0, 0], sizes = [4, 32], strides = [1, 1]} : vector<4x64xf32> to vector<4x32xf32>
    %c0_254 = arith.constant 0 : index
    %c8_255 = arith.constant 8 : index
    %c8_256 = arith.constant 8 : index
    %c0_257 = arith.constant 0 : index
    %247 = vector.load %arg13[%c0_254, %c8_255, %c8_256, %c0_257] : memref<1x20x32x32xf32, #tpu.memory_space<vmem>>, vector<1x4x1x32xf32>
    %248 = vector.shape_cast %247 : vector<1x4x1x32xf32> to vector<4x32xf32>
    %249 = vector.shape_cast %246 : vector<4x32xf32> to vector<1x4x1x32xf32>
    tpu.vector_store %arg13[%c0_254, %c8_255, %c8_256, %c0_257], %249 {strides = array<i32>} : memref<1x20x32x32xf32, #tpu.memory_space<vmem>>, vector<1x4x1x32xf32>,
    %250 = vector.extract_strided_slice %245 {offsets = [0, 32], sizes = [4, 32], strides = [1, 1]} : vector<4x64xf32> to vector<4x32xf32>
    %c0_258 = arith.constant 0 : index
    %c8_259 = arith.constant 8 : index
    %c9_260 = arith.constant 9 : index
    %c0_261 = arith.constant 0 : index
    %251 = vector.load %arg13[%c0_258, %c8_259, %c9_260, %c0_261] : memref<1x20x32x32xf32, #tpu.memory_space<vmem>>, vector<1x4x1x32xf32>
    %252 = vector.shape_cast %251 : vector<1x4x1x32xf32> to vector<4x32xf32>
    %253 = vector.shape_cast %250 : vector<4x32xf32> to vector<1x4x1x32xf32>
    tpu.vector_store %arg13[%c0_258, %c8_259, %c9_260, %c0_261], %253 {strides = array<i32>} : memref<1x20x32x32xf32, #tpu.memory_space<vmem>>, vector<1x4x1x32xf32>,
    %c0_262 = arith.constant 0 : index
    %c0_263 = arith.constant 0 : index
    %c4_264 = arith.constant 4 : index
    %c0_265 = arith.constant 0 : index
    %254 = vector.load %arg6[%c0_262, %c0_263, %c4_264, %c0_265] : memref<1x4x16x16xf32, #tpu.memory_space<vmem>>, vector<1x4x1x16xf32>
    %255 = vector.shape_cast %254 : vector<1x4x1x16xf32> to vector<4x16xf32>
    %cst_266 = arith.constant dense<0.000000e+00> : vector<4x64xf32>
    %256 = tpu.matmul %255, %9, %cst_266 {dimension_numbers = #tpu.dot_dimension_numbers<[1], [0], [0], [1], [0, 0, 1, 1], [], []>} : vector<4x16xf32>, vector<16x64xf32>, vector<4x64xf32> -> vector<4x64xf32>
    %257 = vector.extract_strided_slice %256 {offsets = [0, 0], sizes = [4, 32], strides = [1, 1]} : vector<4x64xf32> to vector<4x32xf32>
    %c0_267 = arith.constant 0 : index
    %c12_268 = arith.constant 12 : index
    %c8_269 = arith.constant 8 : index
    %c0_270 = arith.constant 0 : index
    %258 = vector.load %arg13[%c0_267, %c12_268, %c8_269, %c0_270] : memref<1x20x32x32xf32, #tpu.memory_space<vmem>>, vector<1x4x1x32xf32>
    %259 = vector.shape_cast %258 : vector<1x4x1x32xf32> to vector<4x32xf32>
    %260 = vector.shape_cast %257 : vector<4x32xf32> to vector<1x4x1x32xf32>
    tpu.vector_store %arg13[%c0_267, %c12_268, %c8_269, %c0_270], %260 {strides = array<i32>} : memref<1x20x32x32xf32, #tpu.memory_space<vmem>>, vector<1x4x1x32xf32>,
    %261 = vector.extract_strided_slice %256 {offsets = [0, 32], sizes = [4, 32], strides = [1, 1]} : vector<4x64xf32> to vector<4x32xf32>
    %c0_271 = arith.constant 0 : index
    %c12_272 = arith.constant 12 : index
    %c9_273 = arith.constant 9 : index
    %c0_274 = arith.constant 0 : index
    %262 = vector.load %arg13[%c0_271, %c12_272, %c9_273, %c0_274] : memref<1x20x32x32xf32, #tpu.memory_space<vmem>>, vector<1x4x1x32xf32>
    %263 = vector.shape_cast %262 : vector<1x4x1x32xf32> to vector<4x32xf32>
    %264 = vector.shape_cast %261 : vector<4x32xf32> to vector<1x4x1x32xf32>
    tpu.vector_store %arg13[%c0_271, %c12_272, %c9_273, %c0_274], %264 {strides = array<i32>} : memref<1x20x32x32xf32, #tpu.memory_space<vmem>>, vector<1x4x1x32xf32>,
    %c0_275 = arith.constant 0 : index
    %c0_276 = arith.constant 0 : index
    %c5_277 = arith.constant 5 : index
    %c0_278 = arith.constant 0 : index
    %265 = vector.load %arg3[%c0_275, %c0_276, %c5_277, %c0_278] : memref<1x4x16x16xf32, #tpu.memory_space<vmem>>, vector<1x4x1x16xf32>
    %266 = vector.shape_cast %265 : vector<1x4x1x16xf32> to vector<4x16xf32>
    %cst_279 = arith.constant dense<0.000000e+00> : vector<16x16xf32>
    %267 = tpu.matmul %0, %266, %cst_279 {dimension_numbers = #tpu.dot_dimension_numbers<[1], [0], [0], [1], [0, 0, 1, 1], [], []>} : vector<16x4xf32>, vector<4x16xf32>, vector<16x16xf32> -> vector<16x16xf32>
    %268 = vector.extract_strided_slice %267 {offsets = [0, 0], sizes = [8, 16], strides = [1, 1]} : vector<16x16xf32> to vector<8x16xf32>
    %cst_280 = arith.constant dense<0.000000e+00> : vector<8x32xf32>
    %269 = tpu.matmul %268, %2, %cst_280 {dimension_numbers = #tpu.dot_dimension_numbers<[1], [0], [0], [1], [0, 0, 1, 1], [], []>} : vector<8x16xf32>, vector<16x32xf32>, vector<8x32xf32> -> vector<8x32xf32>
    %270 = vector.extract_strided_slice %267 {offsets = [8, 0], sizes = [8, 16], strides = [1, 1]} : vector<16x16xf32> to vector<8x16xf32>
    %cst_281 = arith.constant dense<0.000000e+00> : vector<8x32xf32>
    %271 = tpu.matmul %270, %3, %cst_281 {dimension_numbers = #tpu.dot_dimension_numbers<[1], [0], [0], [1], [0, 0, 1, 1], [], []>} : vector<8x16xf32>, vector<16x32xf32>, vector<8x32xf32> -> vector<8x32xf32>
    %272 = arith.addf %269, %271 : vector<8x32xf32>
    %273 = vector.broadcast %1 : vector<8x1xf32> to vector<8x32xf32>
    %274 = arith.addf %272, %273 : vector<8x32xf32>
    %275 = vector.extract_strided_slice %274 {offsets = [0, 0], sizes = [4, 32], strides = [1, 1]} : vector<8x32xf32> to vector<4x32xf32>
    %c0_282 = arith.constant 0 : index
    %c0_283 = arith.constant 0 : index
    %c10 = arith.constant 10 : index
    %c0_284 = arith.constant 0 : index
    %276 = vector.load %arg13[%c0_282, %c0_283, %c10, %c0_284] : memref<1x20x32x32xf32, #tpu.memory_space<vmem>>, vector<1x4x1x32xf32>
    %277 = vector.shape_cast %276 : vector<1x4x1x32xf32> to vector<4x32xf32>
    %278 = vector.shape_cast %275 : vector<4x32xf32> to vector<1x4x1x32xf32>
    tpu.vector_store %arg13[%c0_282, %c0_283, %c10, %c0_284], %278 {strides = array<i32>} : memref<1x20x32x32xf32, #tpu.memory_space<vmem>>, vector<1x4x1x32xf32>,
    %279 = vector.extract_strided_slice %274 {offsets = [4, 0], sizes = [4, 32], strides = [1, 1]} : vector<8x32xf32> to vector<4x32xf32>
    %c0_285 = arith.constant 0 : index
    %c0_286 = arith.constant 0 : index
    %c11 = arith.constant 11 : index
    %c0_287 = arith.constant 0 : index
    %280 = vector.load %arg13[%c0_285, %c0_286, %c11, %c0_287] : memref<1x20x32x32xf32, #tpu.memory_space<vmem>>, vector<1x4x1x32xf32>
    %281 = vector.shape_cast %280 : vector<1x4x1x32xf32> to vector<4x32xf32>
    %282 = vector.shape_cast %279 : vector<4x32xf32> to vector<1x4x1x32xf32>
    tpu.vector_store %arg13[%c0_285, %c0_286, %c11, %c0_287], %282 {strides = array<i32>} : memref<1x20x32x32xf32, #tpu.memory_space<vmem>>, vector<1x4x1x32xf32>,
    %c0_288 = arith.constant 0 : index
    %c0_289 = arith.constant 0 : index
    %c5_290 = arith.constant 5 : index
    %c0_291 = arith.constant 0 : index
    %283 = vector.load %arg4[%c0_288, %c0_289, %c5_290, %c0_291] : memref<1x4x16x16xf32, #tpu.memory_space<vmem>>, vector<1x4x1x16xf32>
    %284 = vector.shape_cast %283 : vector<1x4x1x16xf32> to vector<4x16xf32>
    %cst_292 = arith.constant dense<0.000000e+00> : vector<4x64xf32>
    %285 = tpu.matmul %284, %5, %cst_292 {dimension_numbers = #tpu.dot_dimension_numbers<[1], [0], [0], [1], [0, 0, 1, 1], [], []>} : vector<4x16xf32>, vector<16x64xf32>, vector<4x64xf32> -> vector<4x64xf32>
    %286 = vector.extract_strided_slice %285 {offsets = [0, 0], sizes = [4, 32], strides = [1, 1]} : vector<4x64xf32> to vector<4x32xf32>
    %c0_293 = arith.constant 0 : index
    %c4_294 = arith.constant 4 : index
    %c10_295 = arith.constant 10 : index
    %c0_296 = arith.constant 0 : index
    %287 = vector.load %arg13[%c0_293, %c4_294, %c10_295, %c0_296] : memref<1x20x32x32xf32, #tpu.memory_space<vmem>>, vector<1x4x1x32xf32>
    %288 = vector.shape_cast %287 : vector<1x4x1x32xf32> to vector<4x32xf32>
    %289 = vector.shape_cast %286 : vector<4x32xf32> to vector<1x4x1x32xf32>
    tpu.vector_store %arg13[%c0_293, %c4_294, %c10_295, %c0_296], %289 {strides = array<i32>} : memref<1x20x32x32xf32, #tpu.memory_space<vmem>>, vector<1x4x1x32xf32>,
    %290 = vector.extract_strided_slice %285 {offsets = [0, 32], sizes = [4, 32], strides = [1, 1]} : vector<4x64xf32> to vector<4x32xf32>
    %c0_297 = arith.constant 0 : index
    %c4_298 = arith.constant 4 : index
    %c11_299 = arith.constant 11 : index
    %c0_300 = arith.constant 0 : index
    %291 = vector.load %arg13[%c0_297, %c4_298, %c11_299, %c0_300] : memref<1x20x32x32xf32, #tpu.memory_space<vmem>>, vector<1x4x1x32xf32>
    %292 = vector.shape_cast %291 : vector<1x4x1x32xf32> to vector<4x32xf32>
    %293 = vector.shape_cast %290 : vector<4x32xf32> to vector<1x4x1x32xf32>
    tpu.vector_store %arg13[%c0_297, %c4_298, %c11_299, %c0_300], %293 {strides = array<i32>} : memref<1x20x32x32xf32, #tpu.memory_space<vmem>>, vector<1x4x1x32xf32>,
    %c0_301 = arith.constant 0 : index
    %c0_302 = arith.constant 0 : index
    %c5_303 = arith.constant 5 : index
    %c0_304 = arith.constant 0 : index
    %294 = vector.load %arg5[%c0_301, %c0_302, %c5_303, %c0_304] : memref<1x4x16x16xf32, #tpu.memory_space<vmem>>, vector<1x4x1x16xf32>
    %295 = vector.shape_cast %294 : vector<1x4x1x16xf32> to vector<4x16xf32>
    %cst_305 = arith.constant dense<0.000000e+00> : vector<4x64xf32>
    %296 = tpu.matmul %295, %7, %cst_305 {dimension_numbers = #tpu.dot_dimension_numbers<[1], [0], [0], [1], [0, 0, 1, 1], [], []>} : vector<4x16xf32>, vector<16x64xf32>, vector<4x64xf32> -> vector<4x64xf32>
    %297 = vector.extract_strided_slice %296 {offsets = [0, 0], sizes = [4, 32], strides = [1, 1]} : vector<4x64xf32> to vector<4x32xf32>
    %c0_306 = arith.constant 0 : index
    %c8_307 = arith.constant 8 : index
    %c10_308 = arith.constant 10 : index
    %c0_309 = arith.constant 0 : index
    %298 = vector.load %arg13[%c0_306, %c8_307, %c10_308, %c0_309] : memref<1x20x32x32xf32, #tpu.memory_space<vmem>>, vector<1x4x1x32xf32>
    %299 = vector.shape_cast %298 : vector<1x4x1x32xf32> to vector<4x32xf32>
    %300 = vector.shape_cast %297 : vector<4x32xf32> to vector<1x4x1x32xf32>
    tpu.vector_store %arg13[%c0_306, %c8_307, %c10_308, %c0_309], %300 {strides = array<i32>} : memref<1x20x32x32xf32, #tpu.memory_space<vmem>>, vector<1x4x1x32xf32>,
    %301 = vector.extract_strided_slice %296 {offsets = [0, 32], sizes = [4, 32], strides = [1, 1]} : vector<4x64xf32> to vector<4x32xf32>
    %c0_310 = arith.constant 0 : index
    %c8_311 = arith.constant 8 : index
    %c11_312 = arith.constant 11 : index
    %c0_313 = arith.constant 0 : index
    %302 = vector.load %arg13[%c0_310, %c8_311, %c11_312, %c0_313] : memref<1x20x32x32xf32, #tpu.memory_space<vmem>>, vector<1x4x1x32xf32>
    %303 = vector.shape_cast %302 : vector<1x4x1x32xf32> to vector<4x32xf32>
    %304 = vector.shape_cast %301 : vector<4x32xf32> to vector<1x4x1x32xf32>
    tpu.vector_store %arg13[%c0_310, %c8_311, %c11_312, %c0_313], %304 {strides = array<i32>} : memref<1x20x32x32xf32, #tpu.memory_space<vmem>>, vector<1x4x1x32xf32>,
    %c0_314 = arith.constant 0 : index
    %c0_315 = arith.constant 0 : index
    %c5_316 = arith.constant 5 : index
    %c0_317 = arith.constant 0 : index
    %305 = vector.load %arg6[%c0_314, %c0_315, %c5_316, %c0_317] : memref<1x4x16x16xf32, #tpu.memory_space<vmem>>, vector<1x4x1x16xf32>
    %306 = vector.shape_cast %305 : vector<1x4x1x16xf32> to vector<4x16xf32>
    %cst_318 = arith.constant dense<0.000000e+00> : vector<4x64xf32>
    %307 = tpu.matmul %306, %9, %cst_318 {dimension_numbers = #tpu.dot_dimension_numbers<[1], [0], [0], [1], [0, 0, 1, 1], [], []>} : vector<4x16xf32>, vector<16x64xf32>, vector<4x64xf32> -> vector<4x64xf32>
    %308 = vector.extract_strided_slice %307 {offsets = [0, 0], sizes = [4, 32], strides = [1, 1]} : vector<4x64xf32> to vector<4x32xf32>
    %c0_319 = arith.constant 0 : index
    %c12_320 = arith.constant 12 : index
    %c10_321 = arith.constant 10 : index
    %c0_322 = arith.constant 0 : index
    %309 = vector.load %arg13[%c0_319, %c12_320, %c10_321, %c0_322] : memref<1x20x32x32xf32, #tpu.memory_space<vmem>>, vector<1x4x1x32xf32>
    %310 = vector.shape_cast %309 : vector<1x4x1x32xf32> to vector<4x32xf32>
    %311 = vector.shape_cast %308 : vector<4x32xf32> to vector<1x4x1x32xf32>
    tpu.vector_store %arg13[%c0_319, %c12_320, %c10_321, %c0_322], %311 {strides = array<i32>} : memref<1x20x32x32xf32, #tpu.memory_space<vmem>>, vector<1x4x1x32xf32>,
    %312 = vector.extract_strided_slice %307 {offsets = [0, 32], sizes = [4, 32], strides = [1, 1]} : vector<4x64xf32> to vector<4x32xf32>
    %c0_323 = arith.constant 0 : index
    %c12_324 = arith.constant 12 : index
    %c11_325 = arith.constant 11 : index
    %c0_326 = arith.constant 0 : index
    %313 = vector.load %arg13[%c0_323, %c12_324, %c11_325, %c0_326] : memref<1x20x32x32xf32, #tpu.memory_space<vmem>>, vector<1x4x1x32xf32>
    %314 = vector.shape_cast %313 : vector<1x4x1x32xf32> to vector<4x32xf32>
    %315 = vector.shape_cast %312 : vector<4x32xf32> to vector<1x4x1x32xf32>
    tpu.vector_store %arg13[%c0_323, %c12_324, %c11_325, %c0_326], %315 {strides = array<i32>} : memref<1x20x32x32xf32, #tpu.memory_space<vmem>>, vector<1x4x1x32xf32>,
    %c0_327 = arith.constant 0 : index
    %c0_328 = arith.constant 0 : index
    %c6_329 = arith.constant 6 : index
    %c0_330 = arith.constant 0 : index
    %316 = vector.load %arg3[%c0_327, %c0_328, %c6_329, %c0_330] : memref<1x4x16x16xf32, #tpu.memory_space<vmem>>, vector<1x4x1x16xf32>
    %317 = vector.shape_cast %316 : vector<1x4x1x16xf32> to vector<4x16xf32>
    %cst_331 = arith.constant dense<0.000000e+00> : vector<16x16xf32>
    %318 = tpu.matmul %0, %317, %cst_331 {dimension_numbers = #tpu.dot_dimension_numbers<[1], [0], [0], [1], [0, 0, 1, 1], [], []>} : vector<16x4xf32>, vector<4x16xf32>, vector<16x16xf32> -> vector<16x16xf32>
    %319 = vector.extract_strided_slice %318 {offsets = [0, 0], sizes = [8, 16], strides = [1, 1]} : vector<16x16xf32> to vector<8x16xf32>
    %cst_332 = arith.constant dense<0.000000e+00> : vector<8x32xf32>
    %320 = tpu.matmul %319, %2, %cst_332 {dimension_numbers = #tpu.dot_dimension_numbers<[1], [0], [0], [1], [0, 0, 1, 1], [], []>} : vector<8x16xf32>, vector<16x32xf32>, vector<8x32xf32> -> vector<8x32xf32>
    %321 = vector.extract_strided_slice %318 {offsets = [8, 0], sizes = [8, 16], strides = [1, 1]} : vector<16x16xf32> to vector<8x16xf32>
    %cst_333 = arith.constant dense<0.000000e+00> : vector<8x32xf32>
    %322 = tpu.matmul %321, %3, %cst_333 {dimension_numbers = #tpu.dot_dimension_numbers<[1], [0], [0], [1], [0, 0, 1, 1], [], []>} : vector<8x16xf32>, vector<16x32xf32>, vector<8x32xf32> -> vector<8x32xf32>
    %323 = arith.addf %320, %322 : vector<8x32xf32>
    %324 = vector.broadcast %1 : vector<8x1xf32> to vector<8x32xf32>
    %325 = arith.addf %323, %324 : vector<8x32xf32>
    %326 = vector.extract_strided_slice %325 {offsets = [0, 0], sizes = [4, 32], strides = [1, 1]} : vector<8x32xf32> to vector<4x32xf32>
    %c0_334 = arith.constant 0 : index
    %c0_335 = arith.constant 0 : index
    %c12_336 = arith.constant 12 : index
    %c0_337 = arith.constant 0 : index
    %327 = vector.load %arg13[%c0_334, %c0_335, %c12_336, %c0_337] : memref<1x20x32x32xf32, #tpu.memory_space<vmem>>, vector<1x4x1x32xf32>
    %328 = vector.shape_cast %327 : vector<1x4x1x32xf32> to vector<4x32xf32>
    %329 = vector.shape_cast %326 : vector<4x32xf32> to vector<1x4x1x32xf32>
    tpu.vector_store %arg13[%c0_334, %c0_335, %c12_336, %c0_337], %329 {strides = array<i32>} : memref<1x20x32x32xf32, #tpu.memory_space<vmem>>, vector<1x4x1x32xf32>,
    %330 = vector.extract_strided_slice %325 {offsets = [4, 0], sizes = [4, 32], strides = [1, 1]} : vector<8x32xf32> to vector<4x32xf32>
    %c0_338 = arith.constant 0 : index
    %c0_339 = arith.constant 0 : index
    %c13 = arith.constant 13 : index
    %c0_340 = arith.constant 0 : index
    %331 = vector.load %arg13[%c0_338, %c0_339, %c13, %c0_340] : memref<1x20x32x32xf32, #tpu.memory_space<vmem>>, vector<1x4x1x32xf32>
    %332 = vector.shape_cast %331 : vector<1x4x1x32xf32> to vector<4x32xf32>
    %333 = vector.shape_cast %330 : vector<4x32xf32> to vector<1x4x1x32xf32>
    tpu.vector_store %arg13[%c0_338, %c0_339, %c13, %c0_340], %333 {strides = array<i32>} : memref<1x20x32x32xf32, #tpu.memory_space<vmem>>, vector<1x4x1x32xf32>,
    %c0_341 = arith.constant 0 : index
    %c0_342 = arith.constant 0 : index
    %c6_343 = arith.constant 6 : index
    %c0_344 = arith.constant 0 : index
    %334 = vector.load %arg4[%c0_341, %c0_342, %c6_343, %c0_344] : memref<1x4x16x16xf32, #tpu.memory_space<vmem>>, vector<1x4x1x16xf32>
    %335 = vector.shape_cast %334 : vector<1x4x1x16xf32> to vector<4x16xf32>
    %cst_345 = arith.constant dense<0.000000e+00> : vector<4x64xf32>
    %336 = tpu.matmul %335, %5, %cst_345 {dimension_numbers = #tpu.dot_dimension_numbers<[1], [0], [0], [1], [0, 0, 1, 1], [], []>} : vector<4x16xf32>, vector<16x64xf32>, vector<4x64xf32> -> vector<4x64xf32>
    %337 = vector.extract_strided_slice %336 {offsets = [0, 0], sizes = [4, 32], strides = [1, 1]} : vector<4x64xf32> to vector<4x32xf32>
    %c0_346 = arith.constant 0 : index
    %c4_347 = arith.constant 4 : index
    %c12_348 = arith.constant 12 : index
    %c0_349 = arith.constant 0 : index
    %338 = vector.load %arg13[%c0_346, %c4_347, %c12_348, %c0_349] : memref<1x20x32x32xf32, #tpu.memory_space<vmem>>, vector<1x4x1x32xf32>
    %339 = vector.shape_cast %338 : vector<1x4x1x32xf32> to vector<4x32xf32>
    %340 = vector.shape_cast %337 : vector<4x32xf32> to vector<1x4x1x32xf32>
    tpu.vector_store %arg13[%c0_346, %c4_347, %c12_348, %c0_349], %340 {strides = array<i32>} : memref<1x20x32x32xf32, #tpu.memory_space<vmem>>, vector<1x4x1x32xf32>,
    %341 = vector.extract_strided_slice %336 {offsets = [0, 32], sizes = [4, 32], strides = [1, 1]} : vector<4x64xf32> to vector<4x32xf32>
    %c0_350 = arith.constant 0 : index
    %c4_351 = arith.constant 4 : index
    %c13_352 = arith.constant 13 : index
    %c0_353 = arith.constant 0 : index
    %342 = vector.load %arg13[%c0_350, %c4_351, %c13_352, %c0_353] : memref<1x20x32x32xf32, #tpu.memory_space<vmem>>, vector<1x4x1x32xf32>
    %343 = vector.shape_cast %342 : vector<1x4x1x32xf32> to vector<4x32xf32>
    %344 = vector.shape_cast %341 : vector<4x32xf32> to vector<1x4x1x32xf32>
    tpu.vector_store %arg13[%c0_350, %c4_351, %c13_352, %c0_353], %344 {strides = array<i32>} : memref<1x20x32x32xf32, #tpu.memory_space<vmem>>, vector<1x4x1x32xf32>,
    %c0_354 = arith.constant 0 : index
    %c0_355 = arith.constant 0 : index
    %c6_356 = arith.constant 6 : index
    %c0_357 = arith.constant 0 : index
    %345 = vector.load %arg5[%c0_354, %c0_355, %c6_356, %c0_357] : memref<1x4x16x16xf32, #tpu.memory_space<vmem>>, vector<1x4x1x16xf32>
    %346 = vector.shape_cast %345 : vector<1x4x1x16xf32> to vector<4x16xf32>
    %cst_358 = arith.constant dense<0.000000e+00> : vector<4x64xf32>
    %347 = tpu.matmul %346, %7, %cst_358 {dimension_numbers = #tpu.dot_dimension_numbers<[1], [0], [0], [1], [0, 0, 1, 1], [], []>} : vector<4x16xf32>, vector<16x64xf32>, vector<4x64xf32> -> vector<4x64xf32>
    %348 = vector.extract_strided_slice %347 {offsets = [0, 0], sizes = [4, 32], strides = [1, 1]} : vector<4x64xf32> to vector<4x32xf32>
    %c0_359 = arith.constant 0 : index
    %c8_360 = arith.constant 8 : index
    %c12_361 = arith.constant 12 : index
    %c0_362 = arith.constant 0 : index
    %349 = vector.load %arg13[%c0_359, %c8_360, %c12_361, %c0_362] : memref<1x20x32x32xf32, #tpu.memory_space<vmem>>, vector<1x4x1x32xf32>
    %350 = vector.shape_cast %349 : vector<1x4x1x32xf32> to vector<4x32xf32>
    %351 = vector.shape_cast %348 : vector<4x32xf32> to vector<1x4x1x32xf32>
    tpu.vector_store %arg13[%c0_359, %c8_360, %c12_361, %c0_362], %351 {strides = array<i32>} : memref<1x20x32x32xf32, #tpu.memory_space<vmem>>, vector<1x4x1x32xf32>,
    %352 = vector.extract_strided_slice %347 {offsets = [0, 32], sizes = [4, 32], strides = [1, 1]} : vector<4x64xf32> to vector<4x32xf32>
    %c0_363 = arith.constant 0 : index
    %c8_364 = arith.constant 8 : index
    %c13_365 = arith.constant 13 : index
    %c0_366 = arith.constant 0 : index
    %353 = vector.load %arg13[%c0_363, %c8_364, %c13_365, %c0_366] : memref<1x20x32x32xf32, #tpu.memory_space<vmem>>, vector<1x4x1x32xf32>
    %354 = vector.shape_cast %353 : vector<1x4x1x32xf32> to vector<4x32xf32>
    %355 = vector.shape_cast %352 : vector<4x32xf32> to vector<1x4x1x32xf32>
    tpu.vector_store %arg13[%c0_363, %c8_364, %c13_365, %c0_366], %355 {strides = array<i32>} : memref<1x20x32x32xf32, #tpu.memory_space<vmem>>, vector<1x4x1x32xf32>,
    %c0_367 = arith.constant 0 : index
    %c0_368 = arith.constant 0 : index
    %c6_369 = arith.constant 6 : index
    %c0_370 = arith.constant 0 : index
    %356 = vector.load %arg6[%c0_367, %c0_368, %c6_369, %c0_370] : memref<1x4x16x16xf32, #tpu.memory_space<vmem>>, vector<1x4x1x16xf32>
    %357 = vector.shape_cast %356 : vector<1x4x1x16xf32> to vector<4x16xf32>
    %cst_371 = arith.constant dense<0.000000e+00> : vector<4x64xf32>
    %358 = tpu.matmul %357, %9, %cst_371 {dimension_numbers = #tpu.dot_dimension_numbers<[1], [0], [0], [1], [0, 0, 1, 1], [], []>} : vector<4x16xf32>, vector<16x64xf32>, vector<4x64xf32> -> vector<4x64xf32>
    %359 = vector.extract_strided_slice %358 {offsets = [0, 0], sizes = [4, 32], strides = [1, 1]} : vector<4x64xf32> to vector<4x32xf32>
    %c0_372 = arith.constant 0 : index
    %c12_373 = arith.constant 12 : index
    %c12_374 = arith.constant 12 : index
    %c0_375 = arith.constant 0 : index
    %360 = vector.load %arg13[%c0_372, %c12_373, %c12_374, %c0_375] : memref<1x20x32x32xf32, #tpu.memory_space<vmem>>, vector<1x4x1x32xf32>
    %361 = vector.shape_cast %360 : vector<1x4x1x32xf32> to vector<4x32xf32>
    %362 = vector.shape_cast %359 : vector<4x32xf32> to vector<1x4x1x32xf32>
    tpu.vector_store %arg13[%c0_372, %c12_373, %c12_374, %c0_375], %362 {strides = array<i32>} : memref<1x20x32x32xf32, #tpu.memory_space<vmem>>, vector<1x4x1x32xf32>,
    %363 = vector.extract_strided_slice %358 {offsets = [0, 32], sizes = [4, 32], strides = [1, 1]} : vector<4x64xf32> to vector<4x32xf32>
    %c0_376 = arith.constant 0 : index
    %c12_377 = arith.constant 12 : index
    %c13_378 = arith.constant 13 : index
    %c0_379 = arith.constant 0 : index
    %364 = vector.load %arg13[%c0_376, %c12_377, %c13_378, %c0_379] : memref<1x20x32x32xf32, #tpu.memory_space<vmem>>, vector<1x4x1x32xf32>
    %365 = vector.shape_cast %364 : vector<1x4x1x32xf32> to vector<4x32xf32>
    %366 = vector.shape_cast %363 : vector<4x32xf32> to vector<1x4x1x32xf32>
    tpu.vector_store %arg13[%c0_376, %c12_377, %c13_378, %c0_379], %366 {strides = array<i32>} : memref<1x20x32x32xf32, #tpu.memory_space<vmem>>, vector<1x4x1x32xf32>,
    %c0_380 = arith.constant 0 : index
    %c0_381 = arith.constant 0 : index
    %c7_382 = arith.constant 7 : index
    %c0_383 = arith.constant 0 : index
    %367 = vector.load %arg3[%c0_380, %c0_381, %c7_382, %c0_383] : memref<1x4x16x16xf32, #tpu.memory_space<vmem>>, vector<1x4x1x16xf32>
    %368 = vector.shape_cast %367 : vector<1x4x1x16xf32> to vector<4x16xf32>
    %cst_384 = arith.constant dense<0.000000e+00> : vector<16x16xf32>
    %369 = tpu.matmul %0, %368, %cst_384 {dimension_numbers = #tpu.dot_dimension_numbers<[1], [0], [0], [1], [0, 0, 1, 1], [], []>} : vector<16x4xf32>, vector<4x16xf32>, vector<16x16xf32> -> vector<16x16xf32>
    %370 = vector.extract_strided_slice %369 {offsets = [0, 0], sizes = [8, 16], strides = [1, 1]} : vector<16x16xf32> to vector<8x16xf32>
    %cst_385 = arith.constant dense<0.000000e+00> : vector<8x32xf32>
    %371 = tpu.matmul %370, %2, %cst_385 {dimension_numbers = #tpu.dot_dimension_numbers<[1], [0], [0], [1], [0, 0, 1, 1], [], []>} : vector<8x16xf32>, vector<16x32xf32>, vector<8x32xf32> -> vector<8x32xf32>
    %372 = vector.extract_strided_slice %369 {offsets = [8, 0], sizes = [8, 16], strides = [1, 1]} : vector<16x16xf32> to vector<8x16xf32>
    %cst_386 = arith.constant dense<0.000000e+00> : vector<8x32xf32>
    %373 = tpu.matmul %372, %3, %cst_386 {dimension_numbers = #tpu.dot_dimension_numbers<[1], [0], [0], [1], [0, 0, 1, 1], [], []>} : vector<8x16xf32>, vector<16x32xf32>, vector<8x32xf32> -> vector<8x32xf32>
    %374 = arith.addf %371, %373 : vector<8x32xf32>
    %375 = vector.broadcast %1 : vector<8x1xf32> to vector<8x32xf32>
    %376 = arith.addf %374, %375 : vector<8x32xf32>
    %377 = vector.extract_strided_slice %376 {offsets = [0, 0], sizes = [4, 32], strides = [1, 1]} : vector<8x32xf32> to vector<4x32xf32>
    %c0_387 = arith.constant 0 : index
    %c0_388 = arith.constant 0 : index
    %c14 = arith.constant 14 : index
    %c0_389 = arith.constant 0 : index
    %378 = vector.load %arg13[%c0_387, %c0_388, %c14, %c0_389] : memref<1x20x32x32xf32, #tpu.memory_space<vmem>>, vector<1x4x1x32xf32>
    %379 = vector.shape_cast %378 : vector<1x4x1x32xf32> to vector<4x32xf32>
    %380 = vector.shape_cast %377 : vector<4x32xf32> to vector<1x4x1x32xf32>
    tpu.vector_store %arg13[%c0_387, %c0_388, %c14, %c0_389], %380 {strides = array<i32>} : memref<1x20x32x32xf32, #tpu.memory_space<vmem>>, vector<1x4x1x32xf32>,
    %381 = vector.extract_strided_slice %376 {offsets = [4, 0], sizes = [4, 32], strides = [1, 1]} : vector<8x32xf32> to vector<4x32xf32>
    %c0_390 = arith.constant 0 : index
    %c0_391 = arith.constant 0 : index
    %c15 = arith.constant 15 : index
    %c0_392 = arith.constant 0 : index
    %382 = vector.load %arg13[%c0_390, %c0_391, %c15, %c0_392] : memref<1x20x32x32xf32, #tpu.memory_space<vmem>>, vector<1x4x1x32xf32>
    %383 = vector.shape_cast %382 : vector<1x4x1x32xf32> to vector<4x32xf32>
    %384 = vector.shape_cast %381 : vector<4x32xf32> to vector<1x4x1x32xf32>
    tpu.vector_store %arg13[%c0_390, %c0_391, %c15, %c0_392], %384 {strides = array<i32>} : memref<1x20x32x32xf32, #tpu.memory_space<vmem>>, vector<1x4x1x32xf32>,
    %c0_393 = arith.constant 0 : index
    %c0_394 = arith.constant 0 : index
    %c7_395 = arith.constant 7 : index
    %c0_396 = arith.constant 0 : index
    %385 = vector.load %arg4[%c0_393, %c0_394, %c7_395, %c0_396] : memref<1x4x16x16xf32, #tpu.memory_space<vmem>>, vector<1x4x1x16xf32>
    %386 = vector.shape_cast %385 : vector<1x4x1x16xf32> to vector<4x16xf32>
    %cst_397 = arith.constant dense<0.000000e+00> : vector<4x64xf32>
    %387 = tpu.matmul %386, %5, %cst_397 {dimension_numbers = #tpu.dot_dimension_numbers<[1], [0], [0], [1], [0, 0, 1, 1], [], []>} : vector<4x16xf32>, vector<16x64xf32>, vector<4x64xf32> -> vector<4x64xf32>
    %388 = vector.extract_strided_slice %387 {offsets = [0, 0], sizes = [4, 32], strides = [1, 1]} : vector<4x64xf32> to vector<4x32xf32>
    %c0_398 = arith.constant 0 : index
    %c4_399 = arith.constant 4 : index
    %c14_400 = arith.constant 14 : index
    %c0_401 = arith.constant 0 : index
    %389 = vector.load %arg13[%c0_398, %c4_399, %c14_400, %c0_401] : memref<1x20x32x32xf32, #tpu.memory_space<vmem>>, vector<1x4x1x32xf32>
    %390 = vector.shape_cast %389 : vector<1x4x1x32xf32> to vector<4x32xf32>
    %391 = vector.shape_cast %388 : vector<4x32xf32> to vector<1x4x1x32xf32>
    tpu.vector_store %arg13[%c0_398, %c4_399, %c14_400, %c0_401], %391 {strides = array<i32>} : memref<1x20x32x32xf32, #tpu.memory_space<vmem>>, vector<1x4x1x32xf32>,
    %392 = vector.extract_strided_slice %387 {offsets = [0, 32], sizes = [4, 32], strides = [1, 1]} : vector<4x64xf32> to vector<4x32xf32>
    %c0_402 = arith.constant 0 : index
    %c4_403 = arith.constant 4 : index
    %c15_404 = arith.constant 15 : index
    %c0_405 = arith.constant 0 : index
    %393 = vector.load %arg13[%c0_402, %c4_403, %c15_404, %c0_405] : memref<1x20x32x32xf32, #tpu.memory_space<vmem>>, vector<1x4x1x32xf32>
    %394 = vector.shape_cast %393 : vector<1x4x1x32xf32> to vector<4x32xf32>
    %395 = vector.shape_cast %392 : vector<4x32xf32> to vector<1x4x1x32xf32>
    tpu.vector_store %arg13[%c0_402, %c4_403, %c15_404, %c0_405], %395 {strides = array<i32>} : memref<1x20x32x32xf32, #tpu.memory_space<vmem>>, vector<1x4x1x32xf32>,
    %c0_406 = arith.constant 0 : index
    %c0_407 = arith.constant 0 : index
    %c7_408 = arith.constant 7 : index
    %c0_409 = arith.constant 0 : index
    %396 = vector.load %arg5[%c0_406, %c0_407, %c7_408, %c0_409] : memref<1x4x16x16xf32, #tpu.memory_space<vmem>>, vector<1x4x1x16xf32>
    %397 = vector.shape_cast %396 : vector<1x4x1x16xf32> to vector<4x16xf32>
    %cst_410 = arith.constant dense<0.000000e+00> : vector<4x64xf32>
    %398 = tpu.matmul %397, %7, %cst_410 {dimension_numbers = #tpu.dot_dimension_numbers<[1], [0], [0], [1], [0, 0, 1, 1], [], []>} : vector<4x16xf32>, vector<16x64xf32>, vector<4x64xf32> -> vector<4x64xf32>
    %399 = vector.extract_strided_slice %398 {offsets = [0, 0], sizes = [4, 32], strides = [1, 1]} : vector<4x64xf32> to vector<4x32xf32>
    %c0_411 = arith.constant 0 : index
    %c8_412 = arith.constant 8 : index
    %c14_413 = arith.constant 14 : index
    %c0_414 = arith.constant 0 : index
    %400 = vector.load %arg13[%c0_411, %c8_412, %c14_413, %c0_414] : memref<1x20x32x32xf32, #tpu.memory_space<vmem>>, vector<1x4x1x32xf32>
    %401 = vector.shape_cast %400 : vector<1x4x1x32xf32> to vector<4x32xf32>
    %402 = vector.shape_cast %399 : vector<4x32xf32> to vector<1x4x1x32xf32>
    tpu.vector_store %arg13[%c0_411, %c8_412, %c14_413, %c0_414], %402 {strides = array<i32>} : memref<1x20x32x32xf32, #tpu.memory_space<vmem>>, vector<1x4x1x32xf32>,
    %403 = vector.extract_strided_slice %398 {offsets = [0, 32], sizes = [4, 32], strides = [1, 1]} : vector<4x64xf32> to vector<4x32xf32>
    %c0_415 = arith.constant 0 : index
    %c8_416 = arith.constant 8 : index
    %c15_417 = arith.constant 15 : index
    %c0_418 = arith.constant 0 : index
    %404 = vector.load %arg13[%c0_415, %c8_416, %c15_417, %c0_418] : memref<1x20x32x32xf32, #tpu.memory_space<vmem>>, vector<1x4x1x32xf32>
    %405 = vector.shape_cast %404 : vector<1x4x1x32xf32> to vector<4x32xf32>
    %406 = vector.shape_cast %403 : vector<4x32xf32> to vector<1x4x1x32xf32>
    tpu.vector_store %arg13[%c0_415, %c8_416, %c15_417, %c0_418], %406 {strides = array<i32>} : memref<1x20x32x32xf32, #tpu.memory_space<vmem>>, vector<1x4x1x32xf32>,
    %c0_419 = arith.constant 0 : index
    %c0_420 = arith.constant 0 : index
    %c7_421 = arith.constant 7 : index
    %c0_422 = arith.constant 0 : index
    %407 = vector.load %arg6[%c0_419, %c0_420, %c7_421, %c0_422] : memref<1x4x16x16xf32, #tpu.memory_space<vmem>>, vector<1x4x1x16xf32>
    %408 = vector.shape_cast %407 : vector<1x4x1x16xf32> to vector<4x16xf32>
    %cst_423 = arith.constant dense<0.000000e+00> : vector<4x64xf32>
    %409 = tpu.matmul %408, %9, %cst_423 {dimension_numbers = #tpu.dot_dimension_numbers<[1], [0], [0], [1], [0, 0, 1, 1], [], []>} : vector<4x16xf32>, vector<16x64xf32>, vector<4x64xf32> -> vector<4x64xf32>
    %410 = vector.extract_strided_slice %409 {offsets = [0, 0], sizes = [4, 32], strides = [1, 1]} : vector<4x64xf32> to vector<4x32xf32>
    %c0_424 = arith.constant 0 : index
    %c12_425 = arith.constant 12 : index
    %c14_426 = arith.constant 14 : index
    %c0_427 = arith.constant 0 : index
    %411 = vector.load %arg13[%c0_424, %c12_425, %c14_426, %c0_427] : memref<1x20x32x32xf32, #tpu.memory_space<vmem>>, vector<1x4x1x32xf32>
    %412 = vector.shape_cast %411 : vector<1x4x1x32xf32> to vector<4x32xf32>
    %413 = vector.shape_cast %410 : vector<4x32xf32> to vector<1x4x1x32xf32>
    tpu.vector_store %arg13[%c0_424, %c12_425, %c14_426, %c0_427], %413 {strides = array<i32>} : memref<1x20x32x32xf32, #tpu.memory_space<vmem>>, vector<1x4x1x32xf32>,
    %414 = vector.extract_strided_slice %409 {offsets = [0, 32], sizes = [4, 32], strides = [1, 1]} : vector<4x64xf32> to vector<4x32xf32>
    %c0_428 = arith.constant 0 : index
    %c12_429 = arith.constant 12 : index
    %c15_430 = arith.constant 15 : index
    %c0_431 = arith.constant 0 : index
    %415 = vector.load %arg13[%c0_428, %c12_429, %c15_430, %c0_431] : memref<1x20x32x32xf32, #tpu.memory_space<vmem>>, vector<1x4x1x32xf32>
    %416 = vector.shape_cast %415 : vector<1x4x1x32xf32> to vector<4x32xf32>
    %417 = vector.shape_cast %414 : vector<4x32xf32> to vector<1x4x1x32xf32>
    tpu.vector_store %arg13[%c0_428, %c12_429, %c15_430, %c0_431], %417 {strides = array<i32>} : memref<1x20x32x32xf32, #tpu.memory_space<vmem>>, vector<1x4x1x32xf32>,
    %c0_432 = arith.constant 0 : index
    %c0_433 = arith.constant 0 : index
    %c8_434 = arith.constant 8 : index
    %c0_435 = arith.constant 0 : index
    %418 = vector.load %arg3[%c0_432, %c0_433, %c8_434, %c0_435] : memref<1x4x16x16xf32, #tpu.memory_space<vmem>>, vector<1x4x1x16xf32>
    %419 = vector.shape_cast %418 : vector<1x4x1x16xf32> to vector<4x16xf32>
    %cst_436 = arith.constant dense<0.000000e+00> : vector<16x16xf32>
    %420 = tpu.matmul %0, %419, %cst_436 {dimension_numbers = #tpu.dot_dimension_numbers<[1], [0], [0], [1], [0, 0, 1, 1], [], []>} : vector<16x4xf32>, vector<4x16xf32>, vector<16x16xf32> -> vector<16x16xf32>
    %421 = vector.extract_strided_slice %420 {offsets = [0, 0], sizes = [8, 16], strides = [1, 1]} : vector<16x16xf32> to vector<8x16xf32>
    %cst_437 = arith.constant dense<0.000000e+00> : vector<8x32xf32>
    %422 = tpu.matmul %421, %2, %cst_437 {dimension_numbers = #tpu.dot_dimension_numbers<[1], [0], [0], [1], [0, 0, 1, 1], [], []>} : vector<8x16xf32>, vector<16x32xf32>, vector<8x32xf32> -> vector<8x32xf32>
    %423 = vector.extract_strided_slice %420 {offsets = [8, 0], sizes = [8, 16], strides = [1, 1]} : vector<16x16xf32> to vector<8x16xf32>
    %cst_438 = arith.constant dense<0.000000e+00> : vector<8x32xf32>
    %424 = tpu.matmul %423, %3, %cst_438 {dimension_numbers = #tpu.dot_dimension_numbers<[1], [0], [0], [1], [0, 0, 1, 1], [], []>} : vector<8x16xf32>, vector<16x32xf32>, vector<8x32xf32> -> vector<8x32xf32>
    %425 = arith.addf %422, %424 : vector<8x32xf32>
    %426 = vector.broadcast %1 : vector<8x1xf32> to vector<8x32xf32>
    %427 = arith.addf %425, %426 : vector<8x32xf32>
    %428 = vector.extract_strided_slice %427 {offsets = [0, 0], sizes = [4, 32], strides = [1, 1]} : vector<8x32xf32> to vector<4x32xf32>
    %c0_439 = arith.constant 0 : index
    %c0_440 = arith.constant 0 : index
    %c16 = arith.constant 16 : index
    %c0_441 = arith.constant 0 : index
    %429 = vector.load %arg13[%c0_439, %c0_440, %c16, %c0_441] : memref<1x20x32x32xf32, #tpu.memory_space<vmem>>, vector<1x4x1x32xf32>
    %430 = vector.shape_cast %429 : vector<1x4x1x32xf32> to vector<4x32xf32>
    %431 = vector.shape_cast %428 : vector<4x32xf32> to vector<1x4x1x32xf32>
    tpu.vector_store %arg13[%c0_439, %c0_440, %c16, %c0_441], %431 {strides = array<i32>} : memref<1x20x32x32xf32, #tpu.memory_space<vmem>>, vector<1x4x1x32xf32>,
    %432 = vector.extract_strided_slice %427 {offsets = [4, 0], sizes = [4, 32], strides = [1, 1]} : vector<8x32xf32> to vector<4x32xf32>
    %c0_442 = arith.constant 0 : index
    %c0_443 = arith.constant 0 : index
    %c17 = arith.constant 17 : index
    %c0_444 = arith.constant 0 : index
    %433 = vector.load %arg13[%c0_442, %c0_443, %c17, %c0_444] : memref<1x20x32x32xf32, #tpu.memory_space<vmem>>, vector<1x4x1x32xf32>
    %434 = vector.shape_cast %433 : vector<1x4x1x32xf32> to vector<4x32xf32>
    %435 = vector.shape_cast %432 : vector<4x32xf32> to vector<1x4x1x32xf32>
    tpu.vector_store %arg13[%c0_442, %c0_443, %c17, %c0_444], %435 {strides = array<i32>} : memref<1x20x32x32xf32, #tpu.memory_space<vmem>>, vector<1x4x1x32xf32>,
    %c0_445 = arith.constant 0 : index
    %c0_446 = arith.constant 0 : index
    %c8_447 = arith.constant 8 : index
    %c0_448 = arith.constant 0 : index
    %436 = vector.load %arg4[%c0_445, %c0_446, %c8_447, %c0_448] : memref<1x4x16x16xf32, #tpu.memory_space<vmem>>, vector<1x4x1x16xf32>
    %437 = vector.shape_cast %436 : vector<1x4x1x16xf32> to vector<4x16xf32>
    %cst_449 = arith.constant dense<0.000000e+00> : vector<4x64xf32>
    %438 = tpu.matmul %437, %5, %cst_449 {dimension_numbers = #tpu.dot_dimension_numbers<[1], [0], [0], [1], [0, 0, 1, 1], [], []>} : vector<4x16xf32>, vector<16x64xf32>, vector<4x64xf32> -> vector<4x64xf32>
    %439 = vector.extract_strided_slice %438 {offsets = [0, 0], sizes = [4, 32], strides = [1, 1]} : vector<4x64xf32> to vector<4x32xf32>
    %c0_450 = arith.constant 0 : index
    %c4_451 = arith.constant 4 : index
    %c16_452 = arith.constant 16 : index
    %c0_453 = arith.constant 0 : index
    %440 = vector.load %arg13[%c0_450, %c4_451, %c16_452, %c0_453] : memref<1x20x32x32xf32, #tpu.memory_space<vmem>>, vector<1x4x1x32xf32>
    %441 = vector.shape_cast %440 : vector<1x4x1x32xf32> to vector<4x32xf32>
    %442 = vector.shape_cast %439 : vector<4x32xf32> to vector<1x4x1x32xf32>
    tpu.vector_store %arg13[%c0_450, %c4_451, %c16_452, %c0_453], %442 {strides = array<i32>} : memref<1x20x32x32xf32, #tpu.memory_space<vmem>>, vector<1x4x1x32xf32>,
    %443 = vector.extract_strided_slice %438 {offsets = [0, 32], sizes = [4, 32], strides = [1, 1]} : vector<4x64xf32> to vector<4x32xf32>
    %c0_454 = arith.constant 0 : index
    %c4_455 = arith.constant 4 : index
    %c17_456 = arith.constant 17 : index
    %c0_457 = arith.constant 0 : index
    %444 = vector.load %arg13[%c0_454, %c4_455, %c17_456, %c0_457] : memref<1x20x32x32xf32, #tpu.memory_space<vmem>>, vector<1x4x1x32xf32>
    %445 = vector.shape_cast %444 : vector<1x4x1x32xf32> to vector<4x32xf32>
    %446 = vector.shape_cast %443 : vector<4x32xf32> to vector<1x4x1x32xf32>
    tpu.vector_store %arg13[%c0_454, %c4_455, %c17_456, %c0_457], %446 {strides = array<i32>} : memref<1x20x32x32xf32, #tpu.memory_space<vmem>>, vector<1x4x1x32xf32>,
    %c0_458 = arith.constant 0 : index
    %c0_459 = arith.constant 0 : index
    %c8_460 = arith.constant 8 : index
    %c0_461 = arith.constant 0 : index
    %447 = vector.load %arg5[%c0_458, %c0_459, %c8_460, %c0_461] : memref<1x4x16x16xf32, #tpu.memory_space<vmem>>, vector<1x4x1x16xf32>
    %448 = vector.shape_cast %447 : vector<1x4x1x16xf32> to vector<4x16xf32>
    %cst_462 = arith.constant dense<0.000000e+00> : vector<4x64xf32>
    %449 = tpu.matmul %448, %7, %cst_462 {dimension_numbers = #tpu.dot_dimension_numbers<[1], [0], [0], [1], [0, 0, 1, 1], [], []>} : vector<4x16xf32>, vector<16x64xf32>, vector<4x64xf32> -> vector<4x64xf32>
    %450 = vector.extract_strided_slice %449 {offsets = [0, 0], sizes = [4, 32], strides = [1, 1]} : vector<4x64xf32> to vector<4x32xf32>
    %c0_463 = arith.constant 0 : index
    %c8_464 = arith.constant 8 : index
    %c16_465 = arith.constant 16 : index
    %c0_466 = arith.constant 0 : index
    %451 = vector.load %arg13[%c0_463, %c8_464, %c16_465, %c0_466] : memref<1x20x32x32xf32, #tpu.memory_space<vmem>>, vector<1x4x1x32xf32>
    %452 = vector.shape_cast %451 : vector<1x4x1x32xf32> to vector<4x32xf32>
    %453 = vector.shape_cast %450 : vector<4x32xf32> to vector<1x4x1x32xf32>
    tpu.vector_store %arg13[%c0_463, %c8_464, %c16_465, %c0_466], %453 {strides = array<i32>} : memref<1x20x32x32xf32, #tpu.memory_space<vmem>>, vector<1x4x1x32xf32>,
    %454 = vector.extract_strided_slice %449 {offsets = [0, 32], sizes = [4, 32], strides = [1, 1]} : vector<4x64xf32> to vector<4x32xf32>
    %c0_467 = arith.constant 0 : index
    %c8_468 = arith.constant 8 : index
    %c17_469 = arith.constant 17 : index
    %c0_470 = arith.constant 0 : index
    %455 = vector.load %arg13[%c0_467, %c8_468, %c17_469, %c0_470] : memref<1x20x32x32xf32, #tpu.memory_space<vmem>>, vector<1x4x1x32xf32>
    %456 = vector.shape_cast %455 : vector<1x4x1x32xf32> to vector<4x32xf32>
    %457 = vector.shape_cast %454 : vector<4x32xf32> to vector<1x4x1x32xf32>
    tpu.vector_store %arg13[%c0_467, %c8_468, %c17_469, %c0_470], %457 {strides = array<i32>} : memref<1x20x32x32xf32, #tpu.memory_space<vmem>>, vector<1x4x1x32xf32>,
    %c0_471 = arith.constant 0 : index
    %c0_472 = arith.constant 0 : index
    %c8_473 = arith.constant 8 : index
    %c0_474 = arith.constant 0 : index
    %458 = vector.load %arg6[%c0_471, %c0_472, %c8_473, %c0_474] : memref<1x4x16x16xf32, #tpu.memory_space<vmem>>, vector<1x4x1x16xf32>
    %459 = vector.shape_cast %458 : vector<1x4x1x16xf32> to vector<4x16xf32>
    %cst_475 = arith.constant dense<0.000000e+00> : vector<4x64xf32>
    %460 = tpu.matmul %459, %9, %cst_475 {dimension_numbers = #tpu.dot_dimension_numbers<[1], [0], [0], [1], [0, 0, 1, 1], [], []>} : vector<4x16xf32>, vector<16x64xf32>, vector<4x64xf32> -> vector<4x64xf32>
    %461 = vector.extract_strided_slice %460 {offsets = [0, 0], sizes = [4, 32], strides = [1, 1]} : vector<4x64xf32> to vector<4x32xf32>
    %c0_476 = arith.constant 0 : index
    %c12_477 = arith.constant 12 : index
    %c16_478 = arith.constant 16 : index
    %c0_479 = arith.constant 0 : index
    %462 = vector.load %arg13[%c0_476, %c12_477, %c16_478, %c0_479] : memref<1x20x32x32xf32, #tpu.memory_space<vmem>>, vector<1x4x1x32xf32>
    %463 = vector.shape_cast %462 : vector<1x4x1x32xf32> to vector<4x32xf32>
    %464 = vector.shape_cast %461 : vector<4x32xf32> to vector<1x4x1x32xf32>
    tpu.vector_store %arg13[%c0_476, %c12_477, %c16_478, %c0_479], %464 {strides = array<i32>} : memref<1x20x32x32xf32, #tpu.memory_space<vmem>>, vector<1x4x1x32xf32>,
    %465 = vector.extract_strided_slice %460 {offsets = [0, 32], sizes = [4, 32], strides = [1, 1]} : vector<4x64xf32> to vector<4x32xf32>
    %c0_480 = arith.constant 0 : index
    %c12_481 = arith.constant 12 : index
    %c17_482 = arith.constant 17 : index
    %c0_483 = arith.constant 0 : index
    %466 = vector.load %arg13[%c0_480, %c12_481, %c17_482, %c0_483] : memref<1x20x32x32xf32, #tpu.memory_space<vmem>>, vector<1x4x1x32xf32>
    %467 = vector.shape_cast %466 : vector<1x4x1x32xf32> to vector<4x32xf32>
    %468 = vector.shape_cast %465 : vector<4x32xf32> to vector<1x4x1x32xf32>
    tpu.vector_store %arg13[%c0_480, %c12_481, %c17_482, %c0_483], %468 {strides = array<i32>} : memref<1x20x32x32xf32, #tpu.memory_space<vmem>>, vector<1x4x1x32xf32>,
    %c0_484 = arith.constant 0 : index
    %c0_485 = arith.constant 0 : index
    %c9_486 = arith.constant 9 : index
    %c0_487 = arith.constant 0 : index
    %469 = vector.load %arg3[%c0_484, %c0_485, %c9_486, %c0_487] : memref<1x4x16x16xf32, #tpu.memory_space<vmem>>, vector<1x4x1x16xf32>
    %470 = vector.shape_cast %469 : vector<1x4x1x16xf32> to vector<4x16xf32>
    %cst_488 = arith.constant dense<0.000000e+00> : vector<16x16xf32>
    %471 = tpu.matmul %0, %470, %cst_488 {dimension_numbers = #tpu.dot_dimension_numbers<[1], [0], [0], [1], [0, 0, 1, 1], [], []>} : vector<16x4xf32>, vector<4x16xf32>, vector<16x16xf32> -> vector<16x16xf32>
    %472 = vector.extract_strided_slice %471 {offsets = [0, 0], sizes = [8, 16], strides = [1, 1]} : vector<16x16xf32> to vector<8x16xf32>
    %cst_489 = arith.constant dense<0.000000e+00> : vector<8x32xf32>
    %473 = tpu.matmul %472, %2, %cst_489 {dimension_numbers = #tpu.dot_dimension_numbers<[1], [0], [0], [1], [0, 0, 1, 1], [], []>} : vector<8x16xf32>, vector<16x32xf32>, vector<8x32xf32> -> vector<8x32xf32>
    %474 = vector.extract_strided_slice %471 {offsets = [8, 0], sizes = [8, 16], strides = [1, 1]} : vector<16x16xf32> to vector<8x16xf32>
    %cst_490 = arith.constant dense<0.000000e+00> : vector<8x32xf32>
    %475 = tpu.matmul %474, %3, %cst_490 {dimension_numbers = #tpu.dot_dimension_numbers<[1], [0], [0], [1], [0, 0, 1, 1], [], []>} : vector<8x16xf32>, vector<16x32xf32>, vector<8x32xf32> -> vector<8x32xf32>
    %476 = arith.addf %473, %475 : vector<8x32xf32>
    %477 = vector.broadcast %1 : vector<8x1xf32> to vector<8x32xf32>
    %478 = arith.addf %476, %477 : vector<8x32xf32>
    %479 = vector.extract_strided_slice %478 {offsets = [0, 0], sizes = [4, 32], strides = [1, 1]} : vector<8x32xf32> to vector<4x32xf32>
    %c0_491 = arith.constant 0 : index
    %c0_492 = arith.constant 0 : index
    %c18 = arith.constant 18 : index
    %c0_493 = arith.constant 0 : index
    %480 = vector.load %arg13[%c0_491, %c0_492, %c18, %c0_493] : memref<1x20x32x32xf32, #tpu.memory_space<vmem>>, vector<1x4x1x32xf32>
    %481 = vector.shape_cast %480 : vector<1x4x1x32xf32> to vector<4x32xf32>
    %482 = vector.shape_cast %479 : vector<4x32xf32> to vector<1x4x1x32xf32>
    tpu.vector_store %arg13[%c0_491, %c0_492, %c18, %c0_493], %482 {strides = array<i32>} : memref<1x20x32x32xf32, #tpu.memory_space<vmem>>, vector<1x4x1x32xf32>,
    %483 = vector.extract_strided_slice %478 {offsets = [4, 0], sizes = [4, 32], strides = [1, 1]} : vector<8x32xf32> to vector<4x32xf32>
    %c0_494 = arith.constant 0 : index
    %c0_495 = arith.constant 0 : index
    %c19 = arith.constant 19 : index
    %c0_496 = arith.constant 0 : index
    %484 = vector.load %arg13[%c0_494, %c0_495, %c19, %c0_496] : memref<1x20x32x32xf32, #tpu.memory_space<vmem>>, vector<1x4x1x32xf32>
    %485 = vector.shape_cast %484 : vector<1x4x1x32xf32> to vector<4x32xf32>
    %486 = vector.shape_cast %483 : vector<4x32xf32> to vector<1x4x1x32xf32>
    tpu.vector_store %arg13[%c0_494, %c0_495, %c19, %c0_496], %486 {strides = array<i32>} : memref<1x20x32x32xf32, #tpu.memory_space<vmem>>, vector<1x4x1x32xf32>,
    %c0_497 = arith.constant 0 : index
    %c0_498 = arith.constant 0 : index
    %c9_499 = arith.constant 9 : index
    %c0_500 = arith.constant 0 : index
    %487 = vector.load %arg4[%c0_497, %c0_498, %c9_499, %c0_500] : memref<1x4x16x16xf32, #tpu.memory_space<vmem>>, vector<1x4x1x16xf32>
    %488 = vector.shape_cast %487 : vector<1x4x1x16xf32> to vector<4x16xf32>
    %cst_501 = arith.constant dense<0.000000e+00> : vector<4x64xf32>
    %489 = tpu.matmul %488, %5, %cst_501 {dimension_numbers = #tpu.dot_dimension_numbers<[1], [0], [0], [1], [0, 0, 1, 1], [], []>} : vector<4x16xf32>, vector<16x64xf32>, vector<4x64xf32> -> vector<4x64xf32>
    %490 = vector.extract_strided_slice %489 {offsets = [0, 0], sizes = [4, 32], strides = [1, 1]} : vector<4x64xf32> to vector<4x32xf32>
    %c0_502 = arith.constant 0 : index
    %c4_503 = arith.constant 4 : index
    %c18_504 = arith.constant 18 : index
    %c0_505 = arith.constant 0 : index
    %491 = vector.load %arg13[%c0_502, %c4_503, %c18_504, %c0_505] : memref<1x20x32x32xf32, #tpu.memory_space<vmem>>, vector<1x4x1x32xf32>
    %492 = vector.shape_cast %491 : vector<1x4x1x32xf32> to vector<4x32xf32>
    %493 = vector.shape_cast %490 : vector<4x32xf32> to vector<1x4x1x32xf32>
    tpu.vector_store %arg13[%c0_502, %c4_503, %c18_504, %c0_505], %493 {strides = array<i32>} : memref<1x20x32x32xf32, #tpu.memory_space<vmem>>, vector<1x4x1x32xf32>,
    %494 = vector.extract_strided_slice %489 {offsets = [0, 32], sizes = [4, 32], strides = [1, 1]} : vector<4x64xf32> to vector<4x32xf32>
    %c0_506 = arith.constant 0 : index
    %c4_507 = arith.constant 4 : index
    %c19_508 = arith.constant 19 : index
    %c0_509 = arith.constant 0 : index
    %495 = vector.load %arg13[%c0_506, %c4_507, %c19_508, %c0_509] : memref<1x20x32x32xf32, #tpu.memory_space<vmem>>, vector<1x4x1x32xf32>
    %496 = vector.shape_cast %495 : vector<1x4x1x32xf32> to vector<4x32xf32>
    %497 = vector.shape_cast %494 : vector<4x32xf32> to vector<1x4x1x32xf32>
    tpu.vector_store %arg13[%c0_506, %c4_507, %c19_508, %c0_509], %497 {strides = array<i32>} : memref<1x20x32x32xf32, #tpu.memory_space<vmem>>, vector<1x4x1x32xf32>,
    %c0_510 = arith.constant 0 : index
    %c0_511 = arith.constant 0 : index
    %c9_512 = arith.constant 9 : index
    %c0_513 = arith.constant 0 : index
    %498 = vector.load %arg5[%c0_510, %c0_511, %c9_512, %c0_513] : memref<1x4x16x16xf32, #tpu.memory_space<vmem>>, vector<1x4x1x16xf32>
    %499 = vector.shape_cast %498 : vector<1x4x1x16xf32> to vector<4x16xf32>
    %cst_514 = arith.constant dense<0.000000e+00> : vector<4x64xf32>
    %500 = tpu.matmul %499, %7, %cst_514 {dimension_numbers = #tpu.dot_dimension_numbers<[1], [0], [0], [1], [0, 0, 1, 1], [], []>} : vector<4x16xf32>, vector<16x64xf32>, vector<4x64xf32> -> vector<4x64xf32>
    %501 = vector.extract_strided_slice %500 {offsets = [0, 0], sizes = [4, 32], strides = [1, 1]} : vector<4x64xf32> to vector<4x32xf32>
    %c0_515 = arith.constant 0 : index
    %c8_516 = arith.constant 8 : index
    %c18_517 = arith.constant 18 : index
    %c0_518 = arith.constant 0 : index
    %502 = vector.load %arg13[%c0_515, %c8_516, %c18_517, %c0_518] : memref<1x20x32x32xf32, #tpu.memory_space<vmem>>, vector<1x4x1x32xf32>
    %503 = vector.shape_cast %502 : vector<1x4x1x32xf32> to vector<4x32xf32>
    %504 = vector.shape_cast %501 : vector<4x32xf32> to vector<1x4x1x32xf32>
    tpu.vector_store %arg13[%c0_515, %c8_516, %c18_517, %c0_518], %504 {strides = array<i32>} : memref<1x20x32x32xf32, #tpu.memory_space<vmem>>, vector<1x4x1x32xf32>,
    %505 = vector.extract_strided_slice %500 {offsets = [0, 32], sizes = [4, 32], strides = [1, 1]} : vector<4x64xf32> to vector<4x32xf32>
    %c0_519 = arith.constant 0 : index
    %c8_520 = arith.constant 8 : index
    %c19_521 = arith.constant 19 : index
    %c0_522 = arith.constant 0 : index
    %506 = vector.load %arg13[%c0_519, %c8_520, %c19_521, %c0_522] : memref<1x20x32x32xf32, #tpu.memory_space<vmem>>, vector<1x4x1x32xf32>
    %507 = vector.shape_cast %506 : vector<1x4x1x32xf32> to vector<4x32xf32>
    %508 = vector.shape_cast %505 : vector<4x32xf32> to vector<1x4x1x32xf32>
    tpu.vector_store %arg13[%c0_519, %c8_520, %c19_521, %c0_522], %508 {strides = array<i32>} : memref<1x20x32x32xf32, #tpu.memory_space<vmem>>, vector<1x4x1x32xf32>,
    %c0_523 = arith.constant 0 : index
    %c0_524 = arith.constant 0 : index
    %c9_525 = arith.constant 9 : index
    %c0_526 = arith.constant 0 : index
    %509 = vector.load %arg6[%c0_523, %c0_524, %c9_525, %c0_526] : memref<1x4x16x16xf32, #tpu.memory_space<vmem>>, vector<1x4x1x16xf32>
    %510 = vector.shape_cast %509 : vector<1x4x1x16xf32> to vector<4x16xf32>
    %cst_527 = arith.constant dense<0.000000e+00> : vector<4x64xf32>
    %511 = tpu.matmul %510, %9, %cst_527 {dimension_numbers = #tpu.dot_dimension_numbers<[1], [0], [0], [1], [0, 0, 1, 1], [], []>} : vector<4x16xf32>, vector<16x64xf32>, vector<4x64xf32> -> vector<4x64xf32>
    %512 = vector.extract_strided_slice %511 {offsets = [0, 0], sizes = [4, 32], strides = [1, 1]} : vector<4x64xf32> to vector<4x32xf32>
    %c0_528 = arith.constant 0 : index
    %c12_529 = arith.constant 12 : index
    %c18_530 = arith.constant 18 : index
    %c0_531 = arith.constant 0 : index
    %513 = vector.load %arg13[%c0_528, %c12_529, %c18_530, %c0_531] : memref<1x20x32x32xf32, #tpu.memory_space<vmem>>, vector<1x4x1x32xf32>
    %514 = vector.shape_cast %513 : vector<1x4x1x32xf32> to vector<4x32xf32>
    %515 = vector.shape_cast %512 : vector<4x32xf32> to vector<1x4x1x32xf32>
    tpu.vector_store %arg13[%c0_528, %c12_529, %c18_530, %c0_531], %515 {strides = array<i32>} : memref<1x20x32x32xf32, #tpu.memory_space<vmem>>, vector<1x4x1x32xf32>,
    %516 = vector.extract_strided_slice %511 {offsets = [0, 32], sizes = [4, 32], strides = [1, 1]} : vector<4x64xf32> to vector<4x32xf32>
    %c0_532 = arith.constant 0 : index
    %c12_533 = arith.constant 12 : index
    %c19_534 = arith.constant 19 : index
    %c0_535 = arith.constant 0 : index
    %517 = vector.load %arg13[%c0_532, %c12_533, %c19_534, %c0_535] : memref<1x20x32x32xf32, #tpu.memory_space<vmem>>, vector<1x4x1x32xf32>
    %518 = vector.shape_cast %517 : vector<1x4x1x32xf32> to vector<4x32xf32>
    %519 = vector.shape_cast %516 : vector<4x32xf32> to vector<1x4x1x32xf32>
    tpu.vector_store %arg13[%c0_532, %c12_533, %c19_534, %c0_535], %519 {strides = array<i32>} : memref<1x20x32x32xf32, #tpu.memory_space<vmem>>, vector<1x4x1x32xf32>,
    %c0_536 = arith.constant 0 : index
    %c0_537 = arith.constant 0 : index
    %c10_538 = arith.constant 10 : index
    %c0_539 = arith.constant 0 : index
    %520 = vector.load %arg3[%c0_536, %c0_537, %c10_538, %c0_539] : memref<1x4x16x16xf32, #tpu.memory_space<vmem>>, vector<1x4x1x16xf32>
    %521 = vector.shape_cast %520 : vector<1x4x1x16xf32> to vector<4x16xf32>
    %cst_540 = arith.constant dense<0.000000e+00> : vector<16x16xf32>
    %522 = tpu.matmul %0, %521, %cst_540 {dimension_numbers = #tpu.dot_dimension_numbers<[1], [0], [0], [1], [0, 0, 1, 1], [], []>} : vector<16x4xf32>, vector<4x16xf32>, vector<16x16xf32> -> vector<16x16xf32>
    %523 = vector.extract_strided_slice %522 {offsets = [0, 0], sizes = [8, 16], strides = [1, 1]} : vector<16x16xf32> to vector<8x16xf32>
    %cst_541 = arith.constant dense<0.000000e+00> : vector<8x32xf32>
    %524 = tpu.matmul %523, %2, %cst_541 {dimension_numbers = #tpu.dot_dimension_numbers<[1], [0], [0], [1], [0, 0, 1, 1], [], []>} : vector<8x16xf32>, vector<16x32xf32>, vector<8x32xf32> -> vector<8x32xf32>
    %525 = vector.extract_strided_slice %522 {offsets = [8, 0], sizes = [8, 16], strides = [1, 1]} : vector<16x16xf32> to vector<8x16xf32>
    %cst_542 = arith.constant dense<0.000000e+00> : vector<8x32xf32>
    %526 = tpu.matmul %525, %3, %cst_542 {dimension_numbers = #tpu.dot_dimension_numbers<[1], [0], [0], [1], [0, 0, 1, 1], [], []>} : vector<8x16xf32>, vector<16x32xf32>, vector<8x32xf32> -> vector<8x32xf32>
    %527 = arith.addf %524, %526 : vector<8x32xf32>
    %528 = vector.broadcast %1 : vector<8x1xf32> to vector<8x32xf32>
    %529 = arith.addf %527, %528 : vector<8x32xf32>
    %530 = vector.extract_strided_slice %529 {offsets = [0, 0], sizes = [4, 32], strides = [1, 1]} : vector<8x32xf32> to vector<4x32xf32>
    %c0_543 = arith.constant 0 : index
    %c0_544 = arith.constant 0 : index
    %c20 = arith.constant 20 : index
    %c0_545 = arith.constant 0 : index
    %531 = vector.load %arg13[%c0_543, %c0_544, %c20, %c0_545] : memref<1x20x32x32xf32, #tpu.memory_space<vmem>>, vector<1x4x1x32xf32>
    %532 = vector.shape_cast %531 : vector<1x4x1x32xf32> to vector<4x32xf32>
    %533 = vector.shape_cast %530 : vector<4x32xf32> to vector<1x4x1x32xf32>
    tpu.vector_store %arg13[%c0_543, %c0_544, %c20, %c0_545], %533 {strides = array<i32>} : memref<1x20x32x32xf32, #tpu.memory_space<vmem>>, vector<1x4x1x32xf32>,
    %534 = vector.extract_strided_slice %529 {offsets = [4, 0], sizes = [4, 32], strides = [1, 1]} : vector<8x32xf32> to vector<4x32xf32>
    %c0_546 = arith.constant 0 : index
    %c0_547 = arith.constant 0 : index
    %c21 = arith.constant 21 : index
    %c0_548 = arith.constant 0 : index
    %535 = vector.load %arg13[%c0_546, %c0_547, %c21, %c0_548] : memref<1x20x32x32xf32, #tpu.memory_space<vmem>>, vector<1x4x1x32xf32>
    %536 = vector.shape_cast %535 : vector<1x4x1x32xf32> to vector<4x32xf32>
    %537 = vector.shape_cast %534 : vector<4x32xf32> to vector<1x4x1x32xf32>
    tpu.vector_store %arg13[%c0_546, %c0_547, %c21, %c0_548], %537 {strides = array<i32>} : memref<1x20x32x32xf32, #tpu.memory_space<vmem>>, vector<1x4x1x32xf32>,
    %c0_549 = arith.constant 0 : index
    %c0_550 = arith.constant 0 : index
    %c10_551 = arith.constant 10 : index
    %c0_552 = arith.constant 0 : index
    %538 = vector.load %arg4[%c0_549, %c0_550, %c10_551, %c0_552] : memref<1x4x16x16xf32, #tpu.memory_space<vmem>>, vector<1x4x1x16xf32>
    %539 = vector.shape_cast %538 : vector<1x4x1x16xf32> to vector<4x16xf32>
    %cst_553 = arith.constant dense<0.000000e+00> : vector<4x64xf32>
    %540 = tpu.matmul %539, %5, %cst_553 {dimension_numbers = #tpu.dot_dimension_numbers<[1], [0], [0], [1], [0, 0, 1, 1], [], []>} : vector<4x16xf32>, vector<16x64xf32>, vector<4x64xf32> -> vector<4x64xf32>
    %541 = vector.extract_strided_slice %540 {offsets = [0, 0], sizes = [4, 32], strides = [1, 1]} : vector<4x64xf32> to vector<4x32xf32>
    %c0_554 = arith.constant 0 : index
    %c4_555 = arith.constant 4 : index
    %c20_556 = arith.constant 20 : index
    %c0_557 = arith.constant 0 : index
    %542 = vector.load %arg13[%c0_554, %c4_555, %c20_556, %c0_557] : memref<1x20x32x32xf32, #tpu.memory_space<vmem>>, vector<1x4x1x32xf32>
    %543 = vector.shape_cast %542 : vector<1x4x1x32xf32> to vector<4x32xf32>
    %544 = vector.shape_cast %541 : vector<4x32xf32> to vector<1x4x1x32xf32>
    tpu.vector_store %arg13[%c0_554, %c4_555, %c20_556, %c0_557], %544 {strides = array<i32>} : memref<1x20x32x32xf32, #tpu.memory_space<vmem>>, vector<1x4x1x32xf32>,
    %545 = vector.extract_strided_slice %540 {offsets = [0, 32], sizes = [4, 32], strides = [1, 1]} : vector<4x64xf32> to vector<4x32xf32>
    %c0_558 = arith.constant 0 : index
    %c4_559 = arith.constant 4 : index
    %c21_560 = arith.constant 21 : index
    %c0_561 = arith.constant 0 : index
    %546 = vector.load %arg13[%c0_558, %c4_559, %c21_560, %c0_561] : memref<1x20x32x32xf32, #tpu.memory_space<vmem>>, vector<1x4x1x32xf32>
    %547 = vector.shape_cast %546 : vector<1x4x1x32xf32> to vector<4x32xf32>
    %548 = vector.shape_cast %545 : vector<4x32xf32> to vector<1x4x1x32xf32>
    tpu.vector_store %arg13[%c0_558, %c4_559, %c21_560, %c0_561], %548 {strides = array<i32>} : memref<1x20x32x32xf32, #tpu.memory_space<vmem>>, vector<1x4x1x32xf32>,
    %c0_562 = arith.constant 0 : index
    %c0_563 = arith.constant 0 : index
    %c10_564 = arith.constant 10 : index
    %c0_565 = arith.constant 0 : index
    %549 = vector.load %arg5[%c0_562, %c0_563, %c10_564, %c0_565] : memref<1x4x16x16xf32, #tpu.memory_space<vmem>>, vector<1x4x1x16xf32>
    %550 = vector.shape_cast %549 : vector<1x4x1x16xf32> to vector<4x16xf32>
    %cst_566 = arith.constant dense<0.000000e+00> : vector<4x64xf32>
    %551 = tpu.matmul %550, %7, %cst_566 {dimension_numbers = #tpu.dot_dimension_numbers<[1], [0], [0], [1], [0, 0, 1, 1], [], []>} : vector<4x16xf32>, vector<16x64xf32>, vector<4x64xf32> -> vector<4x64xf32>
    %552 = vector.extract_strided_slice %551 {offsets = [0, 0], sizes = [4, 32], strides = [1, 1]} : vector<4x64xf32> to vector<4x32xf32>
    %c0_567 = arith.constant 0 : index
    %c8_568 = arith.constant 8 : index
    %c20_569 = arith.constant 20 : index
    %c0_570 = arith.constant 0 : index
    %553 = vector.load %arg13[%c0_567, %c8_568, %c20_569, %c0_570] : memref<1x20x32x32xf32, #tpu.memory_space<vmem>>, vector<1x4x1x32xf32>
    %554 = vector.shape_cast %553 : vector<1x4x1x32xf32> to vector<4x32xf32>
    %555 = vector.shape_cast %552 : vector<4x32xf32> to vector<1x4x1x32xf32>
    tpu.vector_store %arg13[%c0_567, %c8_568, %c20_569, %c0_570], %555 {strides = array<i32>} : memref<1x20x32x32xf32, #tpu.memory_space<vmem>>, vector<1x4x1x32xf32>,
    %556 = vector.extract_strided_slice %551 {offsets = [0, 32], sizes = [4, 32], strides = [1, 1]} : vector<4x64xf32> to vector<4x32xf32>
    %c0_571 = arith.constant 0 : index
    %c8_572 = arith.constant 8 : index
    %c21_573 = arith.constant 21 : index
    %c0_574 = arith.constant 0 : index
    %557 = vector.load %arg13[%c0_571, %c8_572, %c21_573, %c0_574] : memref<1x20x32x32xf32, #tpu.memory_space<vmem>>, vector<1x4x1x32xf32>
    %558 = vector.shape_cast %557 : vector<1x4x1x32xf32> to vector<4x32xf32>
    %559 = vector.shape_cast %556 : vector<4x32xf32> to vector<1x4x1x32xf32>
    tpu.vector_store %arg13[%c0_571, %c8_572, %c21_573, %c0_574], %559 {strides = array<i32>} : memref<1x20x32x32xf32, #tpu.memory_space<vmem>>, vector<1x4x1x32xf32>,
    %c0_575 = arith.constant 0 : index
    %c0_576 = arith.constant 0 : index
    %c10_577 = arith.constant 10 : index
    %c0_578 = arith.constant 0 : index
    %560 = vector.load %arg6[%c0_575, %c0_576, %c10_577, %c0_578] : memref<1x4x16x16xf32, #tpu.memory_space<vmem>>, vector<1x4x1x16xf32>
    %561 = vector.shape_cast %560 : vector<1x4x1x16xf32> to vector<4x16xf32>
    %cst_579 = arith.constant dense<0.000000e+00> : vector<4x64xf32>
    %562 = tpu.matmul %561, %9, %cst_579 {dimension_numbers = #tpu.dot_dimension_numbers<[1], [0], [0], [1], [0, 0, 1, 1], [], []>} : vector<4x16xf32>, vector<16x64xf32>, vector<4x64xf32> -> vector<4x64xf32>
    %563 = vector.extract_strided_slice %562 {offsets = [0, 0], sizes = [4, 32], strides = [1, 1]} : vector<4x64xf32> to vector<4x32xf32>
    %c0_580 = arith.constant 0 : index
    %c12_581 = arith.constant 12 : index
    %c20_582 = arith.constant 20 : index
    %c0_583 = arith.constant 0 : index
    %564 = vector.load %arg13[%c0_580, %c12_581, %c20_582, %c0_583] : memref<1x20x32x32xf32, #tpu.memory_space<vmem>>, vector<1x4x1x32xf32>
    %565 = vector.shape_cast %564 : vector<1x4x1x32xf32> to vector<4x32xf32>
    %566 = vector.shape_cast %563 : vector<4x32xf32> to vector<1x4x1x32xf32>
    tpu.vector_store %arg13[%c0_580, %c12_581, %c20_582, %c0_583], %566 {strides = array<i32>} : memref<1x20x32x32xf32, #tpu.memory_space<vmem>>, vector<1x4x1x32xf32>,
    %567 = vector.extract_strided_slice %562 {offsets = [0, 32], sizes = [4, 32], strides = [1, 1]} : vector<4x64xf32> to vector<4x32xf32>
    %c0_584 = arith.constant 0 : index
    %c12_585 = arith.constant 12 : index
    %c21_586 = arith.constant 21 : index
    %c0_587 = arith.constant 0 : index
    %568 = vector.load %arg13[%c0_584, %c12_585, %c21_586, %c0_587] : memref<1x20x32x32xf32, #tpu.memory_space<vmem>>, vector<1x4x1x32xf32>
    %569 = vector.shape_cast %568 : vector<1x4x1x32xf32> to vector<4x32xf32>
    %570 = vector.shape_cast %567 : vector<4x32xf32> to vector<1x4x1x32xf32>
    tpu.vector_store %arg13[%c0_584, %c12_585, %c21_586, %c0_587], %570 {strides = array<i32>} : memref<1x20x32x32xf32, #tpu.memory_space<vmem>>, vector<1x4x1x32xf32>,
    %c0_588 = arith.constant 0 : index
    %c0_589 = arith.constant 0 : index
    %c11_590 = arith.constant 11 : index
    %c0_591 = arith.constant 0 : index
    %571 = vector.load %arg3[%c0_588, %c0_589, %c11_590, %c0_591] : memref<1x4x16x16xf32, #tpu.memory_space<vmem>>, vector<1x4x1x16xf32>
    %572 = vector.shape_cast %571 : vector<1x4x1x16xf32> to vector<4x16xf32>
    %cst_592 = arith.constant dense<0.000000e+00> : vector<16x16xf32>
    %573 = tpu.matmul %0, %572, %cst_592 {dimension_numbers = #tpu.dot_dimension_numbers<[1], [0], [0], [1], [0, 0, 1, 1], [], []>} : vector<16x4xf32>, vector<4x16xf32>, vector<16x16xf32> -> vector<16x16xf32>
    %574 = vector.extract_strided_slice %573 {offsets = [0, 0], sizes = [8, 16], strides = [1, 1]} : vector<16x16xf32> to vector<8x16xf32>
    %cst_593 = arith.constant dense<0.000000e+00> : vector<8x32xf32>
    %575 = tpu.matmul %574, %2, %cst_593 {dimension_numbers = #tpu.dot_dimension_numbers<[1], [0], [0], [1], [0, 0, 1, 1], [], []>} : vector<8x16xf32>, vector<16x32xf32>, vector<8x32xf32> -> vector<8x32xf32>
    %576 = vector.extract_strided_slice %573 {offsets = [8, 0], sizes = [8, 16], strides = [1, 1]} : vector<16x16xf32> to vector<8x16xf32>
    %cst_594 = arith.constant dense<0.000000e+00> : vector<8x32xf32>
    %577 = tpu.matmul %576, %3, %cst_594 {dimension_numbers = #tpu.dot_dimension_numbers<[1], [0], [0], [1], [0, 0, 1, 1], [], []>} : vector<8x16xf32>, vector<16x32xf32>, vector<8x32xf32> -> vector<8x32xf32>
    %578 = arith.addf %575, %577 : vector<8x32xf32>
    %579 = vector.broadcast %1 : vector<8x1xf32> to vector<8x32xf32>
    %580 = arith.addf %578, %579 : vector<8x32xf32>
    %581 = vector.extract_strided_slice %580 {offsets = [0, 0], sizes = [4, 32], strides = [1, 1]} : vector<8x32xf32> to vector<4x32xf32>
    %c0_595 = arith.constant 0 : index
    %c0_596 = arith.constant 0 : index
    %c22 = arith.constant 22 : index
    %c0_597 = arith.constant 0 : index
    %582 = vector.load %arg13[%c0_595, %c0_596, %c22, %c0_597] : memref<1x20x32x32xf32, #tpu.memory_space<vmem>>, vector<1x4x1x32xf32>
    %583 = vector.shape_cast %582 : vector<1x4x1x32xf32> to vector<4x32xf32>
    %584 = vector.shape_cast %581 : vector<4x32xf32> to vector<1x4x1x32xf32>
    tpu.vector_store %arg13[%c0_595, %c0_596, %c22, %c0_597], %584 {strides = array<i32>} : memref<1x20x32x32xf32, #tpu.memory_space<vmem>>, vector<1x4x1x32xf32>,
    %585 = vector.extract_strided_slice %580 {offsets = [4, 0], sizes = [4, 32], strides = [1, 1]} : vector<8x32xf32> to vector<4x32xf32>
    %c0_598 = arith.constant 0 : index
    %c0_599 = arith.constant 0 : index
    %c23 = arith.constant 23 : index
    %c0_600 = arith.constant 0 : index
    %586 = vector.load %arg13[%c0_598, %c0_599, %c23, %c0_600] : memref<1x20x32x32xf32, #tpu.memory_space<vmem>>, vector<1x4x1x32xf32>
    %587 = vector.shape_cast %586 : vector<1x4x1x32xf32> to vector<4x32xf32>
    %588 = vector.shape_cast %585 : vector<4x32xf32> to vector<1x4x1x32xf32>
    tpu.vector_store %arg13[%c0_598, %c0_599, %c23, %c0_600], %588 {strides = array<i32>} : memref<1x20x32x32xf32, #tpu.memory_space<vmem>>, vector<1x4x1x32xf32>,
    %c0_601 = arith.constant 0 : index
    %c0_602 = arith.constant 0 : index
    %c11_603 = arith.constant 11 : index
    %c0_604 = arith.constant 0 : index
    %589 = vector.load %arg4[%c0_601, %c0_602, %c11_603, %c0_604] : memref<1x4x16x16xf32, #tpu.memory_space<vmem>>, vector<1x4x1x16xf32>
    %590 = vector.shape_cast %589 : vector<1x4x1x16xf32> to vector<4x16xf32>
    %cst_605 = arith.constant dense<0.000000e+00> : vector<4x64xf32>
    %591 = tpu.matmul %590, %5, %cst_605 {dimension_numbers = #tpu.dot_dimension_numbers<[1], [0], [0], [1], [0, 0, 1, 1], [], []>} : vector<4x16xf32>, vector<16x64xf32>, vector<4x64xf32> -> vector<4x64xf32>
    %592 = vector.extract_strided_slice %591 {offsets = [0, 0], sizes = [4, 32], strides = [1, 1]} : vector<4x64xf32> to vector<4x32xf32>
    %c0_606 = arith.constant 0 : index
    %c4_607 = arith.constant 4 : index
    %c22_608 = arith.constant 22 : index
    %c0_609 = arith.constant 0 : index
    %593 = vector.load %arg13[%c0_606, %c4_607, %c22_608, %c0_609] : memref<1x20x32x32xf32, #tpu.memory_space<vmem>>, vector<1x4x1x32xf32>
    %594 = vector.shape_cast %593 : vector<1x4x1x32xf32> to vector<4x32xf32>
    %595 = vector.shape_cast %592 : vector<4x32xf32> to vector<1x4x1x32xf32>
    tpu.vector_store %arg13[%c0_606, %c4_607, %c22_608, %c0_609], %595 {strides = array<i32>} : memref<1x20x32x32xf32, #tpu.memory_space<vmem>>, vector<1x4x1x32xf32>,
    %596 = vector.extract_strided_slice %591 {offsets = [0, 32], sizes = [4, 32], strides = [1, 1]} : vector<4x64xf32> to vector<4x32xf32>
    %c0_610 = arith.constant 0 : index
    %c4_611 = arith.constant 4 : index
    %c23_612 = arith.constant 23 : index
    %c0_613 = arith.constant 0 : index
    %597 = vector.load %arg13[%c0_610, %c4_611, %c23_612, %c0_613] : memref<1x20x32x32xf32, #tpu.memory_space<vmem>>, vector<1x4x1x32xf32>
    %598 = vector.shape_cast %597 : vector<1x4x1x32xf32> to vector<4x32xf32>
    %599 = vector.shape_cast %596 : vector<4x32xf32> to vector<1x4x1x32xf32>
    tpu.vector_store %arg13[%c0_610, %c4_611, %c23_612, %c0_613], %599 {strides = array<i32>} : memref<1x20x32x32xf32, #tpu.memory_space<vmem>>, vector<1x4x1x32xf32>,
    %c0_614 = arith.constant 0 : index
    %c0_615 = arith.constant 0 : index
    %c11_616 = arith.constant 11 : index
    %c0_617 = arith.constant 0 : index
    %600 = vector.load %arg5[%c0_614, %c0_615, %c11_616, %c0_617] : memref<1x4x16x16xf32, #tpu.memory_space<vmem>>, vector<1x4x1x16xf32>
    %601 = vector.shape_cast %600 : vector<1x4x1x16xf32> to vector<4x16xf32>
    %cst_618 = arith.constant dense<0.000000e+00> : vector<4x64xf32>
    %602 = tpu.matmul %601, %7, %cst_618 {dimension_numbers = #tpu.dot_dimension_numbers<[1], [0], [0], [1], [0, 0, 1, 1], [], []>} : vector<4x16xf32>, vector<16x64xf32>, vector<4x64xf32> -> vector<4x64xf32>
    %603 = vector.extract_strided_slice %602 {offsets = [0, 0], sizes = [4, 32], strides = [1, 1]} : vector<4x64xf32> to vector<4x32xf32>
    %c0_619 = arith.constant 0 : index
    %c8_620 = arith.constant 8 : index
    %c22_621 = arith.constant 22 : index
    %c0_622 = arith.constant 0 : index
    %604 = vector.load %arg13[%c0_619, %c8_620, %c22_621, %c0_622] : memref<1x20x32x32xf32, #tpu.memory_space<vmem>>, vector<1x4x1x32xf32>
    %605 = vector.shape_cast %604 : vector<1x4x1x32xf32> to vector<4x32xf32>
    %606 = vector.shape_cast %603 : vector<4x32xf32> to vector<1x4x1x32xf32>
    tpu.vector_store %arg13[%c0_619, %c8_620, %c22_621, %c0_622], %606 {strides = array<i32>} : memref<1x20x32x32xf32, #tpu.memory_space<vmem>>, vector<1x4x1x32xf32>,
    %607 = vector.extract_strided_slice %602 {offsets = [0, 32], sizes = [4, 32], strides = [1, 1]} : vector<4x64xf32> to vector<4x32xf32>
    %c0_623 = arith.constant 0 : index
    %c8_624 = arith.constant 8 : index
    %c23_625 = arith.constant 23 : index
    %c0_626 = arith.constant 0 : index
    %608 = vector.load %arg13[%c0_623, %c8_624, %c23_625, %c0_626] : memref<1x20x32x32xf32, #tpu.memory_space<vmem>>, vector<1x4x1x32xf32>
    %609 = vector.shape_cast %608 : vector<1x4x1x32xf32> to vector<4x32xf32>
    %610 = vector.shape_cast %607 : vector<4x32xf32> to vector<1x4x1x32xf32>
    tpu.vector_store %arg13[%c0_623, %c8_624, %c23_625, %c0_626], %610 {strides = array<i32>} : memref<1x20x32x32xf32, #tpu.memory_space<vmem>>, vector<1x4x1x32xf32>,
    %c0_627 = arith.constant 0 : index
    %c0_628 = arith.constant 0 : index
    %c11_629 = arith.constant 11 : index
    %c0_630 = arith.constant 0 : index
    %611 = vector.load %arg6[%c0_627, %c0_628, %c11_629, %c0_630] : memref<1x4x16x16xf32, #tpu.memory_space<vmem>>, vector<1x4x1x16xf32>
    %612 = vector.shape_cast %611 : vector<1x4x1x16xf32> to vector<4x16xf32>
    %cst_631 = arith.constant dense<0.000000e+00> : vector<4x64xf32>
    %613 = tpu.matmul %612, %9, %cst_631 {dimension_numbers = #tpu.dot_dimension_numbers<[1], [0], [0], [1], [0, 0, 1, 1], [], []>} : vector<4x16xf32>, vector<16x64xf32>, vector<4x64xf32> -> vector<4x64xf32>
    %614 = vector.extract_strided_slice %613 {offsets = [0, 0], sizes = [4, 32], strides = [1, 1]} : vector<4x64xf32> to vector<4x32xf32>
    %c0_632 = arith.constant 0 : index
    %c12_633 = arith.constant 12 : index
    %c22_634 = arith.constant 22 : index
    %c0_635 = arith.constant 0 : index
    %615 = vector.load %arg13[%c0_632, %c12_633, %c22_634, %c0_635] : memref<1x20x32x32xf32, #tpu.memory_space<vmem>>, vector<1x4x1x32xf32>
    %616 = vector.shape_cast %615 : vector<1x4x1x32xf32> to vector<4x32xf32>
    %617 = vector.shape_cast %614 : vector<4x32xf32> to vector<1x4x1x32xf32>
    tpu.vector_store %arg13[%c0_632, %c12_633, %c22_634, %c0_635], %617 {strides = array<i32>} : memref<1x20x32x32xf32, #tpu.memory_space<vmem>>, vector<1x4x1x32xf32>,
    %618 = vector.extract_strided_slice %613 {offsets = [0, 32], sizes = [4, 32], strides = [1, 1]} : vector<4x64xf32> to vector<4x32xf32>
    %c0_636 = arith.constant 0 : index
    %c12_637 = arith.constant 12 : index
    %c23_638 = arith.constant 23 : index
    %c0_639 = arith.constant 0 : index
    %619 = vector.load %arg13[%c0_636, %c12_637, %c23_638, %c0_639] : memref<1x20x32x32xf32, #tpu.memory_space<vmem>>, vector<1x4x1x32xf32>
    %620 = vector.shape_cast %619 : vector<1x4x1x32xf32> to vector<4x32xf32>
    %621 = vector.shape_cast %618 : vector<4x32xf32> to vector<1x4x1x32xf32>
    tpu.vector_store %arg13[%c0_636, %c12_637, %c23_638, %c0_639], %621 {strides = array<i32>} : memref<1x20x32x32xf32, #tpu.memory_space<vmem>>, vector<1x4x1x32xf32>,
    %c0_640 = arith.constant 0 : index
    %c0_641 = arith.constant 0 : index
    %c12_642 = arith.constant 12 : index
    %c0_643 = arith.constant 0 : index
    %622 = vector.load %arg3[%c0_640, %c0_641, %c12_642, %c0_643] : memref<1x4x16x16xf32, #tpu.memory_space<vmem>>, vector<1x4x1x16xf32>
    %623 = vector.shape_cast %622 : vector<1x4x1x16xf32> to vector<4x16xf32>
    %cst_644 = arith.constant dense<0.000000e+00> : vector<16x16xf32>
    %624 = tpu.matmul %0, %623, %cst_644 {dimension_numbers = #tpu.dot_dimension_numbers<[1], [0], [0], [1], [0, 0, 1, 1], [], []>} : vector<16x4xf32>, vector<4x16xf32>, vector<16x16xf32> -> vector<16x16xf32>
    %625 = vector.extract_strided_slice %624 {offsets = [0, 0], sizes = [8, 16], strides = [1, 1]} : vector<16x16xf32> to vector<8x16xf32>
    %cst_645 = arith.constant dense<0.000000e+00> : vector<8x32xf32>
    %626 = tpu.matmul %625, %2, %cst_645 {dimension_numbers = #tpu.dot_dimension_numbers<[1], [0], [0], [1], [0, 0, 1, 1], [], []>} : vector<8x16xf32>, vector<16x32xf32>, vector<8x32xf32> -> vector<8x32xf32>
    %627 = vector.extract_strided_slice %624 {offsets = [8, 0], sizes = [8, 16], strides = [1, 1]} : vector<16x16xf32> to vector<8x16xf32>
    %cst_646 = arith.constant dense<0.000000e+00> : vector<8x32xf32>
    %628 = tpu.matmul %627, %3, %cst_646 {dimension_numbers = #tpu.dot_dimension_numbers<[1], [0], [0], [1], [0, 0, 1, 1], [], []>} : vector<8x16xf32>, vector<16x32xf32>, vector<8x32xf32> -> vector<8x32xf32>
    %629 = arith.addf %626, %628 : vector<8x32xf32>
    %630 = vector.broadcast %1 : vector<8x1xf32> to vector<8x32xf32>
    %631 = arith.addf %629, %630 : vector<8x32xf32>
    %632 = vector.extract_strided_slice %631 {offsets = [0, 0], sizes = [4, 32], strides = [1, 1]} : vector<8x32xf32> to vector<4x32xf32>
    %c0_647 = arith.constant 0 : index
    %c0_648 = arith.constant 0 : index
    %c24 = arith.constant 24 : index
    %c0_649 = arith.constant 0 : index
    %633 = vector.load %arg13[%c0_647, %c0_648, %c24, %c0_649] : memref<1x20x32x32xf32, #tpu.memory_space<vmem>>, vector<1x4x1x32xf32>
    %634 = vector.shape_cast %633 : vector<1x4x1x32xf32> to vector<4x32xf32>
    %635 = vector.shape_cast %632 : vector<4x32xf32> to vector<1x4x1x32xf32>
    tpu.vector_store %arg13[%c0_647, %c0_648, %c24, %c0_649], %635 {strides = array<i32>} : memref<1x20x32x32xf32, #tpu.memory_space<vmem>>, vector<1x4x1x32xf32>,
    %636 = vector.extract_strided_slice %631 {offsets = [4, 0], sizes = [4, 32], strides = [1, 1]} : vector<8x32xf32> to vector<4x32xf32>
    %c0_650 = arith.constant 0 : index
    %c0_651 = arith.constant 0 : index
    %c25 = arith.constant 25 : index
    %c0_652 = arith.constant 0 : index
    %637 = vector.load %arg13[%c0_650, %c0_651, %c25, %c0_652] : memref<1x20x32x32xf32, #tpu.memory_space<vmem>>, vector<1x4x1x32xf32>
    %638 = vector.shape_cast %637 : vector<1x4x1x32xf32> to vector<4x32xf32>
    %639 = vector.shape_cast %636 : vector<4x32xf32> to vector<1x4x1x32xf32>
    tpu.vector_store %arg13[%c0_650, %c0_651, %c25, %c0_652], %639 {strides = array<i32>} : memref<1x20x32x32xf32, #tpu.memory_space<vmem>>, vector<1x4x1x32xf32>,
    %c0_653 = arith.constant 0 : index
    %c0_654 = arith.constant 0 : index
    %c12_655 = arith.constant 12 : index
    %c0_656 = arith.constant 0 : index
    %640 = vector.load %arg4[%c0_653, %c0_654, %c12_655, %c0_656] : memref<1x4x16x16xf32, #tpu.memory_space<vmem>>, vector<1x4x1x16xf32>
    %641 = vector.shape_cast %640 : vector<1x4x1x16xf32> to vector<4x16xf32>
    %cst_657 = arith.constant dense<0.000000e+00> : vector<4x64xf32>
    %642 = tpu.matmul %641, %5, %cst_657 {dimension_numbers = #tpu.dot_dimension_numbers<[1], [0], [0], [1], [0, 0, 1, 1], [], []>} : vector<4x16xf32>, vector<16x64xf32>, vector<4x64xf32> -> vector<4x64xf32>
    %643 = vector.extract_strided_slice %642 {offsets = [0, 0], sizes = [4, 32], strides = [1, 1]} : vector<4x64xf32> to vector<4x32xf32>
    %c0_658 = arith.constant 0 : index
    %c4_659 = arith.constant 4 : index
    %c24_660 = arith.constant 24 : index
    %c0_661 = arith.constant 0 : index
    %644 = vector.load %arg13[%c0_658, %c4_659, %c24_660, %c0_661] : memref<1x20x32x32xf32, #tpu.memory_space<vmem>>, vector<1x4x1x32xf32>
    %645 = vector.shape_cast %644 : vector<1x4x1x32xf32> to vector<4x32xf32>
    %646 = vector.shape_cast %643 : vector<4x32xf32> to vector<1x4x1x32xf32>
    tpu.vector_store %arg13[%c0_658, %c4_659, %c24_660, %c0_661], %646 {strides = array<i32>} : memref<1x20x32x32xf32, #tpu.memory_space<vmem>>, vector<1x4x1x32xf32>,
    %647 = vector.extract_strided_slice %642 {offsets = [0, 32], sizes = [4, 32], strides = [1, 1]} : vector<4x64xf32> to vector<4x32xf32>
    %c0_662 = arith.constant 0 : index
    %c4_663 = arith.constant 4 : index
    %c25_664 = arith.constant 25 : index
    %c0_665 = arith.constant 0 : index
    %648 = vector.load %arg13[%c0_662, %c4_663, %c25_664, %c0_665] : memref<1x20x32x32xf32, #tpu.memory_space<vmem>>, vector<1x4x1x32xf32>
    %649 = vector.shape_cast %648 : vector<1x4x1x32xf32> to vector<4x32xf32>
    %650 = vector.shape_cast %647 : vector<4x32xf32> to vector<1x4x1x32xf32>
    tpu.vector_store %arg13[%c0_662, %c4_663, %c25_664, %c0_665], %650 {strides = array<i32>} : memref<1x20x32x32xf32, #tpu.memory_space<vmem>>, vector<1x4x1x32xf32>,
    %c0_666 = arith.constant 0 : index
    %c0_667 = arith.constant 0 : index
    %c12_668 = arith.constant 12 : index
    %c0_669 = arith.constant 0 : index
    %651 = vector.load %arg5[%c0_666, %c0_667, %c12_668, %c0_669] : memref<1x4x16x16xf32, #tpu.memory_space<vmem>>, vector<1x4x1x16xf32>
    %652 = vector.shape_cast %651 : vector<1x4x1x16xf32> to vector<4x16xf32>
    %cst_670 = arith.constant dense<0.000000e+00> : vector<4x64xf32>
    %653 = tpu.matmul %652, %7, %cst_670 {dimension_numbers = #tpu.dot_dimension_numbers<[1], [0], [0], [1], [0, 0, 1, 1], [], []>} : vector<4x16xf32>, vector<16x64xf32>, vector<4x64xf32> -> vector<4x64xf32>
    %654 = vector.extract_strided_slice %653 {offsets = [0, 0], sizes = [4, 32], strides = [1, 1]} : vector<4x64xf32> to vector<4x32xf32>
    %c0_671 = arith.constant 0 : index
    %c8_672 = arith.constant 8 : index
    %c24_673 = arith.constant 24 : index
    %c0_674 = arith.constant 0 : index
    %655 = vector.load %arg13[%c0_671, %c8_672, %c24_673, %c0_674] : memref<1x20x32x32xf32, #tpu.memory_space<vmem>>, vector<1x4x1x32xf32>
    %656 = vector.shape_cast %655 : vector<1x4x1x32xf32> to vector<4x32xf32>
    %657 = vector.shape_cast %654 : vector<4x32xf32> to vector<1x4x1x32xf32>
    tpu.vector_store %arg13[%c0_671, %c8_672, %c24_673, %c0_674], %657 {strides = array<i32>} : memref<1x20x32x32xf32, #tpu.memory_space<vmem>>, vector<1x4x1x32xf32>,
    %658 = vector.extract_strided_slice %653 {offsets = [0, 32], sizes = [4, 32], strides = [1, 1]} : vector<4x64xf32> to vector<4x32xf32>
    %c0_675 = arith.constant 0 : index
    %c8_676 = arith.constant 8 : index
    %c25_677 = arith.constant 25 : index
    %c0_678 = arith.constant 0 : index
    %659 = vector.load %arg13[%c0_675, %c8_676, %c25_677, %c0_678] : memref<1x20x32x32xf32, #tpu.memory_space<vmem>>, vector<1x4x1x32xf32>
    %660 = vector.shape_cast %659 : vector<1x4x1x32xf32> to vector<4x32xf32>
    %661 = vector.shape_cast %658 : vector<4x32xf32> to vector<1x4x1x32xf32>
    tpu.vector_store %arg13[%c0_675, %c8_676, %c25_677, %c0_678], %661 {strides = array<i32>} : memref<1x20x32x32xf32, #tpu.memory_space<vmem>>, vector<1x4x1x32xf32>,
    %c0_679 = arith.constant 0 : index
    %c0_680 = arith.constant 0 : index
    %c12_681 = arith.constant 12 : index
    %c0_682 = arith.constant 0 : index
    %662 = vector.load %arg6[%c0_679, %c0_680, %c12_681, %c0_682] : memref<1x4x16x16xf32, #tpu.memory_space<vmem>>, vector<1x4x1x16xf32>
    %663 = vector.shape_cast %662 : vector<1x4x1x16xf32> to vector<4x16xf32>
    %cst_683 = arith.constant dense<0.000000e+00> : vector<4x64xf32>
    %664 = tpu.matmul %663, %9, %cst_683 {dimension_numbers = #tpu.dot_dimension_numbers<[1], [0], [0], [1], [0, 0, 1, 1], [], []>} : vector<4x16xf32>, vector<16x64xf32>, vector<4x64xf32> -> vector<4x64xf32>
    %665 = vector.extract_strided_slice %664 {offsets = [0, 0], sizes = [4, 32], strides = [1, 1]} : vector<4x64xf32> to vector<4x32xf32>
    %c0_684 = arith.constant 0 : index
    %c12_685 = arith.constant 12 : index
    %c24_686 = arith.constant 24 : index
    %c0_687 = arith.constant 0 : index
    %666 = vector.load %arg13[%c0_684, %c12_685, %c24_686, %c0_687] : memref<1x20x32x32xf32, #tpu.memory_space<vmem>>, vector<1x4x1x32xf32>
    %667 = vector.shape_cast %666 : vector<1x4x1x32xf32> to vector<4x32xf32>
    %668 = vector.shape_cast %665 : vector<4x32xf32> to vector<1x4x1x32xf32>
    tpu.vector_store %arg13[%c0_684, %c12_685, %c24_686, %c0_687], %668 {strides = array<i32>} : memref<1x20x32x32xf32, #tpu.memory_space<vmem>>, vector<1x4x1x32xf32>,
    %669 = vector.extract_strided_slice %664 {offsets = [0, 32], sizes = [4, 32], strides = [1, 1]} : vector<4x64xf32> to vector<4x32xf32>
    %c0_688 = arith.constant 0 : index
    %c12_689 = arith.constant 12 : index
    %c25_690 = arith.constant 25 : index
    %c0_691 = arith.constant 0 : index
    %670 = vector.load %arg13[%c0_688, %c12_689, %c25_690, %c0_691] : memref<1x20x32x32xf32, #tpu.memory_space<vmem>>, vector<1x4x1x32xf32>
    %671 = vector.shape_cast %670 : vector<1x4x1x32xf32> to vector<4x32xf32>
    %672 = vector.shape_cast %669 : vector<4x32xf32> to vector<1x4x1x32xf32>
    tpu.vector_store %arg13[%c0_688, %c12_689, %c25_690, %c0_691], %672 {strides = array<i32>} : memref<1x20x32x32xf32, #tpu.memory_space<vmem>>, vector<1x4x1x32xf32>,
    %c0_692 = arith.constant 0 : index
    %c0_693 = arith.constant 0 : index
    %c13_694 = arith.constant 13 : index
    %c0_695 = arith.constant 0 : index
    %673 = vector.load %arg3[%c0_692, %c0_693, %c13_694, %c0_695] : memref<1x4x16x16xf32, #tpu.memory_space<vmem>>, vector<1x4x1x16xf32>
    %674 = vector.shape_cast %673 : vector<1x4x1x16xf32> to vector<4x16xf32>
    %cst_696 = arith.constant dense<0.000000e+00> : vector<16x16xf32>
    %675 = tpu.matmul %0, %674, %cst_696 {dimension_numbers = #tpu.dot_dimension_numbers<[1], [0], [0], [1], [0, 0, 1, 1], [], []>} : vector<16x4xf32>, vector<4x16xf32>, vector<16x16xf32> -> vector<16x16xf32>
    %676 = vector.extract_strided_slice %675 {offsets = [0, 0], sizes = [8, 16], strides = [1, 1]} : vector<16x16xf32> to vector<8x16xf32>
    %cst_697 = arith.constant dense<0.000000e+00> : vector<8x32xf32>
    %677 = tpu.matmul %676, %2, %cst_697 {dimension_numbers = #tpu.dot_dimension_numbers<[1], [0], [0], [1], [0, 0, 1, 1], [], []>} : vector<8x16xf32>, vector<16x32xf32>, vector<8x32xf32> -> vector<8x32xf32>
    %678 = vector.extract_strided_slice %675 {offsets = [8, 0], sizes = [8, 16], strides = [1, 1]} : vector<16x16xf32> to vector<8x16xf32>
    %cst_698 = arith.constant dense<0.000000e+00> : vector<8x32xf32>
    %679 = tpu.matmul %678, %3, %cst_698 {dimension_numbers = #tpu.dot_dimension_numbers<[1], [0], [0], [1], [0, 0, 1, 1], [], []>} : vector<8x16xf32>, vector<16x32xf32>, vector<8x32xf32> -> vector<8x32xf32>
    %680 = arith.addf %677, %679 : vector<8x32xf32>
    %681 = vector.broadcast %1 : vector<8x1xf32> to vector<8x32xf32>
    %682 = arith.addf %680, %681 : vector<8x32xf32>
    %683 = vector.extract_strided_slice %682 {offsets = [0, 0], sizes = [4, 32], strides = [1, 1]} : vector<8x32xf32> to vector<4x32xf32>
    %c0_699 = arith.constant 0 : index
    %c0_700 = arith.constant 0 : index
    %c26 = arith.constant 26 : index
    %c0_701 = arith.constant 0 : index
    %684 = vector.load %arg13[%c0_699, %c0_700, %c26, %c0_701] : memref<1x20x32x32xf32, #tpu.memory_space<vmem>>, vector<1x4x1x32xf32>
    %685 = vector.shape_cast %684 : vector<1x4x1x32xf32> to vector<4x32xf32>
    %686 = vector.shape_cast %683 : vector<4x32xf32> to vector<1x4x1x32xf32>
    tpu.vector_store %arg13[%c0_699, %c0_700, %c26, %c0_701], %686 {strides = array<i32>} : memref<1x20x32x32xf32, #tpu.memory_space<vmem>>, vector<1x4x1x32xf32>,
    %687 = vector.extract_strided_slice %682 {offsets = [4, 0], sizes = [4, 32], strides = [1, 1]} : vector<8x32xf32> to vector<4x32xf32>
    %c0_702 = arith.constant 0 : index
    %c0_703 = arith.constant 0 : index
    %c27 = arith.constant 27 : index
    %c0_704 = arith.constant 0 : index
    %688 = vector.load %arg13[%c0_702, %c0_703, %c27, %c0_704] : memref<1x20x32x32xf32, #tpu.memory_space<vmem>>, vector<1x4x1x32xf32>
    %689 = vector.shape_cast %688 : vector<1x4x1x32xf32> to vector<4x32xf32>
    %690 = vector.shape_cast %687 : vector<4x32xf32> to vector<1x4x1x32xf32>
    tpu.vector_store %arg13[%c0_702, %c0_703, %c27, %c0_704], %690 {strides = array<i32>} : memref<1x20x32x32xf32, #tpu.memory_space<vmem>>, vector<1x4x1x32xf32>,
    %c0_705 = arith.constant 0 : index
    %c0_706 = arith.constant 0 : index
    %c13_707 = arith.constant 13 : index
    %c0_708 = arith.constant 0 : index
    %691 = vector.load %arg4[%c0_705, %c0_706, %c13_707, %c0_708] : memref<1x4x16x16xf32, #tpu.memory_space<vmem>>, vector<1x4x1x16xf32>
    %692 = vector.shape_cast %691 : vector<1x4x1x16xf32> to vector<4x16xf32>
    %cst_709 = arith.constant dense<0.000000e+00> : vector<4x64xf32>
    %693 = tpu.matmul %692, %5, %cst_709 {dimension_numbers = #tpu.dot_dimension_numbers<[1], [0], [0], [1], [0, 0, 1, 1], [], []>} : vector<4x16xf32>, vector<16x64xf32>, vector<4x64xf32> -> vector<4x64xf32>
    %694 = vector.extract_strided_slice %693 {offsets = [0, 0], sizes = [4, 32], strides = [1, 1]} : vector<4x64xf32> to vector<4x32xf32>
    %c0_710 = arith.constant 0 : index
    %c4_711 = arith.constant 4 : index
    %c26_712 = arith.constant 26 : index
    %c0_713 = arith.constant 0 : index
    %695 = vector.load %arg13[%c0_710, %c4_711, %c26_712, %c0_713] : memref<1x20x32x32xf32, #tpu.memory_space<vmem>>, vector<1x4x1x32xf32>
    %696 = vector.shape_cast %695 : vector<1x4x1x32xf32> to vector<4x32xf32>
    %697 = vector.shape_cast %694 : vector<4x32xf32> to vector<1x4x1x32xf32>
    tpu.vector_store %arg13[%c0_710, %c4_711, %c26_712, %c0_713], %697 {strides = array<i32>} : memref<1x20x32x32xf32, #tpu.memory_space<vmem>>, vector<1x4x1x32xf32>,
    %698 = vector.extract_strided_slice %693 {offsets = [0, 32], sizes = [4, 32], strides = [1, 1]} : vector<4x64xf32> to vector<4x32xf32>
    %c0_714 = arith.constant 0 : index
    %c4_715 = arith.constant 4 : index
    %c27_716 = arith.constant 27 : index
    %c0_717 = arith.constant 0 : index
    %699 = vector.load %arg13[%c0_714, %c4_715, %c27_716, %c0_717] : memref<1x20x32x32xf32, #tpu.memory_space<vmem>>, vector<1x4x1x32xf32>
    %700 = vector.shape_cast %699 : vector<1x4x1x32xf32> to vector<4x32xf32>
    %701 = vector.shape_cast %698 : vector<4x32xf32> to vector<1x4x1x32xf32>
    tpu.vector_store %arg13[%c0_714, %c4_715, %c27_716, %c0_717], %701 {strides = array<i32>} : memref<1x20x32x32xf32, #tpu.memory_space<vmem>>, vector<1x4x1x32xf32>,
    %c0_718 = arith.constant 0 : index
    %c0_719 = arith.constant 0 : index
    %c13_720 = arith.constant 13 : index
    %c0_721 = arith.constant 0 : index
    %702 = vector.load %arg5[%c0_718, %c0_719, %c13_720, %c0_721] : memref<1x4x16x16xf32, #tpu.memory_space<vmem>>, vector<1x4x1x16xf32>
    %703 = vector.shape_cast %702 : vector<1x4x1x16xf32> to vector<4x16xf32>
    %cst_722 = arith.constant dense<0.000000e+00> : vector<4x64xf32>
    %704 = tpu.matmul %703, %7, %cst_722 {dimension_numbers = #tpu.dot_dimension_numbers<[1], [0], [0], [1], [0, 0, 1, 1], [], []>} : vector<4x16xf32>, vector<16x64xf32>, vector<4x64xf32> -> vector<4x64xf32>
    %705 = vector.extract_strided_slice %704 {offsets = [0, 0], sizes = [4, 32], strides = [1, 1]} : vector<4x64xf32> to vector<4x32xf32>
    %c0_723 = arith.constant 0 : index
    %c8_724 = arith.constant 8 : index
    %c26_725 = arith.constant 26 : index
    %c0_726 = arith.constant 0 : index
    %706 = vector.load %arg13[%c0_723, %c8_724, %c26_725, %c0_726] : memref<1x20x32x32xf32, #tpu.memory_space<vmem>>, vector<1x4x1x32xf32>
    %707 = vector.shape_cast %706 : vector<1x4x1x32xf32> to vector<4x32xf32>
    %708 = vector.shape_cast %705 : vector<4x32xf32> to vector<1x4x1x32xf32>
    tpu.vector_store %arg13[%c0_723, %c8_724, %c26_725, %c0_726], %708 {strides = array<i32>} : memref<1x20x32x32xf32, #tpu.memory_space<vmem>>, vector<1x4x1x32xf32>,
    %709 = vector.extract_strided_slice %704 {offsets = [0, 32], sizes = [4, 32], strides = [1, 1]} : vector<4x64xf32> to vector<4x32xf32>
    %c0_727 = arith.constant 0 : index
    %c8_728 = arith.constant 8 : index
    %c27_729 = arith.constant 27 : index
    %c0_730 = arith.constant 0 : index
    %710 = vector.load %arg13[%c0_727, %c8_728, %c27_729, %c0_730] : memref<1x20x32x32xf32, #tpu.memory_space<vmem>>, vector<1x4x1x32xf32>
    %711 = vector.shape_cast %710 : vector<1x4x1x32xf32> to vector<4x32xf32>
    %712 = vector.shape_cast %709 : vector<4x32xf32> to vector<1x4x1x32xf32>
    tpu.vector_store %arg13[%c0_727, %c8_728, %c27_729, %c0_730], %712 {strides = array<i32>} : memref<1x20x32x32xf32, #tpu.memory_space<vmem>>, vector<1x4x1x32xf32>,
    %c0_731 = arith.constant 0 : index
    %c0_732 = arith.constant 0 : index
    %c13_733 = arith.constant 13 : index
    %c0_734 = arith.constant 0 : index
    %713 = vector.load %arg6[%c0_731, %c0_732, %c13_733, %c0_734] : memref<1x4x16x16xf32, #tpu.memory_space<vmem>>, vector<1x4x1x16xf32>
    %714 = vector.shape_cast %713 : vector<1x4x1x16xf32> to vector<4x16xf32>
    %cst_735 = arith.constant dense<0.000000e+00> : vector<4x64xf32>
    %715 = tpu.matmul %714, %9, %cst_735 {dimension_numbers = #tpu.dot_dimension_numbers<[1], [0], [0], [1], [0, 0, 1, 1], [], []>} : vector<4x16xf32>, vector<16x64xf32>, vector<4x64xf32> -> vector<4x64xf32>
    %716 = vector.extract_strided_slice %715 {offsets = [0, 0], sizes = [4, 32], strides = [1, 1]} : vector<4x64xf32> to vector<4x32xf32>
    %c0_736 = arith.constant 0 : index
    %c12_737 = arith.constant 12 : index
    %c26_738 = arith.constant 26 : index
    %c0_739 = arith.constant 0 : index
    %717 = vector.load %arg13[%c0_736, %c12_737, %c26_738, %c0_739] : memref<1x20x32x32xf32, #tpu.memory_space<vmem>>, vector<1x4x1x32xf32>
    %718 = vector.shape_cast %717 : vector<1x4x1x32xf32> to vector<4x32xf32>
    %719 = vector.shape_cast %716 : vector<4x32xf32> to vector<1x4x1x32xf32>
    tpu.vector_store %arg13[%c0_736, %c12_737, %c26_738, %c0_739], %719 {strides = array<i32>} : memref<1x20x32x32xf32, #tpu.memory_space<vmem>>, vector<1x4x1x32xf32>,
    %720 = vector.extract_strided_slice %715 {offsets = [0, 32], sizes = [4, 32], strides = [1, 1]} : vector<4x64xf32> to vector<4x32xf32>
    %c0_740 = arith.constant 0 : index
    %c12_741 = arith.constant 12 : index
    %c27_742 = arith.constant 27 : index
    %c0_743 = arith.constant 0 : index
    %721 = vector.load %arg13[%c0_740, %c12_741, %c27_742, %c0_743] : memref<1x20x32x32xf32, #tpu.memory_space<vmem>>, vector<1x4x1x32xf32>
    %722 = vector.shape_cast %721 : vector<1x4x1x32xf32> to vector<4x32xf32>
    %723 = vector.shape_cast %720 : vector<4x32xf32> to vector<1x4x1x32xf32>
    tpu.vector_store %arg13[%c0_740, %c12_741, %c27_742, %c0_743], %723 {strides = array<i32>} : memref<1x20x32x32xf32, #tpu.memory_space<vmem>>, vector<1x4x1x32xf32>,
    %c0_744 = arith.constant 0 : index
    %c0_745 = arith.constant 0 : index
    %c14_746 = arith.constant 14 : index
    %c0_747 = arith.constant 0 : index
    %724 = vector.load %arg3[%c0_744, %c0_745, %c14_746, %c0_747] : memref<1x4x16x16xf32, #tpu.memory_space<vmem>>, vector<1x4x1x16xf32>
    %725 = vector.shape_cast %724 : vector<1x4x1x16xf32> to vector<4x16xf32>
    %cst_748 = arith.constant dense<0.000000e+00> : vector<16x16xf32>
    %726 = tpu.matmul %0, %725, %cst_748 {dimension_numbers = #tpu.dot_dimension_numbers<[1], [0], [0], [1], [0, 0, 1, 1], [], []>} : vector<16x4xf32>, vector<4x16xf32>, vector<16x16xf32> -> vector<16x16xf32>
    %727 = vector.extract_strided_slice %726 {offsets = [0, 0], sizes = [8, 16], strides = [1, 1]} : vector<16x16xf32> to vector<8x16xf32>
    %cst_749 = arith.constant dense<0.000000e+00> : vector<8x32xf32>
    %728 = tpu.matmul %727, %2, %cst_749 {dimension_numbers = #tpu.dot_dimension_numbers<[1], [0], [0], [1], [0, 0, 1, 1], [], []>} : vector<8x16xf32>, vector<16x32xf32>, vector<8x32xf32> -> vector<8x32xf32>
    %729 = vector.extract_strided_slice %726 {offsets = [8, 0], sizes = [8, 16], strides = [1, 1]} : vector<16x16xf32> to vector<8x16xf32>
    %cst_750 = arith.constant dense<0.000000e+00> : vector<8x32xf32>
    %730 = tpu.matmul %729, %3, %cst_750 {dimension_numbers = #tpu.dot_dimension_numbers<[1], [0], [0], [1], [0, 0, 1, 1], [], []>} : vector<8x16xf32>, vector<16x32xf32>, vector<8x32xf32> -> vector<8x32xf32>
    %731 = arith.addf %728, %730 : vector<8x32xf32>
    %732 = vector.broadcast %1 : vector<8x1xf32> to vector<8x32xf32>
    %733 = arith.addf %731, %732 : vector<8x32xf32>
    %734 = vector.extract_strided_slice %733 {offsets = [0, 0], sizes = [4, 32], strides = [1, 1]} : vector<8x32xf32> to vector<4x32xf32>
    %c0_751 = arith.constant 0 : index
    %c0_752 = arith.constant 0 : index
    %c28 = arith.constant 28 : index
    %c0_753 = arith.constant 0 : index
    %735 = vector.load %arg13[%c0_751, %c0_752, %c28, %c0_753] : memref<1x20x32x32xf32, #tpu.memory_space<vmem>>, vector<1x4x1x32xf32>
    %736 = vector.shape_cast %735 : vector<1x4x1x32xf32> to vector<4x32xf32>
    %737 = vector.shape_cast %734 : vector<4x32xf32> to vector<1x4x1x32xf32>
    tpu.vector_store %arg13[%c0_751, %c0_752, %c28, %c0_753], %737 {strides = array<i32>} : memref<1x20x32x32xf32, #tpu.memory_space<vmem>>, vector<1x4x1x32xf32>,
    %738 = vector.extract_strided_slice %733 {offsets = [4, 0], sizes = [4, 32], strides = [1, 1]} : vector<8x32xf32> to vector<4x32xf32>
    %c0_754 = arith.constant 0 : index
    %c0_755 = arith.constant 0 : index
    %c29 = arith.constant 29 : index
    %c0_756 = arith.constant 0 : index
    %739 = vector.load %arg13[%c0_754, %c0_755, %c29, %c0_756] : memref<1x20x32x32xf32, #tpu.memory_space<vmem>>, vector<1x4x1x32xf32>
    %740 = vector.shape_cast %739 : vector<1x4x1x32xf32> to vector<4x32xf32>
    %741 = vector.shape_cast %738 : vector<4x32xf32> to vector<1x4x1x32xf32>
    tpu.vector_store %arg13[%c0_754, %c0_755, %c29, %c0_756], %741 {strides = array<i32>} : memref<1x20x32x32xf32, #tpu.memory_space<vmem>>, vector<1x4x1x32xf32>,
    %c0_757 = arith.constant 0 : index
    %c0_758 = arith.constant 0 : index
    %c14_759 = arith.constant 14 : index
    %c0_760 = arith.constant 0 : index
    %742 = vector.load %arg4[%c0_757, %c0_758, %c14_759, %c0_760] : memref<1x4x16x16xf32, #tpu.memory_space<vmem>>, vector<1x4x1x16xf32>
    %743 = vector.shape_cast %742 : vector<1x4x1x16xf32> to vector<4x16xf32>
    %cst_761 = arith.constant dense<0.000000e+00> : vector<4x64xf32>
    %744 = tpu.matmul %743, %5, %cst_761 {dimension_numbers = #tpu.dot_dimension_numbers<[1], [0], [0], [1], [0, 0, 1, 1], [], []>} : vector<4x16xf32>, vector<16x64xf32>, vector<4x64xf32> -> vector<4x64xf32>
    %745 = vector.extract_strided_slice %744 {offsets = [0, 0], sizes = [4, 32], strides = [1, 1]} : vector<4x64xf32> to vector<4x32xf32>
    %c0_762 = arith.constant 0 : index
    %c4_763 = arith.constant 4 : index
    %c28_764 = arith.constant 28 : index
    %c0_765 = arith.constant 0 : index
    %746 = vector.load %arg13[%c0_762, %c4_763, %c28_764, %c0_765] : memref<1x20x32x32xf32, #tpu.memory_space<vmem>>, vector<1x4x1x32xf32>
    %747 = vector.shape_cast %746 : vector<1x4x1x32xf32> to vector<4x32xf32>
    %748 = vector.shape_cast %745 : vector<4x32xf32> to vector<1x4x1x32xf32>
    tpu.vector_store %arg13[%c0_762, %c4_763, %c28_764, %c0_765], %748 {strides = array<i32>} : memref<1x20x32x32xf32, #tpu.memory_space<vmem>>, vector<1x4x1x32xf32>,
    %749 = vector.extract_strided_slice %744 {offsets = [0, 32], sizes = [4, 32], strides = [1, 1]} : vector<4x64xf32> to vector<4x32xf32>
    %c0_766 = arith.constant 0 : index
    %c4_767 = arith.constant 4 : index
    %c29_768 = arith.constant 29 : index
    %c0_769 = arith.constant 0 : index
    %750 = vector.load %arg13[%c0_766, %c4_767, %c29_768, %c0_769] : memref<1x20x32x32xf32, #tpu.memory_space<vmem>>, vector<1x4x1x32xf32>
    %751 = vector.shape_cast %750 : vector<1x4x1x32xf32> to vector<4x32xf32>
    %752 = vector.shape_cast %749 : vector<4x32xf32> to vector<1x4x1x32xf32>
    tpu.vector_store %arg13[%c0_766, %c4_767, %c29_768, %c0_769], %752 {strides = array<i32>} : memref<1x20x32x32xf32, #tpu.memory_space<vmem>>, vector<1x4x1x32xf32>,
    %c0_770 = arith.constant 0 : index
    %c0_771 = arith.constant 0 : index
    %c14_772 = arith.constant 14 : index
    %c0_773 = arith.constant 0 : index
    %753 = vector.load %arg5[%c0_770, %c0_771, %c14_772, %c0_773] : memref<1x4x16x16xf32, #tpu.memory_space<vmem>>, vector<1x4x1x16xf32>
    %754 = vector.shape_cast %753 : vector<1x4x1x16xf32> to vector<4x16xf32>
    %cst_774 = arith.constant dense<0.000000e+00> : vector<4x64xf32>
    %755 = tpu.matmul %754, %7, %cst_774 {dimension_numbers = #tpu.dot_dimension_numbers<[1], [0], [0], [1], [0, 0, 1, 1], [], []>} : vector<4x16xf32>, vector<16x64xf32>, vector<4x64xf32> -> vector<4x64xf32>
    %756 = vector.extract_strided_slice %755 {offsets = [0, 0], sizes = [4, 32], strides = [1, 1]} : vector<4x64xf32> to vector<4x32xf32>
    %c0_775 = arith.constant 0 : index
    %c8_776 = arith.constant 8 : index
    %c28_777 = arith.constant 28 : index
    %c0_778 = arith.constant 0 : index
    %757 = vector.load %arg13[%c0_775, %c8_776, %c28_777, %c0_778] : memref<1x20x32x32xf32, #tpu.memory_space<vmem>>, vector<1x4x1x32xf32>
    %758 = vector.shape_cast %757 : vector<1x4x1x32xf32> to vector<4x32xf32>
    %759 = vector.shape_cast %756 : vector<4x32xf32> to vector<1x4x1x32xf32>
    tpu.vector_store %arg13[%c0_775, %c8_776, %c28_777, %c0_778], %759 {strides = array<i32>} : memref<1x20x32x32xf32, #tpu.memory_space<vmem>>, vector<1x4x1x32xf32>,
    %760 = vector.extract_strided_slice %755 {offsets = [0, 32], sizes = [4, 32], strides = [1, 1]} : vector<4x64xf32> to vector<4x32xf32>
    %c0_779 = arith.constant 0 : index
    %c8_780 = arith.constant 8 : index
    %c29_781 = arith.constant 29 : index
    %c0_782 = arith.constant 0 : index
    %761 = vector.load %arg13[%c0_779, %c8_780, %c29_781, %c0_782] : memref<1x20x32x32xf32, #tpu.memory_space<vmem>>, vector<1x4x1x32xf32>
    %762 = vector.shape_cast %761 : vector<1x4x1x32xf32> to vector<4x32xf32>
    %763 = vector.shape_cast %760 : vector<4x32xf32> to vector<1x4x1x32xf32>
    tpu.vector_store %arg13[%c0_779, %c8_780, %c29_781, %c0_782], %763 {strides = array<i32>} : memref<1x20x32x32xf32, #tpu.memory_space<vmem>>, vector<1x4x1x32xf32>,
    %c0_783 = arith.constant 0 : index
    %c0_784 = arith.constant 0 : index
    %c14_785 = arith.constant 14 : index
    %c0_786 = arith.constant 0 : index
    %764 = vector.load %arg6[%c0_783, %c0_784, %c14_785, %c0_786] : memref<1x4x16x16xf32, #tpu.memory_space<vmem>>, vector<1x4x1x16xf32>
    %765 = vector.shape_cast %764 : vector<1x4x1x16xf32> to vector<4x16xf32>
    %cst_787 = arith.constant dense<0.000000e+00> : vector<4x64xf32>
    %766 = tpu.matmul %765, %9, %cst_787 {dimension_numbers = #tpu.dot_dimension_numbers<[1], [0], [0], [1], [0, 0, 1, 1], [], []>} : vector<4x16xf32>, vector<16x64xf32>, vector<4x64xf32> -> vector<4x64xf32>
    %767 = vector.extract_strided_slice %766 {offsets = [0, 0], sizes = [4, 32], strides = [1, 1]} : vector<4x64xf32> to vector<4x32xf32>
    %c0_788 = arith.constant 0 : index
    %c12_789 = arith.constant 12 : index
    %c28_790 = arith.constant 28 : index
    %c0_791 = arith.constant 0 : index
    %768 = vector.load %arg13[%c0_788, %c12_789, %c28_790, %c0_791] : memref<1x20x32x32xf32, #tpu.memory_space<vmem>>, vector<1x4x1x32xf32>
    %769 = vector.shape_cast %768 : vector<1x4x1x32xf32> to vector<4x32xf32>
    %770 = vector.shape_cast %767 : vector<4x32xf32> to vector<1x4x1x32xf32>
    tpu.vector_store %arg13[%c0_788, %c12_789, %c28_790, %c0_791], %770 {strides = array<i32>} : memref<1x20x32x32xf32, #tpu.memory_space<vmem>>, vector<1x4x1x32xf32>,
    %771 = vector.extract_strided_slice %766 {offsets = [0, 32], sizes = [4, 32], strides = [1, 1]} : vector<4x64xf32> to vector<4x32xf32>
    %c0_792 = arith.constant 0 : index
    %c12_793 = arith.constant 12 : index
    %c29_794 = arith.constant 29 : index
    %c0_795 = arith.constant 0 : index
    %772 = vector.load %arg13[%c0_792, %c12_793, %c29_794, %c0_795] : memref<1x20x32x32xf32, #tpu.memory_space<vmem>>, vector<1x4x1x32xf32>
    %773 = vector.shape_cast %772 : vector<1x4x1x32xf32> to vector<4x32xf32>
    %774 = vector.shape_cast %771 : vector<4x32xf32> to vector<1x4x1x32xf32>
    tpu.vector_store %arg13[%c0_792, %c12_793, %c29_794, %c0_795], %774 {strides = array<i32>} : memref<1x20x32x32xf32, #tpu.memory_space<vmem>>, vector<1x4x1x32xf32>,
    %c0_796 = arith.constant 0 : index
    %c0_797 = arith.constant 0 : index
    %c15_798 = arith.constant 15 : index
    %c0_799 = arith.constant 0 : index
    %775 = vector.load %arg3[%c0_796, %c0_797, %c15_798, %c0_799] : memref<1x4x16x16xf32, #tpu.memory_space<vmem>>, vector<1x4x1x16xf32>
    %776 = vector.shape_cast %775 : vector<1x4x1x16xf32> to vector<4x16xf32>
    %cst_800 = arith.constant dense<0.000000e+00> : vector<16x16xf32>
    %777 = tpu.matmul %0, %776, %cst_800 {dimension_numbers = #tpu.dot_dimension_numbers<[1], [0], [0], [1], [0, 0, 1, 1], [], []>} : vector<16x4xf32>, vector<4x16xf32>, vector<16x16xf32> -> vector<16x16xf32>
    %778 = vector.extract_strided_slice %777 {offsets = [0, 0], sizes = [8, 16], strides = [1, 1]} : vector<16x16xf32> to vector<8x16xf32>
    %cst_801 = arith.constant dense<0.000000e+00> : vector<8x32xf32>
    %779 = tpu.matmul %778, %2, %cst_801 {dimension_numbers = #tpu.dot_dimension_numbers<[1], [0], [0], [1], [0, 0, 1, 1], [], []>} : vector<8x16xf32>, vector<16x32xf32>, vector<8x32xf32> -> vector<8x32xf32>
    %780 = vector.extract_strided_slice %777 {offsets = [8, 0], sizes = [8, 16], strides = [1, 1]} : vector<16x16xf32> to vector<8x16xf32>
    %cst_802 = arith.constant dense<0.000000e+00> : vector<8x32xf32>
    %781 = tpu.matmul %780, %3, %cst_802 {dimension_numbers = #tpu.dot_dimension_numbers<[1], [0], [0], [1], [0, 0, 1, 1], [], []>} : vector<8x16xf32>, vector<16x32xf32>, vector<8x32xf32> -> vector<8x32xf32>
    %782 = arith.addf %779, %781 : vector<8x32xf32>
    %783 = vector.broadcast %1 : vector<8x1xf32> to vector<8x32xf32>
    %784 = arith.addf %782, %783 : vector<8x32xf32>
    %785 = vector.extract_strided_slice %784 {offsets = [0, 0], sizes = [4, 32], strides = [1, 1]} : vector<8x32xf32> to vector<4x32xf32>
    %c0_803 = arith.constant 0 : index
    %c0_804 = arith.constant 0 : index
    %c30 = arith.constant 30 : index
    %c0_805 = arith.constant 0 : index
    %786 = vector.load %arg13[%c0_803, %c0_804, %c30, %c0_805] : memref<1x20x32x32xf32, #tpu.memory_space<vmem>>, vector<1x4x1x32xf32>
    %787 = vector.shape_cast %786 : vector<1x4x1x32xf32> to vector<4x32xf32>
    %788 = vector.shape_cast %785 : vector<4x32xf32> to vector<1x4x1x32xf32>
    tpu.vector_store %arg13[%c0_803, %c0_804, %c30, %c0_805], %788 {strides = array<i32>} : memref<1x20x32x32xf32, #tpu.memory_space<vmem>>, vector<1x4x1x32xf32>,
    %789 = vector.extract_strided_slice %784 {offsets = [4, 0], sizes = [4, 32], strides = [1, 1]} : vector<8x32xf32> to vector<4x32xf32>
    %c0_806 = arith.constant 0 : index
    %c0_807 = arith.constant 0 : index
    %c31 = arith.constant 31 : index
    %c0_808 = arith.constant 0 : index
    %790 = vector.load %arg13[%c0_806, %c0_807, %c31, %c0_808] : memref<1x20x32x32xf32, #tpu.memory_space<vmem>>, vector<1x4x1x32xf32>
    %791 = vector.shape_cast %790 : vector<1x4x1x32xf32> to vector<4x32xf32>
    %792 = vector.shape_cast %789 : vector<4x32xf32> to vector<1x4x1x32xf32>
    tpu.vector_store %arg13[%c0_806, %c0_807, %c31, %c0_808], %792 {strides = array<i32>} : memref<1x20x32x32xf32, #tpu.memory_space<vmem>>, vector<1x4x1x32xf32>,
    %c0_809 = arith.constant 0 : index
    %c0_810 = arith.constant 0 : index
    %c15_811 = arith.constant 15 : index
    %c0_812 = arith.constant 0 : index
    %793 = vector.load %arg4[%c0_809, %c0_810, %c15_811, %c0_812] : memref<1x4x16x16xf32, #tpu.memory_space<vmem>>, vector<1x4x1x16xf32>
    %794 = vector.shape_cast %793 : vector<1x4x1x16xf32> to vector<4x16xf32>
    %cst_813 = arith.constant dense<0.000000e+00> : vector<4x64xf32>
    %795 = tpu.matmul %794, %5, %cst_813 {dimension_numbers = #tpu.dot_dimension_numbers<[1], [0], [0], [1], [0, 0, 1, 1], [], []>} : vector<4x16xf32>, vector<16x64xf32>, vector<4x64xf32> -> vector<4x64xf32>
    %796 = vector.extract_strided_slice %795 {offsets = [0, 0], sizes = [4, 32], strides = [1, 1]} : vector<4x64xf32> to vector<4x32xf32>
    %c0_814 = arith.constant 0 : index
    %c4_815 = arith.constant 4 : index
    %c30_816 = arith.constant 30 : index
    %c0_817 = arith.constant 0 : index
    %797 = vector.load %arg13[%c0_814, %c4_815, %c30_816, %c0_817] : memref<1x20x32x32xf32, #tpu.memory_space<vmem>>, vector<1x4x1x32xf32>
    %798 = vector.shape_cast %797 : vector<1x4x1x32xf32> to vector<4x32xf32>
    %799 = vector.shape_cast %796 : vector<4x32xf32> to vector<1x4x1x32xf32>
    tpu.vector_store %arg13[%c0_814, %c4_815, %c30_816, %c0_817], %799 {strides = array<i32>} : memref<1x20x32x32xf32, #tpu.memory_space<vmem>>, vector<1x4x1x32xf32>,
    %800 = vector.extract_strided_slice %795 {offsets = [0, 32], sizes = [4, 32], strides = [1, 1]} : vector<4x64xf32> to vector<4x32xf32>
    %c0_818 = arith.constant 0 : index
    %c4_819 = arith.constant 4 : index
    %c31_820 = arith.constant 31 : index
    %c0_821 = arith.constant 0 : index
    %801 = vector.load %arg13[%c0_818, %c4_819, %c31_820, %c0_821] : memref<1x20x32x32xf32, #tpu.memory_space<vmem>>, vector<1x4x1x32xf32>
    %802 = vector.shape_cast %801 : vector<1x4x1x32xf32> to vector<4x32xf32>
    %803 = vector.shape_cast %800 : vector<4x32xf32> to vector<1x4x1x32xf32>
    tpu.vector_store %arg13[%c0_818, %c4_819, %c31_820, %c0_821], %803 {strides = array<i32>} : memref<1x20x32x32xf32, #tpu.memory_space<vmem>>, vector<1x4x1x32xf32>,
    %c0_822 = arith.constant 0 : index
    %c0_823 = arith.constant 0 : index
    %c15_824 = arith.constant 15 : index
    %c0_825 = arith.constant 0 : index
    %804 = vector.load %arg5[%c0_822, %c0_823, %c15_824, %c0_825] : memref<1x4x16x16xf32, #tpu.memory_space<vmem>>, vector<1x4x1x16xf32>
    %805 = vector.shape_cast %804 : vector<1x4x1x16xf32> to vector<4x16xf32>
    %cst_826 = arith.constant dense<0.000000e+00> : vector<4x64xf32>
    %806 = tpu.matmul %805, %7, %cst_826 {dimension_numbers = #tpu.dot_dimension_numbers<[1], [0], [0], [1], [0, 0, 1, 1], [], []>} : vector<4x16xf32>, vector<16x64xf32>, vector<4x64xf32> -> vector<4x64xf32>
    %807 = vector.extract_strided_slice %806 {offsets = [0, 0], sizes = [4, 32], strides = [1, 1]} : vector<4x64xf32> to vector<4x32xf32>
    %c0_827 = arith.constant 0 : index
    %c8_828 = arith.constant 8 : index
    %c30_829 = arith.constant 30 : index
    %c0_830 = arith.constant 0 : index
    %808 = vector.load %arg13[%c0_827, %c8_828, %c30_829, %c0_830] : memref<1x20x32x32xf32, #tpu.memory_space<vmem>>, vector<1x4x1x32xf32>
    %809 = vector.shape_cast %808 : vector<1x4x1x32xf32> to vector<4x32xf32>
    %810 = vector.shape_cast %807 : vector<4x32xf32> to vector<1x4x1x32xf32>
    tpu.vector_store %arg13[%c0_827, %c8_828, %c30_829, %c0_830], %810 {strides = array<i32>} : memref<1x20x32x32xf32, #tpu.memory_space<vmem>>, vector<1x4x1x32xf32>,
    %811 = vector.extract_strided_slice %806 {offsets = [0, 32], sizes = [4, 32], strides = [1, 1]} : vector<4x64xf32> to vector<4x32xf32>
    %c0_831 = arith.constant 0 : index
    %c8_832 = arith.constant 8 : index
    %c31_833 = arith.constant 31 : index
    %c0_834 = arith.constant 0 : index
    %812 = vector.load %arg13[%c0_831, %c8_832, %c31_833, %c0_834] : memref<1x20x32x32xf32, #tpu.memory_space<vmem>>, vector<1x4x1x32xf32>
    %813 = vector.shape_cast %812 : vector<1x4x1x32xf32> to vector<4x32xf32>
    %814 = vector.shape_cast %811 : vector<4x32xf32> to vector<1x4x1x32xf32>
    tpu.vector_store %arg13[%c0_831, %c8_832, %c31_833, %c0_834], %814 {strides = array<i32>} : memref<1x20x32x32xf32, #tpu.memory_space<vmem>>, vector<1x4x1x32xf32>,
    %c0_835 = arith.constant 0 : index
    %c0_836 = arith.constant 0 : index
    %c15_837 = arith.constant 15 : index
    %c0_838 = arith.constant 0 : index
    %815 = vector.load %arg6[%c0_835, %c0_836, %c15_837, %c0_838] : memref<1x4x16x16xf32, #tpu.memory_space<vmem>>, vector<1x4x1x16xf32>
    %816 = vector.shape_cast %815 : vector<1x4x1x16xf32> to vector<4x16xf32>
    %cst_839 = arith.constant dense<0.000000e+00> : vector<4x64xf32>
    %817 = tpu.matmul %816, %9, %cst_839 {dimension_numbers = #tpu.dot_dimension_numbers<[1], [0], [0], [1], [0, 0, 1, 1], [], []>} : vector<4x16xf32>, vector<16x64xf32>, vector<4x64xf32> -> vector<4x64xf32>
    %818 = vector.extract_strided_slice %817 {offsets = [0, 0], sizes = [4, 32], strides = [1, 1]} : vector<4x64xf32> to vector<4x32xf32>
    %c0_840 = arith.constant 0 : index
    %c12_841 = arith.constant 12 : index
    %c30_842 = arith.constant 30 : index
    %c0_843 = arith.constant 0 : index
    %819 = vector.load %arg13[%c0_840, %c12_841, %c30_842, %c0_843] : memref<1x20x32x32xf32, #tpu.memory_space<vmem>>, vector<1x4x1x32xf32>
    %820 = vector.shape_cast %819 : vector<1x4x1x32xf32> to vector<4x32xf32>
    %821 = vector.shape_cast %818 : vector<4x32xf32> to vector<1x4x1x32xf32>
    tpu.vector_store %arg13[%c0_840, %c12_841, %c30_842, %c0_843], %821 {strides = array<i32>} : memref<1x20x32x32xf32, #tpu.memory_space<vmem>>, vector<1x4x1x32xf32>,
    %822 = vector.extract_strided_slice %817 {offsets = [0, 32], sizes = [4, 32], strides = [1, 1]} : vector<4x64xf32> to vector<4x32xf32>
    %c0_844 = arith.constant 0 : index
    %c12_845 = arith.constant 12 : index
    %c31_846 = arith.constant 31 : index
    %c0_847 = arith.constant 0 : index
    %823 = vector.load %arg13[%c0_844, %c12_845, %c31_846, %c0_847] : memref<1x20x32x32xf32, #tpu.memory_space<vmem>>, vector<1x4x1x32xf32>
    %824 = vector.shape_cast %823 : vector<1x4x1x32xf32> to vector<4x32xf32>
    %825 = vector.shape_cast %822 : vector<4x32xf32> to vector<1x4x1x32xf32>
    tpu.vector_store %arg13[%c0_844, %c12_845, %c31_846, %c0_847], %825 {strides = array<i32>} : memref<1x20x32x32xf32, #tpu.memory_space<vmem>>, vector<1x4x1x32xf32>,
    %c0_848 = arith.constant 0 : index
    %c0_849 = arith.constant 0 : index
    %c0_850 = arith.constant 0 : index
    %c0_851 = arith.constant 0 : index
    %826 = vector.load %arg7[%c0_848, %c0_849, %c0_850, %c0_851] : memref<1x4x32x32xf32, #tpu.memory_space<vmem>>, vector<1x4x32x32xf32>
    %827 = vector.shape_cast %826 : vector<1x4x32x32xf32> to vector<4x32x32xf32>
    %c0_852 = arith.constant 0 : index
    %c16_853 = arith.constant 16 : index
    %c0_854 = arith.constant 0 : index
    %c0_855 = arith.constant 0 : index
    %828 = vector.load %arg13[%c0_852, %c16_853, %c0_854, %c0_855] : memref<1x20x32x32xf32, #tpu.memory_space<vmem>>, vector<1x4x32x32xf32>
    %829 = vector.shape_cast %828 : vector<1x4x32x32xf32> to vector<4x32x32xf32>
    %830 = vector.shape_cast %827 : vector<4x32x32xf32> to vector<1x4x32x32xf32>
    tpu.vector_store %arg13[%c0_852, %c16_853, %c0_854, %c0_855], %830 {strides = array<i32>} : memref<1x20x32x32xf32, #tpu.memory_space<vmem>>, vector<1x4x32x32xf32>,
    return
  }
  func.func @transform_0(%arg0: i32, %arg1: i32, %arg2: i32) -> (i32, i32, i32, i32) {
    %c0_i32 = arith.constant 0 : i32
    %c0_i32_0 = arith.constant 0 : i32
    return %arg0, %c0_i32, %arg1, %arg2 : i32, i32, i32, i32
  }
  func.func @transform_1(%arg0: i32, %arg1: i32, %arg2: i32) -> (i32, i32, i32, i32) {
    %c0_i32 = arith.constant 0 : i32
    %c0_i32_0 = arith.constant 0 : i32
    return %arg0, %c0_i32, %arg1, %arg2 : i32, i32, i32, i32
  }
  func.func @transform_2(%arg0: i32, %arg1: i32, %arg2: i32) -> (i32, i32, i32, i32) {
    %c0_i32 = arith.constant 0 : i32
    %c0_i32_0 = arith.constant 0 : i32
    return %arg0, %c0_i32, %arg1, %arg2 : i32, i32, i32, i32
  }
  func.func @transform_3(%arg0: i32, %arg1: i32, %arg2: i32) -> (i32, i32, i32, i32) {
    %c0_i32 = arith.constant 0 : i32
    %c0_i32_0 = arith.constant 0 : i32
    return %arg0, %c0_i32, %arg1, %arg2 : i32, i32, i32, i32
  }
  func.func @transform_4(%arg0: i32, %arg1: i32, %arg2: i32) -> (i32, i32, i32, i32) {
    %c0_i32 = arith.constant 0 : i32
    %c0_i32_0 = arith.constant 0 : i32
    return %arg0, %c0_i32, %arg1, %arg2 : i32, i32, i32, i32
  }
  func.func @transform_5(%arg0: i32, %arg1: i32, %arg2: i32) -> (i32, i32) {
    %c0_i32 = arith.constant 0 : i32
    %c0_i32_0 = arith.constant 0 : i32
    %c0_i32_1 = arith.constant 0 : i32
    return %c0_i32, %c0_i32_0 : i32, i32
  }
  func.func @transform_6(%arg0: i32, %arg1: i32, %arg2: i32) -> (i32, i32) {
    %c0_i32 = arith.constant 0 : i32
    %c0_i32_0 = arith.constant 0 : i32
    %c0_i32_1 = arith.constant 0 : i32
    return %c0_i32, %c0_i32_0 : i32, i32
  }
  func.func @transform_7(%arg0: i32, %arg1: i32, %arg2: i32) -> (i32, i32) {
    %c0_i32 = arith.constant 0 : i32
    %c0_i32_0 = arith.constant 0 : i32
    %c0_i32_1 = arith.constant 0 : i32
    return %c0_i32, %c0_i32_0 : i32, i32
  }
  func.func @transform_8(%arg0: i32, %arg1: i32, %arg2: i32) -> (i32, i32) {
    %c0_i32 = arith.constant 0 : i32
    %c0_i32_0 = arith.constant 0 : i32
    %c0_i32_1 = arith.constant 0 : i32
    return %c0_i32, %c0_i32_0 : i32, i32
  }
  func.func @transform_9(%arg0: i32, %arg1: i32, %arg2: i32) -> (i32, i32, i32) {
    %c0_i32 = arith.constant 0 : i32
    %c0_i32_0 = arith.constant 0 : i32
    %c0_i32_1 = arith.constant 0 : i32
    %c0_i32_2 = arith.constant 0 : i32
    return %c0_i32, %c0_i32_0, %c0_i32_1 : i32, i32, i32
  }
  func.func @transform_10(%arg0: i32, %arg1: i32, %arg2: i32) -> (i32, i32, i32, i32) {
    %c0_i32 = arith.constant 0 : i32
    %c0_i32_0 = arith.constant 0 : i32
    return %arg0, %c0_i32, %arg1, %arg2 : i32, i32, i32, i32
  }
}

</mosaic_0001>

<bundles_post_ra>
// kernel: tpu_custom_call.1
= control target key start
LH: loop header
LB: loop body
LE: loop exit
PB: predicated region body
PF: predicated region fallthrough
CT: control target
= control target key end

     0   :  { %s18469_s0 = inlined_call_operand.hbm [shape: f32[2,4,16,16], index: 0, kind: input, shape index: {}]   ;;  %s18470_s1 = inlined_call_operand.hbm [shape: f32[2,4,16,16], index: 1, kind: input, shape index: {}]   ;;  %s18471_s2 = inlined_call_operand.hbm [shape: f32[2,4,16,16], index: 2, kind: input, shape index: {}]   ;;  %s18472_s3 = inlined_call_operand.hbm [shape: f32[2,4,16,16], index: 3, kind: input, shape index: {}]   ;;  %s18473_s4 = inlined_call_operand.hbm [shape: f32[2,4,32,32], index: 4, kind: input, shape index: {}]   ;;  %s18474_s5 = inlined_call_operand.vmem [shape: f32[16,4], index: 5, kind: input, shape index: {}]   ;;  %s18475_s6 = inlined_call_operand.vmem [shape: f32[8,1], index: 6, kind: input, shape index: {}]   ;;  %s18476_s7 = inlined_call_operand.hbm [shape: f32[16,32], index: 7, kind: input, shape index: {}]   ;;  %s18477_s8 = inlined_call_operand.hbm [shape: f32[16,32], index: 8, kind: input, shape index: {}]   ;;  %s18478_s9 = inlined_call_operand.vmem [shape: f32[3,16,64], index: 9, kind: input, shape index: {}]   ;;  %s18479_s10 = inlined_call_operand.hbm [shape: f32[2,20,32,32], index: 10, kind: output, shape index: {}]  }
   0x1   :  { %18505 = sst [smem:[#allocation27_spill]] %s18470_s1 }
   0x2   :  { %18506 = sst [smem:[#allocation28_spill]] %s18472_s3 }
   0x3   :  { %18507 = sst [smem:[#allocation29_spill]] %s18474_s5 }
   0x4   :  { %18508 = sst [smem:[#allocation30_spill]] %s18475_s6 }
   0x5   :  { %18509 = sst [smem:[#allocation31_spill]] %s18476_s7 }
   0x6   :  { %18510 = sst [smem:[#allocation32_spill]] %s18478_s9 }
   0x7   :  { %18511 = sst [smem:[#allocation33_spill]] %s18479_s10 }
   0x8   :  { %15 = vsyncpa [#allocation3], 0 }
   0x9   :  { %17 = vsyncpa [#allocation3 + $0x1], 0 }
   0xa   :  { %18 = vsyncpa [#allocation6], 0 }
   0xb   :  { %20 = vsyncpa [#allocation6 + $0x1], 0 }
   0xc   :  { %21 = vsyncpa [#allocation9], 0 }
   0xd   :  { %23 = vsyncpa [#allocation9 + $0x1], 0 }
   0xe   :  { %24 = vsyncpa [#allocation12], 0 }
   0xf   :  { %25 = vsyncpa [#allocation4], 0 }
  0x10   :  { %27 = vsyncpa [#allocation4 + $0x1], 0  ;;  %s15273_s13 = smov 0   ;;  %s15275_s14 = smov 0  }
  0x11   :  { %s15277_s15 = smov 0   ;;  %s15279_s16 = smov 0  }
  0x12   :  { %s15281_s17 = smov 0   ;;  %s15283_s18 = smov 0  }
  0x13 LB: > { %18512 = sst [smem:[#allocation20_spill]] %s15178_s13  ;;  %s15304_s19 = sadd.s32 4294967295, %s15198_s18   ;;  %s15198_s18 = sphi %s15283_s18, %s33_s18   ;;  %s15194_s17 = sphi %s15281_s17, %s18562_s17   ;;  %s15190_s16 = sphi %s15279_s16, %s18561_s16   ;;  %s15186_s15 = sphi %s15277_s15, %s18557_s15   ;;  %s15182_s14 = sphi %s15275_s14, %s18560_s14   ;;  %s15178_s13 = sphi %s15273_s13, %s18559_s13  }
  0x14   : > { %18513 = sst [smem:[#allocation21_spill]] %s15186_s15  ;;  %s13038_s20 = sadd.s32 4294967294, %s15198_s18  }
  0x15   : > { %18514 = sst [smem:[#allocation22_spill]] %s15190_s16  ;;  %p70_p0 = scmp.ne.s32.totalorder %s15186_s15, %s15182_s14 }
  0x16   : > { %p71_p1 = scmp.eq.s32.totalorder %s15198_s18, 0  ;;  %p76_p2 = scmp.ne.s32.totalorder %s15182_s14, %s15178_s13 }
  0x17   : > { %p18485_p3 = scmp.eq.s32.totalorder %s15304_s19, 0  ;;  %p329_p4 = scmp.eq.s32.totalorder %s15304_s19, 1 }
  0x18   : > { %p15315_p5 = por %p71_p1, %p70_p0  ;;  %p335_p6 = scmp.eq.s32.totalorder %s13038_s20, 1 }
  0x19   : > { %p15321_p7 = por %p18485_p3, %p76_p2  ;;  %p15325_p8 = por %p329_p4, %p70_p0 }
  0x1a   : > { %p15329_p9 = por %p335_p6, %p76_p2  ;;  %p13039_p10 = scmp.ge.s32.totalorder %s15198_s18, 1 }
  0x1b   : > { %s18516_s23 = scalar_select %p15321_p7, 1, 0 }
  0x1c   : > { %s18517_s24 = scalar_select %p15325_p8, 1, 0 }
  0x1d   : > { %s18519_s25 = scalar_select %p15329_p9, 1, 0 }
  0x1e   : > { %18518 = sst [smem:[#allocation23_spill]] %s18517_s24  ;;  %p342_p11 = scmp.lt.s32.totalorder %s15198_s18, 3 }
  0x1f   : > { %18520 = sst [smem:[#allocation24_spill]] %s18519_s25  ;;  %s15200_s27 = smov [#allocation11]  }
  0x20   : > { %p15335_p12 = pnand %p13039_p10, %p342_p11  ;;  %s360_s28 = sshll.u32 %s15200_s27, 4  ;;  %s15339_s28 = int_to_ptr.vmem [resolvable:$true] %s360_s28 }
  0x21   : > { %s52_s30 = sadd.s32 1, %s15194_s17  ;;  %s15353_s11 = sand.u32 1, %s15186_s15  }
  0x22   : > { %s18521_s26 = scalar_select %p15335_p12, 1, 0 }
  0x23   : > { %p14796_p13 = pneg %p15335_p12  ;;  %p15355_p4 = scmp.ge.s32.totalorder %s52_s30, 2 }
  0x24   : > { %s18524_s7 = sld [smem:[#allocation31_spill]] }
  0x25   : > { %p15347_p2 = pnand %p14796_p13, %p18485_p3 }
  0x27   : > { %s18522_s29 = scalar_select %p15347_p2, 1, 0 }
  0x28   : > { %p18496_p10 = pneg %p15347_p2 }
  0x2a   : > { %s14898_s21 = scalar_lea.hbm %s18524_s7, 256 }
  0x2b   : > { %p14899_p6 = scmp.ne.s32.totalorder %s18524_s7, %s14898_s21  ;;  %p14905_p0 = scmp.lt.u32.totalorder %s14898_s21, %s18524_s7 }
  0x2d   : > { %p14901_p11 = pnand %p18496_p10, %p14899_p6 }
  0x2f   : > { %p14902_p13 = pneg %p14901_p11 }
  0x31   : > { %p14907_p3 = pnand %p14905_p0, %p14902_p13 }
  0x33   : > { %14910 = shalt.err (!%p14907_p3)
}
  0x34   : > { %s14911_s20 = scalar_lea.vmem %s15339_s28, 256  ;;  %p14919_p7 = scmp.lt.s32.totalorder %s15339_s28, %s15339_s28 }
  0x35   : > { %p14912_p1 = scmp.ne.s32.totalorder %s15339_s28, %s14911_s20  ;;  %p14920_p6 = scmp.lt.s32.totalorder %s14911_s20, %s14911_s20 }
  0x37   : > { %p14914_p9 = pnand %p14912_p1, %p18496_p10  ;;  %p14921_p11 = por %p14920_p6, %p14919_p7 }
  0x39   : > { %p14915_p8 = pneg %p14914_p9 }
  0x3b   : > { %p14922_p12 = pnand %p14921_p11, %p14915_p8 }
  0x3d   : > { %14925 = shalt.err (!%p14922_p12)
}
  0x3e   : > { %s18489_s10 = smov 128   ;;  %s18491_s13 = smov 8  }
  0x3f   : > { %14799 = dma.hbm_to_vmem [thread:$0]  (!%p15347_p2), %s18524_s7, 256, %s15339_s28, [#allocation12], %s18489_s10, %s18489_s10, %s18491_s13  }
  0x40   : > { %s18564_s30 = smov (%p15355_p4, %s52_s30), 0  ;;  %s15394_s25 = sshll.u32 %s15353_s11, 6 }
  0x41   : > { %18525 = sst [smem:[#allocation25_spill]] %s18564_s30  ;;  %s15397_s27 = sshll.u32 %s15194_s17, 10 }
  0x42   : > { %s56_s20 = ssub.s32 %s15194_s17, %s18564_s30  ;;  %p18526_p3 = scmp.lt.s32.totalorder %s15198_s18, 2 }
  0x43   : > { %p61_p8 = scmp.eq.s32.totalorder %s56_s20, 0  ;;  %s18495_s28 = sand.u32 1, %s15198_s18  }
  0x44   : > { %p15405_p7 = pnand %p18526_p3, %p15315_p5  ;;  %s18528_s12 = sadd.s32 1, %s15186_s15 }
  0x45   : > { %s15413_s21 = scalar_select %p61_p8, %s15186_s15, %s18528_s12  }
  0x46   : > { %s18527_s16 = scalar_select %p15405_p7, 1, 0 }
  0x47   : > { %18529 = sst [smem:[#allocation26_spill]] %s15413_s21  ;;  %s18530_s1 = sld [smem:[#allocation27_spill]] }
  0x48   : > { %s418_s22 = scalar_lea.vmem [#allocation5], %s15394_s25  ;;  %s15426_s30 = scalar_lea.sflag [#allocation6], %s18495_s28 }
  0x49   : > { %s428_s7 = sshll.u32 %s418_s22, 4  ;;  %p15432_p9 = pneg %p15405_p7  ;;  %s15422_s7 = int_to_ptr.vmem [resolvable:$true] %s428_s7 }
  0x4b   : > { %s18531_s12 = scalar_select %p15432_p9, 1, 0 }
  0x4d   : > { %s15419_s13 = scalar_lea.hbm %s18530_s1, %s15397_s27  ;;  %s14931_s22 = scalar_lea.hbm %s18530_s1, 2048 }
  0x4e   : > { %s14926_s20 = scalar_lea.hbm %s15419_s13, 1024  ;;  %p14932_p1 = scmp.lt.u32.totalorder %s15419_s13, %s18530_s1 }
  0x4f   : > { %p14927_p5 = scmp.ne.s32.totalorder %s15419_s13, %s14926_s20  ;;  %p14933_p4 = scmp.lt.u32.totalorder %s14931_s22, %s14926_s20 }
  0x50   : > { %p14935_p6 = scmp.lt.u32.totalorder %s14926_s20, %s15419_s13 }
  0x51   : > { %p14929_p12 = pnand %p15432_p9, %p14927_p5  ;;  %p14934_p13 = por %p14933_p4, %p14932_p1 }
  0x53   : > { %p14930_p0 = pneg %p14929_p12  ;;  %p14936_p11 = por %p14935_p6, %p14934_p13 }
  0x55   : > { %p14937_p3 = pnand %p14936_p11, %p14930_p0 }
  0x57   : > { %14940 = shalt.err (!%p14937_p3)
}
  0x58   : > { %s14941_s28 = scalar_lea.vmem %s15422_s7, 1024  ;;  %s15203_s10 = smov [#allocation5]  }
  0x59   : > { %p14942_p8 = scmp.ne.s32.totalorder %s15422_s7, %s14941_s28  ;;  %s14946_s24 = sshll.u32 %s15203_s10, 4  ;;  %s14947_s24 = int_to_ptr.vmem [resolvable:$false] %s14946_s24 }
  0x5a   : > { %s14948_s15 = scalar_lea.vmem %s14947_s24, 2048  ;;  %p14949_p10 = scmp.lt.s32.totalorder %s15422_s7, %s14947_s24 }
  0x5b   : > { %p14944_p5 = pnand %p14942_p8, %p15432_p9  ;;  %p14950_p2 = scmp.lt.s32.totalorder %s14948_s15, %s14941_s28 }
  0x5d   : > { %p14945_p12 = pneg %p14944_p5  ;;  %p14951_p1 = por %p14950_p2, %p14949_p10 }
  0x5f   : > { %p14952_p4 = pnand %p14951_p1, %p14945_p12 }
  0x61   : > { %14955 = shalt.err (!%p14952_p4)
}
  0x62   : > { %s18532_s21 = smov 8   ;;  %s18533_s20 = smov 128  }
  0x63   : > { %14809 = dma.hbm_to_vmem [thread:$0]  (!%p15405_p7), %s15419_s13, 1024, %s15422_s7, %s15426_s30, %s18533_s20, %s18533_s20, %s18532_s21  }
  0x64   : > { %s18534_s3 = sld [smem:[#allocation28_spill]]  ;;  %s466_s24 = scalar_lea.vmem [#allocation8], %s15394_s25 }
  0x65   : > { %s476_s15 = sshll.u32 %s466_s24, 4  ;;  %s18535_s1 = sand.u32 1, %s15198_s18   ;;  %s15466_s15 = int_to_ptr.vmem [resolvable:$true] %s476_s15 }
  0x66   : > { %s15470_s9 = scalar_lea.sflag [#allocation9], %s18535_s1 }
  0x6a   : > { %s15463_s28 = scalar_lea.hbm %s18534_s3, %s15397_s27  ;;  %s14961_s22 = scalar_lea.hbm %s18534_s3, 2048 }
  0x6b   : > { %s14956_s6 = scalar_lea.hbm %s15463_s28, 1024  ;;  %p14962_p13 = scmp.lt.u32.totalorder %s15463_s28, %s18534_s3 }
  0x6c   : > { %p14957_p2 = scmp.ne.s32.totalorder %s15463_s28, %s14956_s6  ;;  %p14963_p6 = scmp.lt.u32.totalorder %s14961_s22, %s14956_s6 }
  0x6d   : > { %p14965_p3 = scmp.lt.u32.totalorder %s14956_s6, %s15463_s28 }
  0x6e   : > { %p14959_p10 = pnand %p14957_p2, %p15432_p9  ;;  %p14964_p11 = por %p14963_p6, %p14962_p13 }
  0x70   : > { %p14960_p0 = pneg %p14959_p10  ;;  %p14966_p8 = por %p14965_p3, %p14964_p11 }
  0x72   : > { %p14967_p5 = pnand %p14966_p8, %p14960_p0 }
  0x74   : > { %14970 = shalt.err (!%p14967_p5)
}
  0x75   : > { %s14971_s1 = scalar_lea.vmem %s15466_s15, 1024  ;;  %s15204_s24 = smov [#allocation8]  }
  0x76   : > { %p14972_p12 = scmp.ne.s32.totalorder %s15466_s15, %s14971_s1  ;;  %s14976_s7 = sshll.u32 %s15204_s24, 4  ;;  %s14977_s7 = int_to_ptr.vmem [resolvable:$false] %s14976_s7 }
  0x77   : > { %s14978_s5 = scalar_lea.vmem %s14977_s7, 2048  ;;  %p14979_p2 = scmp.lt.s32.totalorder %s15466_s15, %s14977_s7 }
  0x78   : > { %p14974_p1 = pnand %p14972_p12, %p15432_p9  ;;  %p14980_p10 = scmp.lt.s32.totalorder %s14978_s5, %s14971_s1 }
  0x7a   : > { %p14975_p4 = pneg %p14974_p1  ;;  %p14981_p13 = por %p14980_p10, %p14979_p2 }
  0x7c   : > { %p14982_p6 = pnand %p14981_p13, %p14975_p4 }
  0x7e   : > { %14985 = shalt.err (!%p14982_p6)
}
  0x7f   : > { %14815 = dma.hbm_to_vmem [thread:$0]  (!%p15405_p7), %s15463_s28, 1024, %s15466_s15, %s15470_s9, %s18533_s20, %s18533_s20, %s18532_s21  }
  0x80   : > { %s15205_s6 = smov [#allocation13]   ;;  %s14986_s1 = scalar_lea.hbm %s18477_s8, 256 }
  0x81   : > { %s373_s13 = sshll.u32 %s15205_s6, 4  ;;  %p14987_p0 = scmp.ne.s32.totalorder %s18477_s8, %s14986_s1  ;;  %s374_s13 = int_to_ptr.vmem [resolvable:$true] %s373_s13 }
  0x82   : > { %p18536_p11 = scmp.ne.s32.totalorder %s18522_s29, 0  ;;  %p14993_p12 = scmp.lt.u32.totalorder %s14986_s1, %s18477_s8 }
  0x84   : > { %p18537_p3 = pneg %p18536_p11 }
  0x86   : > { %p14989_p8 = pnand %p14987_p0, %p18537_p3 }
  0x88   : > { %p14990_p5 = pneg %p14989_p8 }
  0x8a   : > { %p14995_p1 = pnand %p14993_p12, %p14990_p5 }
  0x8c   : > { %14998 = shalt.err (!%p14995_p1)
}
  0x8d   : > { %s14999_s28 = scalar_lea.vmem %s374_s13, 256  ;;  %p18538_p2 = pmov %p18537_p3 }
  0x8e   : > { %p15000_p4 = scmp.ne.s32.totalorder %s374_s13, %s14999_s28  ;;  %p15007_p6 = scmp.lt.s32.totalorder %s374_s13, %s374_s13 }
  0x8f   : > { %p15008_p7 = scmp.lt.s32.totalorder %s14999_s28, %s14999_s28 }
  0x90   : > { %p15002_p10 = pnand %p15000_p4, %p18538_p2 }
  0x91   : > { %p15009_p9 = por %p15008_p7, %p15007_p6 }
  0x92   : > { %p15003_p13 = pneg %p15002_p10 }
  0x94   : > { %p15010_p0 = pnand %p15009_p9, %p15003_p13 }
  0x96   : > { %15013 = shalt.err (!%p15010_p0)
}
  0x97   : > { %14802 = dma.hbm_to_vmem [thread:$0]  (!%p18536_p11), %s18477_s8, 256, %s374_s13, [#allocation12], %s18533_s20, %s18533_s20, %s18532_s21  }
  0x98   : > { %s15524_s10 = scalar_lea.hbm %s18469_s0, %s15397_s27  ;;  %s394_s29 = scalar_lea.vmem [#allocation2], %s15394_s25 }
  0x99   : > { %s404_s1 = sshll.u32 %s394_s29, 4  ;;  %s391_s24 = scalar_lea.sflag [#allocation3], %s15353_s11  ;;  %s15527_s1 = int_to_ptr.vmem [resolvable:$true] %s404_s1 }
  0x9a   : > { %s15014_s7 = scalar_lea.hbm %s15524_s10, 1024  ;;  %p18539_p9 = scmp.ne.s32.totalorder %s18531_s12, 0 }
  0x9b   : > { %p15015_p7 = scmp.ne.s32.totalorder %s15524_s10, %s15014_s7  ;;  %s15019_s28 = scalar_lea.hbm %s18469_s0, 2048 }
  0x9c   : > { %p15020_p11 = scmp.lt.u32.totalorder %s15524_s10, %s18469_s0  ;;  %p15021_p5 = scmp.lt.u32.totalorder %s15019_s28, %s15014_s7 }
  0x9d   : > { %p15017_p3 = pnand %p15015_p7, %p18539_p9  ;;  %p15023_p1 = scmp.lt.u32.totalorder %s15014_s7, %s15524_s10 }
  0x9e   : > { %p15022_p12 = por %p15021_p5, %p15020_p11 }
  0x9f   : > { %p15018_p8 = pneg %p15017_p3 }
  0xa0   : > { %p15024_p4 = por %p15023_p1, %p15022_p12 }
  0xa2   : > { %p15025_p2 = pnand %p15024_p4, %p15018_p8 }
  0xa4   : > { %15028 = shalt.err (!%p15025_p2)
}
  0xa5   : > { %s15029_s6 = scalar_lea.vmem %s15527_s1, 1024  ;;  %s15206_s22 = smov [#allocation2]  }
  0xa6   : > { %p15030_p10 = scmp.ne.s32.totalorder %s15527_s1, %s15029_s6  ;;  %s15034_s29 = sshll.u32 %s15206_s22, 4  ;;  %s15035_s29 = int_to_ptr.vmem [resolvable:$false] %s15034_s29 }
  0xa7   : > { %s15036_s13 = scalar_lea.vmem %s15035_s29, 2048  ;;  %p15037_p0 = scmp.lt.s32.totalorder %s15527_s1, %s15035_s29 }
  0xa8   : > { %p15032_p13 = pnand %p15030_p10, %p18539_p9  ;;  %p15038_p7 = scmp.lt.s32.totalorder %s15036_s13, %s15029_s6 }
  0xaa   : > { %p15033_p6 = pneg %p15032_p13  ;;  %p15039_p3 = por %p15038_p7, %p15037_p0 }
  0xac   : > { %p15040_p11 = pnand %p15039_p3, %p15033_p6 }
  0xae   : > { %15043 = shalt.err (!%p15040_p11)
}
  0xaf   : > { %p18540_p8 = scmp.ne.s32.totalorder %s18527_s16, 0  ;;  %s15560_s28 = scalar_lea.hbm %s18471_s2, %s15397_s27 }
  0xb0   : > { %s442_s3 = scalar_lea.vmem [#allocation7], %s15394_s25  ;;  %s13055_s6 = sshll.u32 %s15353_s11, 7 }
  0xb1   : > { %14806 = dma.hbm_to_vmem [thread:$0]  (!%p18540_p8), %s15524_s10, 1024, %s15527_s1, %s391_s24, %s18533_s20, %s18533_s20, %s18532_s21  }
  0xb2   : > { %s452_s15 = sshll.u32 %s442_s3, 4  ;;  %s15044_s22 = scalar_lea.hbm %s15560_s28, 1024  ;;  %s15563_s15 = int_to_ptr.vmem [resolvable:$true] %s452_s15 }
  0xb3   : > { %p15045_p5 = scmp.ne.s32.totalorder %s15560_s28, %s15044_s22  ;;  %s15049_s24 = scalar_lea.hbm %s18471_s2, 2048 }
  0xb4   : > { %p15050_p4 = scmp.lt.u32.totalorder %s15560_s28, %s18471_s2  ;;  %p15051_p2 = scmp.lt.u32.totalorder %s15049_s24, %s15044_s22 }
  0xb5   : > { %p15047_p12 = pnand %p15045_p5, %p18539_p9  ;;  %p15053_p13 = scmp.lt.u32.totalorder %s15044_s22, %s15560_s28 }
  0xb6   : > { %p15052_p10 = por %p15051_p2, %p15050_p4 }
  0xb7   : > { %p15048_p1 = pneg %p15047_p12 }
  0xb8   : > { %p15054_p6 = por %p15053_p13, %p15052_p10 }
  0xba   : > { %p15055_p0 = pnand %p15054_p6, %p15048_p1 }
  0xbc   : > { %15058 = shalt.err (!%p15055_p0)
}
  0xbd   : > { %s15059_s25 = scalar_lea.vmem %s15563_s15, 1024  ;;  %s15207_s13 = smov [#allocation7]  }
  0xbe   : > { %p15060_p7 = scmp.ne.s32.totalorder %s15563_s15, %s15059_s25  ;;  %s15064_s7 = sshll.u32 %s15207_s13, 4  ;;  %s15065_s7 = int_to_ptr.vmem [resolvable:$false] %s15064_s7 }
  0xbf   : > { %s15066_s5 = scalar_lea.vmem %s15065_s7, 2048  ;;  %p15067_p5 = scmp.lt.s32.totalorder %s15563_s15, %s15065_s7 }
  0xc0   : > { %p15062_p3 = pnand %p15060_p7, %p18539_p9  ;;  %p15068_p12 = scmp.lt.s32.totalorder %s15066_s5, %s15059_s25 }
  0xc2   : > { %p15063_p11 = pneg %p15062_p3  ;;  %p15069_p4 = por %p15068_p12, %p15067_p5 }
  0xc4   : > { %p15070_p2 = pnand %p15069_p4, %p15063_p11 }
  0xc6   : > { %15073 = shalt.err (!%p15070_p2)
}
  0xc7   : > { %14812 = dma.hbm_to_vmem [thread:$0]  (!%p18540_p8), %s15560_s28, 1024, %s15563_s15, %s15426_s30, %s18533_s20, %s18533_s20, %s18532_s21  }
  0xc8   : > { %s13605_s3 = sshll.u32 %s15194_s17, 11  ;;  %s490_s24 = scalar_lea.vmem [#allocation10], %s13055_s6 }
  0xc9   : > { %s15595_s1 = scalar_lea.hbm %s18473_s4, %s13605_s3  ;;  %s500_s27 = sshll.u32 %s490_s24, 4  ;;  %s15599_s27 = int_to_ptr.vmem [resolvable:$true] %s500_s27 }
  0xca   : > { %s15074_s29 = scalar_lea.hbm %s15595_s1, 2048  ;;  %s15079_s15 = scalar_lea.hbm %s18473_s4, 4096 }
  0xcb   : > { %p15075_p1 = scmp.ne.s32.totalorder %s15595_s1, %s15074_s29  ;;  %p15080_p6 = scmp.lt.u32.totalorder %s15595_s1, %s18473_s4 }
  0xcc   : > { %p15081_p0 = scmp.lt.u32.totalorder %s15079_s15, %s15074_s29  ;;  %p15083_p3 = scmp.lt.u32.totalorder %s15074_s29, %s15595_s1 }
  0xcd   : > { %p15077_p10 = pnand %p15075_p1, %p18539_p9 }
  0xce   : > { %p15082_p7 = por %p15081_p0, %p15080_p6 }
  0xcf   : > { %p15078_p13 = pneg %p15077_p10 }
  0xd0   : > { %p15084_p11 = por %p15083_p3, %p15082_p7 }
  0xd2   : > { %p15085_p5 = pnand %p15084_p11, %p15078_p13 }
  0xd4   : > { %15088 = shalt.err (!%p15085_p5)
}
  0xd5   : > { %s15089_s11 = scalar_lea.vmem %s15599_s27, 2048  ;;  %s15208_s6 = smov [#allocation10]  }
  0xd6   : > { %p15090_p12 = scmp.ne.s32.totalorder %s15599_s27, %s15089_s11  ;;  %s15094_s7 = sshll.u32 %s15208_s6, 4  ;;  %s15095_s7 = int_to_ptr.vmem [resolvable:$false] %s15094_s7 }
  0xd7   : > { %s15096_s5 = scalar_lea.vmem %s15095_s7, 4096  ;;  %p15097_p1 = scmp.lt.s32.totalorder %s15599_s27, %s15095_s7 }
  0xd8   : > { %p15092_p4 = pnand %p15090_p12, %p18539_p9  ;;  %p15098_p10 = scmp.lt.s32.totalorder %s15096_s5, %s15089_s11 }
  0xda   : > { %p15093_p2 = pneg %p15092_p4  ;;  %p15099_p6 = por %p15098_p10, %p15097_p1 }
  0xdc   : > { %p15100_p0 = pnand %p15099_p6, %p15093_p2 }
  0xde   : > { %15103 = shalt.err (!%p15100_p0)
}
  0xdf   : > { %14818 = dma.hbm_to_vmem [thread:$0]  (!%p18540_p8), %s15595_s1, 2048, %s15599_s27, %s15470_s9, %s18533_s20, %s18533_s20, %s18532_s21  }
  0xe0   : > { %p18541_p9 = scmp.ne.s32.totalorder %s18521_s26, 0 }
  0xe1   : > { %s15629_s12 = sand.u32 (!%p18541_p9), 1, %s15182_s14   ;;  %p18542_p13 = scmp.ne.s32.totalorder (!%p18541_p9), %s18516_s23, 0 }
  0xe2   : > { %512 = sbr.rel (%p18541_p9) target bundleno = 4175 (0x104f), region = 60  ;;  %s13059_s3 = sshll.u32 (!%p18541_p9), %s15629_s12, 6 }
  0xe3   : > { %s515_s22 = scalar_lea.sflag (!%p18541_p9), [#allocation3], %s15629_s12  ;;  %s15633_s10 = scalar_lea.vmem (!%p18541_p9), [#allocation2], %s13059_s3 }
  0xe9   : > { %15157 = dma.done.wait (%p18542_p13), %s515_s22, 1024  }
  0xea   : > { %15159 = vsyncadd (%p18542_p13), %s515_s22, 4294966272  ;;  %s523_s9 = sand.u32 1, %s15304_s19   ;;  %s15640_s26 = scalar_lea.vmem [#allocation5], %s13059_s3 }
  0xeb   : > { %s524_s16 = scalar_lea.sflag [#allocation6], %s523_s9 }
  0xec   : > { %15161 = dma.done.wait (%p18542_p13), %s524_s16, 2048  }
  0xed   : > { %15163 = vsyncadd (%p18542_p13), %s524_s16, 4294965248  ;;  %s15646_s21 = scalar_lea.vmem [#allocation7], %s13059_s3  ;;  %s542_s20 = scalar_lea.sflag [#allocation9], %s523_s9 }
  0xee   : > { %s15648_s1 = scalar_lea.vmem [#allocation8], %s13059_s3 }
  0xef   : > { %15165 = dma.done.wait (%p18542_p13), %s542_s20, 3072  }
  0xf0   : > { %15167 = vsyncadd (%p18542_p13), %s542_s20, 4294964224  ;;  %s13063_s24 = sshll.u32 %s15629_s12, 7  ;;  %p18543_p8 = scmp.eq.s32.totalorder %s15304_s19, 0 }
  0xf1   : > { %s15655_s27 = scalar_lea.vmem [#allocation10], %s13063_s24 }
  0xf2   : > { %15169 = dma.done.wait (%p18543_p8), [#allocation12], 512   ;;  %p18544_p7 = pmov %p18543_p8 }
  0xf3   : > { %v15209_v0 = vmov 0.0|0.0   ;;  %vm649_vm0 = vcmask 1041409   ;;  %vm657_vm1 = vcmask 31744   ;;  %v640_v1 = vld [vmem:[%s15633_s10] sm:$0x1]  ;;  %vm652_vm2 = vcmask 1042434  }
  0xf4   : > { %15171 = vsyncadd (%p18544_p7), [#allocation12], 4294966784  ;;  %14534 = vmatprep.subr.bf16.mxu1 %v15209_v0  ;;  %v641_v2 = vld [vmem:[%s15633_s10 + $0x10] sm:$0x1]  ;;  %v642_v3 = vld [vmem:[%s15633_s10 + $0x20] sm:$0x1] }
  0xf5   : > { %v643_v4 = vld [vmem:[%s15633_s10 + $0x30] sm:$0x1]  ;;  %v648_v5 = vrot.slane %v641_v2, 7  ;;  %v651_v6 = vrot.slane %v642_v3, 6  ;;  %s18545_s19 = sld [smem:[#allocation29_spill]]  ;;  %vm655_vm3 = vcmask 1043459  }
  0xf6   : > { %v654_v8 = vrot.slane %v643_v4, 5  ;;  %v630_v9 = vld [vmem:[#allocation13] sm:$0xff]  ;;  %v631_v10 = vld [vmem:[#allocation13 + $0x8] sm:$0xff]  ;;  %v628_v11 = vld [vmem:[#allocation11] sm:$0xff]  ;;  %vm664_vm4 = vcmask 1043456   ;;  %vm15210_vm5 = vmmov 0  }
  0xf7   : > { %v650_v12 = vsel %vm649_vm0, %v648_v5, %v640_v1  ;;  %v15674_v13 = vpack.c.bf16 %v631_v10, %v630_v9  ;;  %v629_v14 = vld [vmem:[#allocation11 + $0x8] sm:$0xff]  ;;  %v15211_v19 = vmov 0.0   ;;  %s18546_s13 = sld [smem:[#allocation30_spill]]  ;;  %v15212_v21 = vmov 0   ;;  %v1419_v22 = vld [vmem:[%s15633_s10 + $0x11] sm:$0x1] }
  0xf8   : > { %v653_v15 = vsel %vm652_vm2, %v651_v6, %v650_v12  ;;  %v15684_v18 = vpack.c.bf16 %v629_v14, %v628_v11  ;;  %13903 = vmatprep.mubr.msk.f32.mxu1 %vm15210_vm5, %v15211_v19  ;;  %14889 = vset.pattern.permute.xlu0 %v15212_v21  ;;  %v963_v23 = vld [vmem:[%s15640_s26 + $0x10] sm:$0x1]  ;;  %v1420_v25 = vld [vmem:[%s15633_s10 + $0x21] sm:$0x1]  ;;  %v1426_v26 = vrot.slane %v1419_v22, 7  ;;  %s18547_s7 = sld [smem:[#allocation32_spill]] }
  0xf9   : > { %v656_v16 = vsel %vm655_vm3, %v654_v8, %v653_v15  ;;  %14536 = vmatpush3.bf16.msra.mxu1 %v15674_v13  ;;  %v1115_v24 = vld [vmem:[%s15646_s21 + $0x10] sm:$0x1]  ;;  %v964_v27 = vld [vmem:[%s15640_s26 + $0x20] sm:$0x1]  ;;  %v970_v28 = vrot.slane %v963_v23, 7  ;;  %v1428_v34 = vrot.slane %v1420_v25, 6  ;;  %v899_v15 = vlaneseq }
  0xfa   : > { %13894 = vmatprep.subr.msk.mxu0 %vm664_vm4, %v656_v16  ;;  %14540 = vmatprep.subr.bf16.mxu1 %v15209_v0  ;;  %v1418_v29 = vld [vmem:[%s15633_s10 + $0x1] sm:$0x1]  ;;  %v962_v30 = vld [vmem:[%s15640_s26] sm:$0x1]  ;;  %v1122_v32 = vrot.slane %v1115_v24, 7  ;;  %v972_v39 = vrot.slane %v964_v27, 6 }
  0xfb   : > { %v15669_v7 = vld [vmem:[%s18545_s19] sm:$0xff]  ;;  %v15681_v17 = vld [vmem:[%s18545_s19 + $0x8] sm:$0xff]  ;;  %13895 = vmatpush3.msk.msra.mxu0 %vm664_vm4, %v656_v16  ;;  %v1421_v33 = vld [vmem:[%s15633_s10 + $0x31] sm:$0x1]  ;;  %v1427_v40 = vsel %vm649_vm0, %v1426_v26, %v1418_v29  ;;  %v971_v43 = vsel %vm649_vm0, %v970_v28, %v962_v30  ;;  %vm742_vm6 = vcmask 130048   ;;  %v900_v25 = vshrl.u32 %v899_v15, 7 }
  0xfc   : > { %13896 = vmatprep.mubr.msk.f32.mxu0 %vm657_vm1, %v15669_v7  ;;  %14537 = vmatprep.subr.bf16.mxu0 %v15209_v0  ;;  %v1116_v31 = vld [vmem:[%s15646_s21 + $0x20] sm:$0x1]  ;;  %v965_v38 = vld [vmem:[%s15640_s26 + $0x30] sm:$0x1]  ;;  %v1430_v46 = vrot.slane %v1421_v33, 5  ;;  %v1429_v50 = vsel %vm652_vm2, %v1428_v34, %v1427_v40  ;;  %v973_v52 = vsel %vm652_vm2, %v972_v39, %v971_v43  ;;  %s14774_s28 = smul.u32 640, %s15629_s12 }
  0xfd   : > { %13897 = vmatmul.mubr.msk.f32.vlgmr.msra.gmra.mrb[0].mxu0 %vm657_vm1, %v15681_v17  ;;  %v627_v20 = vld [vmem:[%s18546_s13] sm:$0xff]  ;;  %v1117_v44 = vld [vmem:[%s15646_s21 + $0x30] sm:$0x1]  ;;  %v1124_v45 = vrot.slane %v1116_v31, 6  ;;  %v974_v49 = vrot.slane %v965_v38, 5  ;;  %vm924_vm7 = vcmask 253952  }
  0xfe   : > { %14539 = vmatpush3.bf16.msra.mxu0 %v15684_v18  ;;  %13910 = vmatprep.mubr.msk.f32.mxu0 %vm15210_vm5, %v15211_v19  ;;  %v1114_v35 = vld [vmem:[%s15646_s21] sm:$0x1]  ;;  %v633_v37 = vld [vmem:[%s18547_s7 + $0x8] sm:$0xff]  ;;  %v13066_v41 = vld [vmem:[%s18547_s7 + $0x10] sm:$0xff]  ;;  %v1126_v53 = vrot.slane %v1117_v44, 5  ;;  %v1431_v57 = vsel %vm655_vm3, %v1430_v46, %v1429_v50  ;;  %s15819_s15 = scalar_lea.vmem [#allocation14], %s14774_s28 }
  0xff   : > { %14543 = vmatprep.subr.bf16.mxu0 %v15209_v0  ;;  %891 = vperm.xlu0 %14889, %v627_v20   ;;  %v632_v36 = vld [vmem:[%s18547_s7] sm:$0xff]  ;;  %v13067_v42 = vld [vmem:[%s18547_s7 + $0x18] sm:$0xff]  ;;  %v1123_v47 = vsel %vm649_vm0, %v1122_v32, %v1114_v35  ;;  %v975_v58 = vsel %vm655_vm3, %v974_v49, %v973_v52  ;;  %v13069_v61 = vld [vmem:[%s18547_s7 + $0x28] sm:$0xff]  ;;  %v15213_v12 = vmov 1966171168   ;;  %s15214_s25 = smov 96  }
 0x100   : > { %v15728_v48 = vpack.c.bf16 %v633_v37, %v632_v36  ;;  %v15731_v51 = vpack.c.bf16 %v13067_v42, %v13066_v41  ;;  %v1125_v55 = vsel %vm652_vm2, %v1124_v45, %v1123_v47  ;;  %v13068_v60 = vld [vmem:[%s18547_s7 + $0x20] sm:$0xff]  ;;  %v1267_v63 = vld [vmem:[%s15648_s1 + $0x10] sm:$0x1]  ;;  %v1723_v11 = vld [vmem:[%s15640_s26 + $0x11] sm:$0x1]  ;;  %v897_v14 = vunpack.c.l.s4 %v15213_v12  ;;  %s18550_s6 = sld [smem:[#allocation33_spill]] }
 0x101   : > { %v1127_v59 = vsel %vm655_vm3, %v1126_v53, %v1125_v55  ;;  %v15768_v62 = vpack.c.bf16 %v13069_v61, %v13068_v60  ;;  %v1268_v1 = vld [vmem:[%s15648_s1 + $0x20] sm:$0x1]  ;;  %v1274_v2 = vrot.slane %v1267_v63, 7  ;;  %v1269_v4 = vld [vmem:[%s15648_s1 + $0x30] sm:$0x1]  ;;  %v1730_v21 = vrot.slane %v1723_v11, 7 }
 0x102   : > { %v1266_v3 = vld [vmem:[%s15648_s1] sm:$0x1]  ;;  %v1276_v5 = vrot.slane %v1268_v1, 6  ;;  %v1278_v8 = vrot.slane %v1269_v4, 5  ;;  %v2176_v16 = vld [vmem:[%s15633_s10 + $0x12] sm:$0x1]  ;;  %v898_v24 = vunpack.c.0.s8 %v897_v14 }
 0x103   : > { %v1275_v6 = vsel %vm649_vm0, %v1274_v2, %v1266_v3  ;;  %v1724_v20 = vld [vmem:[%s15640_s26 + $0x21] sm:$0x1]  ;;  %v1874_v23 = vld [vmem:[%s15646_s21 + $0x11] sm:$0x1]  ;;  %v2177_v26 = vld [vmem:[%s15633_s10 + $0x22] sm:$0x1] }
 0x104   : > { %v1277_v9 = vsel %vm652_vm2, %v1276_v5, %v1275_v6  ;;  %v1722_v22 = vld [vmem:[%s15640_s26 + $0x1] sm:$0x1]  ;;  %v2183_v27 = vrot.slane %v2176_v16, 7  ;;  %v1725_v28 = vld [vmem:[%s15640_s26 + $0x31] sm:$0x1]  ;;  %v1732_v29 = vrot.slane %v1724_v20, 6  ;;  %v15798_v41 = vsub.s32 %v898_v24, %v900_v25 }
 0x105   : > { %v1279_v10 = vsel %vm655_vm3, %v1278_v8, %v1277_v9  ;;  %v2175_v30 = vld [vmem:[%s15633_s10 + $0x2] sm:$0x1]  ;;  %v1731_v31 = vsel %vm649_vm0, %v1730_v21, %v1722_v22  ;;  %v1875_v32 = vld [vmem:[%s15646_s21 + $0x21] sm:$0x1]  ;;  %v1881_v33 = vrot.slane %v1874_v23, 7  ;;  %v2185_v37 = vrot.slane %v2177_v26, 6 }
 0x106   : > { %v2178_v36 = vld [vmem:[%s15633_s10 + $0x32] sm:$0x1]  ;;  %v1873_v38 = vld [vmem:[%s15646_s21 + $0x1] sm:$0x1]  ;;  %v1734_v42 = vrot.slane %v1725_v28, 5  ;;  %v2184_v43 = vsel %vm649_vm0, %v2183_v27, %v2175_v30  ;;  %v1733_v46 = vsel %vm652_vm2, %v1732_v29, %v1731_v31  ;;  %v1883_v47 = vrot.slane %v1875_v32, 6 }
 0x107   : > { %v2187_v49 = vrot.slane %v2178_v36, 5  ;;  %v1882_v50 = vsel %vm649_vm0, %v1881_v33, %v1873_v38  ;;  %v1876_v55 = vld [vmem:[%s15646_s21 + $0x31] sm:$0x1]  ;;  %vm12790_vm8 = vcmask 261120   ;;  %s12808_s3 = scalar_lea.sflag [#allocation4], %s15629_s12  ;;  %s15215_s9 = smov [#allocation14]  }
 0x108   : > { %v1884_v3 = vsel %vm652_vm2, %v1883_v47, %v1882_v50  ;;  %v1885_v8 = vrot.slane %v1876_v55, 5  ;;  %v2026_v55 = vld [vmem:[%s15648_s1 + $0x21] sm:$0x1]  ;;  %s15108_s16 = sshll.u32 %s15215_s9, 4  ;;  %s15109_s16 = int_to_ptr.vmem [resolvable:$false] %s15108_s16 }
 0x109   : > { %s15110_s20 = scalar_lea.vmem %s15109_s16, 20480 }
 0x10a   : > { %v1886_v29 = vsel %vm655_vm3, %v1885_v8, %v1884_v3 }
 0x17e   : > { %v15794_v35 = vpop.permute.xlu0 %891 }
 0x1d0   : > { %v13898_v54 = vpop.f32.mrb[0].mxu0 }
 0x1d1   : > { %v733_v56 = vpop.f32.mrb[1].mxu0  ;;  %13904 = vmatmul.mubr.msk.f32.vlgmr.msra.gmra.mrb[0].mxu1 %vm742_vm6, %v13898_v54  ;;  %v2186_v54 = vsel %vm652_vm2, %v2185_v37, %v2184_v43 }
 0x1d2   : > { %13911 = vmatmul.mubr.msk.f32.vlgmr.msra.gmra.mrb[2].mxu0 %vm742_vm6, %v733_v56  ;;  %14542 = vmatpush3.bf16.msra.mxu1 %v15728_v48  ;;  %v2188_v6 = vsel %vm655_vm3, %v2187_v49, %v2186_v54 }
 0x1d3   : > { %14545 = vmatpush3.bf16.msra.mxu0 %v15731_v51  ;;  %13917 = vmatprep.mubr.msk.f32.mxu1 %vm15210_vm5, %v15211_v19 }
 0x1d4   : > { %13924 = vmatprep.mubr.msk.f32.mxu0 %vm15210_vm5, %v15211_v19  ;;  %13934 = vmatprep.subr.msk.mxu0 %vm664_vm4, %v1431_v57 }
 0x1d5   : > { %13918 = vmatmul.mubr.msk.f32.vlgmr.msra.gmra.mrb[2].mxu1 %vm742_vm6, %v975_v58  ;;  %14546 = vmatprep.subr.bf16.mxu1 %v15209_v0  ;;  %v15808_v58 = vsub.s32 0, %v900_v25 }
 0x1d6   : > { %13925 = vmatmul.mubr.msk.f32.vlgmr.msra.gmra.mrb[4].mxu0 %vm742_vm6, %v1127_v59  ;;  %13931 = vmatprep.mubr.msk.f32.mxu1 %vm15210_vm5, %v15211_v19  ;;  %v1735_v59 = vsel %vm655_vm3, %v1734_v42, %v1733_v46 }
 0x1d7   : > { %13935 = vmatpush3.msk.msra.mxu0 %vm664_vm4, %v1431_v57  ;;  %13936 = vmatprep.mubr.msk.f32.mxu0 %vm657_vm1, %v15669_v7 }
 0x1d8   : > { %14552 = vmatprep.subr.bf16.mxu0 %v15209_v0  ;;  %14548 = vmatpush3.bf16.msra.mxu1 %v15768_v62 }
 0x1d9   : > { %14549 = vmatprep.subr.bf16.mxu1 %v15209_v0 }
 0x1da   : > { %13937 = vmatmul.mubr.msk.f32.vlgmr.msra.gmra.mrb[6].mxu0 %vm657_vm1, %v15681_v17 }
 0x1db   : > { %14554 = vmatpush3.bf16.msra.mxu0 %v15684_v18  ;;  %13950 = vmatprep.mubr.msk.f32.mxu0 %vm15210_vm5, %v15211_v19 }
 0x1dc   : > { %14558 = vmatprep.subr.bf16.mxu0 %v15209_v0  ;;  %13932 = vmatmul.mubr.msk.f32.vlgmr.msra.gmra.mrb[4].mxu1 %vm742_vm6, %v1279_v10 }
 0x1dd   : > { %14551 = vmatpush3.bf16.msra.mxu1 %v15674_v13  ;;  %13943 = vmatprep.mubr.msk.f32.mxu1 %vm15210_vm5, %v15211_v19 }
 0x1de   : > { %14555 = vmatprep.subr.bf16.mxu1 %v15209_v0 }
 0x2a4   : > { %v812_v34 = vpop.f32.mrb[0].mxu1 }
 0x2a5   : > { %v13905_v39 = vpop.f32.mrb[1].mxu1  ;;  %v885_v40 = vpop.f32.mrb[2].mxu0 }
 0x2a6   : > { %v886_v44 = vadd.f32 %v885_v40, %v812_v34  ;;  %v13912_v45 = vpop.f32.mrb[3].mxu0 }
 0x2a8   : > { %v894_v52 = vadd.f32 %v15794_v35, %v886_v44  ;;  %v1044_v53 = vpop.f32.mrb[2].mxu1 }
 0x2a9   : > { %v1055_v56 = vrot.slane %v1044_v53, %v15798_v41  ;;  %v1196_v57 = vpop.f32.mrb[4].mxu0  ;;  %v13919_v60 = vpop.f32.mrb[3].mxu1  ;;  %v2025_v53 = vld [vmem:[%s15648_s1 + $0x11] sm:$0x1] }
 0x2aa   : > { %v902_v61 = vrot.slane %v894_v52, %v15798_v41  ;;  %v929_v63 = vcombine.high %v894_v52, %v894_v52  ;;  %v1207_v1 = vrot.slane %v1196_v57, %v15798_v41  ;;  %v13926_v2 = vpop.f32.mrb[5].mxu0  ;;  %v2024_v57 = vld [vmem:[%s15648_s1 + $0x1] sm:$0x1]  ;;  %v2034_v60 = vrot.slane %v2026_v55, 6  ;;  %v2633_v55 = vld [vmem:[%s15646_s21 + $0x32] sm:$0x1] }
 0x2ab   : > { %v1056_v4 = vcombine.high %v1055_v56, %v1055_v56  ;;  %v1063_v5 = vrot.slane %v1055_v56, %v15798_v41  ;;  %v2032_v56 = vrot.slane %v2025_v53, 7  ;;  %v2935_v53 = vld [vmem:[%s15633_s10 + $0x33] sm:$0x1] }
 0x2ac   : > { %v903_v9 = vcombine.high %v902_v61, %v902_v61  ;;  %v910_v10 = vrot.slane %v902_v61, %v15798_v41  ;;  %v936_v11 = vrot.slane %v929_v63, %v15798_v41  ;;  %v1208_v12 = vcombine.high %v1207_v1, %v1207_v1 }
 0x2ad   : > { %v1070_v14 = vrot.slane %v1056_v4, %v15798_v41  ;;  %13076 = vst.msk [vmem:[%s15819_s15 + $0x80] sm:$0x1] %vm924_vm7, %v1063_v5  ;;  %v1215_v15 = vrot.slane %v1207_v1, %v15798_v41  ;;  %v13938_v16 = vpop.f32.mrb[6].mxu0  ;;  %v1085_v20 = vrot.slane %v1063_v5, %v15808_v58  ;;  %v1071_v21 = vcombine.high %v1063_v5, %v1063_v5 }
 0x2ae   : > { %v917_v22 = vrot.slane %v903_v9, %v15798_v41  ;;  %v918_v23 = vcombine.high %v910_v10, %v910_v10  ;;  %925 = vst.msk [vmem:[%s15819_s15] sm:$0x1] %vm924_vm7, %v910_v10  ;;  %v937_v24 = vcombine.high %v936_v11, %v936_v11  ;;  %v944_v25 = vrot.slane %v936_v11, %v15798_v41  ;;  %v1500_v26 = vpop.f32.mrb[7].mxu0 }
 0x2af   : > { %13944 = vmatmul.mubr.msk.f32.vlgmr.msra.gmra.mrb[6].mxu1 %vm742_vm6, %v13938_v16  ;;  %13077 = vst.msk [vmem:[%s15819_s15 + $0xa0] sm:$0x1] %vm924_vm7, %v1070_v14  ;;  %v1222_v27 = vrot.slane %v1208_v12, %v15798_v41  ;;  %13085 = vst.msk [vmem:[%s15819_s15 + $0x100] sm:$0x1] %vm924_vm7, %v1215_v15  ;;  %1098 = vrot.lane.b32.xlu0 %v1085_v20, %s15214_s25  ;;  %v1237_v28 = vrot.slane %v1215_v15, %v15808_v58  ;;  %v1348_v45 = vpop.f32.mrb[4].mxu1 }
 0x2b0   : > { %13951 = vmatmul.mubr.msk.f32.vlgmr.msra.gmra.mrb[8].mxu0 %vm742_vm6, %v1500_v26  ;;  %13078 = vst.msk [vmem:[%s15819_s15 + $0xc0] sm:$0x1] %vm924_vm7, %v1071_v21  ;;  %v919_v30 = vcombine.high %v917_v22, %v917_v22  ;;  %926 = vst.msk [vmem:[%s15819_s15 + $0x20] sm:$0x1] %vm924_vm7, %v917_v22  ;;  %v951_v31 = vrot.slane %v937_v24, %v15798_v41  ;;  %v952_v32 = vcombine.high %v944_v25, %v944_v25  ;;  %v13933_v47 = vpop.f32.mrb[5].mxu1 }
 0x2b1   : > { %927 = vst.msk [vmem:[%s15819_s15 + $0x40] sm:$0x1] %vm924_vm7, %v918_v23  ;;  %958 = vst.msk [vmem:[%s15819_s15 + $0x1] sm:$0x1] %vm924_vm7, %v944_v25  ;;  %14557 = vmatpush3.bf16.msra.mxu1 %v15728_v48  ;;  %14560 = vmatpush3.bf16.msra.mxu0 %v15731_v51  ;;  %v1241_v33 = vrot.slane %v1222_v27, %v15808_v58  ;;  %v1089_v34 = vrot.slane %v1070_v14, %v15808_v58  ;;  %v2481_v24 = vld [vmem:[%s15640_s26 + $0x22] sm:$0x1] }
 0x2b2   : > { %13086 = vst.msk [vmem:[%s15819_s15 + $0x120] sm:$0x1] %vm924_vm7, %v1222_v27  ;;  %1250 = vrot.lane.b32.xlu1 %v1237_v28, %s15214_s25  ;;  %13957 = vmatprep.mubr.msk.f32.mxu1 %vm15210_vm5, %v15211_v19  ;;  %v1072_v36 = vcombine.high %v1070_v14, %v1070_v14  ;;  %928 = vst.msk [vmem:[%s15819_s15 + $0x60] sm:$0x1] %vm924_vm7, %v919_v30  ;;  %v953_v37 = vcombine.high %v951_v31, %v951_v31  ;;  %v2479_v26 = vld [vmem:[%s15640_s26 + $0x2] sm:$0x1] }
 0x2b3   : > { %959 = vst.msk [vmem:[%s15819_s15 + $0x21] sm:$0x1] %vm924_vm7, %v951_v31  ;;  %960 = vst.msk [vmem:[%s15819_s15 + $0x41] sm:$0x1] %vm924_vm7, %v952_v32  ;;  %13964 = vmatprep.mubr.msk.f32.mxu0 %vm15210_vm5, %v15211_v19  ;;  %13974 = vmatprep.subr.msk.mxu0 %vm664_vm4, %v2188_v6  ;;  %v1224_v38 = vcombine.high %v1222_v27, %v1222_v27  ;;  %v1223_v39 = vcombine.high %v1215_v15, %v1215_v15  ;;  %v2933_v27 = vld [vmem:[%s15633_s10 + $0x13] sm:$0x1] }
 0x2b4   : > { %13958 = vmatmul.mubr.msk.f32.vlgmr.msra.gmra.mrb[8].mxu1 %vm742_vm6, %v1735_v59  ;;  %1252 = vrot.lane.b32.xlu0 %v1241_v33, %s15214_s25  ;;  %13079 = vst.msk [vmem:[%s15819_s15 + $0xe0] sm:$0x1] %vm924_vm7, %v1072_v36  ;;  %v1097_v40 = vrot.slane %v1072_v36, %v15808_v58  ;;  %961 = vst.msk [vmem:[%s15819_s15 + $0x61] sm:$0x1] %vm924_vm7, %v953_v37  ;;  %v1093_v42 = vrot.slane %v1071_v21, %v15808_v58  ;;  %v2027_v59 = vld [vmem:[%s15648_s1 + $0x31] sm:$0x1] }
 0x2b5   : > { %13965 = vmatmul.mubr.msk.f32.vlgmr.msra.gmra.mrb[10].mxu0 %vm742_vm6, %v1886_v29  ;;  %13088 = vst.msk [vmem:[%s15819_s15 + $0x160] sm:$0x1] %vm924_vm7, %v1224_v38  ;;  %13087 = vst.msk [vmem:[%s15819_s15 + $0x140] sm:$0x1] %vm924_vm7, %v1223_v39  ;;  %14561 = vmatprep.subr.bf16.mxu1 %v15209_v0  ;;  %v1249_v43 = vrot.slane %v1224_v38, %v15808_v58  ;;  %v1245_v44 = vrot.slane %v1223_v39, %v15808_v58  ;;  %v2036_v1 = vrot.slane %v2027_v59, 5 }
 0x2b6   : > { %13975 = vmatpush3.msk.msra.mxu0 %vm664_vm4, %v2188_v6  ;;  %1100 = vrot.lane.b32.xlu1 %v1089_v34, %s15214_s25  ;;  %v1359_v46 = vrot.slane %v1348_v45, %v15798_v41  ;;  %v2033_v63 = vsel %vm649_vm0, %v2032_v56, %v2024_v57  ;;  %v2480_v21 = vld [vmem:[%s15640_s26 + $0x12] sm:$0x1]  ;;  %v2489_v31 = vrot.slane %v2481_v24, 6  ;;  %v2934_v36 = vld [vmem:[%s15633_s10 + $0x23] sm:$0x1]  ;;  %v2940_v37 = vrot.slane %v2933_v27, 7 }
 0x2b7   : > { %13976 = vmatprep.mubr.msk.f32.mxu0 %vm657_vm1, %v15669_v7  ;;  %14563 = vmatpush3.bf16.msra.mxu1 %v15768_v62  ;;  %v2035_v3 = vsel %vm652_vm2, %v2034_v60, %v2033_v63  ;;  %v2487_v25 = vrot.slane %v2480_v21, 7  ;;  %v2631_v29 = vld [vmem:[%s15646_s21 + $0x12] sm:$0x1]  ;;  %v2632_v47 = vld [vmem:[%s15646_s21 + $0x22] sm:$0x1] }
 0x2b8   : > { %1104 = vrot.lane.b32.xlu0 %v1097_v40, %s15214_s25  ;;  %13971 = vmatprep.mubr.msk.f32.mxu1 %vm15210_vm5, %v15211_v19  ;;  %v1360_v49 = vcombine.high %v1359_v46, %v1359_v46  ;;  %v1367_v50 = vrot.slane %v1359_v46, %v15798_v41  ;;  %v2037_v4 = vsel %vm655_vm3, %v2036_v1, %v2035_v3  ;;  %v2482_v30 = vld [vmem:[%s15640_s26 + $0x32] sm:$0x1]  ;;  %v2932_v40 = vld [vmem:[%s15633_s10 + $0x3] sm:$0x1]  ;;  %v2630_v46 = vld [vmem:[%s15646_s21 + $0x2] sm:$0x1] }
 0x2b9   : > { %13977 = vmatmul.mubr.msk.f32.vlgmr.msra.gmra.mrb[12].mxu0 %vm657_vm1, %v15681_v17  ;;  %14564 = vmatprep.subr.bf16.mxu1 %v15209_v0  ;;  %v2488_v34 = vsel %vm649_vm0, %v2487_v25, %v2479_v26  ;;  %v2491_v45 = vrot.slane %v2482_v30, 5  ;;  %v2640_v59 = vrot.slane %v2632_v47, 6 }
 0x2ba   : > { %1102 = vrot.lane.b32.xlu1 %v1093_v42, %s15214_s25  ;;  %14567 = vmatprep.subr.bf16.mxu0 %v15209_v0  ;;  %v1374_v52 = vrot.slane %v1360_v49, %v15798_v41  ;;  %13094 = vst.msk [vmem:[%s15819_s15 + $0x180] sm:$0x1] %vm924_vm7, %v1367_v50  ;;  %v1389_v54 = vrot.slane %v1367_v50, %v15808_v58  ;;  %v2638_v42 = vrot.slane %v2631_v29, 7 }
 0x2bb   : > { %14569 = vmatpush3.bf16.msra.mxu0 %v15684_v18  ;;  %13990 = vmatprep.mubr.msk.f32.mxu0 %vm15210_vm5, %v15211_v19  ;;  %v1375_v2 = vcombine.high %v1367_v50, %v1367_v50  ;;  %v2490_v49 = vsel %vm652_vm2, %v2489_v31, %v2488_v34  ;;  %v2942_v50 = vrot.slane %v2934_v36, 6 }
 0x2bc   : > { %1256 = vrot.lane.b32.xlu0 %v1249_v43, %s15214_s25  ;;  %14573 = vmatprep.subr.bf16.mxu0 %v15209_v0  ;;  %13095 = vst.msk [vmem:[%s15819_s15 + $0x1a0] sm:$0x1] %vm924_vm7, %v1374_v52  ;;  %v1393_v61 = vrot.slane %v1374_v52, %v15808_v58  ;;  %v1376_v6 = vcombine.high %v1374_v52, %v1374_v52 }
 0x2bd   : > { %13096 = vst.msk [vmem:[%s15819_s15 + $0x1c0] sm:$0x1] %vm924_vm7, %v1375_v2  ;;  %v1397_v5 = vrot.slane %v1375_v2, %v15808_v58  ;;  %13972 = vmatmul.mubr.msk.f32.vlgmr.msra.gmra.mrb[10].mxu1 %vm742_vm6, %v2037_v4  ;;  %v2639_v57 = vsel %vm649_vm0, %v2638_v42, %v2630_v46  ;;  %v2492_v2 = vsel %vm655_vm3, %v2491_v45, %v2490_v49 }
 0x2be   : > { %1254 = vrot.lane.b32.xlu1 %v1245_v44, %s15214_s25  ;;  %14566 = vmatpush3.bf16.msra.mxu1 %v15674_v13  ;;  %13097 = vst.msk [vmem:[%s15819_s15 + $0x1e0] sm:$0x1] %vm924_vm7, %v1376_v6  ;;  %v1401_v8 = vrot.slane %v1376_v6, %v15808_v58  ;;  %v2641_v21 = vsel %vm652_vm2, %v2640_v59, %v2639_v57  ;;  %v2783_v59 = vld [vmem:[%s15648_s1 + $0x22] sm:$0x1] }
 0x2bf   : > { %13983 = vmatprep.mubr.msk.f32.mxu1 %vm15210_vm5, %v15211_v19  ;;  %14570 = vmatprep.subr.bf16.mxu1 %v15209_v0 }
 0x2c0   : > { %1404 = vrot.lane.b32.xlu0 %v1393_v61, %s15214_s25 }
 0x2c2   : > { %1402 = vrot.lane.b32.xlu1 %v1389_v54, %s15214_s25  ;;  %v2941_v54 = vsel %vm649_vm0, %v2940_v37, %v2932_v40 }
 0x2c3   : > { %v2943_v6 = vsel %vm652_vm2, %v2942_v50, %v2941_v54 }
 0x2c4   : > { %1408 = vrot.lane.b32.xlu0 %v1401_v8, %s15214_s25  ;;  %v2944_v8 = vrot.slane %v2935_v53, 5 }
 0x2c6   : > { %1406 = vrot.lane.b32.xlu1 %v1397_v5, %s15214_s25  ;;  %v2945_v31 = vsel %vm655_vm3, %v2944_v8, %v2943_v6 }
 0x321   : > { %v1099_v9 = vpop.permute.xlu0 %1098 }
 0x322   : > { %13080 = vst.msk [vmem:[%s15819_s15 + $0x81] sm:$0x1] %vm924_vm7, %v1099_v9  ;;  %v2642_v9 = vrot.slane %v2633_v55, 5  ;;  %v2782_v55 = vld [vmem:[%s15648_s1 + $0x12] sm:$0x1] }
 0x324   : > { %v1251_v10 = vpop.permute.xlu1 %1250  ;;  %v2643_v37 = vsel %vm655_vm3, %v2642_v9, %v2641_v21 }
 0x325   : > { %13089 = vst.msk [vmem:[%s15819_s15 + $0x101] sm:$0x1] %vm924_vm7, %v1251_v10 }
 0x326   : > { %v1253_v11 = vpop.permute.xlu0 %1252 }
 0x327   : > { %13090 = vst.msk [vmem:[%s15819_s15 + $0x121] sm:$0x1] %vm924_vm7, %v1253_v11 }
 0x328   : > { %v1101_v12 = vpop.permute.xlu1 %1100 }
 0x329   : > { %13081 = vst.msk [vmem:[%s15819_s15 + $0xa1] sm:$0x1] %vm924_vm7, %v1101_v12 }
 0x32a   : > { %v1105_v14 = vpop.permute.xlu0 %1104 }
 0x32b   : > { %13083 = vst.msk [vmem:[%s15819_s15 + $0xe1] sm:$0x1] %vm924_vm7, %v1105_v14 }
 0x32c   : > { %v1103_v15 = vpop.permute.xlu1 %1102 }
 0x32d   : > { %13082 = vst.msk [vmem:[%s15819_s15 + $0xc1] sm:$0x1] %vm924_vm7, %v1103_v15 }
 0x32e   : > { %v1257_v16 = vpop.permute.xlu0 %1256 }
 0x32f   : > { %13092 = vst.msk [vmem:[%s15819_s15 + $0x161] sm:$0x1] %vm924_vm7, %v1257_v16 }
 0x330   : > { %v1255_v20 = vpop.permute.xlu1 %1254 }
 0x331   : > { %13091 = vst.msk [vmem:[%s15819_s15 + $0x141] sm:$0x1] %vm924_vm7, %v1255_v20 }
 0x332   : > { %v1405_v23 = vpop.permute.xlu0 %1404 }
 0x333   : > { %13099 = vst.msk [vmem:[%s15819_s15 + $0x1a1] sm:$0x1] %vm924_vm7, %v1405_v23 }
 0x334   : > { %v1403_v22 = vpop.permute.xlu1 %1402 }
 0x335   : > { %13098 = vst.msk [vmem:[%s15819_s15 + $0x181] sm:$0x1] %vm924_vm7, %v1403_v22 }
 0x336   : > { %v1409_v32 = vpop.permute.xlu0 %1408 }
 0x337   : > { %13101 = vst.msk [vmem:[%s15819_s15 + $0x1e1] sm:$0x1] %vm924_vm7, %v1409_v32 }
 0x338   : > { %v1407_v28 = vpop.permute.xlu1 %1406 }
 0x339   : > { %13100 = vst.msk [vmem:[%s15819_s15 + $0x1c1] sm:$0x1] %vm924_vm7, %v1407_v28 }
 0x382   : > { %v1578_v33 = vpop.f32.mrb[6].mxu1 }
 0x383   : > { %v13945_v38 = vpop.f32.mrb[7].mxu1  ;;  %v1651_v39 = vpop.f32.mrb[8].mxu0 }
 0x384   : > { %v1652_v43 = vadd.f32 %v1651_v39, %v1578_v33  ;;  %v13952_v44 = vpop.f32.mrb[9].mxu0 }
 0x386   : > { %v1655_v52 = vadd.f32 %v1652_v43, %v15794_v35 }
 0x387   : > { %v1804_v56 = vpop.f32.mrb[8].mxu1 }
 0x388   : > { %v1663_v60 = vrot.slane %v1655_v52, %v15798_v41  ;;  %v1689_v61 = vcombine.high %v1655_v52, %v1655_v52  ;;  %v1815_v63 = vrot.slane %v1804_v56, %v15798_v41  ;;  %v1955_v1 = vpop.f32.mrb[10].mxu0  ;;  %v13959_v3 = vpop.f32.mrb[9].mxu1 }
 0x389   : > { %v1966_v4 = vrot.slane %v1955_v1, %v15798_v41  ;;  %v13966_v5 = vpop.f32.mrb[11].mxu0  ;;  %v2791_v1 = vrot.slane %v2783_v59, 6  ;;  %v3390_v59 = vld [vmem:[%s15646_s21 + $0x33] sm:$0x1] }
 0x38a   : > { %v1664_v10 = vcombine.high %v1663_v60, %v1663_v60  ;;  %v1671_v11 = vrot.slane %v1663_v60, %v15798_v41  ;;  %v1696_v12 = vrot.slane %v1689_v61, %v15798_v41  ;;  %v1816_v14 = vcombine.high %v1815_v63, %v1815_v63  ;;  %v2781_v61 = vld [vmem:[%s15648_s1 + $0x2] sm:$0x1] }
 0x38b   : > { %v1823_v15 = vrot.slane %v1815_v63, %v15798_v41  ;;  %v1967_v16 = vcombine.high %v1966_v4, %v1966_v4  ;;  %v1974_v20 = vrot.slane %v1966_v4, %v15798_v41  ;;  %v2789_v60 = vrot.slane %v2782_v55, 7  ;;  %v2784_v63 = vld [vmem:[%s15648_s1 + $0x32] sm:$0x1] }
 0x38c   : > { %v1678_v22 = vrot.slane %v1664_v10, %v15798_v41  ;;  %v1679_v23 = vcombine.high %v1671_v11, %v1671_v11  ;;  %1685 = vst.msk [vmem:[%s15819_s15 + $0x2] sm:$0x1] %vm924_vm7, %v1671_v11  ;;  %v1697_v24 = vcombine.high %v1696_v12, %v1696_v12  ;;  %v1704_v25 = vrot.slane %v1696_v12, %v15798_v41  ;;  %v13978_v26 = vpop.f32.mrb[12].mxu0 }
 0x38d   : > { %v1830_v27 = vrot.slane %v1816_v14, %v15798_v41  ;;  %13108 = vst.msk [vmem:[%s15819_s15 + $0x82] sm:$0x1] %vm924_vm7, %v1823_v15  ;;  %v1981_v28 = vrot.slane %v1967_v16, %v15798_v41  ;;  %13117 = vst.msk [vmem:[%s15819_s15 + $0x102] sm:$0x1] %vm924_vm7, %v1974_v20  ;;  %v2257_v29 = vpop.f32.mrb[13].mxu0  ;;  %13984 = vmatmul.mubr.msk.f32.vlgmr.msra.gmra.mrb[12].mxu1 %vm742_vm6, %v13978_v26  ;;  %v1844_v30 = vrot.slane %v1823_v15, %v15808_v58 }
 0x38e   : > { %v1680_v32 = vcombine.high %v1678_v22, %v1678_v22  ;;  %1686 = vst.msk [vmem:[%s15819_s15 + $0x22] sm:$0x1] %vm924_vm7, %v1678_v22  ;;  %1687 = vst.msk [vmem:[%s15819_s15 + $0x42] sm:$0x1] %vm924_vm7, %v1679_v23  ;;  %v1711_v33 = vrot.slane %v1697_v24, %v15798_v41  ;;  %v1712_v34 = vcombine.high %v1704_v25, %v1704_v25  ;;  %13991 = vmatmul.mubr.msk.f32.vlgmr.msra.gmra.mrb[14].mxu0 %vm742_vm6, %v2257_v29  ;;  %v3237_v24 = vld [vmem:[%s15640_s26 + $0x13] sm:$0x1] }
 0x38f   : > { %1718 = vst.msk [vmem:[%s15819_s15 + $0x3] sm:$0x1] %vm924_vm7, %v1704_v25  ;;  %14572 = vmatpush3.bf16.msra.mxu1 %v15728_v48  ;;  %13109 = vst.msk [vmem:[%s15819_s15 + $0xa2] sm:$0x1] %vm924_vm7, %v1830_v27  ;;  %1857 = vrot.lane.b32.xlu1 %v1844_v30, %s15214_s25  ;;  %v1848_v36 = vrot.slane %v1830_v27, %v15808_v58  ;;  %v1831_v38 = vcombine.high %v1823_v15, %v1823_v15  ;;  %v2793_v4 = vrot.slane %v2784_v63, 5 }
 0x390   : > { %13118 = vst.msk [vmem:[%s15819_s15 + $0x122] sm:$0x1] %vm924_vm7, %v1981_v28  ;;  %14575 = vmatpush3.bf16.msra.mxu0 %v15731_v51  ;;  %1688 = vst.msk [vmem:[%s15819_s15 + $0x62] sm:$0x1] %vm924_vm7, %v1680_v32  ;;  %v1713_v39 = vcombine.high %v1711_v33, %v1711_v33  ;;  %13997 = vmatprep.mubr.msk.f32.mxu1 %vm15210_vm5, %v15211_v19  ;;  %v1832_v40 = vcombine.high %v1830_v27, %v1830_v27  ;;  %v2106_v49 = vpop.f32.mrb[10].mxu1 }
 0x391   : > { %1719 = vst.msk [vmem:[%s15819_s15 + $0x23] sm:$0x1] %vm924_vm7, %v1711_v33  ;;  %1720 = vst.msk [vmem:[%s15819_s15 + $0x43] sm:$0x1] %vm924_vm7, %v1712_v34  ;;  %14004 = vmatprep.mubr.msk.f32.mxu0 %vm15210_vm5, %v15211_v19  ;;  %v1982_v42 = vcombine.high %v1974_v20, %v1974_v20  ;;  %1859 = vrot.lane.b32.xlu0 %v1848_v36, %s15214_s25  ;;  %v1995_v43 = vrot.slane %v1974_v20, %v15808_v58  ;;  %v13973_v52 = vpop.f32.mrb[11].mxu1 }
 0x392   : > { %13998 = vmatmul.mubr.msk.f32.vlgmr.msra.gmra.mrb[14].mxu1 %vm742_vm6, %v2492_v2  ;;  %13110 = vst.msk [vmem:[%s15819_s15 + $0xc2] sm:$0x1] %vm924_vm7, %v1831_v38  ;;  %v1983_v44 = vcombine.high %v1981_v28, %v1981_v28  ;;  %1721 = vst.msk [vmem:[%s15819_s15 + $0x63] sm:$0x1] %vm924_vm7, %v1713_v39  ;;  %14014 = vmatprep.subr.msk.mxu0 %vm664_vm4, %v2945_v31  ;;  %v1999_v45 = vrot.slane %v1981_v28, %v15808_v58  ;;  %v3238_v27 = vld [vmem:[%s15640_s26 + $0x23] sm:$0x1] }
 0x393   : > { %14005 = vmatmul.mubr.msk.f32.vlgmr.msra.gmra.mrb[16].mxu0 %vm742_vm6, %v2643_v37  ;;  %13111 = vst.msk [vmem:[%s15819_s15 + $0xe2] sm:$0x1] %vm924_vm7, %v1832_v40  ;;  %13119 = vst.msk [vmem:[%s15819_s15 + $0x142] sm:$0x1] %vm924_vm7, %v1982_v42  ;;  %2008 = vrot.lane.b32.xlu1 %v1995_v43, %s15214_s25  ;;  %v1852_v46 = vrot.slane %v1831_v38, %v15808_v58  ;;  %v1856_v47 = vrot.slane %v1832_v40, %v15808_v58  ;;  %v3244_v28 = vrot.slane %v3237_v24, 7 }
 0x394   : > { %14015 = vmatpush3.msk.msra.mxu0 %vm664_vm4, %v2945_v31  ;;  %13120 = vst.msk [vmem:[%s15819_s15 + $0x162] sm:$0x1] %vm924_vm7, %v1983_v44  ;;  %14016 = vmatprep.mubr.msk.f32.mxu0 %vm657_vm1, %v15669_v7  ;;  %v2003_v7 = vrot.slane %v1982_v42, %v15808_v58  ;;  %v2117_v50 = vrot.slane %v2106_v49, %v15798_v41  ;;  %v3236_v29 = vld [vmem:[%s15640_s26 + $0x3] sm:$0x1]  ;;  %v3690_v30 = vld [vmem:[%s15633_s10 + $0x14] sm:$0x1] }
 0x395   : > { %14576 = vmatprep.subr.bf16.mxu1 %v15209_v0  ;;  %2010 = vrot.lane.b32.xlu0 %v1999_v45, %s15214_s25  ;;  %v2790_v3 = vsel %vm649_vm0, %v2789_v60, %v2781_v61  ;;  %v3388_v32 = vld [vmem:[%s15646_s21 + $0x13] sm:$0x1]  ;;  %v3246_v34 = vrot.slane %v3238_v27, 6  ;;  %v3245_v37 = vsel %vm649_vm0, %v3244_v28, %v3236_v29  ;;  %v3691_v38 = vld [vmem:[%s15633_s10 + $0x24] sm:$0x1]  ;;  %v3697_v39 = vrot.slane %v3690_v30, 7 }
 0x396   : > { %14578 = vmatpush3.bf16.msra.mxu1 %v15768_v62  ;;  %14011 = vmatprep.mubr.msk.f32.mxu1 %vm15210_vm5, %v15211_v19  ;;  %v2118_v53 = vcombine.high %v2117_v50, %v2117_v50  ;;  %v2125_v54 = vrot.slane %v2117_v50, %v15798_v41  ;;  %v2792_v6 = vsel %vm652_vm2, %v2791_v1, %v2790_v3  ;;  %v3239_v33 = vld [vmem:[%s15640_s26 + $0x33] sm:$0x1]  ;;  %v3689_v42 = vld [vmem:[%s15633_s10 + $0x4] sm:$0x1]  ;;  %v3389_v43 = vld [vmem:[%s15646_s21 + $0x23] sm:$0x1] }
 0x397   : > { %14017 = vmatmul.mubr.msk.f32.vlgmr.msra.gmra.mrb[18].mxu0 %vm657_vm1, %v15681_v17  ;;  %1861 = vrot.lane.b32.xlu1 %v1852_v46, %s15214_s25  ;;  %v2007_v17 = vrot.slane %v1983_v44, %v15808_v58  ;;  %v2794_v8 = vsel %vm655_vm3, %v2793_v4, %v2792_v6  ;;  %v3395_v44 = vrot.slane %v3388_v32, 7  ;;  %v3247_v50 = vsel %vm652_vm2, %v3246_v34, %v3245_v37  ;;  %v3692_v52 = vld [vmem:[%s15633_s10 + $0x34] sm:$0x1] }
 0x398   : > { %14579 = vmatprep.subr.bf16.mxu1 %v15209_v0  ;;  %14582 = vmatprep.subr.bf16.mxu0 %v15209_v0  ;;  %v2132_v56 = vrot.slane %v2118_v53, %v15798_v41  ;;  %13126 = vst.msk [vmem:[%s15819_s15 + $0x182] sm:$0x1] %vm924_vm7, %v2125_v54  ;;  %v2146_v57 = vrot.slane %v2125_v54, %v15808_v58  ;;  %v3699_v53 = vrot.slane %v3691_v38, 6  ;;  %v3397_v55 = vrot.slane %v3389_v43, 6 }
 0x399   : > { %14030 = vmatprep.mubr.msk.f32.mxu0 %vm15210_vm5, %v15211_v19  ;;  %1863 = vrot.lane.b32.xlu0 %v1856_v47, %s15214_s25  ;;  %v2133_v5 = vcombine.high %v2125_v54, %v2125_v54  ;;  %v3248_v47 = vrot.slane %v3239_v33, 5  ;;  %v3698_v54 = vsel %vm649_vm0, %v3697_v39, %v3689_v42 }
 0x39a   : > { %14584 = vmatpush3.bf16.msra.mxu0 %v15684_v18  ;;  %13127 = vst.msk [vmem:[%s15819_s15 + $0x1a2] sm:$0x1] %vm924_vm7, %v2132_v56  ;;  %v2150_v2 = vrot.slane %v2132_v56, %v15808_v58  ;;  %v2134_v10 = vcombine.high %v2132_v56, %v2132_v56  ;;  %14012 = vmatmul.mubr.msk.f32.vlgmr.msra.gmra.mrb[16].mxu1 %vm742_vm6, %v2794_v8 }
 0x39b   : > { %14588 = vmatprep.subr.bf16.mxu0 %v15209_v0  ;;  %2012 = vrot.lane.b32.xlu1 %v2003_v7, %s15214_s25  ;;  %13128 = vst.msk [vmem:[%s15819_s15 + $0x1c2] sm:$0x1] %vm924_vm7, %v2133_v5  ;;  %v2154_v9 = vrot.slane %v2133_v5, %v15808_v58  ;;  %v3387_v7 = vld [vmem:[%s15646_s21 + $0x3] sm:$0x1]  ;;  %v3249_v1 = vsel %vm655_vm3, %v3248_v47, %v3247_v50 }
 0x39c   : > { %14581 = vmatpush3.bf16.msra.mxu1 %v15674_v13  ;;  %13129 = vst.msk [vmem:[%s15819_s15 + $0x1e2] sm:$0x1] %vm924_vm7, %v2134_v10  ;;  %v2158_v11 = vrot.slane %v2134_v10, %v15808_v58  ;;  %14023 = vmatprep.mubr.msk.f32.mxu1 %vm15210_vm5, %v15211_v19  ;;  %v3396_v60 = vsel %vm649_vm0, %v3395_v44, %v3387_v7 }
 0x39d   : > { %2014 = vrot.lane.b32.xlu0 %v2007_v17, %s15214_s25  ;;  %14585 = vmatprep.subr.bf16.mxu1 %v15209_v0 }
 0x39f   : > { %2159 = vrot.lane.b32.xlu1 %v2146_v57, %s15214_s25 }
 0x3a1   : > { %2161 = vrot.lane.b32.xlu0 %v2150_v2, %s15214_s25  ;;  %v3701_v2 = vrot.slane %v3692_v52, 5 }
 0x3a3   : > { %2163 = vrot.lane.b32.xlu1 %v2154_v9, %s15214_s25  ;;  %v3700_v9 = vsel %vm652_vm2, %v3699_v53, %v3698_v54 }
 0x3a4   : > { %v3702_v34 = vsel %vm655_vm3, %v3701_v2, %v3700_v9  ;;  %v3538_v2 = vld [vmem:[%s15648_s1 + $0x3] sm:$0x1] }
 0x3a5   : > { %2165 = vrot.lane.b32.xlu0 %v2158_v11, %s15214_s25 }
 0x401   : > { %v1858_v12 = vpop.permute.xlu1 %1857 }
 0x402   : > { %13112 = vst.msk [vmem:[%s15819_s15 + $0x83] sm:$0x1] %vm924_vm7, %v1858_v12  ;;  %v3398_v12 = vsel %vm652_vm2, %v3397_v55, %v3396_v60  ;;  %v3539_v60 = vld [vmem:[%s15648_s1 + $0x13] sm:$0x1] }
 0x403   : > { %v1860_v14 = vpop.permute.xlu0 %1859 }
 0x404   : > { %13113 = vst.msk [vmem:[%s15819_s15 + $0xa3] sm:$0x1] %vm924_vm7, %v1860_v14  ;;  %v3399_v14 = vrot.slane %v3390_v59, 5 }
 0x405   : > { %v2009_v15 = vpop.permute.xlu1 %2008 }
 0x406   : > { %13121 = vst.msk [vmem:[%s15819_s15 + $0x103] sm:$0x1] %vm924_vm7, %v2009_v15 }
 0x407   : > { %v2011_v16 = vpop.permute.xlu0 %2010 }
 0x408   : > { %13122 = vst.msk [vmem:[%s15819_s15 + $0x123] sm:$0x1] %vm924_vm7, %v2011_v16 }
 0x409   : > { %v1862_v20 = vpop.permute.xlu1 %1861 }
 0x40a   : > { %13114 = vst.msk [vmem:[%s15819_s15 + $0xc3] sm:$0x1] %vm924_vm7, %v1862_v20 }
 0x40b   : > { %v1864_v21 = vpop.permute.xlu0 %1863 }
 0x40c   : > { %13115 = vst.msk [vmem:[%s15819_s15 + $0xe3] sm:$0x1] %vm924_vm7, %v1864_v21 }
 0x40d   : > { %v2013_v22 = vpop.permute.xlu1 %2012 }
 0x40e   : > { %13123 = vst.msk [vmem:[%s15819_s15 + $0x143] sm:$0x1] %vm924_vm7, %v2013_v22 }
 0x40f   : > { %v2015_v23 = vpop.permute.xlu0 %2014 }
 0x410   : > { %13124 = vst.msk [vmem:[%s15819_s15 + $0x163] sm:$0x1] %vm924_vm7, %v2015_v23 }
 0x411   : > { %v2160_v25 = vpop.permute.xlu1 %2159 }
 0x412   : > { %13130 = vst.msk [vmem:[%s15819_s15 + $0x183] sm:$0x1] %vm924_vm7, %v2160_v25 }
 0x413   : > { %v2162_v26 = vpop.permute.xlu0 %2161 }
 0x414   : > { %13131 = vst.msk [vmem:[%s15819_s15 + $0x1a3] sm:$0x1] %vm924_vm7, %v2162_v26 }
 0x415   : > { %v2164_v31 = vpop.permute.xlu1 %2163 }
 0x416   : > { %13132 = vst.msk [vmem:[%s15819_s15 + $0x1c3] sm:$0x1] %vm924_vm7, %v2164_v31 }
 0x417   : > { %v2166_v36 = vpop.permute.xlu0 %2165 }
 0x418   : > { %13133 = vst.msk [vmem:[%s15819_s15 + $0x1e3] sm:$0x1] %vm924_vm7, %v2166_v36 }
 0x460   : > { %v2335_v40 = vpop.f32.mrb[12].mxu1 }
 0x461   : > { %v13985_v45 = vpop.f32.mrb[13].mxu1  ;;  %v2408_v46 = vpop.f32.mrb[14].mxu0 }
 0x462   : > { %v2409_v17 = vadd.f32 %v2408_v46, %v2335_v40  ;;  %v13992_v49 = vpop.f32.mrb[15].mxu0  ;;  %v3400_v40 = vsel %vm655_vm3, %v3399_v14, %v3398_v12 }
 0x463   : > { %v16222_v49 = vld [vmem:[%s18545_s19 + $0x8] sm:$0xff] }
 0x464   : > { %v2412_v56 = vadd.f32 %v2409_v17, %v15794_v35  ;;  %v16211_v17 = vld [vmem:[%s18545_s19] sm:$0xff] }
 0x465   : > { %v2561_v57 = vpop.f32.mrb[14].mxu1 }
 0x466   : > { %v2572_v61 = vrot.slane %v2561_v57, %v15798_v41  ;;  %v2712_v63 = vpop.f32.mrb[16].mxu0  ;;  %v13999_v3 = vpop.f32.mrb[15].mxu1  ;;  %v2420_v4 = vrot.slane %v2412_v56, %v15798_v41  ;;  %v2446_v5 = vcombine.high %v2412_v56, %v2412_v56 }
 0x467   : > { %v2723_v6 = vrot.slane %v2712_v63, %v15798_v41  ;;  %v14006_v8 = vpop.f32.mrb[17].mxu0  ;;  %v3540_v63 = vld [vmem:[%s15648_s1 + $0x23] sm:$0x1]  ;;  %v3541_v3 = vld [vmem:[%s15648_s1 + $0x33] sm:$0x1] }
 0x468   : > { %v2573_v10 = vcombine.high %v2572_v61, %v2572_v61  ;;  %v2580_v11 = vrot.slane %v2572_v61, %v15798_v41  ;;  %v2421_v15 = vcombine.high %v2420_v4, %v2420_v4  ;;  %v2428_v16 = vrot.slane %v2420_v4, %v15798_v41 }
 0x469   : > { %v2453_v20 = vrot.slane %v2446_v5, %v15798_v41  ;;  %v2724_v21 = vcombine.high %v2723_v6, %v2723_v6  ;;  %v2731_v23 = vrot.slane %v2723_v6, %v15798_v41  ;;  %v3548_v4 = vrot.slane %v3540_v63, 6  ;;  %v4147_v63 = vld [vmem:[%s15646_s21 + $0x34] sm:$0x1] }
 0x46a   : > { %v2587_v22 = vrot.slane %v2573_v10, %v15798_v41  ;;  %13140 = vst.msk [vmem:[%s15819_s15 + $0x84] sm:$0x1] %vm924_vm7, %v2580_v11  ;;  %v14018_v24 = vpop.f32.mrb[18].mxu0  ;;  %v2601_v25 = vrot.slane %v2580_v11, %v15808_v58  ;;  %v2588_v26 = vcombine.high %v2580_v11, %v2580_v11  ;;  %v2435_v27 = vrot.slane %v2421_v15, %v15798_v41 }
 0x46b   : > { %v2436_v28 = vcombine.high %v2428_v16, %v2428_v16  ;;  %2442 = vst.msk [vmem:[%s15819_s15 + $0x4] sm:$0x1] %vm924_vm7, %v2428_v16  ;;  %v2454_v29 = vcombine.high %v2453_v20, %v2453_v20  ;;  %v2461_v30 = vrot.slane %v2453_v20, %v15798_v41  ;;  %v3014_v31 = vpop.f32.mrb[19].mxu0  ;;  %14024 = vmatmul.mubr.msk.f32.vlgmr.msra.gmra.mrb[18].mxu1 %vm742_vm6, %v14018_v24  ;;  %13149 = vst.msk [vmem:[%s15819_s15 + $0x104] sm:$0x1] %vm924_vm7, %v2731_v23 }
 0x46c   : > { %13141 = vst.msk [vmem:[%s15819_s15 + $0xa4] sm:$0x1] %vm924_vm7, %v2587_v22  ;;  %v2738_v32 = vrot.slane %v2724_v21, %v15798_v41  ;;  %2614 = vrot.lane.b32.xlu1 %v2601_v25, %s15214_s25  ;;  %14031 = vmatmul.mubr.msk.f32.vlgmr.msra.gmra.mrb[20].mxu0 %vm742_vm6, %v3014_v31  ;;  %v2605_v33 = vrot.slane %v2587_v22, %v15808_v58  ;;  %13142 = vst.msk [vmem:[%s15819_s15 + $0xc4] sm:$0x1] %vm924_vm7, %v2588_v26  ;;  %v3550_v8 = vrot.slane %v3541_v3, 5 }
 0x46d   : > { %v2437_v36 = vcombine.high %v2435_v27, %v2435_v27  ;;  %2443 = vst.msk [vmem:[%s15819_s15 + $0x24] sm:$0x1] %vm924_vm7, %v2435_v27  ;;  %2444 = vst.msk [vmem:[%s15819_s15 + $0x44] sm:$0x1] %vm924_vm7, %v2436_v28  ;;  %v2468_v37 = vrot.slane %v2454_v29, %v15798_v41  ;;  %v2469_v38 = vcombine.high %v2461_v30, %v2461_v30  ;;  %14587 = vmatpush3.bf16.msra.mxu1 %v15728_v48  ;;  %v2863_v53 = vpop.f32.mrb[16].mxu1 }
 0x46e   : > { %2475 = vst.msk [vmem:[%s15819_s15 + $0x5] sm:$0x1] %vm924_vm7, %v2461_v30  ;;  %14590 = vmatpush3.bf16.msra.mxu0 %v15731_v51  ;;  %13150 = vst.msk [vmem:[%s15819_s15 + $0x124] sm:$0x1] %vm924_vm7, %v2738_v32  ;;  %2616 = vrot.lane.b32.xlu0 %v2605_v33, %s15214_s25  ;;  %v2752_v39 = vrot.slane %v2731_v23, %v15808_v58  ;;  %v2589_v42 = vcombine.high %v2587_v22, %v2587_v22  ;;  %v14013_v55 = vpop.f32.mrb[17].mxu1 }
 0x46f   : > { %14037 = vmatprep.mubr.msk.f32.mxu1 %vm15210_vm5, %v15211_v19  ;;  %2445 = vst.msk [vmem:[%s15819_s15 + $0x64] sm:$0x1] %vm924_vm7, %v2437_v36  ;;  %v2470_v43 = vcombine.high %v2468_v37, %v2468_v37  ;;  %2476 = vst.msk [vmem:[%s15819_s15 + $0x25] sm:$0x1] %vm924_vm7, %v2468_v37  ;;  %14044 = vmatprep.mubr.msk.f32.mxu0 %vm15210_vm5, %v15211_v19  ;;  %v2739_v44 = vcombine.high %v2731_v23, %v2731_v23  ;;  %v3994_v27 = vld [vmem:[%s15640_s26 + $0x14] sm:$0x1] }
 0x470   : > { %2477 = vst.msk [vmem:[%s15819_s15 + $0x45] sm:$0x1] %vm924_vm7, %v2469_v38  ;;  %14054 = vmatprep.subr.msk.mxu0 %vm664_vm4, %v3702_v34  ;;  %v2740_v45 = vcombine.high %v2738_v32, %v2738_v32  ;;  %14038 = vmatmul.mubr.msk.f32.vlgmr.msra.gmra.mrb[20].mxu1 %vm742_vm6, %v3249_v1  ;;  %v2756_v46 = vrot.slane %v2738_v32, %v15808_v58  ;;  %13143 = vst.msk [vmem:[%s15819_s15 + $0xe4] sm:$0x1] %vm924_vm7, %v2589_v42  ;;  %v3546_v1 = vrot.slane %v3539_v60, 7 }
 0x471   : > { %2765 = vrot.lane.b32.xlu1 %v2752_v39, %s15214_s25  ;;  %v2609_v47 = vrot.slane %v2588_v26, %v15808_v58  ;;  %2478 = vst.msk [vmem:[%s15819_s15 + $0x65] sm:$0x1] %vm924_vm7, %v2470_v43  ;;  %14045 = vmatmul.mubr.msk.f32.vlgmr.msra.gmra.mrb[22].mxu0 %vm742_vm6, %v3400_v40  ;;  %13151 = vst.msk [vmem:[%s15819_s15 + $0x144] sm:$0x1] %vm924_vm7, %v2739_v44  ;;  %v2613_v7 = vrot.slane %v2589_v42, %v15808_v58  ;;  %v3995_v30 = vld [vmem:[%s15640_s26 + $0x24] sm:$0x1] }
 0x472   : > { %13152 = vst.msk [vmem:[%s15819_s15 + $0x164] sm:$0x1] %vm924_vm7, %v2740_v45  ;;  %14591 = vmatprep.subr.bf16.mxu1 %v15209_v0  ;;  %14055 = vmatpush3.msk.msra.mxu0 %vm664_vm4, %v3702_v34  ;;  %v2760_v50 = vrot.slane %v2739_v44, %v15808_v58  ;;  %v2764_v52 = vrot.slane %v2740_v45, %v15808_v58  ;;  %v4001_v31 = vrot.slane %v3994_v27, 7  ;;  %v3993_v32 = vld [vmem:[%s15640_s26 + $0x4] sm:$0x1]  ;;  %v4003_v38 = vrot.slane %v3995_v30, 6 }
 0x473   : > { %2767 = vrot.lane.b32.xlu0 %v2756_v46, %s15214_s25  ;;  %14056 = vmatprep.mubr.msk.f32.mxu0 %vm657_vm1, %v16211_v17  ;;  %v2874_v54 = vrot.slane %v2863_v53, %v15798_v41  ;;  %v3547_v6 = vsel %vm649_vm0, %v3546_v1, %v3538_v2  ;;  %v4447_v33 = vld [vmem:[%s15633_s10 + $0x15] sm:$0x1]  ;;  %v4145_v36 = vld [vmem:[%s15646_s21 + $0x14] sm:$0x1]  ;;  %v4448_v43 = vld [vmem:[%s15633_s10 + $0x25] sm:$0x1] }
 0x474   : > { %14593 = vmatpush3.bf16.msra.mxu1 %v15768_v62  ;;  %14051 = vmatprep.mubr.msk.f32.mxu1 %vm15210_vm5, %v15211_v19  ;;  %v3549_v10 = vsel %vm652_vm2, %v3548_v4, %v3547_v6  ;;  %v3996_v37 = vld [vmem:[%s15640_s26 + $0x34] sm:$0x1]  ;;  %v4002_v42 = vsel %vm649_vm0, %v4001_v31, %v3993_v32  ;;  %v4454_v44 = vrot.slane %v4447_v33, 7  ;;  %v4146_v55 = vld [vmem:[%s15646_s21 + $0x24] sm:$0x1] }
 0x475   : > { %2618 = vrot.lane.b32.xlu1 %v2609_v47, %s15214_s25  ;;  %14057 = vmatmul.mubr.msk.f32.vlgmr.msra.gmra.mrb[24].mxu0 %vm657_vm1, %v16222_v49  ;;  %v2875_v56 = vcombine.high %v2874_v54, %v2874_v54  ;;  %v2882_v57 = vrot.slane %v2874_v54, %v15798_v41  ;;  %v3551_v11 = vsel %vm655_vm3, %v3550_v8, %v3549_v10  ;;  %v4446_v47 = vld [vmem:[%s15633_s10 + $0x5] sm:$0x1]  ;;  %v4005_v53 = vrot.slane %v3996_v37, 5  ;;  %v4144_v54 = vld [vmem:[%s15646_s21 + $0x4] sm:$0x1] }
 0x476   : > { %14594 = vmatprep.subr.bf16.mxu1 %v15209_v0  ;;  %14597 = vmatprep.subr.bf16.mxu0 %v15209_v0  ;;  %v4449_v60 = vld [vmem:[%s15633_s10 + $0x35] sm:$0x1]  ;;  %v4154_v3 = vrot.slane %v4146_v55, 6 }
 0x477   : > { %2620 = vrot.lane.b32.xlu0 %v2613_v7, %s15214_s25  ;;  %14599 = vmatpush3.bf16.msra.mxu0 %v15684_v18  ;;  %v2889_v59 = vrot.slane %v2875_v56, %v15798_v41  ;;  %13158 = vst.msk [vmem:[%s15819_s15 + $0x184] sm:$0x1] %vm924_vm7, %v2882_v57  ;;  %v2903_v61 = vrot.slane %v2882_v57, %v15808_v58  ;;  %v4152_v7 = vrot.slane %v4145_v36, 7 }
 0x478   : > { %14070 = vmatprep.mubr.msk.f32.mxu0 %vm15210_vm5, %v15211_v19  ;;  %14603 = vmatprep.subr.bf16.mxu0 %v15209_v0  ;;  %v2890_v9 = vcombine.high %v2882_v57, %v2882_v57  ;;  %v4004_v56 = vsel %vm652_vm2, %v4003_v38, %v4002_v42  ;;  %v4456_v57 = vrot.slane %v4448_v43, 6 }
 0x479   : > { %2769 = vrot.lane.b32.xlu1 %v2760_v50, %s15214_s25  ;;  %13159 = vst.msk [vmem:[%s15819_s15 + $0x1a4] sm:$0x1] %vm924_vm7, %v2889_v59  ;;  %v2907_v5 = vrot.slane %v2889_v59, %v15808_v58  ;;  %v2891_v14 = vcombine.high %v2889_v59, %v2889_v59  ;;  %14052 = vmatmul.mubr.msk.f32.vlgmr.msra.gmra.mrb[22].mxu1 %vm742_vm6, %v3551_v11 }
 0x47a   : > { %13160 = vst.msk [vmem:[%s15819_s15 + $0x1c4] sm:$0x1] %vm924_vm7, %v2890_v9  ;;  %v2911_v12 = vrot.slane %v2890_v9, %v15808_v58  ;;  %14596 = vmatpush3.bf16.msra.mxu1 %v15674_v13  ;;  %14063 = vmatprep.mubr.msk.f32.mxu1 %vm15210_vm5, %v15211_v19  ;;  %v4153_v2 = vsel %vm649_vm0, %v4152_v7, %v4144_v54 }
 0x47b   : > { %2771 = vrot.lane.b32.xlu0 %v2764_v52, %s15214_s25  ;;  %13161 = vst.msk [vmem:[%s15819_s15 + $0x1e4] sm:$0x1] %vm924_vm7, %v2891_v14  ;;  %v2915_v15 = vrot.slane %v2891_v14, %v15808_v58  ;;  %14600 = vmatprep.subr.bf16.mxu1 %v15209_v0  ;;  %v4006_v9 = vsel %vm655_vm3, %v4005_v53, %v4004_v56 }
 0x47c   : > { %v4155_v27 = vsel %vm652_vm2, %v4154_v3, %v4153_v2  ;;  %v4296_v2 = vld [vmem:[%s15648_s1 + $0x14] sm:$0x1] }
 0x47d   : > { %2916 = vrot.lane.b32.xlu1 %v2903_v61, %s15214_s25  ;;  %v4455_v61 = vsel %vm649_vm0, %v4454_v44, %v4446_v47 }
 0x47e   : > { %v4457_v14 = vsel %vm652_vm2, %v4456_v57, %v4455_v61 }
 0x47f   : > { %2918 = vrot.lane.b32.xlu0 %v2907_v5, %s15214_s25 }
 0x481   : > { %2920 = vrot.lane.b32.xlu1 %v2911_v12, %s15214_s25 }
 0x483   : > { %2922 = vrot.lane.b32.xlu0 %v2915_v15, %s15214_s25  ;;  %v4458_v15 = vrot.slane %v4449_v60, 5 }
 0x485   : > { %v4459_v38 = vsel %vm655_vm3, %v4458_v15, %v4457_v14 }
 0x4de   : > { %v2615_v16 = vpop.permute.xlu1 %2614 }
 0x4df   : > { %13144 = vst.msk [vmem:[%s15819_s15 + $0x85] sm:$0x1] %vm924_vm7, %v2615_v16  ;;  %v4156_v16 = vrot.slane %v4147_v63, 5 }
 0x4e0   : > { %v2617_v20 = vpop.permute.xlu0 %2616 }
 0x4e1   : > { %13145 = vst.msk [vmem:[%s15819_s15 + $0xa5] sm:$0x1] %vm924_vm7, %v2617_v20  ;;  %v4157_v44 = vsel %vm655_vm3, %v4156_v16, %v4155_v27 }
 0x4e3   : > { %v2766_v21 = vpop.permute.xlu1 %2765 }
 0x4e4   : > { %13153 = vst.msk [vmem:[%s15819_s15 + $0x105] sm:$0x1] %vm924_vm7, %v2766_v21 }
 0x4e5   : > { %v2768_v22 = vpop.permute.xlu0 %2767 }
 0x4e6   : > { %13154 = vst.msk [vmem:[%s15819_s15 + $0x125] sm:$0x1] %vm924_vm7, %v2768_v22 }
 0x4e7   : > { %v2619_v23 = vpop.permute.xlu1 %2618 }
 0x4e8   : > { %13146 = vst.msk [vmem:[%s15819_s15 + $0xc5] sm:$0x1] %vm924_vm7, %v2619_v23 }
 0x4e9   : > { %v2621_v24 = vpop.permute.xlu0 %2620 }
 0x4ea   : > { %13147 = vst.msk [vmem:[%s15819_s15 + $0xe5] sm:$0x1] %vm924_vm7, %v2621_v24 }
 0x4eb   : > { %v2770_v25 = vpop.permute.xlu1 %2769 }
 0x4ec   : > { %13155 = vst.msk [vmem:[%s15819_s15 + $0x145] sm:$0x1] %vm924_vm7, %v2770_v25 }
 0x4ed   : > { %v2772_v26 = vpop.permute.xlu0 %2771 }
 0x4ee   : > { %13156 = vst.msk [vmem:[%s15819_s15 + $0x165] sm:$0x1] %vm924_vm7, %v2772_v26 }
 0x4ef   : > { %v2917_v28 = vpop.permute.xlu1 %2916 }
 0x4f0   : > { %13162 = vst.msk [vmem:[%s15819_s15 + $0x185] sm:$0x1] %vm924_vm7, %v2917_v28 }
 0x4f1   : > { %v2919_v29 = vpop.permute.xlu0 %2918 }
 0x4f2   : > { %13163 = vst.msk [vmem:[%s15819_s15 + $0x1a5] sm:$0x1] %vm924_vm7, %v2919_v29 }
 0x4f3   : > { %v2921_v34 = vpop.permute.xlu1 %2920 }
 0x4f4   : > { %13164 = vst.msk [vmem:[%s15819_s15 + $0x1c5] sm:$0x1] %vm924_vm7, %v2921_v34 }
 0x4f5   : > { %v2923_v39 = vpop.permute.xlu0 %2922 }
 0x4f6   : > { %13165 = vst.msk [vmem:[%s15819_s15 + $0x1e5] sm:$0x1] %vm924_vm7, %v2923_v39 }
 0x53e   : > { %v3092_v40 = vpop.f32.mrb[18].mxu1 }
 0x53f   : > { %v14025_v45 = vpop.f32.mrb[19].mxu1  ;;  %v3165_v46 = vpop.f32.mrb[20].mxu0 }
 0x540   : > { %v3166_v50 = vadd.f32 %v3165_v46, %v3092_v40  ;;  %v14032_v52 = vpop.f32.mrb[21].mxu0 }
 0x542   : > { %v3169_v59 = vadd.f32 %v3166_v50, %v15794_v35 }
 0x543   : > { %v3318_v1 = vpop.f32.mrb[20].mxu1 }
 0x544   : > { %v3177_v4 = vrot.slane %v3169_v59, %v15798_v41  ;;  %v3203_v5 = vcombine.high %v3169_v59, %v3169_v59  ;;  %v3329_v6 = vrot.slane %v3318_v1, %v15798_v41  ;;  %v3469_v8 = vpop.f32.mrb[22].mxu0  ;;  %v14039_v10 = vpop.f32.mrb[21].mxu1 }
 0x545   : > { %v3480_v11 = vrot.slane %v3469_v8, %v15798_v41  ;;  %v14046_v12 = vpop.f32.mrb[23].mxu0  ;;  %v4295_v8 = vld [vmem:[%s15648_s1 + $0x4] sm:$0x1] }
 0x546   : > { %v3178_v20 = vcombine.high %v3177_v4, %v3177_v4  ;;  %v3185_v21 = vrot.slane %v3177_v4, %v15798_v41  ;;  %v3210_v22 = vrot.slane %v3203_v5, %v15798_v41  ;;  %v3330_v23 = vcombine.high %v3329_v6, %v3329_v6  ;;  %v4297_v5 = vld [vmem:[%s15648_s1 + $0x24] sm:$0x1] }
 0x547   : > { %v3337_v24 = vrot.slane %v3329_v6, %v15798_v41  ;;  %v3481_v25 = vcombine.high %v3480_v11, %v3480_v11  ;;  %v3488_v26 = vrot.slane %v3480_v11, %v15798_v41  ;;  %v4303_v6 = vrot.slane %v4296_v2, 7 }
 0x548   : > { %v3192_v28 = vrot.slane %v3178_v20, %v15798_v41  ;;  %v3193_v29 = vcombine.high %v3185_v21, %v3185_v21  ;;  %3199 = vst.msk [vmem:[%s15819_s15 + $0x6] sm:$0x1] %vm924_vm7, %v3185_v21  ;;  %v3211_v30 = vcombine.high %v3210_v22, %v3210_v22  ;;  %v3218_v31 = vrot.slane %v3210_v22, %v15798_v41  ;;  %v14058_v32 = vpop.f32.mrb[24].mxu0 }
 0x549   : > { %v3344_v33 = vrot.slane %v3330_v23, %v15798_v41  ;;  %13172 = vst.msk [vmem:[%s15819_s15 + $0x86] sm:$0x1] %vm924_vm7, %v3337_v24  ;;  %v3495_v34 = vrot.slane %v3481_v25, %v15798_v41  ;;  %13181 = vst.msk [vmem:[%s15819_s15 + $0x106] sm:$0x1] %vm924_vm7, %v3488_v26  ;;  %v3771_v36 = vpop.f32.mrb[25].mxu0  ;;  %14064 = vmatmul.mubr.msk.f32.vlgmr.msra.gmra.mrb[24].mxu1 %vm742_vm6, %v14058_v32  ;;  %v3358_v37 = vrot.slane %v3337_v24, %v15808_v58 }
 0x54a   : > { %v3194_v39 = vcombine.high %v3192_v28, %v3192_v28  ;;  %3200 = vst.msk [vmem:[%s15819_s15 + $0x26] sm:$0x1] %vm924_vm7, %v3192_v28  ;;  %3201 = vst.msk [vmem:[%s15819_s15 + $0x46] sm:$0x1] %vm924_vm7, %v3193_v29  ;;  %v3225_v40 = vrot.slane %v3211_v30, %v15798_v41  ;;  %v3226_v42 = vcombine.high %v3218_v31, %v3218_v31  ;;  %14071 = vmatmul.mubr.msk.f32.vlgmr.msra.gmra.mrb[26].mxu0 %vm742_vm6, %v3771_v36  ;;  %v4751_v32 = vld [vmem:[%s15640_s26 + $0x15] sm:$0x1] }
 0x54b   : > { %3232 = vst.msk [vmem:[%s15819_s15 + $0x7] sm:$0x1] %vm924_vm7, %v3218_v31  ;;  %14602 = vmatpush3.bf16.msra.mxu1 %v15728_v48  ;;  %13173 = vst.msk [vmem:[%s15819_s15 + $0xa6] sm:$0x1] %vm924_vm7, %v3344_v33  ;;  %3371 = vrot.lane.b32.xlu1 %v3358_v37, %s15214_s25  ;;  %v3362_v43 = vrot.slane %v3344_v33, %v15808_v58  ;;  %v3345_v45 = vcombine.high %v3337_v24, %v3337_v24  ;;  %v4305_v10 = vrot.slane %v4297_v5, 6 }
 0x54c   : > { %13182 = vst.msk [vmem:[%s15819_s15 + $0x126] sm:$0x1] %vm924_vm7, %v3495_v34  ;;  %14605 = vmatpush3.bf16.msra.mxu0 %v15731_v51  ;;  %3202 = vst.msk [vmem:[%s15819_s15 + $0x66] sm:$0x1] %vm924_vm7, %v3194_v39  ;;  %v3227_v46 = vcombine.high %v3225_v40, %v3225_v40  ;;  %14077 = vmatprep.mubr.msk.f32.mxu1 %vm15210_vm5, %v15211_v19  ;;  %v3346_v47 = vcombine.high %v3344_v33, %v3344_v33  ;;  %v3620_v59 = vpop.f32.mrb[22].mxu1  ;;  %v4758_v37 = vrot.slane %v4751_v32, 7 }
 0x54d   : > { %3233 = vst.msk [vmem:[%s15819_s15 + $0x27] sm:$0x1] %vm924_vm7, %v3225_v40  ;;  %3234 = vst.msk [vmem:[%s15819_s15 + $0x47] sm:$0x1] %vm924_vm7, %v3226_v42  ;;  %14084 = vmatprep.mubr.msk.f32.mxu0 %vm15210_vm5, %v15211_v19  ;;  %v3496_v7 = vcombine.high %v3488_v26, %v3488_v26  ;;  %3373 = vrot.lane.b32.xlu0 %v3362_v43, %s15214_s25  ;;  %v3509_v50 = vrot.slane %v3488_v26, %v15808_v58  ;;  %v14053_v61 = vpop.f32.mrb[23].mxu1 }
 0x54e   : > { %14078 = vmatmul.mubr.msk.f32.vlgmr.msra.gmra.mrb[26].mxu1 %vm742_vm6, %v4006_v9  ;;  %13174 = vst.msk [vmem:[%s15819_s15 + $0xc6] sm:$0x1] %vm924_vm7, %v3345_v45  ;;  %v3497_v52 = vcombine.high %v3495_v34, %v3495_v34  ;;  %3235 = vst.msk [vmem:[%s15819_s15 + $0x67] sm:$0x1] %vm924_vm7, %v3227_v46  ;;  %14094 = vmatprep.subr.msk.mxu0 %vm664_vm4, %v4459_v38  ;;  %v3513_v53 = vrot.slane %v3495_v34, %v15808_v58  ;;  %v4298_v9 = vld [vmem:[%s15648_s1 + $0x34] sm:$0x1] }
 0x54f   : > { %14085 = vmatmul.mubr.msk.f32.vlgmr.msra.gmra.mrb[28].mxu0 %vm742_vm6, %v4157_v44  ;;  %13175 = vst.msk [vmem:[%s15819_s15 + $0xe6] sm:$0x1] %vm924_vm7, %v3346_v47  ;;  %13183 = vst.msk [vmem:[%s15819_s15 + $0x146] sm:$0x1] %vm924_vm7, %v3496_v7  ;;  %3522 = vrot.lane.b32.xlu1 %v3509_v50, %s15214_s25  ;;  %v3366_v54 = vrot.slane %v3345_v45, %v15808_v58  ;;  %v3370_v55 = vrot.slane %v3346_v47, %v15808_v58  ;;  %v4307_v14 = vrot.slane %v4298_v9, 5 }
 0x550   : > { %14095 = vmatpush3.msk.msra.mxu0 %vm664_vm4, %v4459_v38  ;;  %13184 = vst.msk [vmem:[%s15819_s15 + $0x166] sm:$0x1] %vm924_vm7, %v3497_v52  ;;  %14096 = vmatprep.mubr.msk.f32.mxu0 %vm657_vm1, %v16211_v17  ;;  %v3517_v56 = vrot.slane %v3496_v7, %v15808_v58  ;;  %v3521_v57 = vrot.slane %v3497_v52, %v15808_v58  ;;  %v4752_v36 = vld [vmem:[%s15640_s26 + $0x25] sm:$0x1]  ;;  %v5204_v39 = vld [vmem:[%s15633_s10 + $0x16] sm:$0x1] }
 0x551   : > { %14606 = vmatprep.subr.bf16.mxu1 %v15209_v0  ;;  %3524 = vrot.lane.b32.xlu0 %v3513_v53, %s15214_s25  ;;  %v3631_v60 = vrot.slane %v3620_v59, %v15798_v41  ;;  %v4304_v12 = vsel %vm649_vm0, %v4303_v6, %v4295_v8  ;;  %v4750_v38 = vld [vmem:[%s15640_s26 + $0x5] sm:$0x1]  ;;  %v4902_v42 = vld [vmem:[%s15646_s21 + $0x15] sm:$0x1]  ;;  %v4760_v44 = vrot.slane %v4752_v36, 6  ;;  %v5211_v7 = vrot.slane %v5204_v39, 7 }
 0x552   : > { %14608 = vmatpush3.bf16.msra.mxu1 %v15768_v62  ;;  %14091 = vmatprep.mubr.msk.f32.mxu1 %vm15210_vm5, %v15211_v19  ;;  %v4306_v16 = vsel %vm652_vm2, %v4305_v10, %v4304_v12  ;;  %v4753_v43 = vld [vmem:[%s15640_s26 + $0x35] sm:$0x1]  ;;  %v4759_v46 = vsel %vm649_vm0, %v4758_v37, %v4750_v38  ;;  %v5205_v47 = vld [vmem:[%s15633_s10 + $0x26] sm:$0x1]  ;;  %v4903_v53 = vld [vmem:[%s15646_s21 + $0x25] sm:$0x1] }
 0x553   : > { %14097 = vmatmul.mubr.msk.f32.vlgmr.msra.gmra.mrb[30].mxu0 %vm657_vm1, %v16222_v49  ;;  %3375 = vrot.lane.b32.xlu1 %v3366_v54, %s15214_s25  ;;  %v3632_v63 = vcombine.high %v3631_v60, %v3631_v60  ;;  %v3639_v1 = vrot.slane %v3631_v60, %v15798_v41  ;;  %v4308_v20 = vsel %vm655_vm3, %v4307_v14, %v4306_v16  ;;  %v5203_v52 = vld [vmem:[%s15633_s10 + $0x6] sm:$0x1]  ;;  %v4909_v54 = vrot.slane %v4902_v42, 7  ;;  %v4901_v59 = vld [vmem:[%s15646_s21 + $0x5] sm:$0x1] }
 0x554   : > { %14609 = vmatprep.subr.bf16.mxu1 %v15209_v0  ;;  %14612 = vmatprep.subr.bf16.mxu0 %v15209_v0  ;;  %v5213_v2 = vrot.slane %v5205_v47, 6  ;;  %v4904_v8 = vld [vmem:[%s15646_s21 + $0x35] sm:$0x1] }
 0x555   : > { %14110 = vmatprep.mubr.msk.f32.mxu0 %vm15210_vm5, %v15211_v19  ;;  %3377 = vrot.lane.b32.xlu0 %v3370_v55, %s15214_s25  ;;  %v3646_v3 = vrot.slane %v3632_v63, %v15798_v41  ;;  %13190 = vst.msk [vmem:[%s15819_s15 + $0x186] sm:$0x1] %vm924_vm7, %v3639_v1  ;;  %v3660_v4 = vrot.slane %v3639_v1, %v15808_v58 }
 0x556   : > { %14614 = vmatpush3.bf16.msra.mxu0 %v15684_v18  ;;  %v3647_v15 = vcombine.high %v3639_v1, %v3639_v1  ;;  %14092 = vmatmul.mubr.msk.f32.vlgmr.msra.gmra.mrb[28].mxu1 %vm742_vm6, %v4308_v20  ;;  %v4761_v63 = vsel %vm652_vm2, %v4760_v44, %v4759_v46  ;;  %v5206_v1 = vld [vmem:[%s15633_s10 + $0x36] sm:$0x1]  ;;  %v4910_v9 = vsel %vm649_vm0, %v4909_v54, %v4901_v59 }
 0x557   : > { %14618 = vmatprep.subr.bf16.mxu0 %v15209_v0  ;;  %3526 = vrot.lane.b32.xlu1 %v3517_v56, %s15214_s25  ;;  %13191 = vst.msk [vmem:[%s15819_s15 + $0x1a6] sm:$0x1] %vm924_vm7, %v3646_v3  ;;  %v3664_v11 = vrot.slane %v3646_v3, %v15808_v58  ;;  %v3648_v22 = vcombine.high %v3646_v3, %v3646_v3  ;;  %v5215_v14 = vrot.slane %v5206_v1, 5 }
 0x558   : > { %13192 = vst.msk [vmem:[%s15819_s15 + $0x1c6] sm:$0x1] %vm924_vm7, %v3647_v15  ;;  %v3668_v21 = vrot.slane %v3647_v15, %v15808_v58  ;;  %14611 = vmatpush3.bf16.msra.mxu1 %v15674_v13  ;;  %14103 = vmatprep.mubr.msk.f32.mxu1 %vm15210_vm5, %v15211_v19  ;;  %v5212_v3 = vsel %vm649_vm0, %v5211_v7, %v5203_v52 }
 0x559   : > { %3528 = vrot.lane.b32.xlu0 %v3521_v57, %s15214_s25  ;;  %13193 = vst.msk [vmem:[%s15819_s15 + $0x1e6] sm:$0x1] %vm924_vm7, %v3648_v22  ;;  %v3672_v23 = vrot.slane %v3648_v22, %v15808_v58  ;;  %14615 = vmatprep.subr.bf16.mxu1 %v15209_v0  ;;  %v4762_v57 = vrot.slane %v4753_v43, 5 }
 0x55b   : > { %3673 = vrot.lane.b32.xlu1 %v3660_v4, %s15214_s25  ;;  %v4911_v4 = vrot.slane %v4903_v53, 6  ;;  %v4763_v12 = vsel %vm655_vm3, %v4762_v57, %v4761_v63 }
 0x55d   : > { %3675 = vrot.lane.b32.xlu0 %v3664_v11, %s15214_s25 }
 0x55f   : > { %3677 = vrot.lane.b32.xlu1 %v3668_v21, %s15214_s25 }
 0x561   : > { %3679 = vrot.lane.b32.xlu0 %v3672_v23, %s15214_s25  ;;  %v5214_v23 = vsel %vm652_vm2, %v5213_v2, %v5212_v3 }
 0x562   : > { %v5216_v46 = vsel %vm655_vm3, %v5215_v14, %v5214_v23 }
 0x5bd   : > { %v3372_v24 = vpop.permute.xlu1 %3371 }
 0x5be   : > { %13176 = vst.msk [vmem:[%s15819_s15 + $0x87] sm:$0x1] %vm924_vm7, %v3372_v24 }
 0x5bf   : > { %v3374_v25 = vpop.permute.xlu0 %3373 }
 0x5c0   : > { %13177 = vst.msk [vmem:[%s15819_s15 + $0xa7] sm:$0x1] %vm924_vm7, %v3374_v25 }
 0x5c1   : > { %v3523_v26 = vpop.permute.xlu1 %3522 }
 0x5c2   : > { %13185 = vst.msk [vmem:[%s15819_s15 + $0x107] sm:$0x1] %vm924_vm7, %v3523_v26  ;;  %v4912_v26 = vsel %vm652_vm2, %v4911_v4, %v4910_v9  ;;  %v5054_v9 = vld [vmem:[%s15648_s1 + $0x25] sm:$0x1] }
 0x5c3   : > { %v3525_v27 = vpop.permute.xlu0 %3524  ;;  %v5062_v14 = vrot.slane %v5054_v9, 6 }
 0x5c4   : > { %13186 = vst.msk [vmem:[%s15819_s15 + $0x127] sm:$0x1] %vm924_vm7, %v3525_v27  ;;  %v4913_v27 = vrot.slane %v4904_v8, 5 }
 0x5c5   : > { %v3376_v28 = vpop.permute.xlu1 %3375 }
 0x5c6   : > { %13178 = vst.msk [vmem:[%s15819_s15 + $0xc7] sm:$0x1] %vm924_vm7, %v3376_v28  ;;  %v4914_v53 = vsel %vm655_vm3, %v4913_v27, %v4912_v26 }
 0x5c7   : > { %v3378_v29 = vpop.permute.xlu0 %3377 }
 0x5c8   : > { %13179 = vst.msk [vmem:[%s15819_s15 + $0xe7] sm:$0x1] %vm924_vm7, %v3378_v29 }
 0x5c9   : > { %v3527_v30 = vpop.permute.xlu1 %3526 }
 0x5ca   : > { %13187 = vst.msk [vmem:[%s15819_s15 + $0x147] sm:$0x1] %vm924_vm7, %v3527_v30 }
 0x5cb   : > { %v3529_v31 = vpop.permute.xlu0 %3528 }
 0x5cc   : > { %13188 = vst.msk [vmem:[%s15819_s15 + $0x167] sm:$0x1] %vm924_vm7, %v3529_v31 }
 0x5cd   : > { %v3674_v33 = vpop.permute.xlu1 %3673 }
 0x5ce   : > { %13194 = vst.msk [vmem:[%s15819_s15 + $0x187] sm:$0x1] %vm924_vm7, %v3674_v33 }
 0x5cf   : > { %v3676_v34 = vpop.permute.xlu0 %3675 }
 0x5d0   : > { %13195 = vst.msk [vmem:[%s15819_s15 + $0x1a7] sm:$0x1] %vm924_vm7, %v3676_v34 }
 0x5d1   : > { %v3678_v40 = vpop.permute.xlu1 %3677 }
 0x5d2   : > { %13196 = vst.msk [vmem:[%s15819_s15 + $0x1c7] sm:$0x1] %vm924_vm7, %v3678_v40 }
 0x5d3   : > { %v3680_v45 = vpop.permute.xlu0 %3679 }
 0x5d4   : > { %13197 = vst.msk [vmem:[%s15819_s15 + $0x1e7] sm:$0x1] %vm924_vm7, %v3680_v45 }
 0x61c   : > { %v3849_v50 = vpop.f32.mrb[24].mxu1 }
 0x61d   : > { %v14065_v55 = vpop.f32.mrb[25].mxu1  ;;  %v3922_v56 = vpop.f32.mrb[26].mxu0 }
 0x61e   : > { %v3923_v60 = vadd.f32 %v3922_v56, %v3849_v50  ;;  %v14072_v61 = vpop.f32.mrb[27].mxu0 }
 0x620   : > { %v3926_v5 = vadd.f32 %v3923_v60, %v15794_v35 }
 0x621   : > { %v4075_v6 = vpop.f32.mrb[26].mxu1 }
 0x622   : > { %v4086_v10 = vrot.slane %v4075_v6, %v15798_v41  ;;  %v4226_v11 = vpop.f32.mrb[28].mxu0  ;;  %v14079_v15 = vpop.f32.mrb[27].mxu1  ;;  %v3934_v16 = vrot.slane %v3926_v5, %v15798_v41  ;;  %v3960_v20 = vcombine.high %v3926_v5, %v3926_v5  ;;  %v5053_v6 = vld [vmem:[%s15648_s1 + $0x15] sm:$0x1] }
 0x623   : > { %v4237_v21 = vrot.slane %v4226_v11, %v15798_v41  ;;  %v14086_v22 = vpop.f32.mrb[29].mxu0  ;;  %v5052_v11 = vld [vmem:[%s15648_s1 + $0x5] sm:$0x1] }
 0x624   : > { %v4087_v24 = vcombine.high %v4086_v10, %v4086_v10  ;;  %v4094_v25 = vrot.slane %v4086_v10, %v15798_v41  ;;  %v3935_v28 = vcombine.high %v3934_v16, %v3934_v16  ;;  %v3942_v29 = vrot.slane %v3934_v16, %v15798_v41 }
 0x625   : > { %v3967_v30 = vrot.slane %v3960_v20, %v15798_v41  ;;  %v4238_v31 = vcombine.high %v4237_v21, %v4237_v21  ;;  %v4245_v33 = vrot.slane %v4237_v21, %v15798_v41  ;;  %v5060_v10 = vrot.slane %v5053_v6, 7  ;;  %v5661_v6 = vld [vmem:[%s15646_s21 + $0x36] sm:$0x1] }
 0x626   : > { %v4101_v32 = vrot.slane %v4087_v24, %v15798_v41  ;;  %13204 = vst.msk [vmem:[%s15819_s15 + $0x88] sm:$0x1] %vm924_vm7, %v4094_v25  ;;  %v14098_v34 = vpop.f32.mrb[30].mxu0  ;;  %v4115_v36 = vrot.slane %v4094_v25, %v15808_v58  ;;  %v4102_v37 = vcombine.high %v4094_v25, %v4094_v25  ;;  %v3949_v38 = vrot.slane %v3935_v28, %v15798_v41 }
 0x627   : > { %v3950_v39 = vcombine.high %v3942_v29, %v3942_v29  ;;  %3956 = vst.msk [vmem:[%s15819_s15 + $0x8] sm:$0x1] %vm924_vm7, %v3942_v29  ;;  %v3968_v40 = vcombine.high %v3967_v30, %v3967_v30  ;;  %v3975_v42 = vrot.slane %v3967_v30, %v15798_v41  ;;  %v4528_v43 = vpop.f32.mrb[31].mxu0  ;;  %14104 = vmatmul.mubr.msk.f32.vlgmr.msra.gmra.mrb[30].mxu1 %vm742_vm6, %v14098_v34  ;;  %13213 = vst.msk [vmem:[%s15819_s15 + $0x108] sm:$0x1] %vm924_vm7, %v4245_v33 }
 0x628   : > { %13205 = vst.msk [vmem:[%s15819_s15 + $0xa8] sm:$0x1] %vm924_vm7, %v4101_v32  ;;  %v4252_v44 = vrot.slane %v4238_v31, %v15798_v41  ;;  %4128 = vrot.lane.b32.xlu1 %v4115_v36, %s15214_s25  ;;  %14111 = vmatmul.mubr.msk.f32.vlgmr.msra.gmra.mrb[32].mxu0 %vm742_vm6, %v4528_v43  ;;  %v4119_v45 = vrot.slane %v4101_v32, %v15808_v58  ;;  %13206 = vst.msk [vmem:[%s15819_s15 + $0xc8] sm:$0x1] %vm924_vm7, %v4102_v37  ;;  %v5508_v36 = vld [vmem:[%s15640_s26 + $0x16] sm:$0x1] }
 0x629   : > { %v3951_v47 = vcombine.high %v3949_v38, %v3949_v38  ;;  %3957 = vst.msk [vmem:[%s15819_s15 + $0x28] sm:$0x1] %vm924_vm7, %v3949_v38  ;;  %3958 = vst.msk [vmem:[%s15819_s15 + $0x48] sm:$0x1] %vm924_vm7, %v3950_v39  ;;  %v3982_v7 = vrot.slane %v3968_v40, %v15798_v41  ;;  %v3983_v50 = vcombine.high %v3975_v42, %v3975_v42  ;;  %14617 = vmatpush3.bf16.msra.mxu1 %v15728_v48  ;;  %v5509_v39 = vld [vmem:[%s15640_s26 + $0x26] sm:$0x1] }
 0x62a   : > { %3989 = vst.msk [vmem:[%s15819_s15 + $0x9] sm:$0x1] %vm924_vm7, %v3975_v42  ;;  %14620 = vmatpush3.bf16.msra.mxu0 %v15731_v51  ;;  %13214 = vst.msk [vmem:[%s15819_s15 + $0x128] sm:$0x1] %vm924_vm7, %v4252_v44  ;;  %4130 = vrot.lane.b32.xlu0 %v4119_v45, %s15214_s25  ;;  %v4266_v52 = vrot.slane %v4245_v33, %v15808_v58  ;;  %v4103_v54 = vcombine.high %v4101_v32, %v4101_v32  ;;  %v5515_v40 = vrot.slane %v5508_v36, 7 }
 0x62b   : > { %14117 = vmatprep.mubr.msk.f32.mxu1 %vm15210_vm5, %v15211_v19  ;;  %3959 = vst.msk [vmem:[%s15819_s15 + $0x68] sm:$0x1] %vm924_vm7, %v3951_v47  ;;  %v3984_v55 = vcombine.high %v3982_v7, %v3982_v7  ;;  %3990 = vst.msk [vmem:[%s15819_s15 + $0x29] sm:$0x1] %vm924_vm7, %v3982_v7  ;;  %14124 = vmatprep.mubr.msk.f32.mxu0 %vm15210_vm5, %v15211_v19  ;;  %v4253_v56 = vcombine.high %v4245_v33, %v4245_v33  ;;  %v5507_v42 = vld [vmem:[%s15640_s26 + $0x6] sm:$0x1] }
 0x62c   : > { %3991 = vst.msk [vmem:[%s15819_s15 + $0x49] sm:$0x1] %vm924_vm7, %v3983_v50  ;;  %14134 = vmatprep.subr.msk.mxu0 %vm664_vm4, %v5216_v46  ;;  %v4254_v57 = vcombine.high %v4252_v44, %v4252_v44  ;;  %14118 = vmatmul.mubr.msk.f32.vlgmr.msra.gmra.mrb[32].mxu1 %vm742_vm6, %v4763_v12  ;;  %v4270_v59 = vrot.slane %v4252_v44, %v15808_v58  ;;  %13207 = vst.msk [vmem:[%s15819_s15 + $0xe8] sm:$0x1] %vm924_vm7, %v4103_v54  ;;  %v5055_v12 = vld [vmem:[%s15648_s1 + $0x35] sm:$0x1] }
 0x62d   : > { %4279 = vrot.lane.b32.xlu1 %v4266_v52, %s15214_s25  ;;  %v4123_v60 = vrot.slane %v4102_v37, %v15808_v58  ;;  %3992 = vst.msk [vmem:[%s15819_s15 + $0x69] sm:$0x1] %vm924_vm7, %v3984_v55  ;;  %14125 = vmatmul.mubr.msk.f32.vlgmr.msra.gmra.mrb[34].mxu0 %vm742_vm6, %v4914_v53  ;;  %13215 = vst.msk [vmem:[%s15819_s15 + $0x148] sm:$0x1] %vm924_vm7, %v4253_v56  ;;  %v4127_v61 = vrot.slane %v4103_v54, %v15808_v58  ;;  %v5064_v20 = vrot.slane %v5055_v12, 5 }
 0x62e   : > { %13216 = vst.msk [vmem:[%s15819_s15 + $0x168] sm:$0x1] %vm924_vm7, %v4254_v57  ;;  %14621 = vmatprep.subr.bf16.mxu1 %v15209_v0  ;;  %14135 = vmatpush3.msk.msra.mxu0 %vm664_vm4, %v5216_v46  ;;  %v4274_v63 = vrot.slane %v4253_v56, %v15808_v58  ;;  %v5061_v16 = vsel %vm649_vm0, %v5060_v10, %v5052_v11  ;;  %v5961_v43 = vld [vmem:[%s15633_s10 + $0x17] sm:$0x1]  ;;  %v5659_v45 = vld [vmem:[%s15646_s21 + $0x16] sm:$0x1] }
 0x62f   : > { %4281 = vrot.lane.b32.xlu0 %v4270_v59, %s15214_s25  ;;  %14136 = vmatprep.mubr.msk.f32.mxu0 %vm657_vm1, %v16211_v17  ;;  %v4278_v17 = vrot.slane %v4254_v57, %v15808_v58  ;;  %v5063_v22 = vsel %vm652_vm2, %v5062_v14, %v5061_v16  ;;  %v5510_v46 = vld [vmem:[%s15640_s26 + $0x36] sm:$0x1]  ;;  %v5517_v47 = vrot.slane %v5509_v39, 6  ;;  %v5516_v52 = vsel %vm649_vm0, %v5515_v40, %v5507_v42  ;;  %v5962_v53 = vld [vmem:[%s15633_s10 + $0x27] sm:$0x1] }
 0x630   : > { %14623 = vmatpush3.bf16.msra.mxu1 %v15768_v62  ;;  %14131 = vmatprep.mubr.msk.f32.mxu1 %vm15210_vm5, %v15211_v19  ;;  %v5065_v23 = vsel %vm655_vm3, %v5064_v20, %v5063_v22  ;;  %v5968_v54 = vrot.slane %v5961_v43, 7  ;;  %v5960_v57 = vld [vmem:[%s15633_s10 + $0x7] sm:$0x1]  ;;  %v5666_v59 = vrot.slane %v5659_v45, 7 }
 0x631   : > { %4132 = vrot.lane.b32.xlu1 %v4123_v60, %s15214_s25  ;;  %14137 = vmatmul.mubr.msk.f32.vlgmr.msra.gmra.mrb[36].mxu0 %vm657_vm1, %v16222_v49  ;;  %v4377_v49 = vpop.f32.mrb[28].mxu1 }
 0x632   : > { %14624 = vmatprep.subr.bf16.mxu1 %v15209_v0  ;;  %14627 = vmatprep.subr.bf16.mxu0 %v15209_v0  ;;  %v4388_v1 = vrot.slane %v4377_v49, %v15798_v41  ;;  %v14093_v2 = vpop.f32.mrb[29].mxu1  ;;  %v5660_v49 = vld [vmem:[%s15646_s21 + $0x26] sm:$0x1] }
 0x633   : > { %4134 = vrot.lane.b32.xlu0 %v4127_v61, %s15214_s25  ;;  %14629 = vmatpush3.bf16.msra.mxu0 %v15684_v18  ;;  %v5970_v2 = vrot.slane %v5962_v53, 6  ;;  %v5668_v10 = vrot.slane %v5660_v49, 6  ;;  %v16718_v49 = vld [vmem:[%s18545_s19 + $0x8] sm:$0xff] }
 0x634   : > { %14150 = vmatprep.mubr.msk.f32.mxu0 %vm15210_vm5, %v15211_v19  ;;  %14633 = vmatprep.subr.bf16.mxu0 %v15209_v0  ;;  %v4389_v3 = vcombine.high %v4388_v1, %v4388_v1  ;;  %v4396_v4 = vrot.slane %v4388_v1, %v15798_v41  ;;  %v5518_v1 = vsel %vm652_vm2, %v5517_v47, %v5516_v52 }
 0x635   : > { %4283 = vrot.lane.b32.xlu1 %v4274_v63, %s15214_s25  ;;  %14132 = vmatmul.mubr.msk.f32.vlgmr.msra.gmra.mrb[34].mxu1 %vm742_vm6, %v5065_v23  ;;  %v5519_v63 = vrot.slane %v5510_v46, 5 }
 0x636   : > { %v4403_v5 = vrot.slane %v4389_v3, %v15798_v41  ;;  %13222 = vst.msk [vmem:[%s15819_s15 + $0x188] sm:$0x1] %vm924_vm7, %v4396_v4  ;;  %v4417_v8 = vrot.slane %v4396_v4, %v15808_v58  ;;  %v4404_v21 = vcombine.high %v4396_v4, %v4396_v4  ;;  %14626 = vmatpush3.bf16.msra.mxu1 %v15674_v13  ;;  %v5963_v4 = vld [vmem:[%s15633_s10 + $0x37] sm:$0x1] }
 0x637   : > { %4285 = vrot.lane.b32.xlu0 %v4278_v17, %s15214_s25  ;;  %14143 = vmatprep.mubr.msk.f32.mxu1 %vm15210_vm5, %v15211_v19  ;;  %v5658_v17 = vld [vmem:[%s15646_s21 + $0x6] sm:$0x1]  ;;  %v5520_v16 = vsel %vm655_vm3, %v5519_v63, %v5518_v1 }
 0x638   : > { %13223 = vst.msk [vmem:[%s15819_s15 + $0x1a8] sm:$0x1] %vm924_vm7, %v4403_v5  ;;  %v4421_v15 = vrot.slane %v4403_v5, %v15808_v58  ;;  %13224 = vst.msk [vmem:[%s15819_s15 + $0x1c8] sm:$0x1] %vm924_vm7, %v4404_v21  ;;  %v4425_v24 = vrot.slane %v4404_v21, %v15808_v58  ;;  %v4405_v25 = vcombine.high %v4403_v5, %v4403_v5  ;;  %14630 = vmatprep.subr.bf16.mxu1 %v15209_v0  ;;  %v16707_v63 = vld [vmem:[%s18545_s19] sm:$0xff] }
 0x639   : > { %4430 = vrot.lane.b32.xlu1 %v4417_v8, %s15214_s25  ;;  %v5969_v5 = vsel %vm649_vm0, %v5968_v54, %v5960_v57  ;;  %v5667_v9 = vsel %vm649_vm0, %v5666_v59, %v5658_v17 }
 0x63a   : > { %13225 = vst.msk [vmem:[%s15819_s15 + $0x1e8] sm:$0x1] %vm924_vm7, %v4405_v25  ;;  %v4429_v26 = vrot.slane %v4405_v25, %v15808_v58  ;;  %v5971_v23 = vsel %vm652_vm2, %v5970_v2, %v5969_v5  ;;  %v5670_v25 = vrot.slane %v5661_v6, 5 }
 0x63b   : > { %4432 = vrot.lane.b32.xlu0 %v4421_v15, %s15214_s25 }
 0x63d   : > { %4434 = vrot.lane.b32.xlu1 %v4425_v24, %s15214_s25  ;;  %v5972_v24 = vrot.slane %v5963_v4, 5 }
 0x63f   : > { %4436 = vrot.lane.b32.xlu0 %v4429_v26, %s15214_s25  ;;  %v5973_v45 = vsel %vm655_vm3, %v5972_v24, %v5971_v23 }
 0x69a   : > { %v4129_v27 = vpop.permute.xlu1 %4128 }
 0x69b   : > { %13208 = vst.msk [vmem:[%s15819_s15 + $0x89] sm:$0x1] %vm924_vm7, %v4129_v27 }
 0x69c   : > { %v4131_v28 = vpop.permute.xlu0 %4130 }
 0x69d   : > { %13209 = vst.msk [vmem:[%s15819_s15 + $0xa9] sm:$0x1] %vm924_vm7, %v4131_v28 }
 0x69f   : > { %v4280_v29 = vpop.permute.xlu1 %4279 }
 0x6a0   : > { %13217 = vst.msk [vmem:[%s15819_s15 + $0x109] sm:$0x1] %vm924_vm7, %v4280_v29 }
 0x6a1   : > { %v4282_v30 = vpop.permute.xlu0 %4281 }
 0x6a2   : > { %13218 = vst.msk [vmem:[%s15819_s15 + $0x129] sm:$0x1] %vm924_vm7, %v4282_v30 }
 0x6a3   : > { %v4133_v31 = vpop.permute.xlu1 %4132 }
 0x6a4   : > { %13210 = vst.msk [vmem:[%s15819_s15 + $0xc9] sm:$0x1] %vm924_vm7, %v4133_v31 }
 0x6a5   : > { %v4135_v32 = vpop.permute.xlu0 %4134 }
 0x6a6   : > { %13211 = vst.msk [vmem:[%s15819_s15 + $0xe9] sm:$0x1] %vm924_vm7, %v4135_v32 }
 0x6a7   : > { %v4284_v33 = vpop.permute.xlu1 %4283 }
 0x6a8   : > { %13219 = vst.msk [vmem:[%s15819_s15 + $0x149] sm:$0x1] %vm924_vm7, %v4284_v33  ;;  %v5669_v33 = vsel %vm652_vm2, %v5668_v10, %v5667_v9  ;;  %v5810_v9 = vld [vmem:[%s15648_s1 + $0x16] sm:$0x1] }
 0x6a9   : > { %v4286_v34 = vpop.permute.xlu0 %4285  ;;  %v5671_v52 = vsel %vm655_vm3, %v5670_v25, %v5669_v33 }
 0x6aa   : > { %13220 = vst.msk [vmem:[%s15819_s15 + $0x169] sm:$0x1] %vm924_vm7, %v4286_v34 }
 0x6ab   : > { %v4431_v37 = vpop.permute.xlu1 %4430 }
 0x6ac   : > { %13226 = vst.msk [vmem:[%s15819_s15 + $0x189] sm:$0x1] %vm924_vm7, %v4431_v37 }
 0x6ad   : > { %v4433_v38 = vpop.permute.xlu0 %4432 }
 0x6ae   : > { %13227 = vst.msk [vmem:[%s15819_s15 + $0x1a9] sm:$0x1] %vm924_vm7, %v4433_v38 }
 0x6af   : > { %v4435_v44 = vpop.permute.xlu1 %4434 }
 0x6b0   : > { %13228 = vst.msk [vmem:[%s15819_s15 + $0x1c9] sm:$0x1] %vm924_vm7, %v4435_v44 }
 0x6b1   : > { %v4437_v7 = vpop.permute.xlu0 %4436 }
 0x6b2   : > { %13229 = vst.msk [vmem:[%s15819_s15 + $0x1e9] sm:$0x1] %vm924_vm7, %v4437_v7 }
 0x6fa   : > { %v4606_v50 = vpop.f32.mrb[30].mxu1 }
 0x6fb   : > { %v14105_v55 = vpop.f32.mrb[31].mxu1  ;;  %v4679_v56 = vpop.f32.mrb[32].mxu0 }
 0x6fc   : > { %v4680_v60 = vadd.f32 %v4679_v56, %v4606_v50  ;;  %v14112_v61 = vpop.f32.mrb[33].mxu0 }
 0x6fe   : > { %v4683_v3 = vadd.f32 %v4680_v60, %v15794_v35 }
 0x6ff   : > { %v4832_v8 = vpop.f32.mrb[32].mxu1 }
 0x700   : > { %v4691_v11 = vrot.slane %v4683_v3, %v15798_v41  ;;  %v4717_v12 = vcombine.high %v4683_v3, %v4683_v3  ;;  %v4843_v14 = vrot.slane %v4832_v8, %v15798_v41  ;;  %v4983_v15 = vpop.f32.mrb[34].mxu0  ;;  %v14119_v20 = vpop.f32.mrb[33].mxu1 }
 0x701   : > { %v4994_v21 = vrot.slane %v4983_v15, %v15798_v41  ;;  %v14126_v22 = vpop.f32.mrb[35].mxu0  ;;  %v5809_v15 = vld [vmem:[%s15648_s1 + $0x6] sm:$0x1] }
 0x702   : > { %v4692_v26 = vcombine.high %v4691_v11, %v4691_v11  ;;  %v4699_v27 = vrot.slane %v4691_v11, %v15798_v41  ;;  %v4724_v28 = vrot.slane %v4717_v12, %v15798_v41  ;;  %v4844_v29 = vcombine.high %v4843_v14, %v4843_v14  ;;  %v5811_v12 = vld [vmem:[%s15648_s1 + $0x26] sm:$0x1] }
 0x703   : > { %v4851_v30 = vrot.slane %v4843_v14, %v15798_v41  ;;  %v4995_v31 = vcombine.high %v4994_v21, %v4994_v21  ;;  %v5002_v32 = vrot.slane %v4994_v21, %v15798_v41  ;;  %v5817_v14 = vrot.slane %v5810_v9, 7 }
 0x704   : > { %v4706_v34 = vrot.slane %v4692_v26, %v15798_v41  ;;  %v4707_v36 = vcombine.high %v4699_v27, %v4699_v27  ;;  %4713 = vst.msk [vmem:[%s15819_s15 + $0xa] sm:$0x1] %vm924_vm7, %v4699_v27  ;;  %v4725_v37 = vcombine.high %v4724_v28, %v4724_v28  ;;  %v4732_v38 = vrot.slane %v4724_v28, %v15798_v41  ;;  %v14138_v39 = vpop.f32.mrb[36].mxu0 }
 0x705   : > { %v4858_v40 = vrot.slane %v4844_v29, %v15798_v41  ;;  %13236 = vst.msk [vmem:[%s15819_s15 + $0x8a] sm:$0x1] %vm924_vm7, %v4851_v30  ;;  %v5009_v42 = vrot.slane %v4995_v31, %v15798_v41  ;;  %13245 = vst.msk [vmem:[%s15819_s15 + $0x10a] sm:$0x1] %vm924_vm7, %v5002_v32  ;;  %v5285_v43 = vpop.f32.mrb[37].mxu0  ;;  %14144 = vmatmul.mubr.msk.f32.vlgmr.msra.gmra.mrb[36].mxu1 %vm742_vm6, %v14138_v39  ;;  %v4872_v44 = vrot.slane %v4851_v30, %v15808_v58 }
 0x706   : > { %v4708_v46 = vcombine.high %v4706_v34, %v4706_v34  ;;  %4714 = vst.msk [vmem:[%s15819_s15 + $0x2a] sm:$0x1] %vm924_vm7, %v4706_v34  ;;  %4715 = vst.msk [vmem:[%s15819_s15 + $0x4a] sm:$0x1] %vm924_vm7, %v4707_v36  ;;  %v4739_v47 = vrot.slane %v4725_v37, %v15798_v41  ;;  %v4740_v7 = vcombine.high %v4732_v38, %v4732_v38  ;;  %14151 = vmatmul.mubr.msk.f32.vlgmr.msra.gmra.mrb[38].mxu0 %vm742_vm6, %v5285_v43  ;;  %v6265_v39 = vld [vmem:[%s15640_s26 + $0x17] sm:$0x1] }
 0x707   : > { %4746 = vst.msk [vmem:[%s15819_s15 + $0xb] sm:$0x1] %vm924_vm7, %v4732_v38  ;;  %14632 = vmatpush3.bf16.msra.mxu1 %v15728_v48  ;;  %13237 = vst.msk [vmem:[%s15819_s15 + $0xaa] sm:$0x1] %vm924_vm7, %v4858_v40  ;;  %4885 = vrot.lane.b32.xlu1 %v4872_v44, %s15214_s25  ;;  %v4876_v50 = vrot.slane %v4858_v40, %v15808_v58  ;;  %v4859_v53 = vcombine.high %v4851_v30, %v4851_v30  ;;  %v5819_v20 = vrot.slane %v5811_v12, 6 }
 0x708   : > { %13246 = vst.msk [vmem:[%s15819_s15 + $0x12a] sm:$0x1] %vm924_vm7, %v5009_v42  ;;  %14635 = vmatpush3.bf16.msra.mxu0 %v15731_v51  ;;  %4716 = vst.msk [vmem:[%s15819_s15 + $0x6a] sm:$0x1] %vm924_vm7, %v4708_v46  ;;  %v4741_v54 = vcombine.high %v4739_v47, %v4739_v47  ;;  %14157 = vmatprep.mubr.msk.f32.mxu1 %vm15210_vm5, %v15211_v19  ;;  %v4860_v55 = vcombine.high %v4858_v40, %v4858_v40  ;;  %v5134_v3 = vpop.f32.mrb[34].mxu1  ;;  %v6272_v44 = vrot.slane %v6265_v39, 7 }
 0x709   : > { %4747 = vst.msk [vmem:[%s15819_s15 + $0x2b] sm:$0x1] %vm924_vm7, %v4739_v47  ;;  %4748 = vst.msk [vmem:[%s15819_s15 + $0x4b] sm:$0x1] %vm924_vm7, %v4740_v7  ;;  %14164 = vmatprep.mubr.msk.f32.mxu0 %vm15210_vm5, %v15211_v19  ;;  %v5010_v56 = vcombine.high %v5002_v32, %v5002_v32  ;;  %4887 = vrot.lane.b32.xlu0 %v4876_v50, %s15214_s25  ;;  %v5023_v57 = vrot.slane %v5002_v32, %v15808_v58  ;;  %v14133_v5 = vpop.f32.mrb[35].mxu1 }
 0x70a   : > { %14158 = vmatmul.mubr.msk.f32.vlgmr.msra.gmra.mrb[38].mxu1 %vm742_vm6, %v5520_v16  ;;  %13238 = vst.msk [vmem:[%s15819_s15 + $0xca] sm:$0x1] %vm924_vm7, %v4859_v53  ;;  %v5011_v59 = vcombine.high %v5009_v42, %v5009_v42  ;;  %4749 = vst.msk [vmem:[%s15819_s15 + $0x6b] sm:$0x1] %vm924_vm7, %v4741_v54  ;;  %14174 = vmatprep.subr.msk.mxu0 %vm664_vm4, %v5973_v45  ;;  %v5027_v60 = vrot.slane %v5009_v42, %v15808_v58  ;;  %v5812_v16 = vld [vmem:[%s15648_s1 + $0x36] sm:$0x1] }
 0x70b   : > { %14165 = vmatmul.mubr.msk.f32.vlgmr.msra.gmra.mrb[40].mxu0 %vm742_vm6, %v5671_v52  ;;  %13239 = vst.msk [vmem:[%s15819_s15 + $0xea] sm:$0x1] %vm924_vm7, %v4860_v55  ;;  %13247 = vst.msk [vmem:[%s15819_s15 + $0x14a] sm:$0x1] %vm924_vm7, %v5010_v56  ;;  %5036 = vrot.lane.b32.xlu1 %v5023_v57, %s15214_s25  ;;  %v4880_v61 = vrot.slane %v4859_v53, %v15808_v58  ;;  %v4884_v17 = vrot.slane %v4860_v55, %v15808_v58  ;;  %v5821_v23 = vrot.slane %v5812_v16, 5 }
 0x70c   : > { %14175 = vmatpush3.msk.msra.mxu0 %vm664_vm4, %v5973_v45  ;;  %13248 = vst.msk [vmem:[%s15819_s15 + $0x16a] sm:$0x1] %vm924_vm7, %v5011_v59  ;;  %14176 = vmatprep.mubr.msk.f32.mxu0 %vm657_vm1, %v16707_v63  ;;  %v5031_v1 = vrot.slane %v5010_v56, %v15808_v58  ;;  %v5035_v2 = vrot.slane %v5011_v59, %v15808_v58  ;;  %v6266_v43 = vld [vmem:[%s15640_s26 + $0x27] sm:$0x1]  ;;  %v6718_v46 = vld [vmem:[%s15633_s10 + $0x18] sm:$0x1] }
 0x70d   : > { %14636 = vmatprep.subr.bf16.mxu1 %v15209_v0  ;;  %5038 = vrot.lane.b32.xlu0 %v5027_v60, %s15214_s25  ;;  %v5145_v4 = vrot.slane %v5134_v3, %v15798_v41  ;;  %v5818_v22 = vsel %vm649_vm0, %v5817_v14, %v5809_v15  ;;  %v6264_v45 = vld [vmem:[%s15640_s26 + $0x7] sm:$0x1]  ;;  %v6416_v7 = vld [vmem:[%s15646_s21 + $0x17] sm:$0x1]  ;;  %v6274_v52 = vrot.slane %v6266_v43, 6  ;;  %v6725_v56 = vrot.slane %v6718_v46, 7 }
 0x70e   : > { %14638 = vmatpush3.bf16.msra.mxu1 %v15768_v62  ;;  %14171 = vmatprep.mubr.msk.f32.mxu1 %vm15210_vm5, %v15211_v19  ;;  %v5820_v25 = vsel %vm652_vm2, %v5819_v20, %v5818_v22  ;;  %v6267_v50 = vld [vmem:[%s15640_s26 + $0x37] sm:$0x1]  ;;  %v6273_v54 = vsel %vm649_vm0, %v6272_v44, %v6264_v45  ;;  %v6719_v55 = vld [vmem:[%s15633_s10 + $0x28] sm:$0x1]  ;;  %v6417_v60 = vld [vmem:[%s15646_s21 + $0x27] sm:$0x1] }
 0x70f   : > { %14177 = vmatmul.mubr.msk.f32.vlgmr.msra.gmra.mrb[42].mxu0 %vm657_vm1, %v16718_v49  ;;  %4889 = vrot.lane.b32.xlu1 %v4880_v61, %s15214_s25  ;;  %v5146_v6 = vcombine.high %v5145_v4, %v5145_v4  ;;  %v5153_v8 = vrot.slane %v5145_v4, %v15798_v41  ;;  %v5822_v26 = vsel %vm655_vm3, %v5821_v23, %v5820_v25  ;;  %v6717_v59 = vld [vmem:[%s15633_s10 + $0x8] sm:$0x1]  ;;  %v6423_v61 = vrot.slane %v6416_v7, 7  ;;  %v6415_v3 = vld [vmem:[%s15646_s21 + $0x7] sm:$0x1] }
 0x710   : > { %14639 = vmatprep.subr.bf16.mxu1 %v15209_v0  ;;  %14642 = vmatprep.subr.bf16.mxu0 %v15209_v0  ;;  %v6727_v9 = vrot.slane %v6719_v55, 6  ;;  %v6418_v15 = vld [vmem:[%s15646_s21 + $0x37] sm:$0x1] }
 0x711   : > { %14190 = vmatprep.mubr.msk.f32.mxu0 %vm15210_vm5, %v15211_v19  ;;  %4891 = vrot.lane.b32.xlu0 %v4884_v17, %s15214_s25  ;;  %v5160_v10 = vrot.slane %v5146_v6, %v15798_v41  ;;  %13254 = vst.msk [vmem:[%s15819_s15 + $0x18a] sm:$0x1] %vm924_vm7, %v5153_v8  ;;  %v5174_v11 = vrot.slane %v5153_v8, %v15808_v58 }
 0x712   : > { %14644 = vmatpush3.bf16.msra.mxu0 %v15684_v18  ;;  %v5161_v24 = vcombine.high %v5153_v8, %v5153_v8  ;;  %14172 = vmatmul.mubr.msk.f32.vlgmr.msra.gmra.mrb[40].mxu1 %vm742_vm6, %v5822_v26  ;;  %v6275_v6 = vsel %vm652_vm2, %v6274_v52, %v6273_v54  ;;  %v6720_v8 = vld [vmem:[%s15633_s10 + $0x38] sm:$0x1]  ;;  %v6424_v16 = vsel %vm649_vm0, %v6423_v61, %v6415_v3 }
 0x713   : > { %14648 = vmatprep.subr.bf16.mxu0 %v15209_v0  ;;  %5040 = vrot.lane.b32.xlu1 %v5031_v1, %s15214_s25  ;;  %13255 = vst.msk [vmem:[%s15819_s15 + $0x1aa] sm:$0x1] %vm924_vm7, %v5160_v10  ;;  %v5178_v21 = vrot.slane %v5160_v10, %v15808_v58  ;;  %v5162_v28 = vcombine.high %v5160_v10, %v5160_v10  ;;  %v6729_v23 = vrot.slane %v6720_v8, 5 }
 0x714   : > { %13256 = vst.msk [vmem:[%s15819_s15 + $0x1ca] sm:$0x1] %vm924_vm7, %v5161_v24  ;;  %v5182_v27 = vrot.slane %v5161_v24, %v15808_v58  ;;  %14641 = vmatpush3.bf16.msra.mxu1 %v15674_v13  ;;  %14183 = vmatprep.mubr.msk.f32.mxu1 %vm15210_vm5, %v15211_v19  ;;  %v6726_v10 = vsel %vm649_vm0, %v6725_v56, %v6717_v59 }
 0x715   : > { %5042 = vrot.lane.b32.xlu0 %v5035_v2, %s15214_s25  ;;  %13257 = vst.msk [vmem:[%s15819_s15 + $0x1ea] sm:$0x1] %vm924_vm7, %v5162_v28  ;;  %v5186_v29 = vrot.slane %v5162_v28, %v15808_v58  ;;  %14645 = vmatprep.subr.bf16.mxu1 %v15209_v0  ;;  %v6276_v2 = vrot.slane %v6267_v50, 5 }
 0x717   : > { %5187 = vrot.lane.b32.xlu1 %v5174_v11, %s15214_s25  ;;  %v6425_v11 = vrot.slane %v6417_v60, 6  ;;  %v6277_v22 = vsel %vm655_vm3, %v6276_v2, %v6275_v6 }
 0x719   : > { %5189 = vrot.lane.b32.xlu0 %v5178_v21, %s15214_s25 }
 0x71b   : > { %5191 = vrot.lane.b32.xlu1 %v5182_v27, %s15214_s25 }
 0x71d   : > { %5193 = vrot.lane.b32.xlu0 %v5186_v29, %s15214_s25  ;;  %v6728_v29 = vsel %vm652_vm2, %v6727_v9, %v6726_v10 }
 0x71e   : > { %v6730_v54 = vsel %vm655_vm3, %v6729_v23, %v6728_v29  ;;  %v6566_v23 = vld [vmem:[%s15648_s1 + $0x7] sm:$0x1] }
 0x779   : > { %v4886_v30 = vpop.permute.xlu1 %4885 }
 0x77a   : > { %13240 = vst.msk [vmem:[%s15819_s15 + $0x8b] sm:$0x1] %vm924_vm7, %v4886_v30 }
 0x77b   : > { %v4888_v31 = vpop.permute.xlu0 %4887 }
 0x77c   : > { %13241 = vst.msk [vmem:[%s15819_s15 + $0xab] sm:$0x1] %vm924_vm7, %v4888_v31 }
 0x77d   : > { %v5037_v32 = vpop.permute.xlu1 %5036 }
 0x77e   : > { %13249 = vst.msk [vmem:[%s15819_s15 + $0x10b] sm:$0x1] %vm924_vm7, %v5037_v32  ;;  %v6426_v32 = vsel %vm652_vm2, %v6425_v11, %v6424_v16  ;;  %v6567_v16 = vld [vmem:[%s15648_s1 + $0x17] sm:$0x1] }
 0x77f   : > { %v5039_v33 = vpop.permute.xlu0 %5038 }
 0x780   : > { %13250 = vst.msk [vmem:[%s15819_s15 + $0x12b] sm:$0x1] %vm924_vm7, %v5039_v33  ;;  %v6427_v33 = vrot.slane %v6418_v15, 5 }
 0x781   : > { %v4890_v34 = vpop.permute.xlu1 %4889 }
 0x782   : > { %13242 = vst.msk [vmem:[%s15819_s15 + $0xcb] sm:$0x1] %vm924_vm7, %v4890_v34  ;;  %v6428_v60 = vsel %vm655_vm3, %v6427_v33, %v6426_v32 }
 0x783   : > { %v4892_v36 = vpop.permute.xlu0 %4891 }
 0x784   : > { %13243 = vst.msk [vmem:[%s15819_s15 + $0xeb] sm:$0x1] %vm924_vm7, %v4892_v36 }
 0x785   : > { %v5041_v37 = vpop.permute.xlu1 %5040 }
 0x786   : > { %13251 = vst.msk [vmem:[%s15819_s15 + $0x14b] sm:$0x1] %vm924_vm7, %v5041_v37 }
 0x787   : > { %v5043_v38 = vpop.permute.xlu0 %5042 }
 0x788   : > { %13252 = vst.msk [vmem:[%s15819_s15 + $0x16b] sm:$0x1] %vm924_vm7, %v5043_v38 }
 0x789   : > { %v5188_v40 = vpop.permute.xlu1 %5187 }
 0x78a   : > { %13258 = vst.msk [vmem:[%s15819_s15 + $0x18b] sm:$0x1] %vm924_vm7, %v5188_v40 }
 0x78b   : > { %v5190_v42 = vpop.permute.xlu0 %5189 }
 0x78c   : > { %13259 = vst.msk [vmem:[%s15819_s15 + $0x1ab] sm:$0x1] %vm924_vm7, %v5190_v42 }
 0x78d   : > { %v5192_v47 = vpop.permute.xlu1 %5191 }
 0x78e   : > { %13260 = vst.msk [vmem:[%s15819_s15 + $0x1cb] sm:$0x1] %vm924_vm7, %v5192_v47 }
 0x78f   : > { %v5194_v53 = vpop.permute.xlu0 %5193 }
 0x790   : > { %13261 = vst.msk [vmem:[%s15819_s15 + $0x1eb] sm:$0x1] %vm924_vm7, %v5194_v53 }
 0x7d8   : > { %v5363_v57 = vpop.f32.mrb[36].mxu1 }
 0x7d9   : > { %v14145_v17 = vpop.f32.mrb[37].mxu1  ;;  %v5436_v1 = vpop.f32.mrb[38].mxu0 }
 0x7da   : > { %v5437_v4 = vadd.f32 %v5436_v1, %v5363_v57  ;;  %v14152_v5 = vpop.f32.mrb[39].mxu0 }
 0x7dc   : > { %v5440_v12 = vadd.f32 %v5437_v4, %v15794_v35 }
 0x7dd   : > { %v5589_v14 = vpop.f32.mrb[38].mxu1 }
 0x7de   : > { %v5600_v20 = vrot.slane %v5589_v14, %v15798_v41  ;;  %v5740_v21 = vpop.f32.mrb[40].mxu0  ;;  %v14159_v24 = vpop.f32.mrb[39].mxu1  ;;  %v5448_v25 = vrot.slane %v5440_v12, %v15798_v41  ;;  %v5474_v26 = vcombine.high %v5440_v12, %v5440_v12 }
 0x7df   : > { %v5751_v27 = vrot.slane %v5740_v21, %v15798_v41  ;;  %v14166_v28 = vpop.f32.mrb[41].mxu0  ;;  %v6568_v21 = vld [vmem:[%s15648_s1 + $0x27] sm:$0x1]  ;;  %v6569_v24 = vld [vmem:[%s15648_s1 + $0x37] sm:$0x1] }
 0x7e0   : > { %v5601_v30 = vcombine.high %v5600_v20, %v5600_v20  ;;  %v5608_v31 = vrot.slane %v5600_v20, %v15798_v41  ;;  %v5449_v34 = vcombine.high %v5448_v25, %v5448_v25  ;;  %v5456_v36 = vrot.slane %v5448_v25, %v15798_v41 }
 0x7e1   : > { %v5481_v37 = vrot.slane %v5474_v26, %v15798_v41  ;;  %v5752_v38 = vcombine.high %v5751_v27, %v5751_v27  ;;  %v5759_v40 = vrot.slane %v5751_v27, %v15798_v41  ;;  %v6576_v25 = vrot.slane %v6568_v21, 6  ;;  %v7175_v21 = vld [vmem:[%s15646_s21 + $0x38] sm:$0x1] }
 0x7e2   : > { %v5615_v39 = vrot.slane %v5601_v30, %v15798_v41  ;;  %13268 = vst.msk [vmem:[%s15819_s15 + $0x8c] sm:$0x1] %vm924_vm7, %v5608_v31  ;;  %v14178_v42 = vpop.f32.mrb[42].mxu0  ;;  %v5629_v43 = vrot.slane %v5608_v31, %v15808_v58  ;;  %v5616_v44 = vcombine.high %v5608_v31, %v5608_v31  ;;  %v5463_v45 = vrot.slane %v5449_v34, %v15798_v41 }
 0x7e3   : > { %v5464_v46 = vcombine.high %v5456_v36, %v5456_v36  ;;  %5470 = vst.msk [vmem:[%s15819_s15 + $0xc] sm:$0x1] %vm924_vm7, %v5456_v36  ;;  %v5482_v47 = vcombine.high %v5481_v37, %v5481_v37  ;;  %v5489_v7 = vrot.slane %v5481_v37, %v15798_v41  ;;  %v6042_v50 = vpop.f32.mrb[43].mxu0  ;;  %14184 = vmatmul.mubr.msk.f32.vlgmr.msra.gmra.mrb[42].mxu1 %vm742_vm6, %v14178_v42  ;;  %13277 = vst.msk [vmem:[%s15819_s15 + $0x10c] sm:$0x1] %vm924_vm7, %v5759_v40 }
 0x7e4   : > { %13269 = vst.msk [vmem:[%s15819_s15 + $0xac] sm:$0x1] %vm924_vm7, %v5615_v39  ;;  %v5766_v52 = vrot.slane %v5752_v38, %v15798_v41  ;;  %5642 = vrot.lane.b32.xlu1 %v5629_v43, %s15214_s25  ;;  %14191 = vmatmul.mubr.msk.f32.vlgmr.msra.gmra.mrb[44].mxu0 %vm742_vm6, %v6042_v50  ;;  %v5633_v53 = vrot.slane %v5615_v39, %v15808_v58  ;;  %13270 = vst.msk [vmem:[%s15819_s15 + $0xcc] sm:$0x1] %vm924_vm7, %v5616_v44  ;;  %v6578_v28 = vrot.slane %v6569_v24, 5 }
 0x7e5   : > { %v5465_v55 = vcombine.high %v5463_v45, %v5463_v45  ;;  %5471 = vst.msk [vmem:[%s15819_s15 + $0x2c] sm:$0x1] %vm924_vm7, %v5463_v45  ;;  %5472 = vst.msk [vmem:[%s15819_s15 + $0x4c] sm:$0x1] %vm924_vm7, %v5464_v46  ;;  %v5496_v56 = vrot.slane %v5482_v47, %v15798_v41  ;;  %v5497_v57 = vcombine.high %v5489_v7, %v5489_v7  ;;  %14647 = vmatpush3.bf16.msra.mxu1 %v15728_v48  ;;  %v5891_v9 = vpop.f32.mrb[40].mxu1 }
 0x7e6   : > { %5503 = vst.msk [vmem:[%s15819_s15 + $0xd] sm:$0x1] %vm924_vm7, %v5489_v7  ;;  %14650 = vmatpush3.bf16.msra.mxu0 %v15731_v51  ;;  %13278 = vst.msk [vmem:[%s15819_s15 + $0x12c] sm:$0x1] %vm924_vm7, %v5766_v52  ;;  %5644 = vrot.lane.b32.xlu0 %v5633_v53, %s15214_s25  ;;  %v5780_v59 = vrot.slane %v5759_v40, %v15808_v58  ;;  %v5617_v61 = vcombine.high %v5615_v39, %v5615_v39  ;;  %v14173_v11 = vpop.f32.mrb[41].mxu1 }
 0x7e7   : > { %14197 = vmatprep.mubr.msk.f32.mxu1 %vm15210_vm5, %v15211_v19  ;;  %5473 = vst.msk [vmem:[%s15819_s15 + $0x6c] sm:$0x1] %vm924_vm7, %v5465_v55  ;;  %v5498_v17 = vcombine.high %v5496_v56, %v5496_v56  ;;  %5504 = vst.msk [vmem:[%s15819_s15 + $0x2d] sm:$0x1] %vm924_vm7, %v5496_v56  ;;  %14204 = vmatprep.mubr.msk.f32.mxu0 %vm15210_vm5, %v15211_v19  ;;  %v5767_v1 = vcombine.high %v5759_v40, %v5759_v40  ;;  %v7022_v45 = vld [vmem:[%s15640_s26 + $0x18] sm:$0x1] }
 0x7e8   : > { %5505 = vst.msk [vmem:[%s15819_s15 + $0x4d] sm:$0x1] %vm924_vm7, %v5497_v57  ;;  %14214 = vmatprep.subr.msk.mxu0 %vm664_vm4, %v6730_v54  ;;  %v5768_v2 = vcombine.high %v5766_v52, %v5766_v52  ;;  %14198 = vmatmul.mubr.msk.f32.vlgmr.msra.gmra.mrb[44].mxu1 %vm742_vm6, %v6277_v22  ;;  %v5784_v3 = vrot.slane %v5766_v52, %v15808_v58  ;;  %13271 = vst.msk [vmem:[%s15819_s15 + $0xec] sm:$0x1] %vm924_vm7, %v5617_v61  ;;  %v6574_v22 = vrot.slane %v6567_v16, 7 }
 0x7e9   : > { %5793 = vrot.lane.b32.xlu1 %v5780_v59, %s15214_s25  ;;  %v5637_v4 = vrot.slane %v5616_v44, %v15808_v58  ;;  %5506 = vst.msk [vmem:[%s15819_s15 + $0x6d] sm:$0x1] %vm924_vm7, %v5498_v17  ;;  %14205 = vmatmul.mubr.msk.f32.vlgmr.msra.gmra.mrb[46].mxu0 %vm742_vm6, %v6428_v60  ;;  %13279 = vst.msk [vmem:[%s15819_s15 + $0x14c] sm:$0x1] %vm924_vm7, %v5767_v1  ;;  %v5641_v5 = vrot.slane %v5617_v61, %v15808_v58  ;;  %v7023_v7 = vld [vmem:[%s15640_s26 + $0x28] sm:$0x1] }
 0x7ea   : > { %13280 = vst.msk [vmem:[%s15819_s15 + $0x16c] sm:$0x1] %vm924_vm7, %v5768_v2  ;;  %14651 = vmatprep.subr.bf16.mxu1 %v15209_v0  ;;  %14215 = vmatpush3.msk.msra.mxu0 %vm664_vm4, %v6730_v54  ;;  %v5788_v6 = vrot.slane %v5767_v1, %v15808_v58  ;;  %v5792_v8 = vrot.slane %v5768_v2, %v15808_v58  ;;  %v7029_v50 = vrot.slane %v7022_v45, 7  ;;  %v7021_v52 = vld [vmem:[%s15640_s26 + $0x8] sm:$0x1]  ;;  %v7031_v57 = vrot.slane %v7023_v7, 6 }
 0x7eb   : > { %5795 = vrot.lane.b32.xlu0 %v5784_v3, %s15214_s25  ;;  %14216 = vmatprep.mubr.msk.f32.mxu0 %vm657_vm1, %v16707_v63  ;;  %v5902_v10 = vrot.slane %v5891_v9, %v15798_v41  ;;  %v6575_v27 = vsel %vm649_vm0, %v6574_v22, %v6566_v23  ;;  %v7475_v53 = vld [vmem:[%s15633_s10 + $0x19] sm:$0x1]  ;;  %v7173_v55 = vld [vmem:[%s15646_s21 + $0x18] sm:$0x1]  ;;  %v7476_v17 = vld [vmem:[%s15633_s10 + $0x29] sm:$0x1] }
 0x7ec   : > { %14653 = vmatpush3.bf16.msra.mxu1 %v15768_v62  ;;  %14211 = vmatprep.mubr.msk.f32.mxu1 %vm15210_vm5, %v15211_v19  ;;  %v6577_v30 = vsel %vm652_vm2, %v6576_v25, %v6575_v27  ;;  %v7024_v56 = vld [vmem:[%s15640_s26 + $0x38] sm:$0x1]  ;;  %v7030_v61 = vsel %vm649_vm0, %v7029_v50, %v7021_v52  ;;  %v7482_v1 = vrot.slane %v7475_v53, 7  ;;  %v7174_v11 = vld [vmem:[%s15646_s21 + $0x28] sm:$0x1] }
 0x7ed   : > { %5646 = vrot.lane.b32.xlu1 %v5637_v4, %s15214_s25  ;;  %14217 = vmatmul.mubr.msk.f32.vlgmr.msra.gmra.mrb[48].mxu0 %vm657_vm1, %v16718_v49  ;;  %v5903_v12 = vcombine.high %v5902_v10, %v5902_v10  ;;  %v5910_v14 = vrot.slane %v5902_v10, %v15798_v41  ;;  %v6579_v31 = vsel %vm655_vm3, %v6578_v28, %v6577_v30  ;;  %v7474_v4 = vld [vmem:[%s15633_s10 + $0x9] sm:$0x1]  ;;  %v7033_v9 = vrot.slane %v7024_v56, 5  ;;  %v7172_v10 = vld [vmem:[%s15646_s21 + $0x8] sm:$0x1] }
 0x7ee   : > { %14654 = vmatprep.subr.bf16.mxu1 %v15209_v0  ;;  %14657 = vmatprep.subr.bf16.mxu0 %v15209_v0  ;;  %v7477_v16 = vld [vmem:[%s15633_s10 + $0x39] sm:$0x1]  ;;  %v7182_v24 = vrot.slane %v7174_v11, 6 }
 0x7ef   : > { %5648 = vrot.lane.b32.xlu0 %v5641_v5, %s15214_s25  ;;  %14659 = vmatpush3.bf16.msra.mxu0 %v15684_v18  ;;  %v5917_v15 = vrot.slane %v5903_v12, %v15798_v41  ;;  %13286 = vst.msk [vmem:[%s15819_s15 + $0x18c] sm:$0x1] %vm924_vm7, %v5910_v14  ;;  %v5931_v20 = vrot.slane %v5910_v14, %v15808_v58  ;;  %v7180_v5 = vrot.slane %v7173_v55, 7 }
 0x7f0   : > { %14230 = vmatprep.mubr.msk.f32.mxu0 %vm15210_vm5, %v15211_v19  ;;  %14663 = vmatprep.subr.bf16.mxu0 %v15209_v0  ;;  %v5918_v29 = vcombine.high %v5910_v14, %v5910_v14  ;;  %v7032_v12 = vsel %vm652_vm2, %v7031_v57, %v7030_v61  ;;  %v7484_v14 = vrot.slane %v7476_v17, 6 }
 0x7f1   : > { %5797 = vrot.lane.b32.xlu1 %v5788_v6, %s15214_s25  ;;  %13287 = vst.msk [vmem:[%s15819_s15 + $0x1ac] sm:$0x1] %vm924_vm7, %v5917_v15  ;;  %v5935_v26 = vrot.slane %v5917_v15, %v15808_v58  ;;  %v5919_v33 = vcombine.high %v5917_v15, %v5917_v15  ;;  %14212 = vmatmul.mubr.msk.f32.vlgmr.msra.gmra.mrb[46].mxu1 %vm742_vm6, %v6579_v31 }
 0x7f2   : > { %13288 = vst.msk [vmem:[%s15819_s15 + $0x1cc] sm:$0x1] %vm924_vm7, %v5918_v29  ;;  %v5939_v32 = vrot.slane %v5918_v29, %v15808_v58  ;;  %14656 = vmatpush3.bf16.msra.mxu1 %v15674_v13  ;;  %14223 = vmatprep.mubr.msk.f32.mxu1 %vm15210_vm5, %v15211_v19  ;;  %v7181_v23 = vsel %vm649_vm0, %v7180_v5, %v7172_v10 }
 0x7f3   : > { %5799 = vrot.lane.b32.xlu0 %v5792_v8, %s15214_s25  ;;  %13289 = vst.msk [vmem:[%s15819_s15 + $0x1ec] sm:$0x1] %vm924_vm7, %v5919_v33  ;;  %v5943_v34 = vrot.slane %v5919_v33, %v15808_v58  ;;  %14660 = vmatprep.subr.bf16.mxu1 %v15209_v0  ;;  %v7034_v29 = vsel %vm655_vm3, %v7033_v9, %v7032_v12 }
 0x7f4   : > { %v7183_v45 = vsel %vm652_vm2, %v7182_v24, %v7181_v23  ;;  %v7325_v24 = vld [vmem:[%s15648_s1 + $0x28] sm:$0x1] }
 0x7f5   : > { %5944 = vrot.lane.b32.xlu1 %v5931_v20, %s15214_s25  ;;  %v7483_v20 = vsel %vm649_vm0, %v7482_v1, %v7474_v4 }
 0x7f6   : > { %v7485_v33 = vsel %vm652_vm2, %v7484_v14, %v7483_v20 }
 0x7f7   : > { %5946 = vrot.lane.b32.xlu0 %v5935_v26, %s15214_s25 }
 0x7f9   : > { %5948 = vrot.lane.b32.xlu1 %v5939_v32, %s15214_s25 }
 0x7fb   : > { %5950 = vrot.lane.b32.xlu0 %v5943_v34, %s15214_s25  ;;  %v7486_v34 = vrot.slane %v7477_v16, 5 }
 0x7fd   : > { %v7487_v57 = vsel %vm655_vm3, %v7486_v34, %v7485_v33 }
 0x856   : > { %v5643_v36 = vpop.permute.xlu1 %5642 }
 0x857   : > { %13272 = vst.msk [vmem:[%s15819_s15 + $0x8d] sm:$0x1] %vm924_vm7, %v5643_v36  ;;  %v7184_v36 = vrot.slane %v7175_v21, 5  ;;  %v7324_v21 = vld [vmem:[%s15648_s1 + $0x18] sm:$0x1] }
 0x858   : > { %v5645_v37 = vpop.permute.xlu0 %5644 }
 0x859   : > { %13273 = vst.msk [vmem:[%s15819_s15 + $0xad] sm:$0x1] %vm924_vm7, %v5645_v37  ;;  %v7185_v1 = vsel %vm655_vm3, %v7184_v36, %v7183_v45 }
 0x85b   : > { %v5794_v38 = vpop.permute.xlu1 %5793 }
 0x85c   : > { %13281 = vst.msk [vmem:[%s15819_s15 + $0x10d] sm:$0x1] %vm924_vm7, %v5794_v38 }
 0x85d   : > { %v5796_v39 = vpop.permute.xlu0 %5795 }
 0x85e   : > { %13282 = vst.msk [vmem:[%s15819_s15 + $0x12d] sm:$0x1] %vm924_vm7, %v5796_v39 }
 0x85f   : > { %v5647_v40 = vpop.permute.xlu1 %5646 }
 0x860   : > { %13274 = vst.msk [vmem:[%s15819_s15 + $0xcd] sm:$0x1] %vm924_vm7, %v5647_v40 }
 0x861   : > { %v5649_v42 = vpop.permute.xlu0 %5648 }
 0x862   : > { %13275 = vst.msk [vmem:[%s15819_s15 + $0xed] sm:$0x1] %vm924_vm7, %v5649_v42 }
 0x863   : > { %v5798_v43 = vpop.permute.xlu1 %5797 }
 0x864   : > { %13283 = vst.msk [vmem:[%s15819_s15 + $0x14d] sm:$0x1] %vm924_vm7, %v5798_v43 }
 0x865   : > { %v5800_v44 = vpop.permute.xlu0 %5799 }
 0x866   : > { %13284 = vst.msk [vmem:[%s15819_s15 + $0x16d] sm:$0x1] %vm924_vm7, %v5800_v44 }
 0x867   : > { %v5945_v46 = vpop.permute.xlu1 %5944 }
 0x868   : > { %13290 = vst.msk [vmem:[%s15819_s15 + $0x18d] sm:$0x1] %vm924_vm7, %v5945_v46 }
 0x869   : > { %v5947_v47 = vpop.permute.xlu0 %5946 }
 0x86a   : > { %13291 = vst.msk [vmem:[%s15819_s15 + $0x1ad] sm:$0x1] %vm924_vm7, %v5947_v47 }
 0x86b   : > { %v5949_v54 = vpop.permute.xlu1 %5948 }
 0x86c   : > { %13292 = vst.msk [vmem:[%s15819_s15 + $0x1cd] sm:$0x1] %vm924_vm7, %v5949_v54 }
 0x86d   : > { %v5951_v59 = vpop.permute.xlu0 %5950 }
 0x86e   : > { %13293 = vst.msk [vmem:[%s15819_s15 + $0x1ed] sm:$0x1] %vm924_vm7, %v5951_v59 }
 0x8b6   : > { %v6120_v60 = vpop.f32.mrb[42].mxu1 }
 0x8b7   : > { %v14185_v2 = vpop.f32.mrb[43].mxu1  ;;  %v6193_v3 = vpop.f32.mrb[44].mxu0 }
 0x8b8   : > { %v6194_v6 = vadd.f32 %v6193_v3, %v6120_v60  ;;  %v14192_v8 = vpop.f32.mrb[45].mxu0 }
 0x8ba   : > { %v6197_v15 = vadd.f32 %v6194_v6, %v15794_v35 }
 0x8bb   : > { %v6346_v22 = vpop.f32.mrb[44].mxu1 }
 0x8bc   : > { %v6205_v25 = vrot.slane %v6197_v15, %v15798_v41  ;;  %v6231_v26 = vcombine.high %v6197_v15, %v6197_v15  ;;  %v6357_v27 = vrot.slane %v6346_v22, %v15798_v41  ;;  %v6497_v28 = vpop.f32.mrb[46].mxu0  ;;  %v14199_v30 = vpop.f32.mrb[45].mxu1 }
 0x8bd   : > { %v6508_v31 = vrot.slane %v6497_v28, %v15798_v41  ;;  %v14206_v32 = vpop.f32.mrb[47].mxu0  ;;  %v7333_v28 = vrot.slane %v7325_v24, 6  ;;  %v7932_v24 = vld [vmem:[%s15646_s21 + $0x39] sm:$0x1] }
 0x8be   : > { %v6206_v37 = vcombine.high %v6205_v25, %v6205_v25  ;;  %v6213_v38 = vrot.slane %v6205_v25, %v15798_v41  ;;  %v6238_v39 = vrot.slane %v6231_v26, %v15798_v41  ;;  %v6358_v40 = vcombine.high %v6357_v27, %v6357_v27  ;;  %v7323_v26 = vld [vmem:[%s15648_s1 + $0x8] sm:$0x1] }
 0x8bf   : > { %v6365_v42 = vrot.slane %v6357_v27, %v15798_v41  ;;  %v6509_v43 = vcombine.high %v6508_v31, %v6508_v31  ;;  %v6516_v44 = vrot.slane %v6508_v31, %v15798_v41  ;;  %v7331_v25 = vrot.slane %v7324_v21, 7  ;;  %v7326_v27 = vld [vmem:[%s15648_s1 + $0x38] sm:$0x1] }
 0x8c0   : > { %v6220_v46 = vrot.slane %v6206_v37, %v15798_v41  ;;  %v6221_v47 = vcombine.high %v6213_v38, %v6213_v38  ;;  %6227 = vst.msk [vmem:[%s15819_s15 + $0xe] sm:$0x1] %vm924_vm7, %v6213_v38  ;;  %v6239_v7 = vcombine.high %v6238_v39, %v6238_v39  ;;  %v6246_v50 = vrot.slane %v6238_v39, %v15798_v41  ;;  %v14218_v52 = vpop.f32.mrb[48].mxu0 }
 0x8c1   : > { %v6372_v53 = vrot.slane %v6358_v40, %v15798_v41  ;;  %13300 = vst.msk [vmem:[%s15819_s15 + $0x8e] sm:$0x1] %vm924_vm7, %v6365_v42  ;;  %v6523_v54 = vrot.slane %v6509_v43, %v15798_v41  ;;  %13309 = vst.msk [vmem:[%s15819_s15 + $0x10e] sm:$0x1] %vm924_vm7, %v6516_v44  ;;  %v6799_v55 = vpop.f32.mrb[49].mxu0  ;;  %14224 = vmatmul.mubr.msk.f32.vlgmr.msra.gmra.mrb[48].mxu1 %vm742_vm6, %v14218_v52  ;;  %v6386_v56 = vrot.slane %v6365_v42, %v15808_v58 }
 0x8c2   : > { %v6222_v59 = vcombine.high %v6220_v46, %v6220_v46  ;;  %6228 = vst.msk [vmem:[%s15819_s15 + $0x2e] sm:$0x1] %vm924_vm7, %v6220_v46  ;;  %6229 = vst.msk [vmem:[%s15819_s15 + $0x4e] sm:$0x1] %vm924_vm7, %v6221_v47  ;;  %v6253_v60 = vrot.slane %v6239_v7, %v15798_v41  ;;  %v6254_v61 = vcombine.high %v6246_v50, %v6246_v50  ;;  %14231 = vmatmul.mubr.msk.f32.vlgmr.msra.gmra.mrb[50].mxu0 %vm742_vm6, %v6799_v55  ;;  %v7779_v7 = vld [vmem:[%s15640_s26 + $0x19] sm:$0x1] }
 0x8c3   : > { %6260 = vst.msk [vmem:[%s15819_s15 + $0xf] sm:$0x1] %vm924_vm7, %v6246_v50  ;;  %14662 = vmatpush3.bf16.msra.mxu1 %v15728_v48  ;;  %13301 = vst.msk [vmem:[%s15819_s15 + $0xae] sm:$0x1] %vm924_vm7, %v6372_v53  ;;  %6399 = vrot.lane.b32.xlu1 %v6386_v56, %s15214_s25  ;;  %v6390_v17 = vrot.slane %v6372_v53, %v15808_v58  ;;  %v6373_v2 = vcombine.high %v6365_v42, %v6365_v42  ;;  %v7335_v31 = vrot.slane %v7326_v27, 5 }
 0x8c4   : > { %13310 = vst.msk [vmem:[%s15819_s15 + $0x12e] sm:$0x1] %vm924_vm7, %v6523_v54  ;;  %14665 = vmatpush3.bf16.msra.mxu0 %v15731_v51  ;;  %6230 = vst.msk [vmem:[%s15819_s15 + $0x6e] sm:$0x1] %vm924_vm7, %v6222_v59  ;;  %v6255_v3 = vcombine.high %v6253_v60, %v6253_v60  ;;  %14237 = vmatprep.mubr.msk.f32.mxu1 %vm15210_vm5, %v15211_v19  ;;  %v6374_v4 = vcombine.high %v6372_v53, %v6372_v53  ;;  %v6648_v12 = vpop.f32.mrb[46].mxu1 }
 0x8c5   : > { %6261 = vst.msk [vmem:[%s15819_s15 + $0x2f] sm:$0x1] %vm924_vm7, %v6253_v60  ;;  %6262 = vst.msk [vmem:[%s15819_s15 + $0x4f] sm:$0x1] %vm924_vm7, %v6254_v61  ;;  %14244 = vmatprep.mubr.msk.f32.mxu0 %vm15210_vm5, %v15211_v19  ;;  %v6524_v5 = vcombine.high %v6516_v44, %v6516_v44  ;;  %6401 = vrot.lane.b32.xlu0 %v6390_v17, %s15214_s25  ;;  %v6537_v6 = vrot.slane %v6516_v44, %v15808_v58  ;;  %v14213_v15 = vpop.f32.mrb[47].mxu1 }
 0x8c6   : > { %14238 = vmatmul.mubr.msk.f32.vlgmr.msra.gmra.mrb[50].mxu1 %vm742_vm6, %v7034_v29  ;;  %13302 = vst.msk [vmem:[%s15819_s15 + $0xce] sm:$0x1] %vm924_vm7, %v6373_v2  ;;  %v6525_v8 = vcombine.high %v6523_v54, %v6523_v54  ;;  %6263 = vst.msk [vmem:[%s15819_s15 + $0x6f] sm:$0x1] %vm924_vm7, %v6255_v3  ;;  %14254 = vmatprep.subr.msk.mxu0 %vm664_vm4, %v7487_v57  ;;  %v6541_v9 = vrot.slane %v6523_v54, %v15808_v58  ;;  %v7780_v53 = vld [vmem:[%s15640_s26 + $0x29] sm:$0x1] }
 0x8c7   : > { %14245 = vmatmul.mubr.msk.f32.vlgmr.msra.gmra.mrb[52].mxu0 %vm742_vm6, %v7185_v1  ;;  %13303 = vst.msk [vmem:[%s15819_s15 + $0xee] sm:$0x1] %vm924_vm7, %v6374_v4  ;;  %13311 = vst.msk [vmem:[%s15819_s15 + $0x14e] sm:$0x1] %vm924_vm7, %v6524_v5  ;;  %6550 = vrot.lane.b32.xlu1 %v6537_v6, %s15214_s25  ;;  %v6394_v10 = vrot.slane %v6373_v2, %v15808_v58  ;;  %v6398_v11 = vrot.slane %v6374_v4, %v15808_v58  ;;  %v7786_v54 = vrot.slane %v7779_v7, 7 }
 0x8c8   : > { %14255 = vmatpush3.msk.msra.mxu0 %vm664_vm4, %v7487_v57  ;;  %13312 = vst.msk [vmem:[%s15819_s15 + $0x16e] sm:$0x1] %vm924_vm7, %v6525_v8  ;;  %14256 = vmatprep.mubr.msk.f32.mxu0 %vm657_vm1, %v16707_v63  ;;  %v6545_v63 = vrot.slane %v6524_v5, %v15808_v58  ;;  %v6659_v14 = vrot.slane %v6648_v12, %v15798_v41  ;;  %v7778_v55 = vld [vmem:[%s15640_s26 + $0x9] sm:$0x1]  ;;  %v8232_v56 = vld [vmem:[%s15633_s10 + $0x1a] sm:$0x1] }
 0x8c9   : > { %14666 = vmatprep.subr.bf16.mxu1 %v15209_v0  ;;  %6552 = vrot.lane.b32.xlu0 %v6541_v9, %s15214_s25  ;;  %v7332_v30 = vsel %vm649_vm0, %v7331_v25, %v7323_v26  ;;  %v7930_v59 = vld [vmem:[%s15646_s21 + $0x19] sm:$0x1]  ;;  %v7788_v61 = vrot.slane %v7780_v53, 6  ;;  %v7787_v1 = vsel %vm649_vm0, %v7786_v54, %v7778_v55  ;;  %v8233_v2 = vld [vmem:[%s15633_s10 + $0x2a] sm:$0x1]  ;;  %v8239_v3 = vrot.slane %v8232_v56, 7 }
 0x8ca   : > { %14668 = vmatpush3.bf16.msra.mxu1 %v15768_v62  ;;  %14251 = vmatprep.mubr.msk.f32.mxu1 %vm15210_vm5, %v15211_v19  ;;  %v6660_v16 = vcombine.high %v6659_v14, %v6659_v14  ;;  %v6667_v20 = vrot.slane %v6659_v14, %v15798_v41  ;;  %v7334_v33 = vsel %vm652_vm2, %v7333_v28, %v7332_v30  ;;  %v7781_v60 = vld [vmem:[%s15640_s26 + $0x39] sm:$0x1]  ;;  %v8231_v5 = vld [vmem:[%s15633_s10 + $0xa] sm:$0x1]  ;;  %v7931_v6 = vld [vmem:[%s15646_s21 + $0x29] sm:$0x1] }
 0x8cb   : > { %14257 = vmatmul.mubr.msk.f32.vlgmr.msra.gmra.mrb[54].mxu0 %vm657_vm1, %v16718_v49  ;;  %6403 = vrot.lane.b32.xlu1 %v6394_v10, %s15214_s25  ;;  %v6549_v49 = vrot.slane %v6525_v8, %v15808_v58  ;;  %v7336_v34 = vsel %vm655_vm3, %v7335_v31, %v7334_v33  ;;  %v7937_v8 = vrot.slane %v7930_v59, 7  ;;  %v7789_v14 = vsel %vm652_vm2, %v7788_v61, %v7787_v1  ;;  %v8234_v15 = vld [vmem:[%s15633_s10 + $0x3a] sm:$0x1] }
 0x8cc   : > { %14669 = vmatprep.subr.bf16.mxu1 %v15209_v0  ;;  %14672 = vmatprep.subr.bf16.mxu0 %v15209_v0  ;;  %v6674_v22 = vrot.slane %v6660_v16, %v15798_v41  ;;  %13318 = vst.msk [vmem:[%s15819_s15 + $0x18e] sm:$0x1] %vm924_vm7, %v6667_v20  ;;  %v6688_v23 = vrot.slane %v6667_v20, %v15808_v58  ;;  %v8241_v16 = vrot.slane %v8233_v2, 6  ;;  %v7939_v21 = vrot.slane %v7931_v6, 6 }
 0x8cd   : > { %14270 = vmatprep.mubr.msk.f32.mxu0 %vm15210_vm5, %v15211_v19  ;;  %6405 = vrot.lane.b32.xlu0 %v6398_v11, %s15214_s25  ;;  %v6675_v32 = vcombine.high %v6667_v20, %v6667_v20  ;;  %v7790_v11 = vrot.slane %v7781_v60, 5  ;;  %v8240_v20 = vsel %vm649_vm0, %v8239_v3, %v8231_v5 }
 0x8ce   : > { %14674 = vmatpush3.bf16.msra.mxu0 %v15684_v18  ;;  %13319 = vst.msk [vmem:[%s15819_s15 + $0x1ae] sm:$0x1] %vm924_vm7, %v6674_v22  ;;  %v6692_v29 = vrot.slane %v6674_v22, %v15808_v58  ;;  %v6676_v37 = vcombine.high %v6674_v22, %v6674_v22  ;;  %14252 = vmatmul.mubr.msk.f32.vlgmr.msra.gmra.mrb[52].mxu1 %vm742_vm6, %v7336_v34 }
 0x8cf   : > { %14678 = vmatprep.subr.bf16.mxu0 %v15209_v0  ;;  %6554 = vrot.lane.b32.xlu1 %v6545_v63, %s15214_s25  ;;  %13320 = vst.msk [vmem:[%s15819_s15 + $0x1ce] sm:$0x1] %vm924_vm7, %v6675_v32  ;;  %v6696_v36 = vrot.slane %v6675_v32, %v15808_v58  ;;  %v7929_v63 = vld [vmem:[%s15646_s21 + $0x9] sm:$0x1]  ;;  %v7791_v28 = vsel %vm655_vm3, %v7790_v11, %v7789_v14 }
 0x8d0   : > { %14671 = vmatpush3.bf16.msra.mxu1 %v15674_v13  ;;  %13321 = vst.msk [vmem:[%s15819_s15 + $0x1ee] sm:$0x1] %vm924_vm7, %v6676_v37  ;;  %v6700_v38 = vrot.slane %v6676_v37, %v15808_v58  ;;  %14263 = vmatprep.mubr.msk.f32.mxu1 %vm15210_vm5, %v15211_v19  ;;  %v7938_v25 = vsel %vm649_vm0, %v7937_v8, %v7929_v63  ;;  %v17206_v63 = vld [vmem:[%s18545_s19] sm:$0xff] }
 0x8d1   : > { %6556 = vrot.lane.b32.xlu0 %v6549_v49, %s15214_s25  ;;  %14675 = vmatprep.subr.bf16.mxu1 %v15209_v0 }
 0x8d3   : > { %6701 = vrot.lane.b32.xlu1 %v6688_v23, %s15214_s25 }
 0x8d5   : > { %6703 = vrot.lane.b32.xlu0 %v6692_v29, %s15214_s25  ;;  %v8243_v29 = vrot.slane %v8234_v15, 5 }
 0x8d7   : > { %6705 = vrot.lane.b32.xlu1 %v6696_v36, %s15214_s25  ;;  %v8242_v36 = vsel %vm652_vm2, %v8241_v16, %v8240_v20 }
 0x8d9   : > { %6707 = vrot.lane.b32.xlu0 %v6700_v38, %s15214_s25 }
 0x935   : > { %v6400_v39 = vpop.permute.xlu1 %6399 }
 0x936   : > { %13304 = vst.msk [vmem:[%s15819_s15 + $0x8f] sm:$0x1] %vm924_vm7, %v6400_v39  ;;  %v7940_v39 = vsel %vm652_vm2, %v7939_v21, %v7938_v25 }
 0x937   : > { %v6402_v40 = vpop.permute.xlu0 %6401 }
 0x938   : > { %13305 = vst.msk [vmem:[%s15819_s15 + $0xaf] sm:$0x1] %vm924_vm7, %v6402_v40  ;;  %v7941_v40 = vrot.slane %v7932_v24, 5  ;;  %v8081_v24 = vld [vmem:[%s15648_s1 + $0x19] sm:$0x1] }
 0x939   : > { %v6551_v42 = vpop.permute.xlu1 %6550 }
 0x93a   : > { %13313 = vst.msk [vmem:[%s15819_s15 + $0x10f] sm:$0x1] %vm924_vm7, %v6551_v42  ;;  %v7942_v6 = vsel %vm655_vm3, %v7941_v40, %v7940_v39 }
 0x93b   : > { %v6553_v43 = vpop.permute.xlu0 %6552 }
 0x93c   : > { %13314 = vst.msk [vmem:[%s15819_s15 + $0x12f] sm:$0x1] %vm924_vm7, %v6553_v43 }
 0x93d   : > { %v6404_v44 = vpop.permute.xlu1 %6403 }
 0x93e   : > { %13306 = vst.msk [vmem:[%s15819_s15 + $0xcf] sm:$0x1] %vm924_vm7, %v6404_v44 }
 0x93f   : > { %v6406_v45 = vpop.permute.xlu0 %6405 }
 0x940   : > { %13307 = vst.msk [vmem:[%s15819_s15 + $0xef] sm:$0x1] %vm924_vm7, %v6406_v45 }
 0x941   : > { %v6555_v46 = vpop.permute.xlu1 %6554 }
 0x942   : > { %13315 = vst.msk [vmem:[%s15819_s15 + $0x14f] sm:$0x1] %vm924_vm7, %v6555_v46 }
 0x943   : > { %v6557_v47 = vpop.permute.xlu0 %6556 }
 0x944   : > { %13316 = vst.msk [vmem:[%s15819_s15 + $0x16f] sm:$0x1] %vm924_vm7, %v6557_v47 }
 0x945   : > { %v6702_v50 = vpop.permute.xlu1 %6701 }
 0x946   : > { %13322 = vst.msk [vmem:[%s15819_s15 + $0x18f] sm:$0x1] %vm924_vm7, %v6702_v50 }
 0x947   : > { %v6704_v52 = vpop.permute.xlu0 %6703 }
 0x948   : > { %13323 = vst.msk [vmem:[%s15819_s15 + $0x1af] sm:$0x1] %vm924_vm7, %v6704_v52 }
 0x949   : > { %v6706_v57 = vpop.permute.xlu1 %6705 }
 0x94a   : > { %13324 = vst.msk [vmem:[%s15819_s15 + $0x1cf] sm:$0x1] %vm924_vm7, %v6706_v57 }
 0x94b   : > { %v6708_v17 = vpop.permute.xlu0 %6707 }
 0x94c   : > { %13325 = vst.msk [vmem:[%s15819_s15 + $0x1ef] sm:$0x1] %vm924_vm7, %v6708_v17  ;;  %v8244_v17 = vsel %vm655_vm3, %v8243_v29, %v8242_v36  ;;  %v8088_v29 = vrot.slane %v8081_v24, 7 }
 0x994   : > { %v6877_v4 = vpop.f32.mrb[48].mxu1 }
 0x995   : > { %v14225_v9 = vpop.f32.mrb[49].mxu1  ;;  %v6950_v10 = vpop.f32.mrb[50].mxu0 }
 0x996   : > { %v6951_v49 = vadd.f32 %v6950_v10, %v6877_v4  ;;  %v14232_v12 = vpop.f32.mrb[51].mxu0 }
 0x997   : > { %v17220_v12 = vld [vmem:[%s18545_s19 + $0x8] sm:$0xff] }
 0x998   : > { %v6954_v22 = vadd.f32 %v6951_v49, %v15794_v35 }
 0x999   : > { %v7103_v23 = vpop.f32.mrb[50].mxu1 }
 0x99a   : > { %v7114_v26 = vrot.slane %v7103_v23, %v15798_v41  ;;  %v7254_v27 = vpop.f32.mrb[52].mxu0  ;;  %v14239_v30 = vpop.f32.mrb[51].mxu1  ;;  %v6962_v31 = vrot.slane %v6954_v22, %v15798_v41  ;;  %v6988_v32 = vcombine.high %v6954_v22, %v6954_v22 }
 0x99b   : > { %v7265_v33 = vrot.slane %v7254_v27, %v15798_v41  ;;  %v14246_v34 = vpop.f32.mrb[53].mxu0  ;;  %v8080_v30 = vld [vmem:[%s15648_s1 + $0x9] sm:$0x1] }
 0x99c   : > { %v7115_v37 = vcombine.high %v7114_v26, %v7114_v26  ;;  %v7122_v38 = vrot.slane %v7114_v26, %v15798_v41  ;;  %v6963_v42 = vcombine.high %v6962_v31, %v6962_v31  ;;  %v6970_v43 = vrot.slane %v6962_v31, %v15798_v41  ;;  %v8083_v31 = vld [vmem:[%s15648_s1 + $0x39] sm:$0x1] }
 0x99d   : > { %v6995_v44 = vrot.slane %v6988_v32, %v15798_v41  ;;  %v7266_v45 = vcombine.high %v7265_v33, %v7265_v33  ;;  %v7273_v7 = vrot.slane %v7265_v33, %v15798_v41  ;;  %v8089_v36 = vsel %vm649_vm0, %v8088_v29, %v8080_v30  ;;  %v8689_v29 = vld [vmem:[%s15646_s21 + $0x3a] sm:$0x1] }
 0x99e   : > { %v7129_v46 = vrot.slane %v7115_v37, %v15798_v41  ;;  %v7130_v47 = vcombine.high %v7122_v38, %v7122_v38  ;;  %13332 = vst.msk [vmem:[%s15819_s15 + $0x90] sm:$0x1] %vm924_vm7, %v7122_v38  ;;  %v14258_v50 = vpop.f32.mrb[54].mxu0  ;;  %v7143_v52 = vrot.slane %v7122_v38, %v15808_v58  ;;  %v6977_v53 = vrot.slane %v6963_v42, %v15798_v41 }
 0x99f   : > { %v6978_v54 = vcombine.high %v6970_v43, %v6970_v43  ;;  %6984 = vst.msk [vmem:[%s15819_s15 + $0x10] sm:$0x1] %vm924_vm7, %v6970_v43  ;;  %v6996_v55 = vcombine.high %v6995_v44, %v6995_v44  ;;  %v7003_v56 = vrot.slane %v6995_v44, %v15798_v41  ;;  %v7556_v57 = vpop.f32.mrb[55].mxu0  ;;  %14264 = vmatmul.mubr.msk.f32.vlgmr.msra.gmra.mrb[54].mxu1 %vm742_vm6, %v14258_v50  ;;  %13341 = vst.msk [vmem:[%s15819_s15 + $0x110] sm:$0x1] %vm924_vm7, %v7273_v7 }
 0x9a0   : > { %v7131_v59 = vcombine.high %v7129_v46, %v7129_v46  ;;  %13333 = vst.msk [vmem:[%s15819_s15 + $0xb0] sm:$0x1] %vm924_vm7, %v7129_v46  ;;  %13334 = vst.msk [vmem:[%s15819_s15 + $0xd0] sm:$0x1] %vm924_vm7, %v7130_v47  ;;  %v7280_v60 = vrot.slane %v7266_v45, %v15798_v41  ;;  %v7281_v61 = vcombine.high %v7273_v7, %v7273_v7  ;;  %7156 = vrot.lane.b32.xlu1 %v7143_v52, %s15214_s25 }
 0x9a1   : > { %v6979_v1 = vcombine.high %v6977_v53, %v6977_v53  ;;  %6985 = vst.msk [vmem:[%s15819_s15 + $0x30] sm:$0x1] %vm924_vm7, %v6977_v53  ;;  %6986 = vst.msk [vmem:[%s15819_s15 + $0x50] sm:$0x1] %vm924_vm7, %v6978_v54  ;;  %v7010_v2 = vrot.slane %v6996_v55, %v15798_v41  ;;  %v7011_v3 = vcombine.high %v7003_v56, %v7003_v56  ;;  %14271 = vmatmul.mubr.msk.f32.vlgmr.msra.gmra.mrb[56].mxu0 %vm742_vm6, %v7556_v57  ;;  %v7405_v16 = vpop.f32.mrb[52].mxu1 }
 0x9a2   : > { %7017 = vst.msk [vmem:[%s15819_s15 + $0x11] sm:$0x1] %vm924_vm7, %v7003_v56  ;;  %14677 = vmatpush3.bf16.msra.mxu1 %v15728_v48  ;;  %13335 = vst.msk [vmem:[%s15819_s15 + $0xf0] sm:$0x1] %vm924_vm7, %v7131_v59  ;;  %v7282_v4 = vcombine.high %v7280_v60, %v7280_v60  ;;  %14680 = vmatpush3.bf16.msra.mxu0 %v15731_v51  ;;  %v7147_v5 = vrot.slane %v7129_v46, %v15808_v58  ;;  %v14253_v21 = vpop.f32.mrb[53].mxu1  ;;  %v8092_v37 = vrot.slane %v8083_v31, 5 }
 0x9a3   : > { %13342 = vst.msk [vmem:[%s15819_s15 + $0x130] sm:$0x1] %vm924_vm7, %v7280_v60  ;;  %13343 = vst.msk [vmem:[%s15819_s15 + $0x150] sm:$0x1] %vm924_vm7, %v7281_v61  ;;  %14277 = vmatprep.mubr.msk.f32.mxu1 %vm15210_vm5, %v15211_v19  ;;  %v7012_v8 = vcombine.high %v7010_v2, %v7010_v2  ;;  %v7294_v9 = vrot.slane %v7273_v7, %v15808_v58  ;;  %14284 = vmatprep.mubr.msk.f32.mxu0 %vm15210_vm5, %v15211_v19  ;;  %v8536_v54 = vld [vmem:[%s15640_s26 + $0x1a] sm:$0x1] }
 0x9a4   : > { %6987 = vst.msk [vmem:[%s15819_s15 + $0x70] sm:$0x1] %vm924_vm7, %v6979_v1  ;;  %7018 = vst.msk [vmem:[%s15819_s15 + $0x31] sm:$0x1] %vm924_vm7, %v7010_v2  ;;  %14294 = vmatprep.subr.msk.mxu0 %vm664_vm4, %v8244_v17  ;;  %7158 = vrot.lane.b32.xlu0 %v7147_v5, %s15214_s25  ;;  %v7151_v10 = vrot.slane %v7130_v47, %v15808_v58  ;;  %v7298_v11 = vrot.slane %v7280_v60, %v15808_v58  ;;  %v8537_v56 = vld [vmem:[%s15640_s26 + $0x2a] sm:$0x1] }
 0x9a5   : > { %7019 = vst.msk [vmem:[%s15819_s15 + $0x51] sm:$0x1] %vm924_vm7, %v7011_v3  ;;  %13344 = vst.msk [vmem:[%s15819_s15 + $0x170] sm:$0x1] %vm924_vm7, %v7282_v4  ;;  %14278 = vmatmul.mubr.msk.f32.vlgmr.msra.gmra.mrb[56].mxu1 %vm742_vm6, %v7791_v28  ;;  %7307 = vrot.lane.b32.xlu1 %v7294_v9, %s15214_s25  ;;  %v7155_v49 = vrot.slane %v7131_v59, %v15808_v58  ;;  %v7302_v14 = vrot.slane %v7281_v61, %v15808_v58  ;;  %v8082_v28 = vld [vmem:[%s15648_s1 + $0x29] sm:$0x1] }
 0x9a6   : > { %7020 = vst.msk [vmem:[%s15819_s15 + $0x71] sm:$0x1] %vm924_vm7, %v7012_v8  ;;  %14285 = vmatmul.mubr.msk.f32.vlgmr.msra.gmra.mrb[58].mxu0 %vm742_vm6, %v7942_v6  ;;  %14681 = vmatprep.subr.bf16.mxu1 %v15209_v0  ;;  %v7306_v15 = vrot.slane %v7282_v4, %v15808_v58  ;;  %v7416_v20 = vrot.slane %v7405_v16, %v15798_v41  ;;  %v8090_v32 = vrot.slane %v8082_v28, 6  ;;  %v8543_v57 = vrot.slane %v8536_v54, 7  ;;  %v8535_v60 = vld [vmem:[%s15640_s26 + $0xa] sm:$0x1] }
 0x9a7   : > { %14295 = vmatpush3.msk.msra.mxu0 %vm664_vm4, %v8244_v17  ;;  %14296 = vmatprep.mubr.msk.f32.mxu0 %vm657_vm1, %v17206_v63  ;;  %v8989_v61 = vld [vmem:[%s15633_s10 + $0x1b] sm:$0x1]  ;;  %v8687_v17 = vld [vmem:[%s15646_s21 + $0x1a] sm:$0x1]  ;;  %v8545_v3 = vrot.slane %v8537_v56, 6 }
 0x9a8   : > { %14291 = vmatprep.mubr.msk.f32.mxu1 %vm15210_vm5, %v15211_v19  ;;  %7309 = vrot.lane.b32.xlu0 %v7298_v11, %s15214_s25  ;;  %v7417_v22 = vcombine.high %v7416_v20, %v7416_v20  ;;  %v7424_v23 = vrot.slane %v7416_v20, %v15798_v41  ;;  %v8091_v38 = vsel %vm652_vm2, %v8090_v32, %v8089_v36  ;;  %v8538_v2 = vld [vmem:[%s15640_s26 + $0x3a] sm:$0x1]  ;;  %v8990_v6 = vld [vmem:[%s15633_s10 + $0x2b] sm:$0x1]  ;;  %v8996_v8 = vrot.slane %v8989_v61, 7 }
 0x9a9   : > { %14683 = vmatpush3.bf16.msra.mxu1 %v15768_v62  ;;  %7160 = vrot.lane.b32.xlu1 %v7151_v10, %s15214_s25  ;;  %v8093_v39 = vsel %vm655_vm3, %v8092_v37, %v8091_v38  ;;  %v8544_v5 = vsel %vm649_vm0, %v8543_v57, %v8535_v60  ;;  %v8988_v10 = vld [vmem:[%s15633_s10 + $0xb] sm:$0x1]  ;;  %v8688_v11 = vld [vmem:[%s15646_s21 + $0x2a] sm:$0x1]  ;;  %v8998_v24 = vrot.slane %v8990_v6, 6 }
 0x9aa   : > { %14297 = vmatmul.mubr.msk.f32.vlgmr.msra.gmra.mrb[60].mxu0 %vm657_vm1, %v17220_v12  ;;  %14684 = vmatprep.subr.bf16.mxu1 %v15209_v0  ;;  %v7431_v25 = vrot.slane %v7417_v22, %v15798_v41  ;;  %v7432_v26 = vcombine.high %v7424_v23, %v7424_v23  ;;  %13350 = vst.msk [vmem:[%s15819_s15 + $0x190] sm:$0x1] %vm924_vm7, %v7424_v23  ;;  %v8686_v16 = vld [vmem:[%s15646_s21 + $0xa] sm:$0x1] }
 0x9ab   : > { %14687 = vmatprep.subr.bf16.mxu0 %v15209_v0  ;;  %14310 = vmatprep.mubr.msk.f32.mxu0 %vm15210_vm5, %v15211_v19  ;;  %v7445_v27 = vrot.slane %v7424_v23, %v15808_v58  ;;  %v8546_v22 = vsel %vm652_vm2, %v8545_v3, %v8544_v5  ;;  %v8991_v23 = vld [vmem:[%s15633_s10 + $0x3b] sm:$0x1] }
 0x9ac   : > { %14689 = vmatpush3.bf16.msra.mxu0 %v15684_v18  ;;  %7162 = vrot.lane.b32.xlu0 %v7155_v49, %s15214_s25  ;;  %v7433_v33 = vcombine.high %v7431_v25, %v7431_v25  ;;  %13351 = vst.msk [vmem:[%s15819_s15 + $0x1b0] sm:$0x1] %vm924_vm7, %v7431_v25  ;;  %13352 = vst.msk [vmem:[%s15819_s15 + $0x1d0] sm:$0x1] %vm924_vm7, %v7432_v26  ;;  %v7449_v34 = vrot.slane %v7431_v25, %v15808_v58  ;;  %v8694_v49 = vrot.slane %v8687_v17, 7 }
 0x9ad   : > { %14693 = vmatprep.subr.bf16.mxu0 %v15209_v0  ;;  %7311 = vrot.lane.b32.xlu1 %v7302_v14, %s15214_s25  ;;  %v7453_v40 = vrot.slane %v7432_v26, %v15808_v58  ;;  %v8997_v25 = vsel %vm649_vm0, %v8996_v8, %v8988_v10  ;;  %v8696_v26 = vrot.slane %v8688_v11, 6 }
 0x9ae   : > { %13353 = vst.msk [vmem:[%s15819_s15 + $0x1f0] sm:$0x1] %vm924_vm7, %v7433_v33  ;;  %14292 = vmatmul.mubr.msk.f32.vlgmr.msra.gmra.mrb[58].mxu1 %vm742_vm6, %v8093_v39  ;;  %v7457_v42 = vrot.slane %v7433_v33, %v15808_v58  ;;  %v8695_v30 = vsel %vm649_vm0, %v8694_v49, %v8686_v16 }
 0x9af   : > { %14686 = vmatpush3.bf16.msra.mxu1 %v15674_v13  ;;  %14303 = vmatprep.mubr.msk.f32.mxu1 %vm15210_vm5, %v15211_v19 }
 0x9b0   : > { %7313 = vrot.lane.b32.xlu0 %v7306_v15, %s15214_s25  ;;  %14690 = vmatprep.subr.bf16.mxu1 %v15209_v0  ;;  %v8547_v15 = vrot.slane %v8538_v2, 5 }
 0x9b1   : > { %7458 = vrot.lane.b32.xlu1 %v7445_v27, %s15214_s25 }
 0x9b2   : > { %v8548_v33 = vsel %vm655_vm3, %v8547_v15, %v8546_v22 }
 0x9b4   : > { %7460 = vrot.lane.b32.xlu0 %v7449_v34, %s15214_s25  ;;  %v9000_v34 = vrot.slane %v8991_v23, 5 }
 0x9b5   : > { %7462 = vrot.lane.b32.xlu1 %v7453_v40, %s15214_s25 }
 0x9b8   : > { %7464 = vrot.lane.b32.xlu0 %v7457_v42, %s15214_s25  ;;  %v8999_v42 = vsel %vm652_vm2, %v8998_v24, %v8997_v25 }
 0x9b9   : > { %v9001_v5 = vsel %vm655_vm3, %v9000_v34, %v8999_v42 }
 0xa12   : > { %v7157_v43 = vpop.permute.xlu1 %7156 }
 0xa13   : > { %13336 = vst.msk [vmem:[%s15819_s15 + $0x91] sm:$0x1] %vm924_vm7, %v7157_v43 }
 0xa16   : > { %v7159_v44 = vpop.permute.xlu0 %7158 }
 0xa17   : > { %13337 = vst.msk [vmem:[%s15819_s15 + $0xb1] sm:$0x1] %vm924_vm7, %v7159_v44  ;;  %v7308_v45 = vpop.permute.xlu1 %7307 }
 0xa18   : > { %13345 = vst.msk [vmem:[%s15819_s15 + $0x111] sm:$0x1] %vm924_vm7, %v7308_v45  ;;  %v8697_v45 = vsel %vm652_vm2, %v8696_v26, %v8695_v30 }
 0xa1a   : > { %v7310_v46 = vpop.permute.xlu0 %7309 }
 0xa1b   : > { %13346 = vst.msk [vmem:[%s15819_s15 + $0x131] sm:$0x1] %vm924_vm7, %v7310_v46  ;;  %v7161_v47 = vpop.permute.xlu1 %7160  ;;  %v8698_v46 = vrot.slane %v8689_v29, 5 }
 0xa1c   : > { %13338 = vst.msk [vmem:[%s15819_s15 + $0xd1] sm:$0x1] %vm924_vm7, %v7161_v47 }
 0xa1d   : > { %v8699_v49 = vsel %vm655_vm3, %v8698_v46, %v8697_v45 }
 0xa1e   : > { %v7163_v7 = vpop.permute.xlu0 %7162 }
 0xa1f   : > { %13339 = vst.msk [vmem:[%s15819_s15 + $0xf1] sm:$0x1] %vm924_vm7, %v7163_v7  ;;  %v7312_v50 = vpop.permute.xlu1 %7311 }
 0xa20   : > { %13347 = vst.msk [vmem:[%s15819_s15 + $0x151] sm:$0x1] %vm924_vm7, %v7312_v50 }
 0xa22   : > { %v7314_v52 = vpop.permute.xlu0 %7313 }
 0xa23   : > { %13348 = vst.msk [vmem:[%s15819_s15 + $0x171] sm:$0x1] %vm924_vm7, %v7314_v52  ;;  %v7459_v53 = vpop.permute.xlu1 %7458 }
 0xa24   : > { %13354 = vst.msk [vmem:[%s15819_s15 + $0x191] sm:$0x1] %vm924_vm7, %v7459_v53 }
 0xa26   : > { %v7461_v55 = vpop.permute.xlu0 %7460 }
 0xa27   : > { %13355 = vst.msk [vmem:[%s15819_s15 + $0x1b1] sm:$0x1] %vm924_vm7, %v7461_v55  ;;  %v7463_v59 = vpop.permute.xlu1 %7462 }
 0xa28   : > { %13356 = vst.msk [vmem:[%s15819_s15 + $0x1d1] sm:$0x1] %vm924_vm7, %v7463_v59 }
 0xa2a   : > { %v7465_v1 = vpop.permute.xlu0 %7464 }
 0xa2b   : > { %13357 = vst.msk [vmem:[%s15819_s15 + $0x1f1] sm:$0x1] %vm924_vm7, %v7465_v1 }
 0xa72   : > { %v7634_v4 = vpop.f32.mrb[54].mxu1 }
 0xa73   : > { %v14265_v9 = vpop.f32.mrb[55].mxu1 }
 0xa74   : > { %v7707_v14 = vpop.f32.mrb[56].mxu0 }
 0xa75   : > { %v7708_v20 = vadd.f32 %v7707_v14, %v7634_v4  ;;  %v14272_v21 = vpop.f32.mrb[57].mxu0 }
 0xa77   : > { %v7711_v27 = vadd.f32 %v7708_v20, %v15794_v35 }
 0xa78   : > { %v7860_v28 = vpop.f32.mrb[56].mxu1 }
 0xa79   : > { %v7871_v31 = vrot.slane %v7860_v28, %v15798_v41  ;;  %v8011_v32 = vpop.f32.mrb[58].mxu0  ;;  %v14279_v36 = vpop.f32.mrb[57].mxu1  ;;  %v7719_v37 = vrot.slane %v7711_v27, %v15798_v41  ;;  %v7745_v38 = vcombine.high %v7711_v27, %v7711_v27 }
 0xa7a   : > { %v8022_v39 = vrot.slane %v8011_v32, %v15798_v41  ;;  %v14286_v40 = vpop.f32.mrb[59].mxu0  ;;  %v8838_v32 = vld [vmem:[%s15648_s1 + $0x1a] sm:$0x1] }
 0xa7b   : > { %v7872_v43 = vcombine.high %v7871_v31, %v7871_v31  ;;  %v7879_v44 = vrot.slane %v7871_v31, %v15798_v41  ;;  %v7720_v47 = vcombine.high %v7719_v37, %v7719_v37  ;;  %v7727_v7 = vrot.slane %v7719_v37, %v15798_v41  ;;  %v8837_v37 = vld [vmem:[%s15648_s1 + $0xa] sm:$0x1] }
 0xa7c   : > { %v7752_v50 = vrot.slane %v7745_v38, %v15798_v41  ;;  %v8023_v52 = vcombine.high %v8022_v39, %v8022_v39  ;;  %v8030_v56 = vrot.slane %v8022_v39, %v15798_v41  ;;  %v8845_v34 = vrot.slane %v8838_v32, 7  ;;  %v8840_v38 = vld [vmem:[%s15648_s1 + $0x3a] sm:$0x1] }
 0xa7d   : > { %v7886_v53 = vrot.slane %v7872_v43, %v15798_v41  ;;  %v7887_v54 = vcombine.high %v7879_v44, %v7879_v44  ;;  %13364 = vst.msk [vmem:[%s15819_s15 + $0x92] sm:$0x1] %vm924_vm7, %v7879_v44  ;;  %v7900_v55 = vrot.slane %v7879_v44, %v15808_v58  ;;  %v14298_v57 = vpop.f32.mrb[60].mxu0  ;;  %v7734_v59 = vrot.slane %v7720_v47, %v15798_v41 }
 0xa7e   : > { %v7735_v60 = vcombine.high %v7727_v7, %v7727_v7  ;;  %7741 = vst.msk [vmem:[%s15819_s15 + $0x12] sm:$0x1] %vm924_vm7, %v7727_v7  ;;  %v7753_v61 = vcombine.high %v7752_v50, %v7752_v50  ;;  %v7760_v17 = vrot.slane %v7752_v50, %v15798_v41  ;;  %v8313_v1 = vpop.f32.mrb[61].mxu0  ;;  %14304 = vmatmul.mubr.msk.f32.vlgmr.msra.gmra.mrb[60].mxu1 %vm742_vm6, %v14298_v57  ;;  %13373 = vst.msk [vmem:[%s15819_s15 + $0x112] sm:$0x1] %vm924_vm7, %v8030_v56 }
 0xa7f   : > { %v7888_v2 = vcombine.high %v7886_v53, %v7886_v53  ;;  %13365 = vst.msk [vmem:[%s15819_s15 + $0xb2] sm:$0x1] %vm924_vm7, %v7886_v53  ;;  %13366 = vst.msk [vmem:[%s15819_s15 + $0xd2] sm:$0x1] %vm924_vm7, %v7887_v54  ;;  %v8037_v3 = vrot.slane %v8023_v52, %v15798_v41  ;;  %v8038_v4 = vcombine.high %v8030_v56, %v8030_v56  ;;  %7913 = vrot.lane.b32.xlu1 %v7900_v55, %s15214_s25 }
 0xa80   : > { %v7736_v6 = vcombine.high %v7734_v59, %v7734_v59  ;;  %7742 = vst.msk [vmem:[%s15819_s15 + $0x32] sm:$0x1] %vm924_vm7, %v7734_v59  ;;  %7743 = vst.msk [vmem:[%s15819_s15 + $0x52] sm:$0x1] %vm924_vm7, %v7735_v60  ;;  %v7767_v8 = vrot.slane %v7753_v61, %v15798_v41  ;;  %v7768_v9 = vcombine.high %v7760_v17, %v7760_v17  ;;  %14311 = vmatmul.mubr.msk.f32.vlgmr.msra.gmra.mrb[62].mxu0 %vm742_vm6, %v8313_v1  ;;  %v9293_v60 = vld [vmem:[%s15640_s26 + $0x1b] sm:$0x1] }
 0xa81   : > { %7774 = vst.msk [vmem:[%s15819_s15 + $0x13] sm:$0x1] %vm924_vm7, %v7760_v17  ;;  %14692 = vmatpush3.bf16.msra.mxu1 %v15728_v48  ;;  %13367 = vst.msk [vmem:[%s15819_s15 + $0xf2] sm:$0x1] %vm924_vm7, %v7888_v2  ;;  %v8039_v10 = vcombine.high %v8037_v3, %v8037_v3  ;;  %14695 = vmatpush3.bf16.msra.mxu0 %v15731_v51  ;;  %v7904_v11 = vrot.slane %v7886_v53, %v15808_v58  ;;  %v8162_v24 = vpop.f32.mrb[58].mxu1  ;;  %v8849_v43 = vrot.slane %v8840_v38, 5 }
 0xa82   : > { %13374 = vst.msk [vmem:[%s15819_s15 + $0x132] sm:$0x1] %vm924_vm7, %v8037_v3  ;;  %13375 = vst.msk [vmem:[%s15819_s15 + $0x152] sm:$0x1] %vm924_vm7, %v8038_v4  ;;  %14317 = vmatprep.mubr.msk.f32.mxu1 %vm15210_vm5, %v15211_v19  ;;  %v7769_v14 = vcombine.high %v7767_v8, %v7767_v8  ;;  %v8051_v15 = vrot.slane %v8030_v56, %v15808_v58  ;;  %14324 = vmatprep.mubr.msk.f32.mxu0 %vm15210_vm5, %v15211_v19  ;;  %v14293_v26 = vpop.f32.mrb[59].mxu1  ;;  %v9300_v1 = vrot.slane %v9293_v60, 7 }
 0xa83   : > { %7744 = vst.msk [vmem:[%s15819_s15 + $0x72] sm:$0x1] %vm924_vm7, %v7736_v6  ;;  %7775 = vst.msk [vmem:[%s15819_s15 + $0x33] sm:$0x1] %vm924_vm7, %v7767_v8  ;;  %14334 = vmatprep.subr.msk.mxu0 %vm664_vm4, %v9001_v5  ;;  %7915 = vrot.lane.b32.xlu0 %v7904_v11, %s15214_s25  ;;  %v7908_v16 = vrot.slane %v7887_v54, %v15808_v58  ;;  %v8055_v20 = vrot.slane %v8037_v3, %v15808_v58  ;;  %v9294_v17 = vld [vmem:[%s15640_s26 + $0x2b] sm:$0x1] }
 0xa84   : > { %7776 = vst.msk [vmem:[%s15819_s15 + $0x53] sm:$0x1] %vm924_vm7, %v7768_v9  ;;  %13376 = vst.msk [vmem:[%s15819_s15 + $0x172] sm:$0x1] %vm924_vm7, %v8039_v10  ;;  %14318 = vmatmul.mubr.msk.f32.vlgmr.msra.gmra.mrb[62].mxu1 %vm742_vm6, %v8548_v33  ;;  %8064 = vrot.lane.b32.xlu1 %v8051_v15, %s15214_s25  ;;  %v7912_v21 = vrot.slane %v7888_v2, %v15808_v58  ;;  %v8059_v22 = vrot.slane %v8038_v4, %v15808_v58  ;;  %v8839_v33 = vld [vmem:[%s15648_s1 + $0x2a] sm:$0x1] }
 0xa85   : > { %7777 = vst.msk [vmem:[%s15819_s15 + $0x73] sm:$0x1] %vm924_vm7, %v7769_v14  ;;  %14325 = vmatmul.mubr.msk.f32.vlgmr.msra.gmra.mrb[64].mxu0 %vm742_vm6, %v8699_v49  ;;  %14696 = vmatprep.subr.bf16.mxu1 %v15209_v0  ;;  %v8063_v23 = vrot.slane %v8039_v10, %v15808_v58  ;;  %v8173_v25 = vrot.slane %v8162_v24, %v15798_v41  ;;  %v8847_v39 = vrot.slane %v8839_v33, 6  ;;  %v9292_v3 = vld [vmem:[%s15640_s26 + $0xb] sm:$0x1]  ;;  %v9302_v9 = vrot.slane %v9294_v17, 6 }
 0xa86   : > { %14335 = vmatpush3.msk.msra.mxu0 %vm664_vm4, %v9001_v5  ;;  %14336 = vmatprep.mubr.msk.f32.mxu0 %vm657_vm1, %v17206_v63  ;;  %v8846_v42 = vsel %vm649_vm0, %v8845_v34, %v8837_v37  ;;  %v9746_v4 = vld [vmem:[%s15633_s10 + $0x1c] sm:$0x1]  ;;  %v9444_v5 = vld [vmem:[%s15646_s21 + $0x1b] sm:$0x1]  ;;  %v9301_v11 = vsel %vm649_vm0, %v9300_v1, %v9292_v3  ;;  %v9747_v49 = vld [vmem:[%s15633_s10 + $0x2c] sm:$0x1] }
 0xa87   : > { %14331 = vmatprep.mubr.msk.f32.mxu1 %vm15210_vm5, %v15211_v19  ;;  %8066 = vrot.lane.b32.xlu0 %v8055_v20, %s15214_s25  ;;  %v8174_v27 = vcombine.high %v8173_v25, %v8173_v25  ;;  %v8181_v28 = vrot.slane %v8173_v25, %v15798_v41  ;;  %v8848_v44 = vsel %vm652_vm2, %v8847_v39, %v8846_v42  ;;  %v9295_v8 = vld [vmem:[%s15640_s26 + $0x3b] sm:$0x1]  ;;  %v9753_v14 = vrot.slane %v9746_v4, 7  ;;  %v9445_v20 = vld [vmem:[%s15646_s21 + $0x2b] sm:$0x1] }
 0xa88   : > { %14698 = vmatpush3.bf16.msra.mxu1 %v15768_v62  ;;  %7917 = vrot.lane.b32.xlu1 %v7908_v16, %s15214_s25  ;;  %v8850_v45 = vsel %vm655_vm3, %v8849_v43, %v8848_v44  ;;  %v9745_v16 = vld [vmem:[%s15633_s10 + $0xc] sm:$0x1]  ;;  %v9443_v24 = vld [vmem:[%s15646_s21 + $0xb] sm:$0x1]  ;;  %v9446_v34 = vld [vmem:[%s15646_s21 + $0x3b] sm:$0x1] }
 0xa89   : > { %14337 = vmatmul.mubr.msk.f32.vlgmr.msra.gmra.mrb[66].mxu0 %vm657_vm1, %v17220_v12  ;;  %14699 = vmatprep.subr.bf16.mxu1 %v15209_v0  ;;  %v8188_v29 = vrot.slane %v8174_v27, %v15798_v41  ;;  %v8189_v30 = vcombine.high %v8181_v28, %v8181_v28  ;;  %13382 = vst.msk [vmem:[%s15819_s15 + $0x192] sm:$0x1] %vm924_vm7, %v8181_v28 }
 0xa8a   : > { %14702 = vmatprep.subr.bf16.mxu0 %v15209_v0  ;;  %14350 = vmatprep.mubr.msk.f32.mxu0 %vm15210_vm5, %v15211_v19  ;;  %v8202_v31 = vrot.slane %v8181_v28, %v15808_v58  ;;  %v9303_v27 = vsel %vm652_vm2, %v9302_v9, %v9301_v11  ;;  %v9748_v28 = vld [vmem:[%s15633_s10 + $0x3c] sm:$0x1] }
 0xa8b   : > { %14704 = vmatpush3.bf16.msra.mxu0 %v15684_v18  ;;  %7919 = vrot.lane.b32.xlu0 %v7912_v21, %s15214_s25  ;;  %v8190_v36 = vcombine.high %v8188_v29, %v8188_v29  ;;  %13383 = vst.msk [vmem:[%s15819_s15 + $0x1b2] sm:$0x1] %vm924_vm7, %v8188_v29  ;;  %13384 = vst.msk [vmem:[%s15819_s15 + $0x1d2] sm:$0x1] %vm924_vm7, %v8189_v30  ;;  %v8206_v40 = vrot.slane %v8188_v29, %v15808_v58  ;;  %v9451_v21 = vrot.slane %v9444_v5, 7 }
 0xa8c   : > { %14708 = vmatprep.subr.bf16.mxu0 %v15209_v0  ;;  %8068 = vrot.lane.b32.xlu1 %v8059_v22, %s15214_s25  ;;  %v8210_v46 = vrot.slane %v8189_v30, %v15808_v58  ;;  %v9755_v29 = vrot.slane %v9747_v49, 6  ;;  %v9754_v30 = vsel %vm649_vm0, %v9753_v14, %v9745_v16 }
 0xa8d   : > { %13385 = vst.msk [vmem:[%s15819_s15 + $0x1f2] sm:$0x1] %vm924_vm7, %v8190_v36  ;;  %14332 = vmatmul.mubr.msk.f32.vlgmr.msra.gmra.mrb[64].mxu1 %vm742_vm6, %v8850_v45  ;;  %v8214_v47 = vrot.slane %v8190_v36, %v15808_v58  ;;  %v9452_v36 = vsel %vm649_vm0, %v9451_v21, %v9443_v24 }
 0xa8e   : > { %14701 = vmatpush3.bf16.msra.mxu1 %v15674_v13  ;;  %14343 = vmatprep.mubr.msk.f32.mxu1 %vm15210_vm5, %v15211_v19 }
 0xa8f   : > { %8070 = vrot.lane.b32.xlu0 %v8063_v23, %s15214_s25  ;;  %14705 = vmatprep.subr.bf16.mxu1 %v15209_v0  ;;  %v9304_v23 = vrot.slane %v9295_v8, 5 }
 0xa90   : > { %8215 = vrot.lane.b32.xlu1 %v8202_v31, %s15214_s25  ;;  %v9453_v31 = vrot.slane %v9445_v20, 6 }
 0xa91   : > { %v9305_v39 = vsel %vm655_vm3, %v9304_v23, %v9303_v27 }
 0xa93   : > { %8217 = vrot.lane.b32.xlu0 %v8206_v40, %s15214_s25  ;;  %v9757_v40 = vrot.slane %v9748_v28, 5 }
 0xa94   : > { %8219 = vrot.lane.b32.xlu1 %v8210_v46, %s15214_s25 }
 0xa97   : > { %8221 = vrot.lane.b32.xlu0 %v8214_v47, %s15214_s25  ;;  %v9756_v47 = vsel %vm652_vm2, %v9755_v29, %v9754_v30 }
 0xa98   : > { %v9758_v11 = vsel %vm655_vm3, %v9757_v40, %v9756_v47  ;;  %v9594_v40 = vld [vmem:[%s15648_s1 + $0xb] sm:$0x1] }
 0xaf1   : > { %v7914_v7 = vpop.permute.xlu1 %7913 }
 0xaf2   : > { %13368 = vst.msk [vmem:[%s15819_s15 + $0x93] sm:$0x1] %vm924_vm7, %v7914_v7 }
 0xaf5   : > { %v7916_v50 = vpop.permute.xlu0 %7915 }
 0xaf6   : > { %13369 = vst.msk [vmem:[%s15819_s15 + $0xb3] sm:$0x1] %vm924_vm7, %v7916_v50  ;;  %v8065_v52 = vpop.permute.xlu1 %8064 }
 0xaf7   : > { %13377 = vst.msk [vmem:[%s15819_s15 + $0x113] sm:$0x1] %vm924_vm7, %v8065_v52  ;;  %v9454_v52 = vsel %vm652_vm2, %v9453_v31, %v9452_v36  ;;  %v9595_v36 = vld [vmem:[%s15648_s1 + $0x1b] sm:$0x1] }
 0xaf9   : > { %v8067_v53 = vpop.permute.xlu0 %8066 }
 0xafa   : > { %13378 = vst.msk [vmem:[%s15819_s15 + $0x133] sm:$0x1] %vm924_vm7, %v8067_v53  ;;  %v7918_v54 = vpop.permute.xlu1 %7917  ;;  %v9455_v53 = vrot.slane %v9446_v34, 5 }
 0xafb   : > { %13370 = vst.msk [vmem:[%s15819_s15 + $0xd3] sm:$0x1] %vm924_vm7, %v7918_v54 }
 0xafc   : > { %v9456_v21 = vsel %vm655_vm3, %v9455_v53, %v9454_v52 }
 0xafd   : > { %v7920_v55 = vpop.permute.xlu0 %7919 }
 0xafe   : > { %13371 = vst.msk [vmem:[%s15819_s15 + $0xf3] sm:$0x1] %vm924_vm7, %v7920_v55  ;;  %v8069_v56 = vpop.permute.xlu1 %8068 }
 0xaff   : > { %13379 = vst.msk [vmem:[%s15819_s15 + $0x153] sm:$0x1] %vm924_vm7, %v8069_v56 }
 0xb01   : > { %v8071_v57 = vpop.permute.xlu0 %8070 }
 0xb02   : > { %13380 = vst.msk [vmem:[%s15819_s15 + $0x173] sm:$0x1] %vm924_vm7, %v8071_v57  ;;  %v8216_v59 = vpop.permute.xlu1 %8215 }
 0xb03   : > { %13386 = vst.msk [vmem:[%s15819_s15 + $0x193] sm:$0x1] %vm924_vm7, %v8216_v59 }
 0xb05   : > { %v8218_v61 = vpop.permute.xlu0 %8217 }
 0xb06   : > { %13387 = vst.msk [vmem:[%s15819_s15 + $0x1b3] sm:$0x1] %vm924_vm7, %v8218_v61  ;;  %v8220_v2 = vpop.permute.xlu1 %8219 }
 0xb07   : > { %13388 = vst.msk [vmem:[%s15819_s15 + $0x1d3] sm:$0x1] %vm924_vm7, %v8220_v2 }
 0xb09   : > { %v8222_v6 = vpop.permute.xlu0 %8221 }
 0xb0a   : > { %13389 = vst.msk [vmem:[%s15819_s15 + $0x1f3] sm:$0x1] %vm924_vm7, %v8222_v6 }
 0xb51   : > { %v8391_v10 = vpop.f32.mrb[60].mxu1 }
 0xb52   : > { %v14305_v15 = vpop.f32.mrb[61].mxu1 }
 0xb53   : > { %v8464_v22 = vpop.f32.mrb[62].mxu0 }
 0xb54   : > { %v8465_v25 = vadd.f32 %v8464_v22, %v8391_v10  ;;  %v14312_v26 = vpop.f32.mrb[63].mxu0 }
 0xb56   : > { %v8468_v32 = vadd.f32 %v8465_v25, %v15794_v35 }
 0xb57   : > { %v8617_v33 = vpop.f32.mrb[62].mxu1 }
 0xb58   : > { %v8628_v37 = vrot.slane %v8617_v33, %v15798_v41  ;;  %v8768_v38 = vpop.f32.mrb[64].mxu0  ;;  %v14319_v42 = vpop.f32.mrb[63].mxu1  ;;  %v8476_v43 = vrot.slane %v8468_v32, %v15798_v41  ;;  %v8502_v44 = vcombine.high %v8468_v32, %v8468_v32 }
 0xb59   : > { %v8779_v45 = vrot.slane %v8768_v38, %v15798_v41  ;;  %v14326_v46 = vpop.f32.mrb[65].mxu0  ;;  %v9602_v38 = vrot.slane %v9595_v36, 7  ;;  %v9597_v42 = vld [vmem:[%s15648_s1 + $0x3b] sm:$0x1]  ;;  %v10203_v36 = vld [vmem:[%s15646_s21 + $0x3c] sm:$0x1] }
 0xb5a   : > { %v8629_v7 = vcombine.high %v8628_v37, %v8628_v37  ;;  %v8636_v50 = vrot.slane %v8628_v37, %v15798_v41  ;;  %v8477_v54 = vcombine.high %v8476_v43, %v8476_v43  ;;  %v8484_v55 = vrot.slane %v8476_v43, %v15798_v41  ;;  %v9596_v37 = vld [vmem:[%s15648_s1 + $0x2b] sm:$0x1] }
 0xb5b   : > { %v8509_v56 = vrot.slane %v8502_v44, %v15798_v41  ;;  %v8780_v57 = vcombine.high %v8779_v45, %v8779_v45  ;;  %v8787_v17 = vrot.slane %v8779_v45, %v15798_v41  ;;  %v9604_v43 = vrot.slane %v9596_v37, 6 }
 0xb5c   : > { %v8643_v59 = vrot.slane %v8629_v7, %v15798_v41  ;;  %v8644_v60 = vcombine.high %v8636_v50, %v8636_v50  ;;  %13396 = vst.msk [vmem:[%s15819_s15 + $0x94] sm:$0x1] %vm924_vm7, %v8636_v50  ;;  %v8657_v61 = vrot.slane %v8636_v50, %v15808_v58  ;;  %v14338_v1 = vpop.f32.mrb[66].mxu0  ;;  %v8491_v2 = vrot.slane %v8477_v54, %v15798_v41 }
 0xb5d   : > { %v8492_v3 = vcombine.high %v8484_v55, %v8484_v55  ;;  %8498 = vst.msk [vmem:[%s15819_s15 + $0x14] sm:$0x1] %vm924_vm7, %v8484_v55  ;;  %v8510_v4 = vcombine.high %v8509_v56, %v8509_v56  ;;  %v8517_v5 = vrot.slane %v8509_v56, %v15798_v41  ;;  %v9070_v6 = vpop.f32.mrb[67].mxu0  ;;  %14344 = vmatmul.mubr.msk.f32.vlgmr.msra.gmra.mrb[66].mxu1 %vm742_vm6, %v14338_v1  ;;  %13405 = vst.msk [vmem:[%s15819_s15 + $0x114] sm:$0x1] %vm924_vm7, %v8787_v17 }
 0xb5e   : > { %v8645_v8 = vcombine.high %v8643_v59, %v8643_v59  ;;  %13397 = vst.msk [vmem:[%s15819_s15 + $0xb4] sm:$0x1] %vm924_vm7, %v8643_v59  ;;  %13398 = vst.msk [vmem:[%s15819_s15 + $0xd4] sm:$0x1] %vm924_vm7, %v8644_v60  ;;  %v8794_v9 = vrot.slane %v8780_v57, %v15798_v41  ;;  %v8795_v10 = vcombine.high %v8787_v17, %v8787_v17  ;;  %8670 = vrot.lane.b32.xlu1 %v8657_v61, %s15214_s25  ;;  %v10050_v1 = vld [vmem:[%s15640_s26 + $0x1c] sm:$0x1] }
 0xb5f   : > { %v8493_v49 = vcombine.high %v8491_v2, %v8491_v2  ;;  %8499 = vst.msk [vmem:[%s15819_s15 + $0x34] sm:$0x1] %vm924_vm7, %v8491_v2  ;;  %8500 = vst.msk [vmem:[%s15819_s15 + $0x54] sm:$0x1] %vm924_vm7, %v8492_v3  ;;  %v8524_v14 = vrot.slane %v8510_v4, %v15798_v41  ;;  %v8525_v15 = vcombine.high %v8517_v5, %v8517_v5  ;;  %14351 = vmatmul.mubr.msk.f32.vlgmr.msra.gmra.mrb[68].mxu0 %vm742_vm6, %v9070_v6  ;;  %v10051_v3 = vld [vmem:[%s15640_s26 + $0x2c] sm:$0x1] }
 0xb60   : > { %8531 = vst.msk [vmem:[%s15819_s15 + $0x15] sm:$0x1] %vm924_vm7, %v8517_v5  ;;  %14707 = vmatpush3.bf16.msra.mxu1 %v15728_v48  ;;  %13399 = vst.msk [vmem:[%s15819_s15 + $0xf4] sm:$0x1] %vm924_vm7, %v8645_v8  ;;  %v8796_v16 = vcombine.high %v8794_v9, %v8794_v9  ;;  %14710 = vmatpush3.bf16.msra.mxu0 %v15731_v51  ;;  %v8661_v20 = vrot.slane %v8643_v59, %v15808_v58  ;;  %v8919_v27 = vpop.f32.mrb[64].mxu1  ;;  %v9606_v46 = vrot.slane %v9597_v42, 5 }
 0xb61   : > { %13406 = vst.msk [vmem:[%s15819_s15 + $0x134] sm:$0x1] %vm924_vm7, %v8794_v9  ;;  %13407 = vst.msk [vmem:[%s15819_s15 + $0x154] sm:$0x1] %vm924_vm7, %v8795_v10  ;;  %14357 = vmatprep.mubr.msk.f32.mxu1 %vm15210_vm5, %v15211_v19  ;;  %v8526_v22 = vcombine.high %v8524_v14, %v8524_v14  ;;  %v8808_v23 = vrot.slane %v8787_v17, %v15808_v58  ;;  %14364 = vmatprep.mubr.msk.f32.mxu0 %vm15210_vm5, %v15211_v19  ;;  %v14333_v29 = vpop.f32.mrb[65].mxu1  ;;  %v10057_v4 = vrot.slane %v10050_v1, 7 }
 0xb62   : > { %8501 = vst.msk [vmem:[%s15819_s15 + $0x74] sm:$0x1] %vm924_vm7, %v8493_v49  ;;  %8532 = vst.msk [vmem:[%s15819_s15 + $0x35] sm:$0x1] %vm924_vm7, %v8524_v14  ;;  %14374 = vmatprep.subr.msk.mxu0 %vm664_vm4, %v9758_v11  ;;  %8672 = vrot.lane.b32.xlu0 %v8661_v20, %s15214_s25  ;;  %v8665_v24 = vrot.slane %v8644_v60, %v15808_v58  ;;  %v8812_v25 = vrot.slane %v8794_v9, %v15808_v58  ;;  %v10049_v6 = vld [vmem:[%s15640_s26 + $0xc] sm:$0x1] }
 0xb63   : > { %8533 = vst.msk [vmem:[%s15819_s15 + $0x55] sm:$0x1] %vm924_vm7, %v8525_v15  ;;  %13408 = vst.msk [vmem:[%s15819_s15 + $0x174] sm:$0x1] %vm924_vm7, %v8796_v16  ;;  %14358 = vmatmul.mubr.msk.f32.vlgmr.msra.gmra.mrb[68].mxu1 %vm742_vm6, %v9305_v39  ;;  %8821 = vrot.lane.b32.xlu1 %v8808_v23, %s15214_s25  ;;  %v8669_v26 = vrot.slane %v8645_v8, %v15808_v58  ;;  %v8930_v28 = vrot.slane %v8919_v27, %v15798_v41  ;;  %v10503_v8 = vld [vmem:[%s15633_s10 + $0x1d] sm:$0x1] }
 0xb64   : > { %8534 = vst.msk [vmem:[%s15819_s15 + $0x75] sm:$0x1] %vm924_vm7, %v8526_v22  ;;  %14365 = vmatmul.mubr.msk.f32.vlgmr.msra.gmra.mrb[70].mxu0 %vm742_vm6, %v9456_v21  ;;  %14711 = vmatprep.subr.bf16.mxu1 %v15209_v0  ;;  %v9603_v45 = vsel %vm649_vm0, %v9602_v38, %v9594_v40  ;;  %v10201_v9 = vld [vmem:[%s15646_s21 + $0x1c] sm:$0x1]  ;;  %v10059_v49 = vrot.slane %v10051_v3, 6  ;;  %v10058_v15 = vsel %vm649_vm0, %v10057_v4, %v10049_v6  ;;  %v10510_v20 = vrot.slane %v10503_v8, 7 }
 0xb65   : > { %14375 = vmatpush3.msk.msra.mxu0 %vm664_vm4, %v9758_v11  ;;  %14376 = vmatprep.mubr.msk.f32.mxu0 %vm657_vm1, %v17206_v63  ;;  %v8816_v63 = vrot.slane %v8795_v10, %v15808_v58  ;;  %v8931_v30 = vcombine.high %v8930_v28, %v8930_v28  ;;  %v8938_v31 = vrot.slane %v8930_v28, %v15798_v41  ;;  %v10052_v11 = vld [vmem:[%s15640_s26 + $0x3c] sm:$0x1]  ;;  %v10502_v22 = vld [vmem:[%s15633_s10 + $0xd] sm:$0x1]  ;;  %v10202_v23 = vld [vmem:[%s15646_s21 + $0x2c] sm:$0x1] }
 0xb66   : > { %14371 = vmatprep.mubr.msk.f32.mxu1 %vm15210_vm5, %v15211_v19  ;;  %8823 = vrot.lane.b32.xlu0 %v8812_v25, %s15214_s25  ;;  %v9605_v47 = vsel %vm652_vm2, %v9604_v43, %v9603_v45  ;;  %v10060_v28 = vsel %vm652_vm2, %v10059_v49, %v10058_v15  ;;  %v10505_v29 = vld [vmem:[%s15633_s10 + $0x3d] sm:$0x1] }
 0xb67   : > { %14713 = vmatpush3.bf16.msra.mxu1 %v15768_v62  ;;  %8674 = vrot.lane.b32.xlu1 %v8665_v24, %s15214_s25  ;;  %v8945_v32 = vrot.slane %v8931_v30, %v15798_v41  ;;  %v8946_v33 = vcombine.high %v8938_v31, %v8938_v31  ;;  %13414 = vst.msk [vmem:[%s15819_s15 + $0x194] sm:$0x1] %vm924_vm7, %v8938_v31  ;;  %v10208_v24 = vrot.slane %v10201_v9, 7  ;;  %v10514_v42 = vrot.slane %v10505_v29, 5 }
 0xb68   : > { %14377 = vmatmul.mubr.msk.f32.vlgmr.msra.gmra.mrb[72].mxu0 %vm657_vm1, %v17220_v12  ;;  %14714 = vmatprep.subr.bf16.mxu1 %v15209_v0  ;;  %v8820_v12 = vrot.slane %v8796_v16, %v15808_v58  ;;  %v8959_v34 = vrot.slane %v8938_v31, %v15808_v58  ;;  %v9607_v7 = vsel %vm655_vm3, %v9606_v46, %v9605_v47  ;;  %v10504_v16 = vld [vmem:[%s15633_s10 + $0x2d] sm:$0x1] }
 0xb69   : > { %14717 = vmatprep.subr.bf16.mxu0 %v15209_v0  ;;  %14390 = vmatprep.mubr.msk.f32.mxu0 %vm15210_vm5, %v15211_v19  ;;  %v8947_v39 = vcombine.high %v8945_v32, %v8945_v32  ;;  %13415 = vst.msk [vmem:[%s15819_s15 + $0x1b4] sm:$0x1] %vm924_vm7, %v8945_v32  ;;  %13416 = vst.msk [vmem:[%s15819_s15 + $0x1d4] sm:$0x1] %vm924_vm7, %v8946_v33  ;;  %v8963_v44 = vrot.slane %v8945_v32, %v15808_v58  ;;  %v10512_v30 = vrot.slane %v10504_v16, 6 }
 0xb6a   : > { %14719 = vmatpush3.bf16.msra.mxu0 %v15684_v18  ;;  %8676 = vrot.lane.b32.xlu0 %v8669_v26, %s15214_s25  ;;  %v8967_v50 = vrot.slane %v8946_v33, %v15808_v58  ;;  %v10061_v26 = vrot.slane %v10052_v11, 5  ;;  %v10511_v31 = vsel %vm649_vm0, %v10510_v20, %v10502_v22  ;;  %v10210_v32 = vrot.slane %v10202_v23, 6 }
 0xb6b   : > { %14723 = vmatprep.subr.bf16.mxu0 %v15209_v0  ;;  %8825 = vrot.lane.b32.xlu1 %v8816_v63, %s15214_s25  ;;  %13417 = vst.msk [vmem:[%s15819_s15 + $0x1f4] sm:$0x1] %vm924_vm7, %v8947_v39  ;;  %v8971_v52 = vrot.slane %v8947_v39, %v15808_v58  ;;  %v10200_v63 = vld [vmem:[%s15646_s21 + $0xc] sm:$0x1] }
 0xb6c   : > { %14372 = vmatmul.mubr.msk.f32.vlgmr.msra.gmra.mrb[70].mxu1 %vm742_vm6, %v9607_v7  ;;  %v10209_v37 = vsel %vm649_vm0, %v10208_v24, %v10200_v63  ;;  %v10062_v40 = vsel %vm655_vm3, %v10061_v26, %v10060_v28  ;;  %v10513_v7 = vsel %vm652_vm2, %v10512_v30, %v10511_v31  ;;  %v17705_v63 = vld [vmem:[%s18545_s19] sm:$0xff] }
 0xb6d   : > { %14716 = vmatpush3.bf16.msra.mxu1 %v15674_v13  ;;  %14383 = vmatprep.mubr.msk.f32.mxu1 %vm15210_vm5, %v15211_v19  ;;  %v10515_v49 = vsel %vm655_vm3, %v10514_v42, %v10513_v7 }
 0xb6e   : > { %8827 = vrot.lane.b32.xlu0 %v8820_v12, %s15214_s25  ;;  %14720 = vmatprep.subr.bf16.mxu1 %v15209_v0 }
 0xb6f   : > { %8972 = vrot.lane.b32.xlu1 %v8959_v34, %s15214_s25 }
 0xb72   : > { %8974 = vrot.lane.b32.xlu0 %v8963_v44, %s15214_s25 }
 0xb73   : > { %8976 = vrot.lane.b32.xlu1 %v8967_v50, %s15214_s25 }
 0xb76   : > { %8978 = vrot.lane.b32.xlu0 %v8971_v52, %s15214_s25 }
 0xbd0   : > { %v8671_v53 = vpop.permute.xlu1 %8670 }
 0xbd1   : > { %13400 = vst.msk [vmem:[%s15819_s15 + $0x95] sm:$0x1] %vm924_vm7, %v8671_v53  ;;  %v10211_v53 = vsel %vm652_vm2, %v10210_v32, %v10209_v37 }
 0xbd4   : > { %v8673_v54 = vpop.permute.xlu0 %8672 }
 0xbd5   : > { %13401 = vst.msk [vmem:[%s15819_s15 + $0xb5] sm:$0x1] %vm924_vm7, %v8673_v54  ;;  %v8822_v55 = vpop.permute.xlu1 %8821  ;;  %v10212_v54 = vrot.slane %v10203_v36, 5 }
 0xbd6   : > { %13409 = vst.msk [vmem:[%s15819_s15 + $0x115] sm:$0x1] %vm924_vm7, %v8822_v55 }
 0xbd7   : > { %v10213_v22 = vsel %vm655_vm3, %v10212_v54, %v10211_v53 }
 0xbd8   : > { %v8824_v56 = vpop.permute.xlu0 %8823 }
 0xbd9   : > { %13410 = vst.msk [vmem:[%s15819_s15 + $0x135] sm:$0x1] %vm924_vm7, %v8824_v56  ;;  %v8675_v57 = vpop.permute.xlu1 %8674 }
 0xbda   : > { %13402 = vst.msk [vmem:[%s15819_s15 + $0xd5] sm:$0x1] %vm924_vm7, %v8675_v57 }
 0xbdc   : > { %v8677_v59 = vpop.permute.xlu0 %8676 }
 0xbdd   : > { %13403 = vst.msk [vmem:[%s15819_s15 + $0xf5] sm:$0x1] %vm924_vm7, %v8677_v59  ;;  %v8826_v60 = vpop.permute.xlu1 %8825 }
 0xbde   : > { %13411 = vst.msk [vmem:[%s15819_s15 + $0x155] sm:$0x1] %vm924_vm7, %v8826_v60 }
 0xbe0   : > { %v8828_v61 = vpop.permute.xlu0 %8827 }
 0xbe1   : > { %13412 = vst.msk [vmem:[%s15819_s15 + $0x175] sm:$0x1] %vm924_vm7, %v8828_v61  ;;  %v8973_v17 = vpop.permute.xlu1 %8972 }
 0xbe2   : > { %13418 = vst.msk [vmem:[%s15819_s15 + $0x195] sm:$0x1] %vm924_vm7, %v8973_v17 }
 0xbe4   : > { %v8975_v2 = vpop.permute.xlu0 %8974 }
 0xbe5   : > { %13419 = vst.msk [vmem:[%s15819_s15 + $0x1b5] sm:$0x1] %vm924_vm7, %v8975_v2  ;;  %v8977_v5 = vpop.permute.xlu1 %8976 }
 0xbe6   : > { %13420 = vst.msk [vmem:[%s15819_s15 + $0x1d5] sm:$0x1] %vm924_vm7, %v8977_v5 }
 0xbe8   : > { %v8979_v10 = vpop.permute.xlu0 %8978 }
 0xbe9   : > { %13421 = vst.msk [vmem:[%s15819_s15 + $0x1f5] sm:$0x1] %vm924_vm7, %v8979_v10 }
 0xc30   : > { %v9148_v14 = vpop.f32.mrb[66].mxu1 }
 0xc31   : > { %v14345_v21 = vpop.f32.mrb[67].mxu1 }
 0xc32   : > { %v9221_v25 = vpop.f32.mrb[68].mxu0 }
 0xc33   : > { %v9222_v12 = vadd.f32 %v9221_v25, %v9148_v14  ;;  %v14352_v27 = vpop.f32.mrb[69].mxu0 }
 0xc34   : > { %v17719_v27 = vld [vmem:[%s18545_s19 + $0x8] sm:$0xff] }
 0xc35   : > { %v9225_v33 = vadd.f32 %v9222_v12, %v15794_v35 }
 0xc36   : > { %v9374_v34 = vpop.f32.mrb[68].mxu1 }
 0xc37   : > { %v9385_v38 = vrot.slane %v9374_v34, %v15798_v41  ;;  %v9525_v39 = vpop.f32.mrb[70].mxu0  ;;  %v14359_v43 = vpop.f32.mrb[69].mxu1  ;;  %v9233_v44 = vrot.slane %v9225_v33, %v15798_v41  ;;  %v9259_v45 = vcombine.high %v9225_v33, %v9225_v33 }
 0xc38   : > { %v9536_v46 = vrot.slane %v9525_v39, %v15798_v41  ;;  %v14366_v47 = vpop.f32.mrb[71].mxu0  ;;  %v10352_v39 = vld [vmem:[%s15648_s1 + $0x1c] sm:$0x1] }
 0xc39   : > { %v9386_v50 = vcombine.high %v9385_v38, %v9385_v38  ;;  %v9393_v52 = vrot.slane %v9385_v38, %v15798_v41  ;;  %v9234_v55 = vcombine.high %v9233_v44, %v9233_v44  ;;  %v9241_v56 = vrot.slane %v9233_v44, %v15798_v41  ;;  %v10351_v44 = vld [vmem:[%s15648_s1 + $0xc] sm:$0x1] }
 0xc3a   : > { %v9266_v57 = vrot.slane %v9259_v45, %v15798_v41  ;;  %v9537_v59 = vcombine.high %v9536_v46, %v9536_v46  ;;  %v9544_v1 = vrot.slane %v9536_v46, %v15798_v41  ;;  %v10359_v42 = vrot.slane %v10352_v39, 7  ;;  %v10354_v45 = vld [vmem:[%s15648_s1 + $0x3c] sm:$0x1] }
 0xc3b   : > { %v9400_v60 = vrot.slane %v9386_v50, %v15798_v41  ;;  %v9401_v61 = vcombine.high %v9393_v52, %v9393_v52  ;;  %13428 = vst.msk [vmem:[%s15819_s15 + $0x96] sm:$0x1] %vm924_vm7, %v9393_v52  ;;  %v9414_v17 = vrot.slane %v9393_v52, %v15808_v58  ;;  %v14378_v2 = vpop.f32.mrb[72].mxu0  ;;  %v9248_v3 = vrot.slane %v9234_v55, %v15798_v41 }
 0xc3c   : > { %v9249_v4 = vcombine.high %v9241_v56, %v9241_v56  ;;  %9255 = vst.msk [vmem:[%s15819_s15 + $0x16] sm:$0x1] %vm924_vm7, %v9241_v56  ;;  %v9267_v5 = vcombine.high %v9266_v57, %v9266_v57  ;;  %v9274_v6 = vrot.slane %v9266_v57, %v15798_v41  ;;  %v9827_v8 = vpop.f32.mrb[73].mxu0  ;;  %14384 = vmatmul.mubr.msk.f32.vlgmr.msra.gmra.mrb[72].mxu1 %vm742_vm6, %v14378_v2  ;;  %13437 = vst.msk [vmem:[%s15819_s15 + $0x116] sm:$0x1] %vm924_vm7, %v9544_v1 }
 0xc3d   : > { %v9402_v9 = vcombine.high %v9400_v60, %v9400_v60  ;;  %13429 = vst.msk [vmem:[%s15819_s15 + $0xb6] sm:$0x1] %vm924_vm7, %v9400_v60  ;;  %13430 = vst.msk [vmem:[%s15819_s15 + $0xd6] sm:$0x1] %vm924_vm7, %v9401_v61  ;;  %v9551_v10 = vrot.slane %v9537_v59, %v15798_v41  ;;  %v9552_v11 = vcombine.high %v9544_v1, %v9544_v1  ;;  %9427 = vrot.lane.b32.xlu1 %v9414_v17, %s15214_s25 }
 0xc3e   : > { %v9250_v14 = vcombine.high %v9248_v3, %v9248_v3  ;;  %9256 = vst.msk [vmem:[%s15819_s15 + $0x36] sm:$0x1] %vm924_vm7, %v9248_v3  ;;  %9257 = vst.msk [vmem:[%s15819_s15 + $0x56] sm:$0x1] %vm924_vm7, %v9249_v4  ;;  %v9281_v15 = vrot.slane %v9267_v5, %v15798_v41  ;;  %v9282_v16 = vcombine.high %v9274_v6, %v9274_v6  ;;  %14391 = vmatmul.mubr.msk.f32.vlgmr.msra.gmra.mrb[74].mxu0 %vm742_vm6, %v9827_v8  ;;  %v10807_v4 = vld [vmem:[%s15640_s26 + $0x1d] sm:$0x1] }
 0xc3f   : > { %9288 = vst.msk [vmem:[%s15819_s15 + $0x17] sm:$0x1] %vm924_vm7, %v9274_v6  ;;  %14722 = vmatpush3.bf16.msra.mxu1 %v15728_v48  ;;  %13431 = vst.msk [vmem:[%s15819_s15 + $0xf6] sm:$0x1] %vm924_vm7, %v9402_v9  ;;  %v9553_v20 = vcombine.high %v9551_v10, %v9551_v10  ;;  %14725 = vmatpush3.bf16.msra.mxu0 %v15731_v51  ;;  %v9418_v21 = vrot.slane %v9400_v60, %v15808_v58  ;;  %v9676_v30 = vpop.f32.mrb[70].mxu1  ;;  %v10363_v50 = vrot.slane %v10354_v45, 5 }
 0xc40   : > { %13438 = vst.msk [vmem:[%s15819_s15 + $0x136] sm:$0x1] %vm924_vm7, %v9551_v10  ;;  %13439 = vst.msk [vmem:[%s15819_s15 + $0x156] sm:$0x1] %vm924_vm7, %v9552_v11  ;;  %14397 = vmatprep.mubr.msk.f32.mxu1 %vm15210_vm5, %v15211_v19  ;;  %v9283_v23 = vcombine.high %v9281_v15, %v9281_v15  ;;  %v9565_v24 = vrot.slane %v9544_v1, %v15808_v58  ;;  %14404 = vmatprep.mubr.msk.f32.mxu0 %vm15210_vm5, %v15211_v19  ;;  %v14373_v32 = vpop.f32.mrb[71].mxu1  ;;  %v10814_v8 = vrot.slane %v10807_v4, 7 }
 0xc41   : > { %9258 = vst.msk [vmem:[%s15819_s15 + $0x76] sm:$0x1] %vm924_vm7, %v9250_v14  ;;  %9289 = vst.msk [vmem:[%s15819_s15 + $0x37] sm:$0x1] %vm924_vm7, %v9281_v15  ;;  %14414 = vmatprep.subr.msk.mxu0 %vm664_vm4, %v10515_v49  ;;  %9429 = vrot.lane.b32.xlu0 %v9418_v21, %s15214_s25  ;;  %v9422_v25 = vrot.slane %v9401_v61, %v15808_v58  ;;  %v9569_v26 = vrot.slane %v9551_v10, %v15808_v58  ;;  %v10808_v6 = vld [vmem:[%s15640_s26 + $0x2d] sm:$0x1] }
 0xc42   : > { %9290 = vst.msk [vmem:[%s15819_s15 + $0x57] sm:$0x1] %vm924_vm7, %v9282_v16  ;;  %13440 = vst.msk [vmem:[%s15819_s15 + $0x176] sm:$0x1] %vm924_vm7, %v9553_v20  ;;  %14398 = vmatmul.mubr.msk.f32.vlgmr.msra.gmra.mrb[74].mxu1 %vm742_vm6, %v10062_v40  ;;  %9578 = vrot.lane.b32.xlu1 %v9565_v24, %s15214_s25  ;;  %v9426_v12 = vrot.slane %v9402_v9, %v15808_v58  ;;  %v9573_v28 = vrot.slane %v9552_v11, %v15808_v58  ;;  %v10353_v40 = vld [vmem:[%s15648_s1 + $0x2c] sm:$0x1] }
 0xc43   : > { %9291 = vst.msk [vmem:[%s15819_s15 + $0x77] sm:$0x1] %vm924_vm7, %v9283_v23  ;;  %14405 = vmatmul.mubr.msk.f32.vlgmr.msra.gmra.mrb[76].mxu0 %vm742_vm6, %v10213_v22  ;;  %14726 = vmatprep.subr.bf16.mxu1 %v15209_v0  ;;  %v9577_v29 = vrot.slane %v9553_v20, %v15808_v58  ;;  %v9687_v31 = vrot.slane %v9676_v30, %v15798_v41  ;;  %v10361_v46 = vrot.slane %v10353_v40, 6  ;;  %v10806_v10 = vld [vmem:[%s15640_s26 + $0xd] sm:$0x1]  ;;  %v10816_v16 = vrot.slane %v10808_v6, 6 }
 0xc44   : > { %14415 = vmatpush3.msk.msra.mxu0 %vm664_vm4, %v10515_v49  ;;  %14416 = vmatprep.mubr.msk.f32.mxu0 %vm657_vm1, %v17705_v63  ;;  %v10360_v7 = vsel %vm649_vm0, %v10359_v42, %v10351_v44  ;;  %v11260_v11 = vld [vmem:[%s15633_s10 + $0x1e] sm:$0x1]  ;;  %v10958_v49 = vld [vmem:[%s15646_s21 + $0x1d] sm:$0x1]  ;;  %v10815_v21 = vsel %vm649_vm0, %v10814_v8, %v10806_v10  ;;  %v11261_v22 = vld [vmem:[%s15633_s10 + $0x2e] sm:$0x1] }
 0xc45   : > { %14411 = vmatprep.mubr.msk.f32.mxu1 %vm15210_vm5, %v15211_v19  ;;  %9580 = vrot.lane.b32.xlu0 %v9569_v26, %s15214_s25  ;;  %v9688_v33 = vcombine.high %v9687_v31, %v9687_v31  ;;  %v9695_v34 = vrot.slane %v9687_v31, %v15798_v41  ;;  %v10362_v52 = vsel %vm652_vm2, %v10361_v46, %v10360_v7  ;;  %v10809_v15 = vld [vmem:[%s15640_s26 + $0x3d] sm:$0x1]  ;;  %v11267_v23 = vrot.slane %v11260_v11, 7  ;;  %v10959_v26 = vld [vmem:[%s15646_s21 + $0x2d] sm:$0x1] }
 0xc46   : > { %14728 = vmatpush3.bf16.msra.mxu1 %v15768_v62  ;;  %9431 = vrot.lane.b32.xlu1 %v9422_v25, %s15214_s25  ;;  %v10364_v53 = vsel %vm655_vm3, %v10363_v50, %v10362_v52  ;;  %v11259_v25 = vld [vmem:[%s15633_s10 + $0xe] sm:$0x1]  ;;  %v10957_v30 = vld [vmem:[%s15646_s21 + $0xd] sm:$0x1]  ;;  %v10960_v42 = vld [vmem:[%s15646_s21 + $0x3d] sm:$0x1] }
 0xc47   : > { %14417 = vmatmul.mubr.msk.f32.vlgmr.msra.gmra.mrb[78].mxu0 %vm657_vm1, %v17719_v27  ;;  %14729 = vmatprep.subr.bf16.mxu1 %v15209_v0  ;;  %v9702_v36 = vrot.slane %v9688_v33, %v15798_v41  ;;  %v9703_v37 = vcombine.high %v9695_v34, %v9695_v34  ;;  %13446 = vst.msk [vmem:[%s15819_s15 + $0x196] sm:$0x1] %vm924_vm7, %v9695_v34 }
 0xc48   : > { %14732 = vmatprep.subr.bf16.mxu0 %v15209_v0  ;;  %14430 = vmatprep.mubr.msk.f32.mxu0 %vm15210_vm5, %v15211_v19  ;;  %v9716_v38 = vrot.slane %v9695_v34, %v15808_v58  ;;  %v10817_v33 = vsel %vm652_vm2, %v10816_v16, %v10815_v21  ;;  %v11262_v34 = vld [vmem:[%s15633_s10 + $0x3e] sm:$0x1] }
 0xc49   : > { %14734 = vmatpush3.bf16.msra.mxu0 %v15684_v18  ;;  %9433 = vrot.lane.b32.xlu0 %v9426_v12, %s15214_s25  ;;  %v9704_v43 = vcombine.high %v9702_v36, %v9702_v36  ;;  %13447 = vst.msk [vmem:[%s15819_s15 + $0x1b6] sm:$0x1] %vm924_vm7, %v9702_v36  ;;  %13448 = vst.msk [vmem:[%s15819_s15 + $0x1d6] sm:$0x1] %vm924_vm7, %v9703_v37  ;;  %v9720_v47 = vrot.slane %v9702_v36, %v15808_v58  ;;  %v10965_v12 = vrot.slane %v10958_v49, 7 }
 0xc4a   : > { %14738 = vmatprep.subr.bf16.mxu0 %v15209_v0  ;;  %9582 = vrot.lane.b32.xlu1 %v9573_v28, %s15214_s25  ;;  %v9724_v54 = vrot.slane %v9703_v37, %v15808_v58  ;;  %v11269_v36 = vrot.slane %v11261_v22, 6  ;;  %v11268_v37 = vsel %vm649_vm0, %v11267_v23, %v11259_v25 }
 0xc4b   : > { %13449 = vst.msk [vmem:[%s15819_s15 + $0x1f6] sm:$0x1] %vm924_vm7, %v9704_v43  ;;  %14412 = vmatmul.mubr.msk.f32.vlgmr.msra.gmra.mrb[76].mxu1 %vm742_vm6, %v10364_v53  ;;  %v9728_v55 = vrot.slane %v9704_v43, %v15808_v58  ;;  %v10966_v43 = vsel %vm649_vm0, %v10965_v12, %v10957_v30 }
 0xc4c   : > { %14731 = vmatpush3.bf16.msra.mxu1 %v15674_v13  ;;  %14423 = vmatprep.mubr.msk.f32.mxu1 %vm15210_vm5, %v15211_v19 }
 0xc4d   : > { %9584 = vrot.lane.b32.xlu0 %v9577_v29, %s15214_s25  ;;  %14735 = vmatprep.subr.bf16.mxu1 %v15209_v0  ;;  %v10818_v29 = vrot.slane %v10809_v15, 5 }
 0xc4e   : > { %9729 = vrot.lane.b32.xlu1 %v9716_v38, %s15214_s25  ;;  %v10967_v38 = vrot.slane %v10959_v26, 6 }
 0xc4f   : > { %v10819_v46 = vsel %vm655_vm3, %v10818_v29, %v10817_v33 }
 0xc51   : > { %9731 = vrot.lane.b32.xlu0 %v9720_v47, %s15214_s25  ;;  %v11271_v47 = vrot.slane %v11262_v34, 5 }
 0xc52   : > { %9733 = vrot.lane.b32.xlu1 %v9724_v54, %s15214_s25 }
 0xc55   : > { %9735 = vrot.lane.b32.xlu0 %v9728_v55, %s15214_s25  ;;  %v11270_v55 = vsel %vm652_vm2, %v11269_v36, %v11268_v37 }
 0xc56   : > { %v11272_v21 = vsel %vm655_vm3, %v11271_v47, %v11270_v55 }
 0xcaf   : > { %v9428_v56 = vpop.permute.xlu1 %9427 }
 0xcb0   : > { %13432 = vst.msk [vmem:[%s15819_s15 + $0x97] sm:$0x1] %vm924_vm7, %v9428_v56 }
 0xcb3   : > { %v9430_v57 = vpop.permute.xlu0 %9429 }
 0xcb4   : > { %13433 = vst.msk [vmem:[%s15819_s15 + $0xb7] sm:$0x1] %vm924_vm7, %v9430_v57  ;;  %v9579_v59 = vpop.permute.xlu1 %9578 }
 0xcb5   : > { %13441 = vst.msk [vmem:[%s15819_s15 + $0x117] sm:$0x1] %vm924_vm7, %v9579_v59  ;;  %v10968_v59 = vsel %vm652_vm2, %v10967_v38, %v10966_v43 }
 0xcb7   : > { %v9581_v60 = vpop.permute.xlu0 %9580 }
 0xcb8   : > { %13442 = vst.msk [vmem:[%s15819_s15 + $0x137] sm:$0x1] %vm924_vm7, %v9581_v60  ;;  %v9432_v61 = vpop.permute.xlu1 %9431  ;;  %v10969_v60 = vrot.slane %v10960_v42, 5 }
 0xcb9   : > { %13434 = vst.msk [vmem:[%s15819_s15 + $0xd7] sm:$0x1] %vm924_vm7, %v9432_v61 }
 0xcba   : > { %v10970_v12 = vsel %vm655_vm3, %v10969_v60, %v10968_v59 }
 0xcbb   : > { %v9434_v17 = vpop.permute.xlu0 %9433 }
 0xcbc   : > { %13435 = vst.msk [vmem:[%s15819_s15 + $0xf7] sm:$0x1] %vm924_vm7, %v9434_v17  ;;  %v9583_v1 = vpop.permute.xlu1 %9582 }
 0xcbd   : > { %13443 = vst.msk [vmem:[%s15819_s15 + $0x157] sm:$0x1] %vm924_vm7, %v9583_v1 }
 0xcbf   : > { %v9585_v2 = vpop.permute.xlu0 %9584 }
 0xcc0   : > { %13444 = vst.msk [vmem:[%s15819_s15 + $0x177] sm:$0x1] %vm924_vm7, %v9585_v2  ;;  %v9730_v3 = vpop.permute.xlu1 %9729 }
 0xcc1   : > { %13450 = vst.msk [vmem:[%s15819_s15 + $0x197] sm:$0x1] %vm924_vm7, %v9730_v3 }
 0xcc3   : > { %v9732_v5 = vpop.permute.xlu0 %9731 }
 0xcc4   : > { %13451 = vst.msk [vmem:[%s15819_s15 + $0x1b7] sm:$0x1] %vm924_vm7, %v9732_v5  ;;  %v9734_v9 = vpop.permute.xlu1 %9733 }
 0xcc5   : > { %13452 = vst.msk [vmem:[%s15819_s15 + $0x1d7] sm:$0x1] %vm924_vm7, %v9734_v9 }
 0xcc7   : > { %v9736_v14 = vpop.permute.xlu0 %9735 }
 0xcc8   : > { %13453 = vst.msk [vmem:[%s15819_s15 + $0x1f7] sm:$0x1] %vm924_vm7, %v9736_v14 }
 0xd0f   : > { %v9905_v20 = vpop.f32.mrb[72].mxu1 }
 0xd10   : > { %v14385_v24 = vpop.f32.mrb[73].mxu1 }
 0xd11   : > { %v9978_v28 = vpop.f32.mrb[74].mxu0 }
 0xd12   : > { %v9979_v31 = vadd.f32 %v9978_v28, %v9905_v20  ;;  %v14392_v32 = vpop.f32.mrb[75].mxu0 }
 0xd14   : > { %v9982_v39 = vadd.f32 %v9979_v31, %v15794_v35 }
 0xd15   : > { %v10131_v40 = vpop.f32.mrb[74].mxu1 }
 0xd16   : > { %v10142_v44 = vrot.slane %v10131_v40, %v15798_v41  ;;  %v10282_v45 = vpop.f32.mrb[76].mxu0  ;;  %v14399_v7 = vpop.f32.mrb[75].mxu1  ;;  %v9990_v50 = vrot.slane %v9982_v39, %v15798_v41  ;;  %v10016_v52 = vcombine.high %v9982_v39, %v9982_v39 }
 0xd17   : > { %v10293_v53 = vrot.slane %v10282_v45, %v15798_v41  ;;  %v14406_v54 = vpop.f32.mrb[77].mxu0  ;;  %v11109_v45 = vld [vmem:[%s15648_s1 + $0x1d] sm:$0x1] }
 0xd18   : > { %v10143_v56 = vcombine.high %v10142_v44, %v10142_v44  ;;  %v10150_v57 = vrot.slane %v10142_v44, %v15798_v41  ;;  %v9991_v61 = vcombine.high %v9990_v50, %v9990_v50  ;;  %v9998_v17 = vrot.slane %v9990_v50, %v15798_v41  ;;  %v11108_v50 = vld [vmem:[%s15648_s1 + $0xd] sm:$0x1] }
 0xd19   : > { %v10023_v1 = vrot.slane %v10016_v52, %v15798_v41  ;;  %v10294_v2 = vcombine.high %v10293_v53, %v10293_v53  ;;  %v10301_v6 = vrot.slane %v10293_v53, %v15798_v41  ;;  %v11116_v47 = vrot.slane %v11109_v45, 7  ;;  %v11111_v52 = vld [vmem:[%s15648_s1 + $0x3d] sm:$0x1] }
 0xd1a   : > { %v10157_v3 = vrot.slane %v10143_v56, %v15798_v41  ;;  %v10158_v4 = vcombine.high %v10150_v57, %v10150_v57  ;;  %13460 = vst.msk [vmem:[%s15819_s15 + $0x98] sm:$0x1] %vm924_vm7, %v10150_v57  ;;  %v10171_v5 = vrot.slane %v10150_v57, %v15808_v58  ;;  %v14418_v8 = vpop.f32.mrb[78].mxu0  ;;  %v10005_v9 = vrot.slane %v9991_v61, %v15798_v41 }
 0xd1b   : > { %v10006_v10 = vcombine.high %v9998_v17, %v9998_v17  ;;  %10012 = vst.msk [vmem:[%s15819_s15 + $0x18] sm:$0x1] %vm924_vm7, %v9998_v17  ;;  %v10024_v11 = vcombine.high %v10023_v1, %v10023_v1  ;;  %v10031_v49 = vrot.slane %v10023_v1, %v15798_v41  ;;  %v10584_v14 = vpop.f32.mrb[79].mxu0  ;;  %14424 = vmatmul.mubr.msk.f32.vlgmr.msra.gmra.mrb[78].mxu1 %vm742_vm6, %v14418_v8  ;;  %13469 = vst.msk [vmem:[%s15819_s15 + $0x118] sm:$0x1] %vm924_vm7, %v10301_v6 }
 0xd1c   : > { %v10159_v15 = vcombine.high %v10157_v3, %v10157_v3  ;;  %13461 = vst.msk [vmem:[%s15819_s15 + $0xb8] sm:$0x1] %vm924_vm7, %v10157_v3  ;;  %13462 = vst.msk [vmem:[%s15819_s15 + $0xd8] sm:$0x1] %vm924_vm7, %v10158_v4  ;;  %v10308_v16 = vrot.slane %v10294_v2, %v15798_v41  ;;  %v10309_v20 = vcombine.high %v10301_v6, %v10301_v6  ;;  %10184 = vrot.lane.b32.xlu1 %v10171_v5, %s15214_s25 }
 0xd1d   : > { %v10007_v22 = vcombine.high %v10005_v9, %v10005_v9  ;;  %10013 = vst.msk [vmem:[%s15819_s15 + $0x38] sm:$0x1] %vm924_vm7, %v10005_v9  ;;  %10014 = vst.msk [vmem:[%s15819_s15 + $0x58] sm:$0x1] %vm924_vm7, %v10006_v10  ;;  %v10038_v23 = vrot.slane %v10024_v11, %v15798_v41  ;;  %v10039_v24 = vcombine.high %v10031_v49, %v10031_v49  ;;  %14431 = vmatmul.mubr.msk.f32.vlgmr.msra.gmra.mrb[80].mxu0 %vm742_vm6, %v10584_v14  ;;  %v11564_v10 = vld [vmem:[%s15640_s26 + $0x1e] sm:$0x1] }
 0xd1e   : > { %10045 = vst.msk [vmem:[%s15819_s15 + $0x19] sm:$0x1] %vm924_vm7, %v10031_v49  ;;  %14737 = vmatpush3.bf16.msra.mxu1 %v15728_v48  ;;  %13463 = vst.msk [vmem:[%s15819_s15 + $0xf8] sm:$0x1] %vm924_vm7, %v10159_v15  ;;  %v10310_v25 = vcombine.high %v10308_v16, %v10308_v16  ;;  %14740 = vmatpush3.bf16.msra.mxu0 %v15731_v51  ;;  %v10175_v26 = vrot.slane %v10157_v3, %v15808_v58  ;;  %v10433_v36 = vpop.f32.mrb[76].mxu1  ;;  %v11120_v56 = vrot.slane %v11111_v52, 5 }
 0xd1f   : > { %13470 = vst.msk [vmem:[%s15819_s15 + $0x138] sm:$0x1] %vm924_vm7, %v10308_v16  ;;  %13471 = vst.msk [vmem:[%s15819_s15 + $0x158] sm:$0x1] %vm924_vm7, %v10309_v20  ;;  %14437 = vmatprep.mubr.msk.f32.mxu1 %vm15210_vm5, %v15211_v19  ;;  %v10040_v28 = vcombine.high %v10038_v23, %v10038_v23  ;;  %v10322_v29 = vrot.slane %v10301_v6, %v15808_v58  ;;  %14444 = vmatprep.mubr.msk.f32.mxu0 %vm15210_vm5, %v15211_v19  ;;  %v14413_v38 = vpop.f32.mrb[77].mxu1  ;;  %v11571_v14 = vrot.slane %v11564_v10, 7 }
 0xd20   : > { %10015 = vst.msk [vmem:[%s15819_s15 + $0x78] sm:$0x1] %vm924_vm7, %v10007_v22  ;;  %10046 = vst.msk [vmem:[%s15819_s15 + $0x39] sm:$0x1] %vm924_vm7, %v10038_v23  ;;  %14454 = vmatprep.subr.msk.mxu0 %vm664_vm4, %v11272_v21  ;;  %10186 = vrot.lane.b32.xlu0 %v10175_v26, %s15214_s25  ;;  %v10179_v30 = vrot.slane %v10158_v4, %v15808_v58  ;;  %v10326_v31 = vrot.slane %v10308_v16, %v15808_v58  ;;  %v11565_v49 = vld [vmem:[%s15640_s26 + $0x2e] sm:$0x1] }
 0xd21   : > { %10047 = vst.msk [vmem:[%s15819_s15 + $0x59] sm:$0x1] %vm924_vm7, %v10039_v24  ;;  %13472 = vst.msk [vmem:[%s15819_s15 + $0x178] sm:$0x1] %vm924_vm7, %v10310_v25  ;;  %14438 = vmatmul.mubr.msk.f32.vlgmr.msra.gmra.mrb[80].mxu1 %vm742_vm6, %v10819_v46  ;;  %10335 = vrot.lane.b32.xlu1 %v10322_v29, %s15214_s25  ;;  %v10183_v32 = vrot.slane %v10159_v15, %v15808_v58  ;;  %v10330_v33 = vrot.slane %v10309_v20, %v15808_v58  ;;  %v11110_v46 = vld [vmem:[%s15648_s1 + $0x2d] sm:$0x1] }
 0xd22   : > { %10048 = vst.msk [vmem:[%s15819_s15 + $0x79] sm:$0x1] %vm924_vm7, %v10040_v28  ;;  %14445 = vmatmul.mubr.msk.f32.vlgmr.msra.gmra.mrb[82].mxu0 %vm742_vm6, %v10970_v12  ;;  %14741 = vmatprep.subr.bf16.mxu1 %v15209_v0  ;;  %v10334_v34 = vrot.slane %v10310_v25, %v15808_v58  ;;  %v10444_v37 = vrot.slane %v10433_v36, %v15798_v41  ;;  %v11118_v53 = vrot.slane %v11110_v46, 6  ;;  %v11563_v16 = vld [vmem:[%s15640_s26 + $0xe] sm:$0x1]  ;;  %v11573_v24 = vrot.slane %v11565_v49, 6 }
 0xd23   : > { %14455 = vmatpush3.msk.msra.mxu0 %vm664_vm4, %v11272_v21  ;;  %14456 = vmatprep.mubr.msk.f32.mxu0 %vm657_vm1, %v17705_v63  ;;  %v11117_v55 = vsel %vm649_vm0, %v11116_v47, %v11108_v50  ;;  %v12017_v20 = vld [vmem:[%s15633_s10 + $0x1f] sm:$0x1]  ;;  %v11715_v21 = vld [vmem:[%s15646_s21 + $0x1e] sm:$0x1]  ;;  %v11572_v26 = vsel %vm649_vm0, %v11571_v14, %v11563_v16  ;;  %v12018_v12 = vld [vmem:[%s15633_s10 + $0x2f] sm:$0x1] }
 0xd24   : > { %14451 = vmatprep.mubr.msk.f32.mxu1 %vm15210_vm5, %v15211_v19  ;;  %10337 = vrot.lane.b32.xlu0 %v10326_v31, %s15214_s25  ;;  %v10445_v39 = vcombine.high %v10444_v37, %v10444_v37  ;;  %v10452_v40 = vrot.slane %v10444_v37, %v15798_v41  ;;  %v11119_v57 = vsel %vm652_vm2, %v11118_v53, %v11117_v55  ;;  %v11566_v23 = vld [vmem:[%s15640_s26 + $0x3e] sm:$0x1]  ;;  %v12024_v28 = vrot.slane %v12017_v20, 7  ;;  %v11716_v31 = vld [vmem:[%s15646_s21 + $0x2e] sm:$0x1] }
 0xd25   : > { %14743 = vmatpush3.bf16.msra.mxu1 %v15768_v62  ;;  %10188 = vrot.lane.b32.xlu1 %v10179_v30, %s15214_s25  ;;  %v11121_v59 = vsel %vm655_vm3, %v11120_v56, %v11119_v57  ;;  %v12016_v30 = vld [vmem:[%s15633_s10 + $0xf] sm:$0x1]  ;;  %v11714_v36 = vld [vmem:[%s15646_s21 + $0xe] sm:$0x1]  ;;  %v11717_v47 = vld [vmem:[%s15646_s21 + $0x3e] sm:$0x1] }
 0xd26   : > { %14457 = vmatmul.mubr.msk.f32.vlgmr.msra.gmra.mrb[84].mxu0 %vm657_vm1, %v17719_v27  ;;  %14744 = vmatprep.subr.bf16.mxu1 %v15209_v0  ;;  %v10459_v42 = vrot.slane %v10445_v39, %v15798_v41  ;;  %v10460_v43 = vcombine.high %v10452_v40, %v10452_v40  ;;  %13478 = vst.msk [vmem:[%s15819_s15 + $0x198] sm:$0x1] %vm924_vm7, %v10452_v40 }
 0xd27   : > { %14747 = vmatprep.subr.bf16.mxu0 %v15209_v0  ;;  %14470 = vmatprep.mubr.msk.f32.mxu0 %vm15210_vm5, %v15211_v19  ;;  %v10473_v44 = vrot.slane %v10452_v40, %v15808_v58  ;;  %v11574_v39 = vsel %vm652_vm2, %v11573_v24, %v11572_v26  ;;  %v12019_v40 = vld [vmem:[%s15633_s10 + $0x3f] sm:$0x1]  ;;  %s18548_s10 = sld [smem:[#allocation22_spill]] }
 0xd28   : > { %14749 = vmatpush3.bf16.msra.mxu0 %v15684_v18  ;;  %10190 = vrot.lane.b32.xlu0 %v10183_v32, %s15214_s25  ;;  %v10461_v7 = vcombine.high %v10459_v42, %v10459_v42  ;;  %13479 = vst.msk [vmem:[%s15819_s15 + $0x1b8] sm:$0x1] %vm924_vm7, %v10459_v42  ;;  %13480 = vst.msk [vmem:[%s15819_s15 + $0x1d8] sm:$0x1] %vm924_vm7, %v10460_v43  ;;  %v10477_v54 = vrot.slane %v10459_v42, %v15808_v58  ;;  %v11722_v32 = vrot.slane %v11715_v21, 7 }
 0xd29   : > { %14753 = vmatprep.subr.bf16.mxu0 %v15209_v0  ;;  %10339 = vrot.lane.b32.xlu1 %v10330_v33, %s15214_s25  ;;  %v10481_v60 = vrot.slane %v10460_v43, %v15808_v58  ;;  %v12026_v42 = vrot.slane %v12018_v12, 6  ;;  %v12025_v43 = vsel %vm649_vm0, %v12024_v28, %v12016_v30 }
 0xd2a   : > { %13481 = vst.msk [vmem:[%s15819_s15 + $0x1f8] sm:$0x1] %vm924_vm7, %v10461_v7  ;;  %14452 = vmatmul.mubr.msk.f32.vlgmr.msra.gmra.mrb[82].mxu1 %vm742_vm6, %v11121_v59  ;;  %v10485_v61 = vrot.slane %v10461_v7, %v15808_v58  ;;  %v11723_v7 = vsel %vm649_vm0, %v11722_v32, %v11714_v36 }
 0xd2b   : > { %14746 = vmatpush3.bf16.msra.mxu1 %v15674_v13  ;;  %14463 = vmatprep.mubr.msk.f32.mxu1 %vm15210_vm5, %v15211_v19 }
 0xd2c   : > { %10341 = vrot.lane.b32.xlu0 %v10334_v34, %s15214_s25  ;;  %14750 = vmatprep.subr.bf16.mxu1 %v15209_v0  ;;  %v11575_v34 = vrot.slane %v11566_v23, 5 }
 0xd2d   : > { %10486 = vrot.lane.b32.xlu1 %v10473_v44, %s15214_s25  ;;  %v11724_v44 = vrot.slane %v11716_v31, 6 }
 0xd2e   : > { %v11576_v53 = vsel %vm655_vm3, %v11575_v34, %v11574_v39 }
 0xd30   : > { %10488 = vrot.lane.b32.xlu0 %v10477_v54, %s15214_s25  ;;  %v12028_v54 = vrot.slane %v12019_v40, 5 }
 0xd31   : > { %10490 = vrot.lane.b32.xlu1 %v10481_v60, %s15214_s25 }
 0xd34   : > { %10492 = vrot.lane.b32.xlu0 %v10485_v61, %s15214_s25  ;;  %v12027_v61 = vsel %vm652_vm2, %v12026_v42, %v12025_v43 }
 0xd35   : > { %v12029_v26 = vsel %vm655_vm3, %v12028_v54, %v12027_v61 }
 0xd8e   : > { %v10185_v17 = vpop.permute.xlu1 %10184 }
 0xd8f   : > { %13464 = vst.msk [vmem:[%s15819_s15 + $0x99] sm:$0x1] %vm924_vm7, %v10185_v17 }
 0xd92   : > { %v10187_v1 = vpop.permute.xlu0 %10186 }
 0xd93   : > { %13465 = vst.msk [vmem:[%s15819_s15 + $0xb9] sm:$0x1] %vm924_vm7, %v10187_v1  ;;  %v10336_v2 = vpop.permute.xlu1 %10335 }
 0xd94   : > { %13473 = vst.msk [vmem:[%s15819_s15 + $0x119] sm:$0x1] %vm924_vm7, %v10336_v2  ;;  %v11725_v2 = vsel %vm652_vm2, %v11724_v44, %v11723_v7  ;;  %v11866_v44 = vld [vmem:[%s15648_s1 + $0x1e] sm:$0x1] }
 0xd96   : > { %v10338_v3 = vpop.permute.xlu0 %10337 }
 0xd97   : > { %13474 = vst.msk [vmem:[%s15819_s15 + $0x139] sm:$0x1] %vm924_vm7, %v10338_v3  ;;  %v10189_v4 = vpop.permute.xlu1 %10188  ;;  %v11726_v3 = vrot.slane %v11717_v47, 5 }
 0xd98   : > { %13466 = vst.msk [vmem:[%s15819_s15 + $0xd9] sm:$0x1] %vm924_vm7, %v10189_v4 }
 0xd99   : > { %v11727_v32 = vsel %vm655_vm3, %v11726_v3, %v11725_v2 }
 0xd9a   : > { %v10191_v5 = vpop.permute.xlu0 %10190 }
 0xd9b   : > { %13467 = vst.msk [vmem:[%s15819_s15 + $0xf9] sm:$0x1] %vm924_vm7, %v10191_v5  ;;  %v10340_v6 = vpop.permute.xlu1 %10339 }
 0xd9c   : > { %13475 = vst.msk [vmem:[%s15819_s15 + $0x159] sm:$0x1] %vm924_vm7, %v10340_v6 }
 0xd9e   : > { %v10342_v8 = vpop.permute.xlu0 %10341 }
 0xd9f   : > { %13476 = vst.msk [vmem:[%s15819_s15 + $0x179] sm:$0x1] %vm924_vm7, %v10342_v8  ;;  %v10487_v9 = vpop.permute.xlu1 %10486 }
 0xda0   : > { %13482 = vst.msk [vmem:[%s15819_s15 + $0x199] sm:$0x1] %vm924_vm7, %v10487_v9 }
 0xda2   : > { %v10489_v11 = vpop.permute.xlu0 %10488 }
 0xda3   : > { %13483 = vst.msk [vmem:[%s15819_s15 + $0x1b9] sm:$0x1] %vm924_vm7, %v10489_v11  ;;  %v10491_v15 = vpop.permute.xlu1 %10490 }
 0xda4   : > { %13484 = vst.msk [vmem:[%s15819_s15 + $0x1d9] sm:$0x1] %vm924_vm7, %v10491_v15 }
 0xda6   : > { %v10493_v22 = vpop.permute.xlu0 %10492 }
 0xda7   : > { %13485 = vst.msk [vmem:[%s15819_s15 + $0x1f9] sm:$0x1] %vm924_vm7, %v10493_v22 }
 0xdee   : > { %v10662_v25 = vpop.f32.mrb[78].mxu1 }
 0xdef   : > { %v14425_v29 = vpop.f32.mrb[79].mxu1 }
 0xdf0   : > { %v10735_v33 = vpop.f32.mrb[80].mxu0 }
 0xdf1   : > { %v10736_v37 = vadd.f32 %v10735_v33, %v10662_v25  ;;  %v14432_v38 = vpop.f32.mrb[81].mxu0 }
 0xdf3   : > { %v10739_v45 = vadd.f32 %v10736_v37, %v15794_v35 }
 0xdf4   : > { %v10888_v46 = vpop.f32.mrb[80].mxu1 }
 0xdf5   : > { %v10899_v50 = vrot.slane %v10888_v46, %v15798_v41  ;;  %v11039_v52 = vpop.f32.mrb[82].mxu0  ;;  %v14439_v55 = vpop.f32.mrb[81].mxu1  ;;  %v10747_v56 = vrot.slane %v10739_v45, %v15798_v41  ;;  %v10773_v57 = vcombine.high %v10739_v45, %v10739_v45  ;;  %v11867_v45 = vld [vmem:[%s15648_s1 + $0x2e] sm:$0x1]  ;;  %v11873_v46 = vrot.slane %v11866_v44, 7 }
 0xdf6   : > { %v11050_v59 = vrot.slane %v11039_v52, %v15798_v41  ;;  %v14446_v60 = vpop.f32.mrb[83].mxu0  ;;  %v11865_v52 = vld [vmem:[%s15648_s1 + $0xe] sm:$0x1]  ;;  %v11875_v54 = vrot.slane %v11867_v45, 6 }
 0xdf7   : > { %v10900_v17 = vcombine.high %v10899_v50, %v10899_v50  ;;  %v10907_v1 = vrot.slane %v10899_v50, %v15798_v41  ;;  %v10748_v4 = vcombine.high %v10747_v56, %v10747_v56  ;;  %v10755_v5 = vrot.slane %v10747_v56, %v15798_v41 }
 0xdf8   : > { %v10780_v6 = vrot.slane %v10773_v57, %v15798_v41  ;;  %v11051_v8 = vcombine.high %v11050_v59, %v11050_v59  ;;  %v11058_v49 = vrot.slane %v11050_v59, %v15798_v41  ;;  %v11874_v55 = vsel %vm649_vm0, %v11873_v46, %v11865_v52 }
 0xdf9   : > { %v10914_v9 = vrot.slane %v10900_v17, %v15798_v41  ;;  %v10915_v10 = vcombine.high %v10907_v1, %v10907_v1  ;;  %13492 = vst.msk [vmem:[%s15819_s15 + $0x9a] sm:$0x1] %vm924_vm7, %v10907_v1  ;;  %v10928_v11 = vrot.slane %v10907_v1, %v15808_v58  ;;  %v14458_v14 = vpop.f32.mrb[84].mxu0  ;;  %v10762_v15 = vrot.slane %v10748_v4, %v15798_v41 }
 0xdfa   : > { %v10763_v16 = vcombine.high %v10755_v5, %v10755_v5  ;;  %10769 = vst.msk [vmem:[%s15819_s15 + $0x1a] sm:$0x1] %vm924_vm7, %v10755_v5  ;;  %v10781_v20 = vcombine.high %v10780_v6, %v10780_v6  ;;  %v10788_v21 = vrot.slane %v10780_v6, %v15798_v41  ;;  %v11341_v22 = vpop.f32.mrb[85].mxu0  ;;  %14464 = vmatmul.mubr.msk.f32.vlgmr.msra.gmra.mrb[84].mxu1 %vm742_vm6, %v14458_v14  ;;  %13501 = vst.msk [vmem:[%s15819_s15 + $0x11a] sm:$0x1] %vm924_vm7, %v11058_v49 }
 0xdfb   : > { %v10916_v23 = vcombine.high %v10914_v9, %v10914_v9  ;;  %13493 = vst.msk [vmem:[%s15819_s15 + $0xba] sm:$0x1] %vm924_vm7, %v10914_v9  ;;  %13494 = vst.msk [vmem:[%s15819_s15 + $0xda] sm:$0x1] %vm924_vm7, %v10915_v10  ;;  %v11065_v24 = vrot.slane %v11051_v8, %v15798_v41  ;;  %v11066_v25 = vcombine.high %v11058_v49, %v11058_v49  ;;  %10941 = vrot.lane.b32.xlu1 %v10928_v11, %s15214_s25  ;;  %v12321_v11 = vld [vmem:[%s15640_s26 + $0x1f] sm:$0x1] }
 0xdfc   : > { %v10764_v12 = vcombine.high %v10762_v15, %v10762_v15  ;;  %10770 = vst.msk [vmem:[%s15819_s15 + $0x3a] sm:$0x1] %vm924_vm7, %v10762_v15  ;;  %10771 = vst.msk [vmem:[%s15819_s15 + $0x5a] sm:$0x1] %vm924_vm7, %v10763_v16  ;;  %v10795_v28 = vrot.slane %v10781_v20, %v15798_v41  ;;  %v10796_v29 = vcombine.high %v10788_v21, %v10788_v21  ;;  %14471 = vmatmul.mubr.msk.f32.vlgmr.msra.gmra.mrb[86].mxu0 %vm742_vm6, %v11341_v22  ;;  %v12322_v14 = vld [vmem:[%s15640_s26 + $0x2f] sm:$0x1] }
 0xdfd   : > { %10802 = vst.msk [vmem:[%s15819_s15 + $0x1b] sm:$0x1] %vm924_vm7, %v10788_v21  ;;  %14752 = vmatpush3.bf16.msra.mxu1 %v15728_v48  ;;  %13495 = vst.msk [vmem:[%s15819_s15 + $0xfa] sm:$0x1] %vm924_vm7, %v10916_v23  ;;  %v11067_v30 = vcombine.high %v11065_v24, %v11065_v24  ;;  %14755 = vmatpush3.bf16.msra.mxu0 %v15731_v51  ;;  %v10932_v31 = vrot.slane %v10914_v9, %v15808_v58  ;;  %v11190_v39 = vpop.f32.mrb[82].mxu1  ;;  %v12328_v15 = vrot.slane %v12321_v11, 7 }
 0xdfe   : > { %13502 = vst.msk [vmem:[%s15819_s15 + $0x13a] sm:$0x1] %vm924_vm7, %v11065_v24  ;;  %13503 = vst.msk [vmem:[%s15819_s15 + $0x15a] sm:$0x1] %vm924_vm7, %v11066_v25  ;;  %14477 = vmatprep.mubr.msk.f32.mxu1 %vm15210_vm5, %v15211_v19  ;;  %v10797_v33 = vcombine.high %v10795_v28, %v10795_v28  ;;  %v11079_v34 = vrot.slane %v11058_v49, %v15808_v58  ;;  %14484 = vmatprep.mubr.msk.f32.mxu0 %vm15210_vm5, %v15211_v19  ;;  %v12320_v20 = vld [vmem:[%s15640_s26 + $0xf] sm:$0x1] }
 0xdff   : > { %10772 = vst.msk [vmem:[%s15819_s15 + $0x7a] sm:$0x1] %vm924_vm7, %v10764_v12  ;;  %10803 = vst.msk [vmem:[%s15819_s15 + $0x3b] sm:$0x1] %vm924_vm7, %v10795_v28  ;;  %14494 = vmatprep.subr.msk.mxu0 %vm664_vm4, %v12029_v26  ;;  %10943 = vrot.lane.b32.xlu0 %v10932_v31, %s15214_s25  ;;  %v10936_v36 = vrot.slane %v10915_v10, %v15808_v58  ;;  %v11083_v37 = vrot.slane %v11065_v24, %v15808_v58  ;;  %v12472_v21 = vld [vmem:[%s15646_s21 + $0x1f] sm:$0x1] }
 0xe00   : > { %10804 = vst.msk [vmem:[%s15819_s15 + $0x5b] sm:$0x1] %vm924_vm7, %v10796_v29  ;;  %13504 = vst.msk [vmem:[%s15819_s15 + $0x17a] sm:$0x1] %vm924_vm7, %v11067_v30  ;;  %14478 = vmatmul.mubr.msk.f32.vlgmr.msra.gmra.mrb[86].mxu1 %vm742_vm6, %v11576_v53  ;;  %11092 = vrot.lane.b32.xlu1 %v11079_v34, %s15214_s25  ;;  %v10940_v38 = vrot.slane %v10916_v23, %v15808_v58  ;;  %v11201_v40 = vrot.slane %v11190_v39, %v15798_v41  ;;  %v11868_v53 = vld [vmem:[%s15648_s1 + $0x3e] sm:$0x1] }
 0xe01   : > { %10805 = vst.msk [vmem:[%s15819_s15 + $0x7b] sm:$0x1] %vm924_vm7, %v10797_v33  ;;  %14485 = vmatmul.mubr.msk.f32.vlgmr.msra.gmra.mrb[88].mxu0 %vm742_vm6, %v11727_v32  ;;  %14756 = vmatprep.subr.bf16.mxu1 %v15209_v0  ;;  %v11877_v56 = vrot.slane %v11868_v53, 5  ;;  %v11876_v59 = vsel %vm652_vm2, %v11875_v54, %v11874_v55  ;;  %v12323_v23 = vld [vmem:[%s15640_s26 + $0x3f] sm:$0x1]  ;;  %v12330_v24 = vrot.slane %v12322_v14, 6 }
 0xe02   : > { %14495 = vmatpush3.msk.msra.mxu0 %vm664_vm4, %v12029_v26  ;;  %14496 = vmatprep.mubr.msk.f32.mxu0 %vm657_vm1, %v17705_v63  ;;  %v11087_v63 = vrot.slane %v11066_v25, %v15808_v58  ;;  %v11202_v42 = vcombine.high %v11201_v40, %v11201_v40  ;;  %v11209_v43 = vrot.slane %v11201_v40, %v15798_v41  ;;  %v12473_v12 = vld [vmem:[%s15646_s21 + $0x2f] sm:$0x1]  ;;  %v12479_v28 = vrot.slane %v12472_v21, 7  ;;  %v12623_v40 = vld [vmem:[%s15648_s1 + $0x1f] sm:$0x1]  ;;  %s18549_s26 = sld [smem:[#allocation23_spill]] }
 0xe03   : > { %14491 = vmatprep.mubr.msk.f32.mxu1 %vm15210_vm5, %v15211_v19  ;;  %11094 = vrot.lane.b32.xlu0 %v11083_v37, %s15214_s25  ;;  %v11878_v60 = vsel %vm655_vm3, %v11877_v56, %v11876_v59  ;;  %v12329_v26 = vsel %vm649_vm0, %v12328_v15, %v12320_v20  ;;  %v12332_v32 = vrot.slane %v12323_v23, 5  ;;  %v18125_v37 = vld [vmem:[%s15646_s21 + $0x3f] sm:$0x1]  ;;  %v12630_v56 = vrot.slane %v12623_v40, 7 }
 0xe04   : > { %14758 = vmatpush3.bf16.msra.mxu1 %v15768_v62  ;;  %10945 = vrot.lane.b32.xlu1 %v10936_v36, %s15214_s25  ;;  %v11216_v47 = vrot.slane %v11202_v42, %v15798_v41  ;;  %v11217_v7 = vcombine.high %v11209_v43, %v11209_v43  ;;  %13510 = vst.msk [vmem:[%s15819_s15 + $0x19a] sm:$0x1] %vm924_vm7, %v11209_v43  ;;  %v12483_v45 = vrot.slane %v18125_v37, 5 }
 0xe05   : > { %14497 = vmatmul.mubr.msk.f32.vlgmr.msra.gmra.mrb[90].mxu0 %vm657_vm1, %v17719_v27  ;;  %14759 = vmatprep.subr.bf16.mxu1 %v15209_v0  ;;  %v11091_v27 = vrot.slane %v11067_v30, %v15808_v58  ;;  %v11230_v50 = vrot.slane %v11209_v43, %v15808_v58  ;;  %v12471_v30 = vld [vmem:[%s15646_s21 + $0xf] sm:$0x1]  ;;  %v12331_v36 = vsel %vm652_vm2, %v12330_v24, %v12329_v26  ;;  %s14775_s21 = smul.u32 10240, %s18548_s10 }
 0xe06   : > { %14762 = vmatprep.subr.bf16.mxu0 %v15209_v0  ;;  %14510 = vmatprep.mubr.msk.f32.mxu0 %vm15210_vm5, %v15211_v19  ;;  %v11218_v57 = vcombine.high %v11216_v47, %v11216_v47  ;;  %13511 = vst.msk [vmem:[%s15819_s15 + $0x1ba] sm:$0x1] %vm924_vm7, %v11216_v47  ;;  %13512 = vst.msk [vmem:[%s15819_s15 + $0x1da] sm:$0x1] %vm924_vm7, %v11217_v7  ;;  %v11234_v61 = vrot.slane %v11216_v47, %v15808_v58 }
 0xe07   : > { %14764 = vmatpush3.bf16.msra.mxu0 %v15684_v18  ;;  %10947 = vrot.lane.b32.xlu0 %v10940_v38, %s15214_s25  ;;  %v14453_v18 = vpop.f32.mrb[83].mxu1  ;;  %v11238_v17 = vrot.slane %v11217_v7, %v15808_v58  ;;  %v12481_v38 = vrot.slane %v12473_v12, 6  ;;  %v12333_v44 = vsel %vm655_vm3, %v12332_v32, %v12331_v36  ;;  %s18416_s5 = scalar_lea.hbm %s18550_s6, %s14775_s21 }
 0xe08   : > { %14768 = vmatprep.subr.bf16.mxu0 %v15209_v0  ;;  %11096 = vrot.lane.b32.xlu1 %v11087_v63, %s15214_s25  ;;  %13513 = vst.msk [vmem:[%s15819_s15 + $0x1fa] sm:$0x1] %vm924_vm7, %v11218_v57  ;;  %v11242_v1 = vrot.slane %v11218_v57, %v15808_v58  ;;  %v12480_v63 = vsel %vm649_vm0, %v12479_v28, %v12471_v30  ;;  %v18131_v18 = vld [vmem:[%s15648_s1 + $0x2f] sm:$0x1]  ;;  %p18551_p11 = scmp.ne.s32.totalorder %s18549_s26, 0 }
 0xe09   : > { %14492 = vmatmul.mubr.msk.f32.vlgmr.msra.gmra.mrb[88].mxu1 %vm742_vm6, %v11878_v60  ;;  %v12482_v53 = vsel %vm652_vm2, %v12481_v38, %v12480_v63  ;;  %v12632_v57 = vrot.slane %v18131_v18, 6 }
 0xe0a   : > { %14761 = vmatpush3.bf16.msra.mxu1 %v15674_v13  ;;  %14503 = vmatprep.mubr.msk.f32.mxu1 %vm15210_vm5, %v15211_v19 }
 0xe0b   : > { %11098 = vrot.lane.b32.xlu0 %v11091_v27, %s15214_s25  ;;  %14765 = vmatprep.subr.bf16.mxu1 %v15209_v0 }
 0xe0c   : > { %11243 = vrot.lane.b32.xlu1 %v11230_v50, %s15214_s25 }
 0xe0f   : > { %11245 = vrot.lane.b32.xlu0 %v11234_v61, %s15214_s25 }
 0xe10   : > { %11247 = vrot.lane.b32.xlu1 %v11238_v17, %s15214_s25 }
 0xe13   : > { %11249 = vrot.lane.b32.xlu0 %v11242_v1, %s15214_s25  ;;  %v12622_v1 = vld [vmem:[%s15648_s1 + $0xf] sm:$0x1] }
 0xe14   : > { %v12631_v20 = vsel %vm649_vm0, %v12630_v56, %v12622_v1 }
 0xe6d   : > { %v10942_v2 = vpop.permute.xlu1 %10941 }
 0xe6e   : > { %13496 = vst.msk [vmem:[%s15819_s15 + $0x9b] sm:$0x1] %vm924_vm7, %v10942_v2 }
 0xe71   : > { %v10944_v13 = vpop.permute.xlu0 %10943 }
 0xe72   : > { %13497 = vst.msk [vmem:[%s15819_s15 + $0xbb] sm:$0x1] %vm924_vm7, %v10944_v13  ;;  %v11093_v3 = vpop.permute.xlu1 %11092 }
 0xe73   : > { %13505 = vst.msk [vmem:[%s15819_s15 + $0x11b] sm:$0x1] %vm924_vm7, %v11093_v3 }
 0xe75   : > { %v11095_v4 = vpop.permute.xlu0 %11094 }
 0xe76   : > { %13506 = vst.msk [vmem:[%s15819_s15 + $0x13b] sm:$0x1] %vm924_vm7, %v11095_v4  ;;  %v10946_v5 = vpop.permute.xlu1 %10945 }
 0xe77   : > { %13498 = vst.msk [vmem:[%s15819_s15 + $0xdb] sm:$0x1] %vm924_vm7, %v10946_v5 }
 0xe79   : > { %v10948_v6 = vpop.permute.xlu0 %10947 }
 0xe7a   : > { %13499 = vst.msk [vmem:[%s15819_s15 + $0xfb] sm:$0x1] %vm924_vm7, %v10948_v6  ;;  %v11097_v8 = vpop.permute.xlu1 %11096 }
 0xe7b   : > { %13507 = vst.msk [vmem:[%s15819_s15 + $0x15b] sm:$0x1] %vm924_vm7, %v11097_v8 }
 0xe7d   : > { %v11099_v9 = vpop.permute.xlu0 %11098 }
 0xe7e   : > { %13508 = vst.msk [vmem:[%s15819_s15 + $0x17b] sm:$0x1] %vm924_vm7, %v11099_v9  ;;  %v11244_v10 = vpop.permute.xlu1 %11243 }
 0xe7f   : > { %13514 = vst.msk [vmem:[%s15819_s15 + $0x19b] sm:$0x1] %vm924_vm7, %v11244_v10 }
 0xe81   : > { %v11246_v49 = vpop.permute.xlu0 %11245 }
 0xe82   : > { %13515 = vst.msk [vmem:[%s15819_s15 + $0x1bb] sm:$0x1] %vm924_vm7, %v11246_v49  ;;  %v11248_v16 = vpop.permute.xlu1 %11247  ;;  %v12625_v49 = vld [vmem:[%s15648_s1 + $0x3f] sm:$0x1]  ;;  %s12824_s1 = sshll.u32 %s15819_s15, 4  ;;  %s18418_s1 = int_to_ptr.vmem [resolvable:$true] %s12824_s1 }
 0xe83   : > { %13516 = vst.msk [vmem:[%s15819_s15 + $0x1db] sm:$0x1] %vm924_vm7, %v11248_v16  ;;  %v12634_v26 = vrot.slane %v12625_v49, 5  ;;  %s15104_s22 = scalar_lea.vmem %s18418_s1, 10240  ;;  %p15111_p4 = scmp.lt.s32.totalorder %s18418_s1, %s15109_s16 }
 0xe84   : > { %p15105_p3 = scmp.ne.s32.totalorder %s18418_s1, %s15104_s22  ;;  %p15112_p2 = scmp.lt.s32.totalorder %s15110_s20, %s15104_s22 }
 0xe85   : > { %v11250_v22 = vpop.permute.xlu0 %11249 }
 0xe86   : > { %13517 = vst.msk [vmem:[%s15819_s15 + $0x1fb] sm:$0x1] %vm924_vm7, %v11250_v22  ;;  %p15106_p5 = pnand %p15105_p3, %p18551_p11  ;;  %p15113_p1 = por %p15112_p2, %p15111_p4 }
 0xe88   : > { %p15107_p12 = pneg %p15106_p5 }
 0xe8a   : > { %p15114_p10 = pnand %p15113_p1, %p15107_p12 }
 0xecd   : > { %v11419_v25 = vpop.f32.mrb[84].mxu1 }
 0xece   : > { %v14465_v29 = vpop.f32.mrb[85].mxu1 }
 0xecf   : > { %v11492_v31 = vpop.f32.mrb[86].mxu0  ;;  %v12633_v29 = vsel %vm652_vm2, %v12632_v57, %v12631_v20 }
 0xed0   : > { %v11493_v33 = vadd.f32 %v11492_v31, %v11419_v25  ;;  %v14472_v34 = vpop.f32.mrb[87].mxu0  ;;  %v12484_v25 = vsel %vm655_vm3, %v12483_v45, %v12482_v53  ;;  %v12635_v31 = vsel %vm655_vm3, %v12634_v26, %v12633_v29 }
 0xed2   : > { %v11496_v27 = vadd.f32 %v11493_v33, %v15794_v35 }
 0xed3   : > { %v11645_v39 = vpop.f32.mrb[86].mxu1 }
 0xed4   : > { %v11656_v42 = vrot.slane %v11645_v39, %v15798_v41  ;;  %v11796_v43 = vpop.f32.mrb[88].mxu0  ;;  %v14479_v46 = vpop.f32.mrb[87].mxu1  ;;  %v11504_v47 = vrot.slane %v11496_v27, %v15798_v41  ;;  %v11530_v7 = vcombine.high %v11496_v27, %v11496_v27 }
 0xed5   : > { %v11807_v50 = vrot.slane %v11796_v43, %v15798_v41  ;;  %v14486_v52 = vpop.f32.mrb[89].mxu0 }
 0xed6   : > { %v11657_v54 = vcombine.high %v11656_v42, %v11656_v42  ;;  %v11664_v55 = vrot.slane %v11656_v42, %v15798_v41  ;;  %v11505_v59 = vcombine.high %v11504_v47, %v11504_v47  ;;  %v11512_v60 = vrot.slane %v11504_v47, %v15798_v41 }
 0xed7   : > { %v11537_v61 = vrot.slane %v11530_v7, %v15798_v41  ;;  %v11808_v17 = vcombine.high %v11807_v50, %v11807_v50  ;;  %v11815_v4 = vrot.slane %v11807_v50, %v15798_v41 }
 0xed8   : > { %v11671_v2 = vrot.slane %v11657_v54, %v15798_v41  ;;  %v11672_v13 = vcombine.high %v11664_v55, %v11664_v55  ;;  %13524 = vst.msk [vmem:[%s15819_s15 + $0x9c] sm:$0x1] %vm924_vm7, %v11664_v55  ;;  %v11685_v3 = vrot.slane %v11664_v55, %v15808_v58  ;;  %v14498_v5 = vpop.f32.mrb[90].mxu0  ;;  %v11519_v6 = vrot.slane %v11505_v59, %v15798_v41 }
 0xed9   : > { %v11520_v8 = vcombine.high %v11512_v60, %v11512_v60  ;;  %11526 = vst.msk [vmem:[%s15819_s15 + $0x1c] sm:$0x1] %vm924_vm7, %v11512_v60  ;;  %v11538_v9 = vcombine.high %v11537_v61, %v11537_v61  ;;  %v11545_v10 = vrot.slane %v11537_v61, %v15798_v41  ;;  %v12098_v11 = vpop.f32.mrb[91].mxu0  ;;  %14504 = vmatmul.mubr.msk.f32.vlgmr.msra.gmra.mrb[90].mxu1 %vm742_vm6, %v14498_v5  ;;  %13533 = vst.msk [vmem:[%s15819_s15 + $0x11c] sm:$0x1] %vm924_vm7, %v11815_v4 }
 0xeda   : > { %v11673_v14 = vcombine.high %v11671_v2, %v11671_v2  ;;  %13525 = vst.msk [vmem:[%s15819_s15 + $0xbc] sm:$0x1] %vm924_vm7, %v11671_v2  ;;  %13526 = vst.msk [vmem:[%s15819_s15 + $0xdc] sm:$0x1] %vm924_vm7, %v11672_v13  ;;  %v11822_v15 = vrot.slane %v11808_v17, %v15798_v41  ;;  %v11823_v16 = vcombine.high %v11815_v4, %v11815_v4  ;;  %14767 = vmatpush3.bf16.msra.mxu1 %v15728_v48 }
 0xedb   : > { %v11521_v21 = vcombine.high %v11519_v6, %v11519_v6  ;;  %11527 = vst.msk [vmem:[%s15819_s15 + $0x3c] sm:$0x1] %vm924_vm7, %v11519_v6  ;;  %11528 = vst.msk [vmem:[%s15819_s15 + $0x5c] sm:$0x1] %vm924_vm7, %v11520_v8  ;;  %v11552_v22 = vrot.slane %v11538_v9, %v15798_v41  ;;  %v11553_v23 = vcombine.high %v11545_v10, %v11545_v10  ;;  %11698 = vrot.lane.b32.xlu1 %v11685_v3, %s15214_s25 }
 0xedc   : > { %11559 = vst.msk [vmem:[%s15819_s15 + $0x1d] sm:$0x1] %vm924_vm7, %v11545_v10  ;;  %14511 = vmatmul.mubr.msk.f32.vlgmr.msra.gmra.mrb[92].mxu0 %vm742_vm6, %v12098_v11  ;;  %13527 = vst.msk [vmem:[%s15819_s15 + $0xfc] sm:$0x1] %vm924_vm7, %v11673_v14  ;;  %v11824_v48 = vcombine.high %v11822_v15, %v11822_v15  ;;  %v11689_v24 = vrot.slane %v11671_v2, %v15808_v58  ;;  %14517 = vmatprep.mubr.msk.f32.mxu1 %vm15210_vm5, %v15211_v19 }
 0xedd   : > { %13534 = vst.msk [vmem:[%s15819_s15 + $0x13c] sm:$0x1] %vm924_vm7, %v11822_v15  ;;  %13535 = vst.msk [vmem:[%s15819_s15 + $0x15c] sm:$0x1] %vm924_vm7, %v11823_v16  ;;  %14770 = vmatpush3.bf16.msra.mxu0 %v15731_v51  ;;  %v11554_v12 = vcombine.high %v11552_v22, %v11552_v22  ;;  %v11836_v28 = vrot.slane %v11815_v4, %v15808_v58  ;;  %14518 = vmatmul.mubr.msk.f32.vlgmr.msra.gmra.mrb[92].mxu1 %vm742_vm6, %v12333_v44 }
 0xede   : > { %11529 = vst.msk [vmem:[%s15819_s15 + $0x7c] sm:$0x1] %vm924_vm7, %v11521_v21  ;;  %11560 = vst.msk [vmem:[%s15819_s15 + $0x3d] sm:$0x1] %vm924_vm7, %v11552_v22  ;;  %14524 = vmatprep.mubr.msk.f32.mxu0 %vm15210_vm5, %v15211_v19  ;;  %11700 = vrot.lane.b32.xlu0 %v11689_v24, %s15214_s25  ;;  %v11693_v51 = vrot.slane %v11672_v13, %v15808_v58  ;;  %v11840_v30 = vrot.slane %v11822_v15, %v15808_v58 }
 0xedf   : > { %11561 = vst.msk [vmem:[%s15819_s15 + $0x5d] sm:$0x1] %vm924_vm7, %v11553_v23  ;;  %13536 = vst.msk [vmem:[%s15819_s15 + $0x17c] sm:$0x1] %vm924_vm7, %v11824_v48  ;;  %14771 = vmatprep.subr.bf16.mxu1 %v15209_v0  ;;  %11849 = vrot.lane.b32.xlu1 %v11836_v28, %s15214_s25  ;;  %v11697_v0 = vrot.slane %v11673_v14, %v15808_v58  ;;  %v11844_v32 = vrot.slane %v11823_v16, %v15808_v58 }
 0xee0   : > { %11562 = vst.msk [vmem:[%s15819_s15 + $0x7d] sm:$0x1] %vm924_vm7, %v11554_v12  ;;  %14525 = vmatmul.mubr.msk.f32.vlgmr.msra.gmra.mrb[94].mxu0 %vm742_vm6, %v12484_v25  ;;  %14773 = vmatpush3.bf16.msra.mxu1 %v15768_v62  ;;  %v11947_v62 = vpop.f32.mrb[88].mxu1 }
 0xee1   : > { %14531 = vmatprep.mubr.msk.f32.mxu1 %vm15210_vm5, %v15211_v19  ;;  %v11848_v19 = vrot.slane %v11824_v48, %v15808_v58  ;;  %v11958_v33 = vrot.slane %v11947_v62, %v15798_v41  ;;  %v14493_v34 = vpop.f32.mrb[89].mxu1 }
 0xee2   : > { %11851 = vrot.lane.b32.xlu0 %v11840_v30, %s15214_s25 }
 0xee3   : > { %11702 = vrot.lane.b32.xlu1 %v11693_v51, %s15214_s25  ;;  %14532 = vmatmul.mubr.msk.f32.vlgmr.msra.gmra.mrb[94].mxu1 %vm742_vm6, %v12635_v31  ;;  %v11959_v36 = vcombine.high %v11958_v33, %v11958_v33  ;;  %v11966_v37 = vrot.slane %v11958_v33, %v15798_v41 }
 0xee5   : > { %v11973_v38 = vrot.slane %v11959_v36, %v15798_v41  ;;  %v11974_v63 = vcombine.high %v11966_v37, %v11966_v37  ;;  %13542 = vst.msk [vmem:[%s15819_s15 + $0x19c] sm:$0x1] %vm924_vm7, %v11966_v37  ;;  %v11987_v27 = vrot.slane %v11966_v37, %v15808_v58 }
 0xee6   : > { %11704 = vrot.lane.b32.xlu0 %v11697_v0, %s15214_s25 }
 0xee7   : > { %11853 = vrot.lane.b32.xlu1 %v11844_v32, %s15214_s25  ;;  %v11975_v39 = vcombine.high %v11973_v38, %v11973_v38  ;;  %13543 = vst.msk [vmem:[%s15819_s15 + $0x1bc] sm:$0x1] %vm924_vm7, %v11973_v38  ;;  %13544 = vst.msk [vmem:[%s15819_s15 + $0x1dc] sm:$0x1] %vm924_vm7, %v11974_v63  ;;  %v11991_v40 = vrot.slane %v11973_v38, %v15808_v58  ;;  %v11995_v18 = vrot.slane %v11974_v63, %v15808_v58 }
 0xee9   : > { %13545 = vst.msk [vmem:[%s15819_s15 + $0x1fc] sm:$0x1] %vm924_vm7, %v11975_v39  ;;  %v11999_v42 = vrot.slane %v11975_v39, %v15808_v58 }
 0xeea   : > { %11855 = vrot.lane.b32.xlu0 %v11848_v19, %s15214_s25 }
 0xeeb   : > { %12000 = vrot.lane.b32.xlu1 %v11987_v27, %s15214_s25 }
 0xeee   : > { %12002 = vrot.lane.b32.xlu0 %v11991_v40, %s15214_s25 }
 0xeef   : > { %12004 = vrot.lane.b32.xlu1 %v11995_v18, %s15214_s25 }
 0xef2   : > { %12006 = vrot.lane.b32.xlu0 %v11999_v42, %s15214_s25  ;;  %v12773_v42 = vld [vmem:[%s15655_s27] sm:$0xff] }
 0xef3   : > { %13582 = vst.msk [vmem:[%s15819_s15 + $0x200] sm:$0xff] %vm12790_vm8, %v12773_v42 }
 0xf4d   : > { %v11699_v43 = vpop.permute.xlu1 %11698 }
 0xf4e   : > { %13528 = vst.msk [vmem:[%s15819_s15 + $0x9d] sm:$0x1] %vm924_vm7, %v11699_v43  ;;  %v12774_v43 = vld [vmem:[%s15655_s27 + $0x8] sm:$0xff] }
 0xf4f   : > { %13583 = vst.msk [vmem:[%s15819_s15 + $0x208] sm:$0xff] %vm12790_vm8, %v12774_v43 }
 0xf50   : > { %v11701_v44 = vpop.permute.xlu0 %11700 }
 0xf51   : > { %13529 = vst.msk [vmem:[%s15819_s15 + $0xbd] sm:$0x1] %vm924_vm7, %v11701_v44  ;;  %v11850_v45 = vpop.permute.xlu1 %11849  ;;  %v12775_v44 = vld [vmem:[%s15655_s27 + $0x10] sm:$0xff] }
 0xf52   : > { %13537 = vst.msk [vmem:[%s15819_s15 + $0x11d] sm:$0x1] %vm924_vm7, %v11850_v45  ;;  %v12776_v45 = vld [vmem:[%s15655_s27 + $0x18] sm:$0xff] }
 0xf53   : > { %13584 = vst.msk [vmem:[%s15819_s15 + $0x210] sm:$0xff] %vm12790_vm8, %v12775_v44  ;;  %13585 = vst.msk [vmem:[%s15819_s15 + $0x218] sm:$0xff] %vm12790_vm8, %v12776_v45 }
 0xf54   : > { %v11852_v46 = vpop.permute.xlu0 %11851 }
 0xf55   : > { %13538 = vst.msk [vmem:[%s15819_s15 + $0x13d] sm:$0x1] %vm924_vm7, %v11852_v46  ;;  %v11703_v47 = vpop.permute.xlu1 %11702  ;;  %v12777_v46 = vld [vmem:[%s15655_s27 + $0x20] sm:$0xff] }
 0xf56   : > { %13530 = vst.msk [vmem:[%s15819_s15 + $0xdd] sm:$0x1] %vm924_vm7, %v11703_v47  ;;  %v12778_v47 = vld [vmem:[%s15655_s27 + $0x28] sm:$0xff] }
 0xf57   : > { %13586 = vst.msk [vmem:[%s15819_s15 + $0x220] sm:$0xff] %vm12790_vm8, %v12777_v46  ;;  %13587 = vst.msk [vmem:[%s15819_s15 + $0x228] sm:$0xff] %vm12790_vm8, %v12778_v47 }
 0xf58   : > { %v11705_v7 = vpop.permute.xlu0 %11704 }
 0xf59   : > { %13531 = vst.msk [vmem:[%s15819_s15 + $0xfd] sm:$0x1] %vm924_vm7, %v11705_v7  ;;  %v11854_v50 = vpop.permute.xlu1 %11853 }
 0xf5a   : > { %13539 = vst.msk [vmem:[%s15819_s15 + $0x15d] sm:$0x1] %vm924_vm7, %v11854_v50  ;;  %v12779_v50 = vld [vmem:[%s15655_s27 + $0x30] sm:$0xff] }
 0xf5b   : > { %13588 = vst.msk [vmem:[%s15819_s15 + $0x230] sm:$0xff] %vm12790_vm8, %v12779_v50 }
 0xf5c   : > { %v11856_v52 = vpop.permute.xlu0 %11855 }
 0xf5d   : > { %13540 = vst.msk [vmem:[%s15819_s15 + $0x17d] sm:$0x1] %vm924_vm7, %v11856_v52  ;;  %v12001_v53 = vpop.permute.xlu1 %12000  ;;  %v12780_v52 = vld [vmem:[%s15655_s27 + $0x38] sm:$0xff] }
 0xf5e   : > { %13546 = vst.msk [vmem:[%s15819_s15 + $0x19d] sm:$0x1] %vm924_vm7, %v12001_v53  ;;  %v12781_v53 = vld [vmem:[%s15655_s27 + $0x40] sm:$0xff] }
 0xf5f   : > { %13589 = vst.msk [vmem:[%s15819_s15 + $0x238] sm:$0xff] %vm12790_vm8, %v12780_v52  ;;  %13590 = vst.msk [vmem:[%s15819_s15 + $0x240] sm:$0xff] %vm12790_vm8, %v12781_v53 }
 0xf60   : > { %v12003_v54 = vpop.permute.xlu0 %12002 }
 0xf61   : > { %13547 = vst.msk [vmem:[%s15819_s15 + $0x1bd] sm:$0x1] %vm924_vm7, %v12003_v54  ;;  %v12005_v55 = vpop.permute.xlu1 %12004 }
 0xf62   : > { %13548 = vst.msk [vmem:[%s15819_s15 + $0x1dd] sm:$0x1] %vm924_vm7, %v12005_v55  ;;  %v12782_v55 = vld [vmem:[%s15655_s27 + $0x48] sm:$0xff] }
 0xf63   : > { %13591 = vst.msk [vmem:[%s15819_s15 + $0x248] sm:$0xff] %vm12790_vm8, %v12782_v55 }
 0xf64   : > { %v12007_v56 = vpop.permute.xlu0 %12006 }
 0xf65   : > { %13549 = vst.msk [vmem:[%s15819_s15 + $0x1fd] sm:$0x1] %vm924_vm7, %v12007_v56  ;;  %v12783_v56 = vld [vmem:[%s15655_s27 + $0x50] sm:$0xff] }
 0xf66   : > { %13592 = vst.msk [vmem:[%s15819_s15 + $0x250] sm:$0xff] %vm12790_vm8, %v12783_v56 }
 0xfac   : > { %v12176_v57 = vpop.f32.mrb[90].mxu1 }
 0xfad   : > { %v14505_v59 = vpop.f32.mrb[91].mxu1 }
 0xfae   : > { %v12785_v59 = vld [vmem:[%s15655_s27 + $0x60] sm:$0xff] }
 0xfaf   : > { %v12249_v60 = vpop.f32.mrb[92].mxu0  ;;  %13594 = vst.msk [vmem:[%s15819_s15 + $0x260] sm:$0xff] %vm12790_vm8, %v12785_v59 }
 0xfb0   : > { %v12250_v61 = vadd.f32 %v12249_v60, %v12176_v57  ;;  %v14512_v17 = vpop.f32.mrb[93].mxu0  ;;  %v12402_v1 = vpop.f32.mrb[92].mxu1  ;;  %v12784_v57 = vld [vmem:[%s15655_s27 + $0x58] sm:$0xff]  ;;  %v12786_v60 = vld [vmem:[%s15655_s27 + $0x68] sm:$0xff] }
 0xfb1   : > { %v12413_v13 = vrot.slane %v12402_v1, %v15798_v41  ;;  %v14519_v3 = vpop.f32.mrb[93].mxu1  ;;  %13593 = vst.msk [vmem:[%s15819_s15 + $0x258] sm:$0xff] %vm12790_vm8, %v12784_v57  ;;  %v12788_v1 = vld [vmem:[%s15655_s27 + $0x78] sm:$0xff]  ;;  %13595 = vst.msk [vmem:[%s15819_s15 + $0x268] sm:$0xff] %vm12790_vm8, %v12786_v60 }
 0xfb2   : > { %v12253_v2 = vadd.f32 %v12250_v61, %v15794_v35  ;;  %v12787_v61 = vld [vmem:[%s15655_s27 + $0x70] sm:$0xff]  ;;  %13597 = vst.msk [vmem:[%s15819_s15 + $0x278] sm:$0xff] %vm12790_vm8, %v12788_v1 }
 0xfb3   : > { %v12553_v4 = vpop.f32.mrb[94].mxu0  ;;  %v12414_v8 = vcombine.high %v12413_v13, %v12413_v13  ;;  %v12421_v9 = vrot.slane %v12413_v13, %v15798_v41  ;;  %13596 = vst.msk [vmem:[%s15819_s15 + $0x270] sm:$0xff] %vm12790_vm8, %v12787_v61 }
 0xfb4   : > { %v12261_v5 = vrot.slane %v12253_v2, %v15798_v41  ;;  %v12287_v6 = vcombine.high %v12253_v2, %v12253_v2  ;;  %v14526_v10 = vpop.f32.mrb[95].mxu0  ;;  %v12564_v11 = vrot.slane %v12553_v4, %v15798_v41 }
 0xfb5   : > { %v12428_v15 = vrot.slane %v12414_v8, %v15798_v41  ;;  %13556 = vst.msk [vmem:[%s15819_s15 + $0x9e] sm:$0x1] %vm924_vm7, %v12421_v9  ;;  %v12429_v16 = vcombine.high %v12421_v9, %v12421_v9  ;;  %v12442_v20 = vrot.slane %v12421_v9, %v15808_v58 }
 0xfb6   : > { %v12262_v49 = vcombine.high %v12261_v5, %v12261_v5  ;;  %v12269_v14 = vrot.slane %v12261_v5, %v15798_v41  ;;  %v12294_v35 = vrot.slane %v12287_v6, %v15798_v41  ;;  %v12565_v21 = vcombine.high %v12564_v11, %v12564_v11  ;;  %v12704_v23 = vpop.f32.mrb[94].mxu1 }
 0xfb7   : > { %v12572_v22 = vrot.slane %v12564_v11, %v15798_v41  ;;  %13557 = vst.msk [vmem:[%s15819_s15 + $0xbe] sm:$0x1] %vm924_vm7, %v12428_v15  ;;  %v14533_v12 = vpop.f32.mrb[95].mxu1  ;;  %v12430_v28 = vcombine.high %v12428_v15, %v12428_v15  ;;  %13558 = vst.msk [vmem:[%s15819_s15 + $0xde] sm:$0x1] %vm924_vm7, %v12429_v16  ;;  %12455 = vrot.lane.b32.xlu1 %v12442_v20, %s15214_s25  ;;  %v12446_v19 = vrot.slane %v12428_v15, %v15808_v58 }
 0xfb8   : > { %v12276_v48 = vrot.slane %v12262_v49, %v15798_v41  ;;  %v12277_v24 = vcombine.high %v12269_v14, %v12269_v14  ;;  %12283 = vst.msk [vmem:[%s15819_s15 + $0x1e] sm:$0x1] %vm924_vm7, %v12269_v14  ;;  %v12295_v25 = vcombine.high %v12294_v35, %v12294_v35  ;;  %v12302_v26 = vrot.slane %v12294_v35, %v15798_v41 }
 0xfb9   : > { %v12579_v29 = vrot.slane %v12565_v21, %v15798_v41  ;;  %v12580_v51 = vcombine.high %v12572_v22, %v12572_v22  ;;  %13565 = vst.msk [vmem:[%s15819_s15 + $0x11e] sm:$0x1] %vm924_vm7, %v12572_v22  ;;  %v12593_v30 = vrot.slane %v12572_v22, %v15808_v58  ;;  %13559 = vst.msk [vmem:[%s15819_s15 + $0xfe] sm:$0x1] %vm924_vm7, %v12430_v28  ;;  %12457 = vrot.lane.b32.xlu0 %v12446_v19, %s15214_s25 }
 0xfba   : > { %v12278_v31 = vcombine.high %v12276_v48, %v12276_v48  ;;  %12284 = vst.msk [vmem:[%s15819_s15 + $0x3e] sm:$0x1] %vm924_vm7, %v12276_v48  ;;  %12285 = vst.msk [vmem:[%s15819_s15 + $0x5e] sm:$0x1] %vm924_vm7, %v12277_v24  ;;  %v12309_v0 = vrot.slane %v12295_v25, %v15798_v41  ;;  %v12310_v32 = vcombine.high %v12302_v26, %v12302_v26 }
 0xfbb   : > { %12316 = vst.msk [vmem:[%s15819_s15 + $0x1f] sm:$0x1] %vm924_vm7, %v12302_v26  ;;  %v12581_v62 = vcombine.high %v12579_v29, %v12579_v29  ;;  %13566 = vst.msk [vmem:[%s15819_s15 + $0x13e] sm:$0x1] %vm924_vm7, %v12579_v29  ;;  %v12715_v33 = vrot.slane %v12704_v23, %v15798_v41  ;;  %v12597_v36 = vrot.slane %v12579_v29, %v15808_v58  ;;  %12606 = vrot.lane.b32.xlu1 %v12593_v30, %s15214_s25 }
 0xfbc   : > { %13567 = vst.msk [vmem:[%s15819_s15 + $0x15e] sm:$0x1] %vm924_vm7, %v12580_v51  ;;  %12286 = vst.msk [vmem:[%s15819_s15 + $0x7e] sm:$0x1] %vm924_vm7, %v12278_v31  ;;  %v12311_v34 = vcombine.high %v12309_v0, %v12309_v0  ;;  %v12450_v39 = vrot.slane %v12429_v16, %v15808_v58  ;;  %v12601_v18 = vrot.slane %v12580_v51, %v15808_v58 }
 0xfbd   : > { %12317 = vst.msk [vmem:[%s15819_s15 + $0x3f] sm:$0x1] %vm924_vm7, %v12309_v0  ;;  %12318 = vst.msk [vmem:[%s15819_s15 + $0x5f] sm:$0x1] %vm924_vm7, %v12310_v32  ;;  %v12716_v37 = vcombine.high %v12715_v33, %v12715_v33  ;;  %v12723_v38 = vrot.slane %v12715_v33, %v15798_v41  ;;  %12608 = vrot.lane.b32.xlu0 %v12597_v36, %s15214_s25  ;;  %v12605_v54 = vrot.slane %v12581_v62, %v15808_v58 }
 0xfbe   : > { %13568 = vst.msk [vmem:[%s15819_s15 + $0x17e] sm:$0x1] %vm924_vm7, %v12581_v62  ;;  %12319 = vst.msk [vmem:[%s15819_s15 + $0x7f] sm:$0x1] %vm924_vm7, %v12311_v34 }
 0xfbf   : > { %v12730_v63 = vrot.slane %v12716_v37, %v15798_v41  ;;  %v12731_v27 = vcombine.high %v12723_v38, %v12723_v38  ;;  %13574 = vst.msk [vmem:[%s15819_s15 + $0x19e] sm:$0x1] %vm924_vm7, %v12723_v38  ;;  %12459 = vrot.lane.b32.xlu1 %v12450_v39, %s15214_s25  ;;  %v12454_v41 = vrot.slane %v12430_v28, %v15808_v58 }
 0xfc0   : > { %v12744_v7 = vrot.slane %v12723_v38, %v15808_v58 }
 0xfc1   : > { %v12732_v40 = vcombine.high %v12730_v63, %v12730_v63  ;;  %13575 = vst.msk [vmem:[%s15819_s15 + $0x1be] sm:$0x1] %vm924_vm7, %v12730_v63  ;;  %13576 = vst.msk [vmem:[%s15819_s15 + $0x1de] sm:$0x1] %vm924_vm7, %v12731_v27  ;;  %12461 = vrot.lane.b32.xlu0 %v12454_v41, %s15214_s25  ;;  %v12748_v17 = vrot.slane %v12730_v63, %v15808_v58  ;;  %v12752_v2 = vrot.slane %v12731_v27, %v15808_v58 }
 0xfc3   : > { %13577 = vst.msk [vmem:[%s15819_s15 + $0x1fe] sm:$0x1] %vm924_vm7, %v12732_v40  ;;  %12610 = vrot.lane.b32.xlu1 %v12601_v18, %s15214_s25  ;;  %v12756_v13 = vrot.slane %v12732_v40, %v15808_v58 }
 0xfc5   : > { %12612 = vrot.lane.b32.xlu0 %v12605_v54, %s15214_s25 }
 0xfc7   : > { %12757 = vrot.lane.b32.xlu1 %v12744_v7, %s15214_s25 }
 0xfc9   : > { %12759 = vrot.lane.b32.xlu0 %v12748_v17, %s15214_s25 }
 0xfcb   : > { %12761 = vrot.lane.b32.xlu1 %v12752_v2, %s15214_s25 }
 0xfcd   : > { %12763 = vrot.lane.b32.xlu0 %v12756_v13, %s15214_s25 }
0x1029   : > { %v12456_v3 = vpop.permute.xlu1 %12455 }
0x102a   : > { %13560 = vst.msk [vmem:[%s15819_s15 + $0x9f] sm:$0x1] %vm924_vm7, %v12456_v3 }
0x102b   : > { %v12458_v4 = vpop.permute.xlu0 %12457 }
0x102c   : > { %13561 = vst.msk [vmem:[%s15819_s15 + $0xbf] sm:$0x1] %vm924_vm7, %v12458_v4 }
0x102d   : > { %v12607_v5 = vpop.permute.xlu1 %12606 }
0x102e   : > { %13569 = vst.msk [vmem:[%s15819_s15 + $0x11f] sm:$0x1] %vm924_vm7, %v12607_v5 }
0x102f   : > { %v12609_v6 = vpop.permute.xlu0 %12608 }
0x1030   : > { %13570 = vst.msk [vmem:[%s15819_s15 + $0x13f] sm:$0x1] %vm924_vm7, %v12609_v6 }
0x1031   : > { %v12460_v58 = vpop.permute.xlu1 %12459 }
0x1032   : > { %13562 = vst.msk [vmem:[%s15819_s15 + $0xdf] sm:$0x1] %vm924_vm7, %v12460_v58 }
0x1033   : > { %v12462_v8 = vpop.permute.xlu0 %12461 }
0x1034   : > { %13563 = vst.msk [vmem:[%s15819_s15 + $0xff] sm:$0x1] %vm924_vm7, %v12462_v8 }
0x1035   : > { %v12611_v9 = vpop.permute.xlu1 %12610 }
0x1036   : > { %13571 = vst.msk [vmem:[%s15819_s15 + $0x15f] sm:$0x1] %vm924_vm7, %v12611_v9 }
0x1037   : > { %v12613_v10 = vpop.permute.xlu0 %12612 }
0x1038   : > { %13572 = vst.msk [vmem:[%s15819_s15 + $0x17f] sm:$0x1] %vm924_vm7, %v12613_v10 }
0x1039   : > { %v12758_v11 = vpop.permute.xlu1 %12757 }
0x103a   : > { %13578 = vst.msk [vmem:[%s15819_s15 + $0x19f] sm:$0x1] %vm924_vm7, %v12758_v11 }
0x103b   : > { %v12760_v49 = vpop.permute.xlu0 %12759 }
0x103c   : > { %13579 = vst.msk [vmem:[%s15819_s15 + $0x1bf] sm:$0x1] %vm924_vm7, %v12760_v49 }
0x103d   : > { %v12762_v14 = vpop.permute.xlu1 %12761 }
0x103e   : > { %13580 = vst.msk [vmem:[%s15819_s15 + $0x1df] sm:$0x1] %vm924_vm7, %v12762_v14 }
0x103f   : > { %v12764_v35 = vpop.permute.xlu0 %12763 }
0x1040   : > { %13581 = vst.msk [vmem:[%s15819_s15 + $0x1ff] sm:$0x1] %vm924_vm7, %v12764_v35 }
0x1041   : > { %15117 = shalt.err (!%p15114_p10)
}
0x1042   : > { %s15118_s15 = scalar_lea.hbm %s18416_s5, 10240  ;;  %s15122_s29 = scalar_lea.hbm %s18550_s6, 20480 }
0x1043   : > { %p15119_p6 = scmp.ne.s32.totalorder %s18416_s5, %s15118_s15  ;;  %p15123_p13 = scmp.lt.u32.totalorder %s18416_s5, %s18550_s6 }
0x1044   : > { %p15124_p8 = scmp.lt.u32.totalorder %s15122_s29, %s15118_s15  ;;  %p15126_p3 = scmp.lt.u32.totalorder %s15118_s15, %s18416_s5 }
0x1045   : > { %p15120_p0 = pnand %p15119_p6, %p18551_p11 }
0x1046   : > { %p15125_p7 = por %p15124_p8, %p15123_p13 }
0x1047   : > { %p15121_p9 = pneg %p15120_p0 }
0x1048   : > { %p15127_p5 = por %p15126_p3, %p15125_p7 }
0x104a   : > { %p15128_p12 = pnand %p15127_p5, %p15121_p9 }
0x104c   : > { %15131 = shalt.err (!%p15128_p12)
}
0x104d   : > { %s15216_s13 = smov 128   ;;  %s15217_s11 = smov 8  }
0x104e   : > { %14794 = dma.vmem_to_hbm [thread:$0]  (%p18551_p11), %s18418_s1, 10240, %s18416_s5, %s12808_s3, %s15216_s13, %s15216_s13, %s15217_s11  }
0x104f PF: > { %s18552_s10 = sld [smem:[#allocation20_spill]]  ;;  %s18553_s21 = sld [smem:[#allocation24_spill]] }
0x1050   : > { %p18555_p2 = scmp.ge.s32.totalorder %s15198_s18, 2 }
0x1055   : > { %s12839_s27 = sand.u32 1, %s18552_s10   ;;  %p18554_p4 = scmp.ne.s32.totalorder %s18553_s21, 0 }
0x1056   : > { %s12840_s25 = scalar_lea.sflag [#allocation4], %s12839_s27 }
0x1057   : > { %p14820_p1 = pnand %p18555_p2, %p18554_p4 }
0x1059   : > { %15173 = dma.done.wait (!%p14820_p1), %s12840_s25, 10240  }
0x105a   : > { %15175 = vsyncadd (!%p14820_p1), %s12840_s25, 4294957056  ;;  %s33_s18 = sadd.s32 1, %s15198_s18   ;;  %s18556_s22 = sld [smem:[#allocation21_spill]] }
0x105b   : > { %p30_p10 = scmp.ge.s32.totalorder %s33_s18, 4   ;;  %s18557_s15 = sld [smem:[#allocation26_spill]] }
0x105c   : > { %s18558_s12 = sld [smem:[#allocation25_spill]]  ;;  %s18559_s13 = smov %s15182_s14 }
0x105d   : > { %s18561_s16 = smov %s15194_s17  ;;  %32 = sbr.rel (!%p30_p10) target bundleno = 19 (0x13), region = 167 }
0x1060   : > { %s18560_s14 = smov %s18556_s22 }
0x1062   : > { %s18562_s17 = smov %s18558_s12 }
0x1064   :  { %12845 = vsyncpa [#allocation3], 1 }
0x1065   :  { %12847 = vsyncpa [#allocation3 + $0x1], 1 }
0x1066   :  { %12848 = vsyncpa [#allocation6], 1 }
0x1067   :  { %12850 = vsyncpa [#allocation6 + $0x1], 1 }
0x1068   :  { %12851 = vsyncpa [#allocation9], 1 }
0x1069   :  { %12853 = vsyncpa [#allocation9 + $0x1], 1 }
0x106a   :  { %12854 = vsyncpa [#allocation12], 1 }
0x106b   :  { %12855 = vsyncpa [#allocation4], 1 }
0x106c   :  { %12857 = vsyncpa [#allocation4 + $0x1], 1 }

</bundles_post_ra>
